<compile_context>
chip_gen: v7x
topology: tpu7x:2x2x1
jax: 0.10.0
libtpu: 0.0.40
codegen_flags: <defaults>
</compile_context>

<pallas_src>
import math
import functools

import jax
import jax.numpy as jnp
from jax import lax
from jax.experimental import pallas as pl
from jax.experimental.pallas import tpu as pltpu


_TB = 8        # batch tile (sublane-friendly); raise to 16-32 for production batches
_TK = 128      # noise-sample tile (lane-dense output); raise to 256-512 for large K
_UNROLL = 8    # static unroll of the DMA issue / wait loops (must divide _TK)


def _memory_insdis_kernel(idx_ref,    # SMEM i32[B_pad, K1_pad]   (scalar prefetch)
                          mem_ref,    # ANY/HBM f32[outputSize, D] memory bank
                          x_ref,      # VMEM f32[TB, D]
                          expv_ref,   # VMEM f32[TB, TK]  out: exp(<m_idx, x>/T)
                          w_buf,      # VMEM f32[TB, TK, D] gathered rows scratch
                          sems,       # DMA semaphores, shape (TB,) — one per batch row
                          *, inv_t):
    tb, tk, _d = w_buf.shape
    b0 = pl.program_id(0) * tb
    k0 = pl.program_id(1) * tk

    # ---- 1) issue the whole tile's row gathers up front ---------------------
    # One D*4-byte DMA per (bl, kl).  All loops are static-trip-count and
    # partially unrolled; padded idx slots hold 0 (a valid row) so every copy
    # is in range and every w_buf slot gets written -> no masking, no tail path.
    def issue_rows(bl):
        row_b = b0 + bl

        @pl.loop(0, tk, step=_UNROLL)
        def _(kl0):
            for u in range(_UNROLL):
                row = idx_ref[row_b, k0 + kl0 + u]
                pltpu.make_async_copy(mem_ref.at[row], w_buf.at[bl, kl0 + u],
                                      sems.at[bl]).start()

    for bl in range(tb):
        issue_rows(bl)

    # ---- 2) per batch row: drain its copies, then compute its scores --------
    # Per-bl semaphores let row bl's compute overlap with the still-in-flight
    # gathers of rows bl+1..TB-1; only row 0's DMAs are (partially) exposed.
    def wait_rows(bl):
        @pl.loop(0, tk, step=_UNROLL)
        def _(kl0):
            for _u in range(_UNROLL):
                # Wait descriptor only needs a matching byte count + semaphore;
                # exactly tk waits per bl match the tk copies issued above.
                pltpu.make_async_copy(mem_ref.at[0], w_buf.at[bl, 0],
                                      sems.at[bl]).wait()

    for bl in range(tb):
        wait_rows(bl)
        # Strip-mined score compute: one (1, TK, D) slab -> ~32-48 live vregs.
        # D is the lane axis: VPU multiply + XLU cross-lane reduce + EUP exp,
        # all hidden under the outstanding gather DMAs (kernel is HBM/DMA bound).
        w = w_buf[pl.ds(bl, 1), :, :]                        # (1, TK, D)
        xb = x_ref[pl.ds(bl, 1), :]                          # (1, D)
        scores = jnp.sum(w * xb[:, None, :], axis=-1)        # (1, TK) f32
        expv_ref[pl.ds(bl, 1), :] = jnp.exp(scores * inv_t)  # 1/T baked in


def _round_up(v, m):
    return (v + m - 1) // m * m


@functools.partial(jax.jit, static_argnames=("T", "momentum"), donate_argnums=(0,))
def memory_insdis_step(memory, x, y, idx, Z, *, T, momentum):
    """One MemoryInsDis forward step (use_softmax=False).

    Returns (out, new_memory, Z_used).  `memory` is donated so the row scatter
    happens in place; Z_used is a device scalar — thread it (and new_memory)
    back into the next call.  Duplicate entries in `y` are last-write-wins,
    matching torch.index_copy_'s nondeterminism.
    """
    output_size, d = memory.shape
    b = x.shape[0]
    k1 = idx.shape[1]

    b_pad = _round_up(b, _TB)
    k1_pad = _round_up(k1, _TK)

    x_p = jnp.pad(x.astype(jnp.float32), ((0, b_pad - b), (0, 0)))
    # Pad with index 0 (valid row): padded slots gather row 0 and produce
    # finite garbage that is sliced off below.
    idx_p = jnp.pad(idx.astype(jnp.int32), ((0, b_pad - b), (0, k1_pad - k1)))

    grid = (b_pad // _TB, k1_pad // _TK)
    kernel = functools.partial(_memory_insdis_kernel, inv_t=1.0 / T)

    expv_raw = pl.pallas_call(
        kernel,
        out_shape=jax.ShapeDtypeStruct((b_pad, k1_pad), jnp.float32),
        grid_spec=pltpu.PrefetchScalarGridSpec(
            num_scalar_prefetch=1,                       # idx table -> SMEM
            grid=grid,
            in_specs=[
                pl.BlockSpec(memory_space=pl.ANY),                        # memory bank (HBM)
                pl.BlockSpec((_TB, d), lambda bi, ki, _idx: (bi, 0)),     # x
            ],
            out_specs=pl.BlockSpec((_TB, _TK), lambda bi, ki, _idx: (bi, ki)),
            scratch_shapes=[
                pltpu.VMEM((_TB, _TK, d), jnp.float32),   # gathered rows
                pltpu.SemaphoreType.DMA((_TB,)),          # per-batch-row sems
            ],
        ),
        compiler_params=pltpu.CompilerParams(
            # No in-kernel state across grid steps -> both axes parallel
            # (K-tiles shard across both TensorCores on v7x).
            dimension_semantics=("parallel", "parallel"),
            vmem_limit_bytes=32 * 1024 * 1024,
        ),
    )(idx_p, memory, x_p)

    # Un-pad.
    expv = expv_raw[:b, :k1]

    # NCE normalization constant Z: global mean over the whole (B, K+1) batch
    # on the first call (Z < 0).  Single scalar reciprocal, no per-element div.
    z_first = jnp.sum(expv) * (float(output_size) / float(b * k1))
    z_used = jnp.where(Z < 0.0, z_first, Z).astype(jnp.float32)
    out = expv * (1.0 / z_used)

    # Momentum update + L2 renorm of the positive rows (tiny (B, D) work, pure
    # JAX) followed by index_copy_; with donated `memory` the scatter is an
    # in-place row update instead of a full-bank copy.
    mem_pos = jnp.take(memory, y, axis=0)
    wp = momentum * mem_pos + (1.0 - momentum) * x.astype(jnp.float32)
    wp = wp / jnp.sqrt(jnp.sum(wp * wp, axis=1, keepdims=True))
    new_memory = memory.at[y].set(wp)
    return out, new_memory, z_used


def _reference_forward(memory, x, y, idx, *, T, Z, momentum):
    """Pure-JAX reference mirroring the PyTorch module (use_softmax=False)."""
    output_size, input_size = memory.shape
    b = x.shape[0]
    k1 = idx.shape[1]
    weight = jnp.take(memory, idx.reshape(-1), axis=0).reshape(b, k1, input_size)
    scores = jnp.einsum("bkd,bd->bk", weight, x)
    expv = jnp.exp(scores / T)
    z_used = jnp.where(Z < 0, jnp.mean(expv) * output_size, Z)
    out = expv / z_used
    wp = momentum * jnp.take(memory, y, axis=0) + (1.0 - momentum) * x
    wp = wp / jnp.sqrt(jnp.sum(wp * wp, axis=1, keepdims=True))
    new_memory = memory.at[y].set(wp)
    return out, new_memory, z_used


if __name__ == "__main__":
    # Small shapes consistent with the module (D=128 is the usual InsDis dim).
    input_size = 128     # feature dim D
    output_size = 256    # number of instances in the memory bank
    K = 15               # noise samples -> K+1 = 16 scores per sample
    B = 8                # batch size
    T = 0.07
    momentum = 0.5
    Z0 = -1.0            # unset -> computed on the first forward

    key = jax.random.PRNGKey(0)
    k_mem, k_x, k_y, k_idx = jax.random.split(key, 4)

    # memory init: rand(outputSize, inputSize) * 2*stdv - stdv
    stdv = 1.0 / math.sqrt(input_size / 3)
    memory = jax.random.uniform(k_mem, (output_size, input_size),
                                dtype=jnp.float32) * (2 * stdv) - stdv

    x = jax.random.normal(k_x, (B, input_size), dtype=jnp.float32)
    x = x / jnp.linalg.norm(x, axis=1, keepdims=True)   # l2-normed features

    y = jax.random.randint(k_y, (B,), 0, output_size, dtype=jnp.int32)
    # AliasMethod over uniform unigrams == uniform sampling; column 0 = positives.
    idx = jax.random.randint(k_idx, (B, K + 1), 0, output_size, dtype=jnp.int32)
    idx = idx.at[:, 0].set(y)

    # Reference computed first: `memory` is donated to the kernel step below.
    ref_out, ref_mem, ref_z = _reference_forward(
        memory, x, y, idx, T=T, Z=Z0, momentum=momentum)
    ref_out, ref_mem, ref_z = jax.block_until_ready((ref_out, ref_mem, ref_z))

    out, new_memory, z_used = memory_insdis_step(
        memory, x, y, idx, jnp.float32(Z0), T=T, momentum=momentum)
    out, new_memory, z_used = jax.block_until_ready((out, new_memory, z_used))

    assert out.shape == (B, K + 1)
    assert jnp.allclose(out, ref_out, rtol=1e-3, atol=1e-5), "output mismatch"
    assert jnp.allclose(new_memory, ref_mem, rtol=1e-3, atol=1e-5), "memory mismatch"
    assert abs(float(z_used) - float(ref_z)) / float(ref_z) < 1e-3, "Z mismatch"

    print("KERNEL_OK")
</pallas_src>

<mosaic_0001>
module attributes {stable_mosaic.version = 11 : i64} {
  func.func @_memory_insdis_kernel(%arg0: i32, %arg1: i32, %arg2: memref<8x128xi32, #tpu.memory_space<smem>>, %arg3: memref<256x128xf32, #tpu.memory_space<any>>, %arg4: memref<8x128xf32, #tpu.memory_space<vmem>>, %arg5: memref<8x128xf32, #tpu.memory_space<vmem>>, %arg6: memref<8x128x128xf32, #tpu.memory_space<vmem>>, %arg7: memref<8x!tpu.dma_semaphore, #tpu.memory_space<semaphore_mem>>) attributes {dimension_semantics = [#tpu.dimension_semantics<parallel>, #tpu.dimension_semantics<parallel>], iteration_bounds = array<i64: 1, 1>, scalar_prefetch = 1 : i64, scratch_operands = 2 : i64, tpu.core_type = #tpu.core_type<tc>, window_params = [{}, {transform_indices = @transform_1, window_bounds = array<i64: 8, 128>}, {transform_indices = @transform_2, window_bounds = array<i64: 8, 128>}]} {
    %c8_i32 = arith.constant 8 : i32
    %0 = arith.muli %arg0, %c8_i32 : i32
    %c128_i32 = arith.constant 128 : i32
    %1 = arith.muli %arg1, %c128_i32 : i32
    %c0_i32 = arith.constant 0 : i32
    %2 = arith.addi %0, %c0_i32 : i32
    %c0_i32_0 = arith.constant 0 : i32
    %c16_i32 = arith.constant 16 : i32
    %3 = arith.addi %c0_i32_0, %c16_i32 : i32
    %c1_i32 = arith.constant 1 : i32
    scf.for %arg8 = %c0_i32_0 to %3 step %c1_i32  : i32 {
      %c8_i32_118 = arith.constant 8 : i32
      %106 = arith.muli %arg8, %c8_i32_118 : i32
      %c0_i32_119 = arith.constant 0 : i32
      %107 = arith.addi %c0_i32_119, %106 : i32
      %108 = arith.addi %1, %107 : i32
      %c0_i32_120 = arith.constant 0 : i32
      %109 = arith.addi %108, %c0_i32_120 : i32
      %110 = arith.index_cast %2 : i32 to index
      %111 = arith.index_cast %109 : i32 to index
      %112 = memref.load %arg2[%110, %111] : memref<8x128xi32, #tpu.memory_space<smem>>
      %c0_i32_121 = arith.constant 0 : i32
      %113 = arith.addi %107, %c0_i32_121 : i32
      %c0_i32_122 = arith.constant 0 : i32
      %c0_i32_123 = arith.constant 0 : i32
      %c0_i32_124 = arith.constant 0 : i32
      %114 = tpu.memref_slice %arg3[%112, %c0_i32_124] : memref<256x128xf32, #tpu.memory_space<any>> -> memref<1x128xf32, #tpu.memory_space<any>>
      %115 = tpu.memref_squeeze %114 : memref<1x128xf32, #tpu.memory_space<any>> -> memref<128xf32, #tpu.memory_space<any>>
      %c0_i32_125 = arith.constant 0 : i32
      %116 = tpu.memref_slice %arg6[%c0_i32_122, %113, %c0_i32_125] : memref<8x128x128xf32, #tpu.memory_space<vmem>> -> memref<1x1x128xf32, #tpu.memory_space<vmem>>
      %117 = tpu.memref_squeeze %116 : memref<1x1x128xf32, #tpu.memory_space<vmem>> -> memref<128xf32, #tpu.memory_space<vmem>>
      %118 = tpu.memref_slice %arg7[%c0_i32_123] : memref<8x!tpu.dma_semaphore, #tpu.memory_space<semaphore_mem>> -> memref<1x!tpu.dma_semaphore, #tpu.memory_space<semaphore_mem>>
      %119 = tpu.memref_squeeze %118 : memref<1x!tpu.dma_semaphore, #tpu.memory_space<semaphore_mem>> -> memref<!tpu.dma_semaphore, #tpu.memory_space<semaphore_mem>>
      tpu.enqueue_dma source(%115 : memref<128xf32, #tpu.memory_space<any>>) target(%117 : memref<128xf32, #tpu.memory_space<vmem>>) target_semaphore(%119 : memref<!tpu.dma_semaphore, #tpu.memory_space<semaphore_mem>>)
      %120 = arith.addi %1, %107 : i32
      %c1_i32_126 = arith.constant 1 : i32
      %121 = arith.addi %120, %c1_i32_126 : i32
      %122 = arith.index_cast %2 : i32 to index
      %123 = arith.index_cast %121 : i32 to index
      %124 = memref.load %arg2[%122, %123] : memref<8x128xi32, #tpu.memory_space<smem>>
      %c1_i32_127 = arith.constant 1 : i32
      %125 = arith.addi %107, %c1_i32_127 : i32
      %c0_i32_128 = arith.constant 0 : i32
      %c0_i32_129 = arith.constant 0 : i32
      %c0_i32_130 = arith.constant 0 : i32
      %126 = tpu.memref_slice %arg3[%124, %c0_i32_130] : memref<256x128xf32, #tpu.memory_space<any>> -> memref<1x128xf32, #tpu.memory_space<any>>
      %127 = tpu.memref_squeeze %126 : memref<1x128xf32, #tpu.memory_space<any>> -> memref<128xf32, #tpu.memory_space<any>>
      %c0_i32_131 = arith.constant 0 : i32
      %128 = tpu.memref_slice %arg6[%c0_i32_128, %125, %c0_i32_131] : memref<8x128x128xf32, #tpu.memory_space<vmem>> -> memref<1x1x128xf32, #tpu.memory_space<vmem>>
      %129 = tpu.memref_squeeze %128 : memref<1x1x128xf32, #tpu.memory_space<vmem>> -> memref<128xf32, #tpu.memory_space<vmem>>
      %130 = tpu.memref_slice %arg7[%c0_i32_129] : memref<8x!tpu.dma_semaphore, #tpu.memory_space<semaphore_mem>> -> memref<1x!tpu.dma_semaphore, #tpu.memory_space<semaphore_mem>>
      %131 = tpu.memref_squeeze %130 : memref<1x!tpu.dma_semaphore, #tpu.memory_space<semaphore_mem>> -> memref<!tpu.dma_semaphore, #tpu.memory_space<semaphore_mem>>
      tpu.enqueue_dma source(%127 : memref<128xf32, #tpu.memory_space<any>>) target(%129 : memref<128xf32, #tpu.memory_space<vmem>>) target_semaphore(%131 : memref<!tpu.dma_semaphore, #tpu.memory_space<semaphore_mem>>)
      %132 = arith.addi %1, %107 : i32
      %c2_i32_132 = arith.constant 2 : i32
      %133 = arith.addi %132, %c2_i32_132 : i32
      %134 = arith.index_cast %2 : i32 to index
      %135 = arith.index_cast %133 : i32 to index
      %136 = memref.load %arg2[%134, %135] : memref<8x128xi32, #tpu.memory_space<smem>>
      %c2_i32_133 = arith.constant 2 : i32
      %137 = arith.addi %107, %c2_i32_133 : i32
      %c0_i32_134 = arith.constant 0 : i32
      %c0_i32_135 = arith.constant 0 : i32
      %c0_i32_136 = arith.constant 0 : i32
      %138 = tpu.memref_slice %arg3[%136, %c0_i32_136] : memref<256x128xf32, #tpu.memory_space<any>> -> memref<1x128xf32, #tpu.memory_space<any>>
      %139 = tpu.memref_squeeze %138 : memref<1x128xf32, #tpu.memory_space<any>> -> memref<128xf32, #tpu.memory_space<any>>
      %c0_i32_137 = arith.constant 0 : i32
      %140 = tpu.memref_slice %arg6[%c0_i32_134, %137, %c0_i32_137] : memref<8x128x128xf32, #tpu.memory_space<vmem>> -> memref<1x1x128xf32, #tpu.memory_space<vmem>>
      %141 = tpu.memref_squeeze %140 : memref<1x1x128xf32, #tpu.memory_space<vmem>> -> memref<128xf32, #tpu.memory_space<vmem>>
      %142 = tpu.memref_slice %arg7[%c0_i32_135] : memref<8x!tpu.dma_semaphore, #tpu.memory_space<semaphore_mem>> -> memref<1x!tpu.dma_semaphore, #tpu.memory_space<semaphore_mem>>
      %143 = tpu.memref_squeeze %142 : memref<1x!tpu.dma_semaphore, #tpu.memory_space<semaphore_mem>> -> memref<!tpu.dma_semaphore, #tpu.memory_space<semaphore_mem>>
      tpu.enqueue_dma source(%139 : memref<128xf32, #tpu.memory_space<any>>) target(%141 : memref<128xf32, #tpu.memory_space<vmem>>) target_semaphore(%143 : memref<!tpu.dma_semaphore, #tpu.memory_space<semaphore_mem>>)
      %144 = arith.addi %1, %107 : i32
      %c3_i32_138 = arith.constant 3 : i32
      %145 = arith.addi %144, %c3_i32_138 : i32
      %146 = arith.index_cast %2 : i32 to index
      %147 = arith.index_cast %145 : i32 to index
      %148 = memref.load %arg2[%146, %147] : memref<8x128xi32, #tpu.memory_space<smem>>
      %c3_i32_139 = arith.constant 3 : i32
      %149 = arith.addi %107, %c3_i32_139 : i32
      %c0_i32_140 = arith.constant 0 : i32
      %c0_i32_141 = arith.constant 0 : i32
      %c0_i32_142 = arith.constant 0 : i32
      %150 = tpu.memref_slice %arg3[%148, %c0_i32_142] : memref<256x128xf32, #tpu.memory_space<any>> -> memref<1x128xf32, #tpu.memory_space<any>>
      %151 = tpu.memref_squeeze %150 : memref<1x128xf32, #tpu.memory_space<any>> -> memref<128xf32, #tpu.memory_space<any>>
      %c0_i32_143 = arith.constant 0 : i32
      %152 = tpu.memref_slice %arg6[%c0_i32_140, %149, %c0_i32_143] : memref<8x128x128xf32, #tpu.memory_space<vmem>> -> memref<1x1x128xf32, #tpu.memory_space<vmem>>
      %153 = tpu.memref_squeeze %152 : memref<1x1x128xf32, #tpu.memory_space<vmem>> -> memref<128xf32, #tpu.memory_space<vmem>>
      %154 = tpu.memref_slice %arg7[%c0_i32_141] : memref<8x!tpu.dma_semaphore, #tpu.memory_space<semaphore_mem>> -> memref<1x!tpu.dma_semaphore, #tpu.memory_space<semaphore_mem>>
      %155 = tpu.memref_squeeze %154 : memref<1x!tpu.dma_semaphore, #tpu.memory_space<semaphore_mem>> -> memref<!tpu.dma_semaphore, #tpu.memory_space<semaphore_mem>>
      tpu.enqueue_dma source(%151 : memref<128xf32, #tpu.memory_space<any>>) target(%153 : memref<128xf32, #tpu.memory_space<vmem>>) target_semaphore(%155 : memref<!tpu.dma_semaphore, #tpu.memory_space<semaphore_mem>>)
      %156 = arith.addi %1, %107 : i32
      %c4_i32_144 = arith.constant 4 : i32
      %157 = arith.addi %156, %c4_i32_144 : i32
      %158 = arith.index_cast %2 : i32 to index
      %159 = arith.index_cast %157 : i32 to index
      %160 = memref.load %arg2[%158, %159] : memref<8x128xi32, #tpu.memory_space<smem>>
      %c4_i32_145 = arith.constant 4 : i32
      %161 = arith.addi %107, %c4_i32_145 : i32
      %c0_i32_146 = arith.constant 0 : i32
      %c0_i32_147 = arith.constant 0 : i32
      %c0_i32_148 = arith.constant 0 : i32
      %162 = tpu.memref_slice %arg3[%160, %c0_i32_148] : memref<256x128xf32, #tpu.memory_space<any>> -> memref<1x128xf32, #tpu.memory_space<any>>
      %163 = tpu.memref_squeeze %162 : memref<1x128xf32, #tpu.memory_space<any>> -> memref<128xf32, #tpu.memory_space<any>>
      %c0_i32_149 = arith.constant 0 : i32
      %164 = tpu.memref_slice %arg6[%c0_i32_146, %161, %c0_i32_149] : memref<8x128x128xf32, #tpu.memory_space<vmem>> -> memref<1x1x128xf32, #tpu.memory_space<vmem>>
      %165 = tpu.memref_squeeze %164 : memref<1x1x128xf32, #tpu.memory_space<vmem>> -> memref<128xf32, #tpu.memory_space<vmem>>
      %166 = tpu.memref_slice %arg7[%c0_i32_147] : memref<8x!tpu.dma_semaphore, #tpu.memory_space<semaphore_mem>> -> memref<1x!tpu.dma_semaphore, #tpu.memory_space<semaphore_mem>>
      %167 = tpu.memref_squeeze %166 : memref<1x!tpu.dma_semaphore, #tpu.memory_space<semaphore_mem>> -> memref<!tpu.dma_semaphore, #tpu.memory_space<semaphore_mem>>
      tpu.enqueue_dma source(%163 : memref<128xf32, #tpu.memory_space<any>>) target(%165 : memref<128xf32, #tpu.memory_space<vmem>>) target_semaphore(%167 : memref<!tpu.dma_semaphore, #tpu.memory_space<semaphore_mem>>)
      %168 = arith.addi %1, %107 : i32
      %c5_i32_150 = arith.constant 5 : i32
      %169 = arith.addi %168, %c5_i32_150 : i32
      %170 = arith.index_cast %2 : i32 to index
      %171 = arith.index_cast %169 : i32 to index
      %172 = memref.load %arg2[%170, %171] : memref<8x128xi32, #tpu.memory_space<smem>>
      %c5_i32_151 = arith.constant 5 : i32
      %173 = arith.addi %107, %c5_i32_151 : i32
      %c0_i32_152 = arith.constant 0 : i32
      %c0_i32_153 = arith.constant 0 : i32
      %c0_i32_154 = arith.constant 0 : i32
      %174 = tpu.memref_slice %arg3[%172, %c0_i32_154] : memref<256x128xf32, #tpu.memory_space<any>> -> memref<1x128xf32, #tpu.memory_space<any>>
      %175 = tpu.memref_squeeze %174 : memref<1x128xf32, #tpu.memory_space<any>> -> memref<128xf32, #tpu.memory_space<any>>
      %c0_i32_155 = arith.constant 0 : i32
      %176 = tpu.memref_slice %arg6[%c0_i32_152, %173, %c0_i32_155] : memref<8x128x128xf32, #tpu.memory_space<vmem>> -> memref<1x1x128xf32, #tpu.memory_space<vmem>>
      %177 = tpu.memref_squeeze %176 : memref<1x1x128xf32, #tpu.memory_space<vmem>> -> memref<128xf32, #tpu.memory_space<vmem>>
      %178 = tpu.memref_slice %arg7[%c0_i32_153] : memref<8x!tpu.dma_semaphore, #tpu.memory_space<semaphore_mem>> -> memref<1x!tpu.dma_semaphore, #tpu.memory_space<semaphore_mem>>
      %179 = tpu.memref_squeeze %178 : memref<1x!tpu.dma_semaphore, #tpu.memory_space<semaphore_mem>> -> memref<!tpu.dma_semaphore, #tpu.memory_space<semaphore_mem>>
      tpu.enqueue_dma source(%175 : memref<128xf32, #tpu.memory_space<any>>) target(%177 : memref<128xf32, #tpu.memory_space<vmem>>) target_semaphore(%179 : memref<!tpu.dma_semaphore, #tpu.memory_space<semaphore_mem>>)
      %180 = arith.addi %1, %107 : i32
      %c6_i32_156 = arith.constant 6 : i32
      %181 = arith.addi %180, %c6_i32_156 : i32
      %182 = arith.index_cast %2 : i32 to index
      %183 = arith.index_cast %181 : i32 to index
      %184 = memref.load %arg2[%182, %183] : memref<8x128xi32, #tpu.memory_space<smem>>
      %c6_i32_157 = arith.constant 6 : i32
      %185 = arith.addi %107, %c6_i32_157 : i32
      %c0_i32_158 = arith.constant 0 : i32
      %c0_i32_159 = arith.constant 0 : i32
      %c0_i32_160 = arith.constant 0 : i32
      %186 = tpu.memref_slice %arg3[%184, %c0_i32_160] : memref<256x128xf32, #tpu.memory_space<any>> -> memref<1x128xf32, #tpu.memory_space<any>>
      %187 = tpu.memref_squeeze %186 : memref<1x128xf32, #tpu.memory_space<any>> -> memref<128xf32, #tpu.memory_space<any>>
      %c0_i32_161 = arith.constant 0 : i32
      %188 = tpu.memref_slice %arg6[%c0_i32_158, %185, %c0_i32_161] : memref<8x128x128xf32, #tpu.memory_space<vmem>> -> memref<1x1x128xf32, #tpu.memory_space<vmem>>
      %189 = tpu.memref_squeeze %188 : memref<1x1x128xf32, #tpu.memory_space<vmem>> -> memref<128xf32, #tpu.memory_space<vmem>>
      %190 = tpu.memref_slice %arg7[%c0_i32_159] : memref<8x!tpu.dma_semaphore, #tpu.memory_space<semaphore_mem>> -> memref<1x!tpu.dma_semaphore, #tpu.memory_space<semaphore_mem>>
      %191 = tpu.memref_squeeze %190 : memref<1x!tpu.dma_semaphore, #tpu.memory_space<semaphore_mem>> -> memref<!tpu.dma_semaphore, #tpu.memory_space<semaphore_mem>>
      tpu.enqueue_dma source(%187 : memref<128xf32, #tpu.memory_space<any>>) target(%189 : memref<128xf32, #tpu.memory_space<vmem>>) target_semaphore(%191 : memref<!tpu.dma_semaphore, #tpu.memory_space<semaphore_mem>>)
      %192 = arith.addi %1, %107 : i32
      %c7_i32_162 = arith.constant 7 : i32
      %193 = arith.addi %192, %c7_i32_162 : i32
      %194 = arith.index_cast %2 : i32 to index
      %195 = arith.index_cast %193 : i32 to index
      %196 = memref.load %arg2[%194, %195] : memref<8x128xi32, #tpu.memory_space<smem>>
      %c7_i32_163 = arith.constant 7 : i32
      %197 = arith.addi %107, %c7_i32_163 : i32
      %c0_i32_164 = arith.constant 0 : i32
      %c0_i32_165 = arith.constant 0 : i32
      %c0_i32_166 = arith.constant 0 : i32
      %198 = tpu.memref_slice %arg3[%196, %c0_i32_166] : memref<256x128xf32, #tpu.memory_space<any>> -> memref<1x128xf32, #tpu.memory_space<any>>
      %199 = tpu.memref_squeeze %198 : memref<1x128xf32, #tpu.memory_space<any>> -> memref<128xf32, #tpu.memory_space<any>>
      %c0_i32_167 = arith.constant 0 : i32
      %200 = tpu.memref_slice %arg6[%c0_i32_164, %197, %c0_i32_167] : memref<8x128x128xf32, #tpu.memory_space<vmem>> -> memref<1x1x128xf32, #tpu.memory_space<vmem>>
      %201 = tpu.memref_squeeze %200 : memref<1x1x128xf32, #tpu.memory_space<vmem>> -> memref<128xf32, #tpu.memory_space<vmem>>
      %202 = tpu.memref_slice %arg7[%c0_i32_165] : memref<8x!tpu.dma_semaphore, #tpu.memory_space<semaphore_mem>> -> memref<1x!tpu.dma_semaphore, #tpu.memory_space<semaphore_mem>>
      %203 = tpu.memref_squeeze %202 : memref<1x!tpu.dma_semaphore, #tpu.memory_space<semaphore_mem>> -> memref<!tpu.dma_semaphore, #tpu.memory_space<semaphore_mem>>
      tpu.enqueue_dma source(%199 : memref<128xf32, #tpu.memory_space<any>>) target(%201 : memref<128xf32, #tpu.memory_space<vmem>>) target_semaphore(%203 : memref<!tpu.dma_semaphore, #tpu.memory_space<semaphore_mem>>)
    }
    %c16_i32_1 = arith.constant 16 : i32
    %c1_i32_2 = arith.constant 1 : i32
    %4 = arith.addi %0, %c1_i32_2 : i32
    %c0_i32_3 = arith.constant 0 : i32
    %c16_i32_4 = arith.constant 16 : i32
    %5 = arith.addi %c0_i32_3, %c16_i32_4 : i32
    %c1_i32_5 = arith.constant 1 : i32
    scf.for %arg8 = %c0_i32_3 to %5 step %c1_i32_5  : i32 {
      %c8_i32_118 = arith.constant 8 : i32
      %106 = arith.muli %arg8, %c8_i32_118 : i32
      %c0_i32_119 = arith.constant 0 : i32
      %107 = arith.addi %c0_i32_119, %106 : i32
      %108 = arith.addi %1, %107 : i32
      %c0_i32_120 = arith.constant 0 : i32
      %109 = arith.addi %108, %c0_i32_120 : i32
      %110 = arith.index_cast %4 : i32 to index
      %111 = arith.index_cast %109 : i32 to index
      %112 = memref.load %arg2[%110, %111] : memref<8x128xi32, #tpu.memory_space<smem>>
      %c0_i32_121 = arith.constant 0 : i32
      %113 = arith.addi %107, %c0_i32_121 : i32
      %c1_i32_122 = arith.constant 1 : i32
      %c1_i32_123 = arith.constant 1 : i32
      %c0_i32_124 = arith.constant 0 : i32
      %114 = tpu.memref_slice %arg3[%112, %c0_i32_124] : memref<256x128xf32, #tpu.memory_space<any>> -> memref<1x128xf32, #tpu.memory_space<any>>
      %115 = tpu.memref_squeeze %114 : memref<1x128xf32, #tpu.memory_space<any>> -> memref<128xf32, #tpu.memory_space<any>>
      %c0_i32_125 = arith.constant 0 : i32
      %116 = tpu.memref_slice %arg6[%c1_i32_122, %113, %c0_i32_125] : memref<8x128x128xf32, #tpu.memory_space<vmem>> -> memref<1x1x128xf32, #tpu.memory_space<vmem>>
      %117 = tpu.memref_squeeze %116 : memref<1x1x128xf32, #tpu.memory_space<vmem>> -> memref<128xf32, #tpu.memory_space<vmem>>
      %118 = tpu.memref_slice %arg7[%c1_i32_123] : memref<8x!tpu.dma_semaphore, #tpu.memory_space<semaphore_mem>> -> memref<1x!tpu.dma_semaphore, #tpu.memory_space<semaphore_mem>>
      %119 = tpu.memref_squeeze %118 : memref<1x!tpu.dma_semaphore, #tpu.memory_space<semaphore_mem>> -> memref<!tpu.dma_semaphore, #tpu.memory_space<semaphore_mem>>
      tpu.enqueue_dma source(%115 : memref<128xf32, #tpu.memory_space<any>>) target(%117 : memref<128xf32, #tpu.memory_space<vmem>>) target_semaphore(%119 : memref<!tpu.dma_semaphore, #tpu.memory_space<semaphore_mem>>)
      %120 = arith.addi %1, %107 : i32
      %c1_i32_126 = arith.constant 1 : i32
      %121 = arith.addi %120, %c1_i32_126 : i32
      %122 = arith.index_cast %4 : i32 to index
      %123 = arith.index_cast %121 : i32 to index
      %124 = memref.load %arg2[%122, %123] : memref<8x128xi32, #tpu.memory_space<smem>>
      %c1_i32_127 = arith.constant 1 : i32
      %125 = arith.addi %107, %c1_i32_127 : i32
      %c1_i32_128 = arith.constant 1 : i32
      %c1_i32_129 = arith.constant 1 : i32
      %c0_i32_130 = arith.constant 0 : i32
      %126 = tpu.memref_slice %arg3[%124, %c0_i32_130] : memref<256x128xf32, #tpu.memory_space<any>> -> memref<1x128xf32, #tpu.memory_space<any>>
      %127 = tpu.memref_squeeze %126 : memref<1x128xf32, #tpu.memory_space<any>> -> memref<128xf32, #tpu.memory_space<any>>
      %c0_i32_131 = arith.constant 0 : i32
      %128 = tpu.memref_slice %arg6[%c1_i32_128, %125, %c0_i32_131] : memref<8x128x128xf32, #tpu.memory_space<vmem>> -> memref<1x1x128xf32, #tpu.memory_space<vmem>>
      %129 = tpu.memref_squeeze %128 : memref<1x1x128xf32, #tpu.memory_space<vmem>> -> memref<128xf32, #tpu.memory_space<vmem>>
      %130 = tpu.memref_slice %arg7[%c1_i32_129] : memref<8x!tpu.dma_semaphore, #tpu.memory_space<semaphore_mem>> -> memref<1x!tpu.dma_semaphore, #tpu.memory_space<semaphore_mem>>
      %131 = tpu.memref_squeeze %130 : memref<1x!tpu.dma_semaphore, #tpu.memory_space<semaphore_mem>> -> memref<!tpu.dma_semaphore, #tpu.memory_space<semaphore_mem>>
      tpu.enqueue_dma source(%127 : memref<128xf32, #tpu.memory_space<any>>) target(%129 : memref<128xf32, #tpu.memory_space<vmem>>) target_semaphore(%131 : memref<!tpu.dma_semaphore, #tpu.memory_space<semaphore_mem>>)
      %132 = arith.addi %1, %107 : i32
      %c2_i32_132 = arith.constant 2 : i32
      %133 = arith.addi %132, %c2_i32_132 : i32
      %134 = arith.index_cast %4 : i32 to index
      %135 = arith.index_cast %133 : i32 to index
      %136 = memref.load %arg2[%134, %135] : memref<8x128xi32, #tpu.memory_space<smem>>
      %c2_i32_133 = arith.constant 2 : i32
      %137 = arith.addi %107, %c2_i32_133 : i32
      %c1_i32_134 = arith.constant 1 : i32
      %c1_i32_135 = arith.constant 1 : i32
      %c0_i32_136 = arith.constant 0 : i32
      %138 = tpu.memref_slice %arg3[%136, %c0_i32_136] : memref<256x128xf32, #tpu.memory_space<any>> -> memref<1x128xf32, #tpu.memory_space<any>>
      %139 = tpu.memref_squeeze %138 : memref<1x128xf32, #tpu.memory_space<any>> -> memref<128xf32, #tpu.memory_space<any>>
      %c0_i32_137 = arith.constant 0 : i32
      %140 = tpu.memref_slice %arg6[%c1_i32_134, %137, %c0_i32_137] : memref<8x128x128xf32, #tpu.memory_space<vmem>> -> memref<1x1x128xf32, #tpu.memory_space<vmem>>
      %141 = tpu.memref_squeeze %140 : memref<1x1x128xf32, #tpu.memory_space<vmem>> -> memref<128xf32, #tpu.memory_space<vmem>>
      %142 = tpu.memref_slice %arg7[%c1_i32_135] : memref<8x!tpu.dma_semaphore, #tpu.memory_space<semaphore_mem>> -> memref<1x!tpu.dma_semaphore, #tpu.memory_space<semaphore_mem>>
      %143 = tpu.memref_squeeze %142 : memref<1x!tpu.dma_semaphore, #tpu.memory_space<semaphore_mem>> -> memref<!tpu.dma_semaphore, #tpu.memory_space<semaphore_mem>>
      tpu.enqueue_dma source(%139 : memref<128xf32, #tpu.memory_space<any>>) target(%141 : memref<128xf32, #tpu.memory_space<vmem>>) target_semaphore(%143 : memref<!tpu.dma_semaphore, #tpu.memory_space<semaphore_mem>>)
      %144 = arith.addi %1, %107 : i32
      %c3_i32_138 = arith.constant 3 : i32
      %145 = arith.addi %144, %c3_i32_138 : i32
      %146 = arith.index_cast %4 : i32 to index
      %147 = arith.index_cast %145 : i32 to index
      %148 = memref.load %arg2[%146, %147] : memref<8x128xi32, #tpu.memory_space<smem>>
      %c3_i32_139 = arith.constant 3 : i32
      %149 = arith.addi %107, %c3_i32_139 : i32
      %c1_i32_140 = arith.constant 1 : i32
      %c1_i32_141 = arith.constant 1 : i32
      %c0_i32_142 = arith.constant 0 : i32
      %150 = tpu.memref_slice %arg3[%148, %c0_i32_142] : memref<256x128xf32, #tpu.memory_space<any>> -> memref<1x128xf32, #tpu.memory_space<any>>
      %151 = tpu.memref_squeeze %150 : memref<1x128xf32, #tpu.memory_space<any>> -> memref<128xf32, #tpu.memory_space<any>>
      %c0_i32_143 = arith.constant 0 : i32
      %152 = tpu.memref_slice %arg6[%c1_i32_140, %149, %c0_i32_143] : memref<8x128x128xf32, #tpu.memory_space<vmem>> -> memref<1x1x128xf32, #tpu.memory_space<vmem>>
      %153 = tpu.memref_squeeze %152 : memref<1x1x128xf32, #tpu.memory_space<vmem>> -> memref<128xf32, #tpu.memory_space<vmem>>
      %154 = tpu.memref_slice %arg7[%c1_i32_141] : memref<8x!tpu.dma_semaphore, #tpu.memory_space<semaphore_mem>> -> memref<1x!tpu.dma_semaphore, #tpu.memory_space<semaphore_mem>>
      %155 = tpu.memref_squeeze %154 : memref<1x!tpu.dma_semaphore, #tpu.memory_space<semaphore_mem>> -> memref<!tpu.dma_semaphore, #tpu.memory_space<semaphore_mem>>
      tpu.enqueue_dma source(%151 : memref<128xf32, #tpu.memory_space<any>>) target(%153 : memref<128xf32, #tpu.memory_space<vmem>>) target_semaphore(%155 : memref<!tpu.dma_semaphore, #tpu.memory_space<semaphore_mem>>)
      %156 = arith.addi %1, %107 : i32
      %c4_i32_144 = arith.constant 4 : i32
      %157 = arith.addi %156, %c4_i32_144 : i32
      %158 = arith.index_cast %4 : i32 to index
      %159 = arith.index_cast %157 : i32 to index
      %160 = memref.load %arg2[%158, %159] : memref<8x128xi32, #tpu.memory_space<smem>>
      %c4_i32_145 = arith.constant 4 : i32
      %161 = arith.addi %107, %c4_i32_145 : i32
      %c1_i32_146 = arith.constant 1 : i32
      %c1_i32_147 = arith.constant 1 : i32
      %c0_i32_148 = arith.constant 0 : i32
      %162 = tpu.memref_slice %arg3[%160, %c0_i32_148] : memref<256x128xf32, #tpu.memory_space<any>> -> memref<1x128xf32, #tpu.memory_space<any>>
      %163 = tpu.memref_squeeze %162 : memref<1x128xf32, #tpu.memory_space<any>> -> memref<128xf32, #tpu.memory_space<any>>
      %c0_i32_149 = arith.constant 0 : i32
      %164 = tpu.memref_slice %arg6[%c1_i32_146, %161, %c0_i32_149] : memref<8x128x128xf32, #tpu.memory_space<vmem>> -> memref<1x1x128xf32, #tpu.memory_space<vmem>>
      %165 = tpu.memref_squeeze %164 : memref<1x1x128xf32, #tpu.memory_space<vmem>> -> memref<128xf32, #tpu.memory_space<vmem>>
      %166 = tpu.memref_slice %arg7[%c1_i32_147] : memref<8x!tpu.dma_semaphore, #tpu.memory_space<semaphore_mem>> -> memref<1x!tpu.dma_semaphore, #tpu.memory_space<semaphore_mem>>
      %167 = tpu.memref_squeeze %166 : memref<1x!tpu.dma_semaphore, #tpu.memory_space<semaphore_mem>> -> memref<!tpu.dma_semaphore, #tpu.memory_space<semaphore_mem>>
      tpu.enqueue_dma source(%163 : memref<128xf32, #tpu.memory_space<any>>) target(%165 : memref<128xf32, #tpu.memory_space<vmem>>) target_semaphore(%167 : memref<!tpu.dma_semaphore, #tpu.memory_space<semaphore_mem>>)
      %168 = arith.addi %1, %107 : i32
      %c5_i32_150 = arith.constant 5 : i32
      %169 = arith.addi %168, %c5_i32_150 : i32
      %170 = arith.index_cast %4 : i32 to index
      %171 = arith.index_cast %169 : i32 to index
      %172 = memref.load %arg2[%170, %171] : memref<8x128xi32, #tpu.memory_space<smem>>
      %c5_i32_151 = arith.constant 5 : i32
      %173 = arith.addi %107, %c5_i32_151 : i32
      %c1_i32_152 = arith.constant 1 : i32
      %c1_i32_153 = arith.constant 1 : i32
      %c0_i32_154 = arith.constant 0 : i32
      %174 = tpu.memref_slice %arg3[%172, %c0_i32_154] : memref<256x128xf32, #tpu.memory_space<any>> -> memref<1x128xf32, #tpu.memory_space<any>>
      %175 = tpu.memref_squeeze %174 : memref<1x128xf32, #tpu.memory_space<any>> -> memref<128xf32, #tpu.memory_space<any>>
      %c0_i32_155 = arith.constant 0 : i32
      %176 = tpu.memref_slice %arg6[%c1_i32_152, %173, %c0_i32_155] : memref<8x128x128xf32, #tpu.memory_space<vmem>> -> memref<1x1x128xf32, #tpu.memory_space<vmem>>
      %177 = tpu.memref_squeeze %176 : memref<1x1x128xf32, #tpu.memory_space<vmem>> -> memref<128xf32, #tpu.memory_space<vmem>>
      %178 = tpu.memref_slice %arg7[%c1_i32_153] : memref<8x!tpu.dma_semaphore, #tpu.memory_space<semaphore_mem>> -> memref<1x!tpu.dma_semaphore, #tpu.memory_space<semaphore_mem>>
      %179 = tpu.memref_squeeze %178 : memref<1x!tpu.dma_semaphore, #tpu.memory_space<semaphore_mem>> -> memref<!tpu.dma_semaphore, #tpu.memory_space<semaphore_mem>>
      tpu.enqueue_dma source(%175 : memref<128xf32, #tpu.memory_space<any>>) target(%177 : memref<128xf32, #tpu.memory_space<vmem>>) target_semaphore(%179 : memref<!tpu.dma_semaphore, #tpu.memory_space<semaphore_mem>>)
      %180 = arith.addi %1, %107 : i32
      %c6_i32_156 = arith.constant 6 : i32
      %181 = arith.addi %180, %c6_i32_156 : i32
      %182 = arith.index_cast %4 : i32 to index
      %183 = arith.index_cast %181 : i32 to index
      %184 = memref.load %arg2[%182, %183] : memref<8x128xi32, #tpu.memory_space<smem>>
      %c6_i32_157 = arith.constant 6 : i32
      %185 = arith.addi %107, %c6_i32_157 : i32
      %c1_i32_158 = arith.constant 1 : i32
      %c1_i32_159 = arith.constant 1 : i32
      %c0_i32_160 = arith.constant 0 : i32
      %186 = tpu.memref_slice %arg3[%184, %c0_i32_160] : memref<256x128xf32, #tpu.memory_space<any>> -> memref<1x128xf32, #tpu.memory_space<any>>
      %187 = tpu.memref_squeeze %186 : memref<1x128xf32, #tpu.memory_space<any>> -> memref<128xf32, #tpu.memory_space<any>>
      %c0_i32_161 = arith.constant 0 : i32
      %188 = tpu.memref_slice %arg6[%c1_i32_158, %185, %c0_i32_161] : memref<8x128x128xf32, #tpu.memory_space<vmem>> -> memref<1x1x128xf32, #tpu.memory_space<vmem>>
      %189 = tpu.memref_squeeze %188 : memref<1x1x128xf32, #tpu.memory_space<vmem>> -> memref<128xf32, #tpu.memory_space<vmem>>
      %190 = tpu.memref_slice %arg7[%c1_i32_159] : memref<8x!tpu.dma_semaphore, #tpu.memory_space<semaphore_mem>> -> memref<1x!tpu.dma_semaphore, #tpu.memory_space<semaphore_mem>>
      %191 = tpu.memref_squeeze %190 : memref<1x!tpu.dma_semaphore, #tpu.memory_space<semaphore_mem>> -> memref<!tpu.dma_semaphore, #tpu.memory_space<semaphore_mem>>
      tpu.enqueue_dma source(%187 : memref<128xf32, #tpu.memory_space<any>>) target(%189 : memref<128xf32, #tpu.memory_space<vmem>>) target_semaphore(%191 : memref<!tpu.dma_semaphore, #tpu.memory_space<semaphore_mem>>)
      %192 = arith.addi %1, %107 : i32
      %c7_i32_162 = arith.constant 7 : i32
      %193 = arith.addi %192, %c7_i32_162 : i32
      %194 = arith.index_cast %4 : i32 to index
      %195 = arith.index_cast %193 : i32 to index
      %196 = memref.load %arg2[%194, %195] : memref<8x128xi32, #tpu.memory_space<smem>>
      %c7_i32_163 = arith.constant 7 : i32
      %197 = arith.addi %107, %c7_i32_163 : i32
      %c1_i32_164 = arith.constant 1 : i32
      %c1_i32_165 = arith.constant 1 : i32
      %c0_i32_166 = arith.constant 0 : i32
      %198 = tpu.memref_slice %arg3[%196, %c0_i32_166] : memref<256x128xf32, #tpu.memory_space<any>> -> memref<1x128xf32, #tpu.memory_space<any>>
      %199 = tpu.memref_squeeze %198 : memref<1x128xf32, #tpu.memory_space<any>> -> memref<128xf32, #tpu.memory_space<any>>
      %c0_i32_167 = arith.constant 0 : i32
      %200 = tpu.memref_slice %arg6[%c1_i32_164, %197, %c0_i32_167] : memref<8x128x128xf32, #tpu.memory_space<vmem>> -> memref<1x1x128xf32, #tpu.memory_space<vmem>>
      %201 = tpu.memref_squeeze %200 : memref<1x1x128xf32, #tpu.memory_space<vmem>> -> memref<128xf32, #tpu.memory_space<vmem>>
      %202 = tpu.memref_slice %arg7[%c1_i32_165] : memref<8x!tpu.dma_semaphore, #tpu.memory_space<semaphore_mem>> -> memref<1x!tpu.dma_semaphore, #tpu.memory_space<semaphore_mem>>
      %203 = tpu.memref_squeeze %202 : memref<1x!tpu.dma_semaphore, #tpu.memory_space<semaphore_mem>> -> memref<!tpu.dma_semaphore, #tpu.memory_space<semaphore_mem>>
      tpu.enqueue_dma source(%199 : memref<128xf32, #tpu.memory_space<any>>) target(%201 : memref<128xf32, #tpu.memory_space<vmem>>) target_semaphore(%203 : memref<!tpu.dma_semaphore, #tpu.memory_space<semaphore_mem>>)
    }
    %c16_i32_6 = arith.constant 16 : i32
    %c2_i32 = arith.constant 2 : i32
    %6 = arith.addi %0, %c2_i32 : i32
    %c0_i32_7 = arith.constant 0 : i32
    %c16_i32_8 = arith.constant 16 : i32
    %7 = arith.addi %c0_i32_7, %c16_i32_8 : i32
    %c1_i32_9 = arith.constant 1 : i32
    scf.for %arg8 = %c0_i32_7 to %7 step %c1_i32_9  : i32 {
      %c8_i32_118 = arith.constant 8 : i32
      %106 = arith.muli %arg8, %c8_i32_118 : i32
      %c0_i32_119 = arith.constant 0 : i32
      %107 = arith.addi %c0_i32_119, %106 : i32
      %108 = arith.addi %1, %107 : i32
      %c0_i32_120 = arith.constant 0 : i32
      %109 = arith.addi %108, %c0_i32_120 : i32
      %110 = arith.index_cast %6 : i32 to index
      %111 = arith.index_cast %109 : i32 to index
      %112 = memref.load %arg2[%110, %111] : memref<8x128xi32, #tpu.memory_space<smem>>
      %c0_i32_121 = arith.constant 0 : i32
      %113 = arith.addi %107, %c0_i32_121 : i32
      %c2_i32_122 = arith.constant 2 : i32
      %c2_i32_123 = arith.constant 2 : i32
      %c0_i32_124 = arith.constant 0 : i32
      %114 = tpu.memref_slice %arg3[%112, %c0_i32_124] : memref<256x128xf32, #tpu.memory_space<any>> -> memref<1x128xf32, #tpu.memory_space<any>>
      %115 = tpu.memref_squeeze %114 : memref<1x128xf32, #tpu.memory_space<any>> -> memref<128xf32, #tpu.memory_space<any>>
      %c0_i32_125 = arith.constant 0 : i32
      %116 = tpu.memref_slice %arg6[%c2_i32_122, %113, %c0_i32_125] : memref<8x128x128xf32, #tpu.memory_space<vmem>> -> memref<1x1x128xf32, #tpu.memory_space<vmem>>
      %117 = tpu.memref_squeeze %116 : memref<1x1x128xf32, #tpu.memory_space<vmem>> -> memref<128xf32, #tpu.memory_space<vmem>>
      %118 = tpu.memref_slice %arg7[%c2_i32_123] : memref<8x!tpu.dma_semaphore, #tpu.memory_space<semaphore_mem>> -> memref<1x!tpu.dma_semaphore, #tpu.memory_space<semaphore_mem>>
      %119 = tpu.memref_squeeze %118 : memref<1x!tpu.dma_semaphore, #tpu.memory_space<semaphore_mem>> -> memref<!tpu.dma_semaphore, #tpu.memory_space<semaphore_mem>>
      tpu.enqueue_dma source(%115 : memref<128xf32, #tpu.memory_space<any>>) target(%117 : memref<128xf32, #tpu.memory_space<vmem>>) target_semaphore(%119 : memref<!tpu.dma_semaphore, #tpu.memory_space<semaphore_mem>>)
      %120 = arith.addi %1, %107 : i32
      %c1_i32_126 = arith.constant 1 : i32
      %121 = arith.addi %120, %c1_i32_126 : i32
      %122 = arith.index_cast %6 : i32 to index
      %123 = arith.index_cast %121 : i32 to index
      %124 = memref.load %arg2[%122, %123] : memref<8x128xi32, #tpu.memory_space<smem>>
      %c1_i32_127 = arith.constant 1 : i32
      %125 = arith.addi %107, %c1_i32_127 : i32
      %c2_i32_128 = arith.constant 2 : i32
      %c2_i32_129 = arith.constant 2 : i32
      %c0_i32_130 = arith.constant 0 : i32
      %126 = tpu.memref_slice %arg3[%124, %c0_i32_130] : memref<256x128xf32, #tpu.memory_space<any>> -> memref<1x128xf32, #tpu.memory_space<any>>
      %127 = tpu.memref_squeeze %126 : memref<1x128xf32, #tpu.memory_space<any>> -> memref<128xf32, #tpu.memory_space<any>>
      %c0_i32_131 = arith.constant 0 : i32
      %128 = tpu.memref_slice %arg6[%c2_i32_128, %125, %c0_i32_131] : memref<8x128x128xf32, #tpu.memory_space<vmem>> -> memref<1x1x128xf32, #tpu.memory_space<vmem>>
      %129 = tpu.memref_squeeze %128 : memref<1x1x128xf32, #tpu.memory_space<vmem>> -> memref<128xf32, #tpu.memory_space<vmem>>
      %130 = tpu.memref_slice %arg7[%c2_i32_129] : memref<8x!tpu.dma_semaphore, #tpu.memory_space<semaphore_mem>> -> memref<1x!tpu.dma_semaphore, #tpu.memory_space<semaphore_mem>>
      %131 = tpu.memref_squeeze %130 : memref<1x!tpu.dma_semaphore, #tpu.memory_space<semaphore_mem>> -> memref<!tpu.dma_semaphore, #tpu.memory_space<semaphore_mem>>
      tpu.enqueue_dma source(%127 : memref<128xf32, #tpu.memory_space<any>>) target(%129 : memref<128xf32, #tpu.memory_space<vmem>>) target_semaphore(%131 : memref<!tpu.dma_semaphore, #tpu.memory_space<semaphore_mem>>)
      %132 = arith.addi %1, %107 : i32
      %c2_i32_132 = arith.constant 2 : i32
      %133 = arith.addi %132, %c2_i32_132 : i32
      %134 = arith.index_cast %6 : i32 to index
      %135 = arith.index_cast %133 : i32 to index
      %136 = memref.load %arg2[%134, %135] : memref<8x128xi32, #tpu.memory_space<smem>>
      %c2_i32_133 = arith.constant 2 : i32
      %137 = arith.addi %107, %c2_i32_133 : i32
      %c2_i32_134 = arith.constant 2 : i32
      %c2_i32_135 = arith.constant 2 : i32
      %c0_i32_136 = arith.constant 0 : i32
      %138 = tpu.memref_slice %arg3[%136, %c0_i32_136] : memref<256x128xf32, #tpu.memory_space<any>> -> memref<1x128xf32, #tpu.memory_space<any>>
      %139 = tpu.memref_squeeze %138 : memref<1x128xf32, #tpu.memory_space<any>> -> memref<128xf32, #tpu.memory_space<any>>
      %c0_i32_137 = arith.constant 0 : i32
      %140 = tpu.memref_slice %arg6[%c2_i32_134, %137, %c0_i32_137] : memref<8x128x128xf32, #tpu.memory_space<vmem>> -> memref<1x1x128xf32, #tpu.memory_space<vmem>>
      %141 = tpu.memref_squeeze %140 : memref<1x1x128xf32, #tpu.memory_space<vmem>> -> memref<128xf32, #tpu.memory_space<vmem>>
      %142 = tpu.memref_slice %arg7[%c2_i32_135] : memref<8x!tpu.dma_semaphore, #tpu.memory_space<semaphore_mem>> -> memref<1x!tpu.dma_semaphore, #tpu.memory_space<semaphore_mem>>
      %143 = tpu.memref_squeeze %142 : memref<1x!tpu.dma_semaphore, #tpu.memory_space<semaphore_mem>> -> memref<!tpu.dma_semaphore, #tpu.memory_space<semaphore_mem>>
      tpu.enqueue_dma source(%139 : memref<128xf32, #tpu.memory_space<any>>) target(%141 : memref<128xf32, #tpu.memory_space<vmem>>) target_semaphore(%143 : memref<!tpu.dma_semaphore, #tpu.memory_space<semaphore_mem>>)
      %144 = arith.addi %1, %107 : i32
      %c3_i32_138 = arith.constant 3 : i32
      %145 = arith.addi %144, %c3_i32_138 : i32
      %146 = arith.index_cast %6 : i32 to index
      %147 = arith.index_cast %145 : i32 to index
      %148 = memref.load %arg2[%146, %147] : memref<8x128xi32, #tpu.memory_space<smem>>
      %c3_i32_139 = arith.constant 3 : i32
      %149 = arith.addi %107, %c3_i32_139 : i32
      %c2_i32_140 = arith.constant 2 : i32
      %c2_i32_141 = arith.constant 2 : i32
      %c0_i32_142 = arith.constant 0 : i32
      %150 = tpu.memref_slice %arg3[%148, %c0_i32_142] : memref<256x128xf32, #tpu.memory_space<any>> -> memref<1x128xf32, #tpu.memory_space<any>>
      %151 = tpu.memref_squeeze %150 : memref<1x128xf32, #tpu.memory_space<any>> -> memref<128xf32, #tpu.memory_space<any>>
      %c0_i32_143 = arith.constant 0 : i32
      %152 = tpu.memref_slice %arg6[%c2_i32_140, %149, %c0_i32_143] : memref<8x128x128xf32, #tpu.memory_space<vmem>> -> memref<1x1x128xf32, #tpu.memory_space<vmem>>
      %153 = tpu.memref_squeeze %152 : memref<1x1x128xf32, #tpu.memory_space<vmem>> -> memref<128xf32, #tpu.memory_space<vmem>>
      %154 = tpu.memref_slice %arg7[%c2_i32_141] : memref<8x!tpu.dma_semaphore, #tpu.memory_space<semaphore_mem>> -> memref<1x!tpu.dma_semaphore, #tpu.memory_space<semaphore_mem>>
      %155 = tpu.memref_squeeze %154 : memref<1x!tpu.dma_semaphore, #tpu.memory_space<semaphore_mem>> -> memref<!tpu.dma_semaphore, #tpu.memory_space<semaphore_mem>>
      tpu.enqueue_dma source(%151 : memref<128xf32, #tpu.memory_space<any>>) target(%153 : memref<128xf32, #tpu.memory_space<vmem>>) target_semaphore(%155 : memref<!tpu.dma_semaphore, #tpu.memory_space<semaphore_mem>>)
      %156 = arith.addi %1, %107 : i32
      %c4_i32_144 = arith.constant 4 : i32
      %157 = arith.addi %156, %c4_i32_144 : i32
      %158 = arith.index_cast %6 : i32 to index
      %159 = arith.index_cast %157 : i32 to index
      %160 = memref.load %arg2[%158, %159] : memref<8x128xi32, #tpu.memory_space<smem>>
      %c4_i32_145 = arith.constant 4 : i32
      %161 = arith.addi %107, %c4_i32_145 : i32
      %c2_i32_146 = arith.constant 2 : i32
      %c2_i32_147 = arith.constant 2 : i32
      %c0_i32_148 = arith.constant 0 : i32
      %162 = tpu.memref_slice %arg3[%160, %c0_i32_148] : memref<256x128xf32, #tpu.memory_space<any>> -> memref<1x128xf32, #tpu.memory_space<any>>
      %163 = tpu.memref_squeeze %162 : memref<1x128xf32, #tpu.memory_space<any>> -> memref<128xf32, #tpu.memory_space<any>>
      %c0_i32_149 = arith.constant 0 : i32
      %164 = tpu.memref_slice %arg6[%c2_i32_146, %161, %c0_i32_149] : memref<8x128x128xf32, #tpu.memory_space<vmem>> -> memref<1x1x128xf32, #tpu.memory_space<vmem>>
      %165 = tpu.memref_squeeze %164 : memref<1x1x128xf32, #tpu.memory_space<vmem>> -> memref<128xf32, #tpu.memory_space<vmem>>
      %166 = tpu.memref_slice %arg7[%c2_i32_147] : memref<8x!tpu.dma_semaphore, #tpu.memory_space<semaphore_mem>> -> memref<1x!tpu.dma_semaphore, #tpu.memory_space<semaphore_mem>>
      %167 = tpu.memref_squeeze %166 : memref<1x!tpu.dma_semaphore, #tpu.memory_space<semaphore_mem>> -> memref<!tpu.dma_semaphore, #tpu.memory_space<semaphore_mem>>
      tpu.enqueue_dma source(%163 : memref<128xf32, #tpu.memory_space<any>>) target(%165 : memref<128xf32, #tpu.memory_space<vmem>>) target_semaphore(%167 : memref<!tpu.dma_semaphore, #tpu.memory_space<semaphore_mem>>)
      %168 = arith.addi %1, %107 : i32
      %c5_i32_150 = arith.constant 5 : i32
      %169 = arith.addi %168, %c5_i32_150 : i32
      %170 = arith.index_cast %6 : i32 to index
      %171 = arith.index_cast %169 : i32 to index
      %172 = memref.load %arg2[%170, %171] : memref<8x128xi32, #tpu.memory_space<smem>>
      %c5_i32_151 = arith.constant 5 : i32
      %173 = arith.addi %107, %c5_i32_151 : i32
      %c2_i32_152 = arith.constant 2 : i32
      %c2_i32_153 = arith.constant 2 : i32
      %c0_i32_154 = arith.constant 0 : i32
      %174 = tpu.memref_slice %arg3[%172, %c0_i32_154] : memref<256x128xf32, #tpu.memory_space<any>> -> memref<1x128xf32, #tpu.memory_space<any>>
      %175 = tpu.memref_squeeze %174 : memref<1x128xf32, #tpu.memory_space<any>> -> memref<128xf32, #tpu.memory_space<any>>
      %c0_i32_155 = arith.constant 0 : i32
      %176 = tpu.memref_slice %arg6[%c2_i32_152, %173, %c0_i32_155] : memref<8x128x128xf32, #tpu.memory_space<vmem>> -> memref<1x1x128xf32, #tpu.memory_space<vmem>>
      %177 = tpu.memref_squeeze %176 : memref<1x1x128xf32, #tpu.memory_space<vmem>> -> memref<128xf32, #tpu.memory_space<vmem>>
      %178 = tpu.memref_slice %arg7[%c2_i32_153] : memref<8x!tpu.dma_semaphore, #tpu.memory_space<semaphore_mem>> -> memref<1x!tpu.dma_semaphore, #tpu.memory_space<semaphore_mem>>
      %179 = tpu.memref_squeeze %178 : memref<1x!tpu.dma_semaphore, #tpu.memory_space<semaphore_mem>> -> memref<!tpu.dma_semaphore, #tpu.memory_space<semaphore_mem>>
      tpu.enqueue_dma source(%175 : memref<128xf32, #tpu.memory_space<any>>) target(%177 : memref<128xf32, #tpu.memory_space<vmem>>) target_semaphore(%179 : memref<!tpu.dma_semaphore, #tpu.memory_space<semaphore_mem>>)
      %180 = arith.addi %1, %107 : i32
      %c6_i32_156 = arith.constant 6 : i32
      %181 = arith.addi %180, %c6_i32_156 : i32
      %182 = arith.index_cast %6 : i32 to index
      %183 = arith.index_cast %181 : i32 to index
      %184 = memref.load %arg2[%182, %183] : memref<8x128xi32, #tpu.memory_space<smem>>
      %c6_i32_157 = arith.constant 6 : i32
      %185 = arith.addi %107, %c6_i32_157 : i32
      %c2_i32_158 = arith.constant 2 : i32
      %c2_i32_159 = arith.constant 2 : i32
      %c0_i32_160 = arith.constant 0 : i32
      %186 = tpu.memref_slice %arg3[%184, %c0_i32_160] : memref<256x128xf32, #tpu.memory_space<any>> -> memref<1x128xf32, #tpu.memory_space<any>>
      %187 = tpu.memref_squeeze %186 : memref<1x128xf32, #tpu.memory_space<any>> -> memref<128xf32, #tpu.memory_space<any>>
      %c0_i32_161 = arith.constant 0 : i32
      %188 = tpu.memref_slice %arg6[%c2_i32_158, %185, %c0_i32_161] : memref<8x128x128xf32, #tpu.memory_space<vmem>> -> memref<1x1x128xf32, #tpu.memory_space<vmem>>
      %189 = tpu.memref_squeeze %188 : memref<1x1x128xf32, #tpu.memory_space<vmem>> -> memref<128xf32, #tpu.memory_space<vmem>>
      %190 = tpu.memref_slice %arg7[%c2_i32_159] : memref<8x!tpu.dma_semaphore, #tpu.memory_space<semaphore_mem>> -> memref<1x!tpu.dma_semaphore, #tpu.memory_space<semaphore_mem>>
      %191 = tpu.memref_squeeze %190 : memref<1x!tpu.dma_semaphore, #tpu.memory_space<semaphore_mem>> -> memref<!tpu.dma_semaphore, #tpu.memory_space<semaphore_mem>>
      tpu.enqueue_dma source(%187 : memref<128xf32, #tpu.memory_space<any>>) target(%189 : memref<128xf32, #tpu.memory_space<vmem>>) target_semaphore(%191 : memref<!tpu.dma_semaphore, #tpu.memory_space<semaphore_mem>>)
      %192 = arith.addi %1, %107 : i32
      %c7_i32_162 = arith.constant 7 : i32
      %193 = arith.addi %192, %c7_i32_162 : i32
      %194 = arith.index_cast %6 : i32 to index
      %195 = arith.index_cast %193 : i32 to index
      %196 = memref.load %arg2[%194, %195] : memref<8x128xi32, #tpu.memory_space<smem>>
      %c7_i32_163 = arith.constant 7 : i32
      %197 = arith.addi %107, %c7_i32_163 : i32
      %c2_i32_164 = arith.constant 2 : i32
      %c2_i32_165 = arith.constant 2 : i32
      %c0_i32_166 = arith.constant 0 : i32
      %198 = tpu.memref_slice %arg3[%196, %c0_i32_166] : memref<256x128xf32, #tpu.memory_space<any>> -> memref<1x128xf32, #tpu.memory_space<any>>
      %199 = tpu.memref_squeeze %198 : memref<1x128xf32, #tpu.memory_space<any>> -> memref<128xf32, #tpu.memory_space<any>>
      %c0_i32_167 = arith.constant 0 : i32
      %200 = tpu.memref_slice %arg6[%c2_i32_164, %197, %c0_i32_167] : memref<8x128x128xf32, #tpu.memory_space<vmem>> -> memref<1x1x128xf32, #tpu.memory_space<vmem>>
      %201 = tpu.memref_squeeze %200 : memref<1x1x128xf32, #tpu.memory_space<vmem>> -> memref<128xf32, #tpu.memory_space<vmem>>
      %202 = tpu.memref_slice %arg7[%c2_i32_165] : memref<8x!tpu.dma_semaphore, #tpu.memory_space<semaphore_mem>> -> memref<1x!tpu.dma_semaphore, #tpu.memory_space<semaphore_mem>>
      %203 = tpu.memref_squeeze %202 : memref<1x!tpu.dma_semaphore, #tpu.memory_space<semaphore_mem>> -> memref<!tpu.dma_semaphore, #tpu.memory_space<semaphore_mem>>
      tpu.enqueue_dma source(%199 : memref<128xf32, #tpu.memory_space<any>>) target(%201 : memref<128xf32, #tpu.memory_space<vmem>>) target_semaphore(%203 : memref<!tpu.dma_semaphore, #tpu.memory_space<semaphore_mem>>)
    }
    %c16_i32_10 = arith.constant 16 : i32
    %c3_i32 = arith.constant 3 : i32
    %8 = arith.addi %0, %c3_i32 : i32
    %c0_i32_11 = arith.constant 0 : i32
    %c16_i32_12 = arith.constant 16 : i32
    %9 = arith.addi %c0_i32_11, %c16_i32_12 : i32
    %c1_i32_13 = arith.constant 1 : i32
    scf.for %arg8 = %c0_i32_11 to %9 step %c1_i32_13  : i32 {
      %c8_i32_118 = arith.constant 8 : i32
      %106 = arith.muli %arg8, %c8_i32_118 : i32
      %c0_i32_119 = arith.constant 0 : i32
      %107 = arith.addi %c0_i32_119, %106 : i32
      %108 = arith.addi %1, %107 : i32
      %c0_i32_120 = arith.constant 0 : i32
      %109 = arith.addi %108, %c0_i32_120 : i32
      %110 = arith.index_cast %8 : i32 to index
      %111 = arith.index_cast %109 : i32 to index
      %112 = memref.load %arg2[%110, %111] : memref<8x128xi32, #tpu.memory_space<smem>>
      %c0_i32_121 = arith.constant 0 : i32
      %113 = arith.addi %107, %c0_i32_121 : i32
      %c3_i32_122 = arith.constant 3 : i32
      %c3_i32_123 = arith.constant 3 : i32
      %c0_i32_124 = arith.constant 0 : i32
      %114 = tpu.memref_slice %arg3[%112, %c0_i32_124] : memref<256x128xf32, #tpu.memory_space<any>> -> memref<1x128xf32, #tpu.memory_space<any>>
      %115 = tpu.memref_squeeze %114 : memref<1x128xf32, #tpu.memory_space<any>> -> memref<128xf32, #tpu.memory_space<any>>
      %c0_i32_125 = arith.constant 0 : i32
      %116 = tpu.memref_slice %arg6[%c3_i32_122, %113, %c0_i32_125] : memref<8x128x128xf32, #tpu.memory_space<vmem>> -> memref<1x1x128xf32, #tpu.memory_space<vmem>>
      %117 = tpu.memref_squeeze %116 : memref<1x1x128xf32, #tpu.memory_space<vmem>> -> memref<128xf32, #tpu.memory_space<vmem>>
      %118 = tpu.memref_slice %arg7[%c3_i32_123] : memref<8x!tpu.dma_semaphore, #tpu.memory_space<semaphore_mem>> -> memref<1x!tpu.dma_semaphore, #tpu.memory_space<semaphore_mem>>
      %119 = tpu.memref_squeeze %118 : memref<1x!tpu.dma_semaphore, #tpu.memory_space<semaphore_mem>> -> memref<!tpu.dma_semaphore, #tpu.memory_space<semaphore_mem>>
      tpu.enqueue_dma source(%115 : memref<128xf32, #tpu.memory_space<any>>) target(%117 : memref<128xf32, #tpu.memory_space<vmem>>) target_semaphore(%119 : memref<!tpu.dma_semaphore, #tpu.memory_space<semaphore_mem>>)
      %120 = arith.addi %1, %107 : i32
      %c1_i32_126 = arith.constant 1 : i32
      %121 = arith.addi %120, %c1_i32_126 : i32
      %122 = arith.index_cast %8 : i32 to index
      %123 = arith.index_cast %121 : i32 to index
      %124 = memref.load %arg2[%122, %123] : memref<8x128xi32, #tpu.memory_space<smem>>
      %c1_i32_127 = arith.constant 1 : i32
      %125 = arith.addi %107, %c1_i32_127 : i32
      %c3_i32_128 = arith.constant 3 : i32
      %c3_i32_129 = arith.constant 3 : i32
      %c0_i32_130 = arith.constant 0 : i32
      %126 = tpu.memref_slice %arg3[%124, %c0_i32_130] : memref<256x128xf32, #tpu.memory_space<any>> -> memref<1x128xf32, #tpu.memory_space<any>>
      %127 = tpu.memref_squeeze %126 : memref<1x128xf32, #tpu.memory_space<any>> -> memref<128xf32, #tpu.memory_space<any>>
      %c0_i32_131 = arith.constant 0 : i32
      %128 = tpu.memref_slice %arg6[%c3_i32_128, %125, %c0_i32_131] : memref<8x128x128xf32, #tpu.memory_space<vmem>> -> memref<1x1x128xf32, #tpu.memory_space<vmem>>
      %129 = tpu.memref_squeeze %128 : memref<1x1x128xf32, #tpu.memory_space<vmem>> -> memref<128xf32, #tpu.memory_space<vmem>>
      %130 = tpu.memref_slice %arg7[%c3_i32_129] : memref<8x!tpu.dma_semaphore, #tpu.memory_space<semaphore_mem>> -> memref<1x!tpu.dma_semaphore, #tpu.memory_space<semaphore_mem>>
      %131 = tpu.memref_squeeze %130 : memref<1x!tpu.dma_semaphore, #tpu.memory_space<semaphore_mem>> -> memref<!tpu.dma_semaphore, #tpu.memory_space<semaphore_mem>>
      tpu.enqueue_dma source(%127 : memref<128xf32, #tpu.memory_space<any>>) target(%129 : memref<128xf32, #tpu.memory_space<vmem>>) target_semaphore(%131 : memref<!tpu.dma_semaphore, #tpu.memory_space<semaphore_mem>>)
      %132 = arith.addi %1, %107 : i32
      %c2_i32_132 = arith.constant 2 : i32
      %133 = arith.addi %132, %c2_i32_132 : i32
      %134 = arith.index_cast %8 : i32 to index
      %135 = arith.index_cast %133 : i32 to index
      %136 = memref.load %arg2[%134, %135] : memref<8x128xi32, #tpu.memory_space<smem>>
      %c2_i32_133 = arith.constant 2 : i32
      %137 = arith.addi %107, %c2_i32_133 : i32
      %c3_i32_134 = arith.constant 3 : i32
      %c3_i32_135 = arith.constant 3 : i32
      %c0_i32_136 = arith.constant 0 : i32
      %138 = tpu.memref_slice %arg3[%136, %c0_i32_136] : memref<256x128xf32, #tpu.memory_space<any>> -> memref<1x128xf32, #tpu.memory_space<any>>
      %139 = tpu.memref_squeeze %138 : memref<1x128xf32, #tpu.memory_space<any>> -> memref<128xf32, #tpu.memory_space<any>>
      %c0_i32_137 = arith.constant 0 : i32
      %140 = tpu.memref_slice %arg6[%c3_i32_134, %137, %c0_i32_137] : memref<8x128x128xf32, #tpu.memory_space<vmem>> -> memref<1x1x128xf32, #tpu.memory_space<vmem>>
      %141 = tpu.memref_squeeze %140 : memref<1x1x128xf32, #tpu.memory_space<vmem>> -> memref<128xf32, #tpu.memory_space<vmem>>
      %142 = tpu.memref_slice %arg7[%c3_i32_135] : memref<8x!tpu.dma_semaphore, #tpu.memory_space<semaphore_mem>> -> memref<1x!tpu.dma_semaphore, #tpu.memory_space<semaphore_mem>>
      %143 = tpu.memref_squeeze %142 : memref<1x!tpu.dma_semaphore, #tpu.memory_space<semaphore_mem>> -> memref<!tpu.dma_semaphore, #tpu.memory_space<semaphore_mem>>
      tpu.enqueue_dma source(%139 : memref<128xf32, #tpu.memory_space<any>>) target(%141 : memref<128xf32, #tpu.memory_space<vmem>>) target_semaphore(%143 : memref<!tpu.dma_semaphore, #tpu.memory_space<semaphore_mem>>)
      %144 = arith.addi %1, %107 : i32
      %c3_i32_138 = arith.constant 3 : i32
      %145 = arith.addi %144, %c3_i32_138 : i32
      %146 = arith.index_cast %8 : i32 to index
      %147 = arith.index_cast %145 : i32 to index
      %148 = memref.load %arg2[%146, %147] : memref<8x128xi32, #tpu.memory_space<smem>>
      %c3_i32_139 = arith.constant 3 : i32
      %149 = arith.addi %107, %c3_i32_139 : i32
      %c3_i32_140 = arith.constant 3 : i32
      %c3_i32_141 = arith.constant 3 : i32
      %c0_i32_142 = arith.constant 0 : i32
      %150 = tpu.memref_slice %arg3[%148, %c0_i32_142] : memref<256x128xf32, #tpu.memory_space<any>> -> memref<1x128xf32, #tpu.memory_space<any>>
      %151 = tpu.memref_squeeze %150 : memref<1x128xf32, #tpu.memory_space<any>> -> memref<128xf32, #tpu.memory_space<any>>
      %c0_i32_143 = arith.constant 0 : i32
      %152 = tpu.memref_slice %arg6[%c3_i32_140, %149, %c0_i32_143] : memref<8x128x128xf32, #tpu.memory_space<vmem>> -> memref<1x1x128xf32, #tpu.memory_space<vmem>>
      %153 = tpu.memref_squeeze %152 : memref<1x1x128xf32, #tpu.memory_space<vmem>> -> memref<128xf32, #tpu.memory_space<vmem>>
      %154 = tpu.memref_slice %arg7[%c3_i32_141] : memref<8x!tpu.dma_semaphore, #tpu.memory_space<semaphore_mem>> -> memref<1x!tpu.dma_semaphore, #tpu.memory_space<semaphore_mem>>
      %155 = tpu.memref_squeeze %154 : memref<1x!tpu.dma_semaphore, #tpu.memory_space<semaphore_mem>> -> memref<!tpu.dma_semaphore, #tpu.memory_space<semaphore_mem>>
      tpu.enqueue_dma source(%151 : memref<128xf32, #tpu.memory_space<any>>) target(%153 : memref<128xf32, #tpu.memory_space<vmem>>) target_semaphore(%155 : memref<!tpu.dma_semaphore, #tpu.memory_space<semaphore_mem>>)
      %156 = arith.addi %1, %107 : i32
      %c4_i32_144 = arith.constant 4 : i32
      %157 = arith.addi %156, %c4_i32_144 : i32
      %158 = arith.index_cast %8 : i32 to index
      %159 = arith.index_cast %157 : i32 to index
      %160 = memref.load %arg2[%158, %159] : memref<8x128xi32, #tpu.memory_space<smem>>
      %c4_i32_145 = arith.constant 4 : i32
      %161 = arith.addi %107, %c4_i32_145 : i32
      %c3_i32_146 = arith.constant 3 : i32
      %c3_i32_147 = arith.constant 3 : i32
      %c0_i32_148 = arith.constant 0 : i32
      %162 = tpu.memref_slice %arg3[%160, %c0_i32_148] : memref<256x128xf32, #tpu.memory_space<any>> -> memref<1x128xf32, #tpu.memory_space<any>>
      %163 = tpu.memref_squeeze %162 : memref<1x128xf32, #tpu.memory_space<any>> -> memref<128xf32, #tpu.memory_space<any>>
      %c0_i32_149 = arith.constant 0 : i32
      %164 = tpu.memref_slice %arg6[%c3_i32_146, %161, %c0_i32_149] : memref<8x128x128xf32, #tpu.memory_space<vmem>> -> memref<1x1x128xf32, #tpu.memory_space<vmem>>
      %165 = tpu.memref_squeeze %164 : memref<1x1x128xf32, #tpu.memory_space<vmem>> -> memref<128xf32, #tpu.memory_space<vmem>>
      %166 = tpu.memref_slice %arg7[%c3_i32_147] : memref<8x!tpu.dma_semaphore, #tpu.memory_space<semaphore_mem>> -> memref<1x!tpu.dma_semaphore, #tpu.memory_space<semaphore_mem>>
      %167 = tpu.memref_squeeze %166 : memref<1x!tpu.dma_semaphore, #tpu.memory_space<semaphore_mem>> -> memref<!tpu.dma_semaphore, #tpu.memory_space<semaphore_mem>>
      tpu.enqueue_dma source(%163 : memref<128xf32, #tpu.memory_space<any>>) target(%165 : memref<128xf32, #tpu.memory_space<vmem>>) target_semaphore(%167 : memref<!tpu.dma_semaphore, #tpu.memory_space<semaphore_mem>>)
      %168 = arith.addi %1, %107 : i32
      %c5_i32_150 = arith.constant 5 : i32
      %169 = arith.addi %168, %c5_i32_150 : i32
      %170 = arith.index_cast %8 : i32 to index
      %171 = arith.index_cast %169 : i32 to index
      %172 = memref.load %arg2[%170, %171] : memref<8x128xi32, #tpu.memory_space<smem>>
      %c5_i32_151 = arith.constant 5 : i32
      %173 = arith.addi %107, %c5_i32_151 : i32
      %c3_i32_152 = arith.constant 3 : i32
      %c3_i32_153 = arith.constant 3 : i32
      %c0_i32_154 = arith.constant 0 : i32
      %174 = tpu.memref_slice %arg3[%172, %c0_i32_154] : memref<256x128xf32, #tpu.memory_space<any>> -> memref<1x128xf32, #tpu.memory_space<any>>
      %175 = tpu.memref_squeeze %174 : memref<1x128xf32, #tpu.memory_space<any>> -> memref<128xf32, #tpu.memory_space<any>>
      %c0_i32_155 = arith.constant 0 : i32
      %176 = tpu.memref_slice %arg6[%c3_i32_152, %173, %c0_i32_155] : memref<8x128x128xf32, #tpu.memory_space<vmem>> -> memref<1x1x128xf32, #tpu.memory_space<vmem>>
      %177 = tpu.memref_squeeze %176 : memref<1x1x128xf32, #tpu.memory_space<vmem>> -> memref<128xf32, #tpu.memory_space<vmem>>
      %178 = tpu.memref_slice %arg7[%c3_i32_153] : memref<8x!tpu.dma_semaphore, #tpu.memory_space<semaphore_mem>> -> memref<1x!tpu.dma_semaphore, #tpu.memory_space<semaphore_mem>>
      %179 = tpu.memref_squeeze %178 : memref<1x!tpu.dma_semaphore, #tpu.memory_space<semaphore_mem>> -> memref<!tpu.dma_semaphore, #tpu.memory_space<semaphore_mem>>
      tpu.enqueue_dma source(%175 : memref<128xf32, #tpu.memory_space<any>>) target(%177 : memref<128xf32, #tpu.memory_space<vmem>>) target_semaphore(%179 : memref<!tpu.dma_semaphore, #tpu.memory_space<semaphore_mem>>)
      %180 = arith.addi %1, %107 : i32
      %c6_i32_156 = arith.constant 6 : i32
      %181 = arith.addi %180, %c6_i32_156 : i32
      %182 = arith.index_cast %8 : i32 to index
      %183 = arith.index_cast %181 : i32 to index
      %184 = memref.load %arg2[%182, %183] : memref<8x128xi32, #tpu.memory_space<smem>>
      %c6_i32_157 = arith.constant 6 : i32
      %185 = arith.addi %107, %c6_i32_157 : i32
      %c3_i32_158 = arith.constant 3 : i32
      %c3_i32_159 = arith.constant 3 : i32
      %c0_i32_160 = arith.constant 0 : i32
      %186 = tpu.memref_slice %arg3[%184, %c0_i32_160] : memref<256x128xf32, #tpu.memory_space<any>> -> memref<1x128xf32, #tpu.memory_space<any>>
      %187 = tpu.memref_squeeze %186 : memref<1x128xf32, #tpu.memory_space<any>> -> memref<128xf32, #tpu.memory_space<any>>
      %c0_i32_161 = arith.constant 0 : i32
      %188 = tpu.memref_slice %arg6[%c3_i32_158, %185, %c0_i32_161] : memref<8x128x128xf32, #tpu.memory_space<vmem>> -> memref<1x1x128xf32, #tpu.memory_space<vmem>>
      %189 = tpu.memref_squeeze %188 : memref<1x1x128xf32, #tpu.memory_space<vmem>> -> memref<128xf32, #tpu.memory_space<vmem>>
      %190 = tpu.memref_slice %arg7[%c3_i32_159] : memref<8x!tpu.dma_semaphore, #tpu.memory_space<semaphore_mem>> -> memref<1x!tpu.dma_semaphore, #tpu.memory_space<semaphore_mem>>
      %191 = tpu.memref_squeeze %190 : memref<1x!tpu.dma_semaphore, #tpu.memory_space<semaphore_mem>> -> memref<!tpu.dma_semaphore, #tpu.memory_space<semaphore_mem>>
      tpu.enqueue_dma source(%187 : memref<128xf32, #tpu.memory_space<any>>) target(%189 : memref<128xf32, #tpu.memory_space<vmem>>) target_semaphore(%191 : memref<!tpu.dma_semaphore, #tpu.memory_space<semaphore_mem>>)
      %192 = arith.addi %1, %107 : i32
      %c7_i32_162 = arith.constant 7 : i32
      %193 = arith.addi %192, %c7_i32_162 : i32
      %194 = arith.index_cast %8 : i32 to index
      %195 = arith.index_cast %193 : i32 to index
      %196 = memref.load %arg2[%194, %195] : memref<8x128xi32, #tpu.memory_space<smem>>
      %c7_i32_163 = arith.constant 7 : i32
      %197 = arith.addi %107, %c7_i32_163 : i32
      %c3_i32_164 = arith.constant 3 : i32
      %c3_i32_165 = arith.constant 3 : i32
      %c0_i32_166 = arith.constant 0 : i32
      %198 = tpu.memref_slice %arg3[%196, %c0_i32_166] : memref<256x128xf32, #tpu.memory_space<any>> -> memref<1x128xf32, #tpu.memory_space<any>>
      %199 = tpu.memref_squeeze %198 : memref<1x128xf32, #tpu.memory_space<any>> -> memref<128xf32, #tpu.memory_space<any>>
      %c0_i32_167 = arith.constant 0 : i32
      %200 = tpu.memref_slice %arg6[%c3_i32_164, %197, %c0_i32_167] : memref<8x128x128xf32, #tpu.memory_space<vmem>> -> memref<1x1x128xf32, #tpu.memory_space<vmem>>
      %201 = tpu.memref_squeeze %200 : memref<1x1x128xf32, #tpu.memory_space<vmem>> -> memref<128xf32, #tpu.memory_space<vmem>>
      %202 = tpu.memref_slice %arg7[%c3_i32_165] : memref<8x!tpu.dma_semaphore, #tpu.memory_space<semaphore_mem>> -> memref<1x!tpu.dma_semaphore, #tpu.memory_space<semaphore_mem>>
      %203 = tpu.memref_squeeze %202 : memref<1x!tpu.dma_semaphore, #tpu.memory_space<semaphore_mem>> -> memref<!tpu.dma_semaphore, #tpu.memory_space<semaphore_mem>>
      tpu.enqueue_dma source(%199 : memref<128xf32, #tpu.memory_space<any>>) target(%201 : memref<128xf32, #tpu.memory_space<vmem>>) target_semaphore(%203 : memref<!tpu.dma_semaphore, #tpu.memory_space<semaphore_mem>>)
    }
    %c16_i32_14 = arith.constant 16 : i32
    %c4_i32 = arith.constant 4 : i32
    %10 = arith.addi %0, %c4_i32 : i32
    %c0_i32_15 = arith.constant 0 : i32
    %c16_i32_16 = arith.constant 16 : i32
    %11 = arith.addi %c0_i32_15, %c16_i32_16 : i32
    %c1_i32_17 = arith.constant 1 : i32
    scf.for %arg8 = %c0_i32_15 to %11 step %c1_i32_17  : i32 {
      %c8_i32_118 = arith.constant 8 : i32
      %106 = arith.muli %arg8, %c8_i32_118 : i32
      %c0_i32_119 = arith.constant 0 : i32
      %107 = arith.addi %c0_i32_119, %106 : i32
      %108 = arith.addi %1, %107 : i32
      %c0_i32_120 = arith.constant 0 : i32
      %109 = arith.addi %108, %c0_i32_120 : i32
      %110 = arith.index_cast %10 : i32 to index
      %111 = arith.index_cast %109 : i32 to index
      %112 = memref.load %arg2[%110, %111] : memref<8x128xi32, #tpu.memory_space<smem>>
      %c0_i32_121 = arith.constant 0 : i32
      %113 = arith.addi %107, %c0_i32_121 : i32
      %c4_i32_122 = arith.constant 4 : i32
      %c4_i32_123 = arith.constant 4 : i32
      %c0_i32_124 = arith.constant 0 : i32
      %114 = tpu.memref_slice %arg3[%112, %c0_i32_124] : memref<256x128xf32, #tpu.memory_space<any>> -> memref<1x128xf32, #tpu.memory_space<any>>
      %115 = tpu.memref_squeeze %114 : memref<1x128xf32, #tpu.memory_space<any>> -> memref<128xf32, #tpu.memory_space<any>>
      %c0_i32_125 = arith.constant 0 : i32
      %116 = tpu.memref_slice %arg6[%c4_i32_122, %113, %c0_i32_125] : memref<8x128x128xf32, #tpu.memory_space<vmem>> -> memref<1x1x128xf32, #tpu.memory_space<vmem>>
      %117 = tpu.memref_squeeze %116 : memref<1x1x128xf32, #tpu.memory_space<vmem>> -> memref<128xf32, #tpu.memory_space<vmem>>
      %118 = tpu.memref_slice %arg7[%c4_i32_123] : memref<8x!tpu.dma_semaphore, #tpu.memory_space<semaphore_mem>> -> memref<1x!tpu.dma_semaphore, #tpu.memory_space<semaphore_mem>>
      %119 = tpu.memref_squeeze %118 : memref<1x!tpu.dma_semaphore, #tpu.memory_space<semaphore_mem>> -> memref<!tpu.dma_semaphore, #tpu.memory_space<semaphore_mem>>
      tpu.enqueue_dma source(%115 : memref<128xf32, #tpu.memory_space<any>>) target(%117 : memref<128xf32, #tpu.memory_space<vmem>>) target_semaphore(%119 : memref<!tpu.dma_semaphore, #tpu.memory_space<semaphore_mem>>)
      %120 = arith.addi %1, %107 : i32
      %c1_i32_126 = arith.constant 1 : i32
      %121 = arith.addi %120, %c1_i32_126 : i32
      %122 = arith.index_cast %10 : i32 to index
      %123 = arith.index_cast %121 : i32 to index
      %124 = memref.load %arg2[%122, %123] : memref<8x128xi32, #tpu.memory_space<smem>>
      %c1_i32_127 = arith.constant 1 : i32
      %125 = arith.addi %107, %c1_i32_127 : i32
      %c4_i32_128 = arith.constant 4 : i32
      %c4_i32_129 = arith.constant 4 : i32
      %c0_i32_130 = arith.constant 0 : i32
      %126 = tpu.memref_slice %arg3[%124, %c0_i32_130] : memref<256x128xf32, #tpu.memory_space<any>> -> memref<1x128xf32, #tpu.memory_space<any>>
      %127 = tpu.memref_squeeze %126 : memref<1x128xf32, #tpu.memory_space<any>> -> memref<128xf32, #tpu.memory_space<any>>
      %c0_i32_131 = arith.constant 0 : i32
      %128 = tpu.memref_slice %arg6[%c4_i32_128, %125, %c0_i32_131] : memref<8x128x128xf32, #tpu.memory_space<vmem>> -> memref<1x1x128xf32, #tpu.memory_space<vmem>>
      %129 = tpu.memref_squeeze %128 : memref<1x1x128xf32, #tpu.memory_space<vmem>> -> memref<128xf32, #tpu.memory_space<vmem>>
      %130 = tpu.memref_slice %arg7[%c4_i32_129] : memref<8x!tpu.dma_semaphore, #tpu.memory_space<semaphore_mem>> -> memref<1x!tpu.dma_semaphore, #tpu.memory_space<semaphore_mem>>
      %131 = tpu.memref_squeeze %130 : memref<1x!tpu.dma_semaphore, #tpu.memory_space<semaphore_mem>> -> memref<!tpu.dma_semaphore, #tpu.memory_space<semaphore_mem>>
      tpu.enqueue_dma source(%127 : memref<128xf32, #tpu.memory_space<any>>) target(%129 : memref<128xf32, #tpu.memory_space<vmem>>) target_semaphore(%131 : memref<!tpu.dma_semaphore, #tpu.memory_space<semaphore_mem>>)
      %132 = arith.addi %1, %107 : i32
      %c2_i32_132 = arith.constant 2 : i32
      %133 = arith.addi %132, %c2_i32_132 : i32
      %134 = arith.index_cast %10 : i32 to index
      %135 = arith.index_cast %133 : i32 to index
      %136 = memref.load %arg2[%134, %135] : memref<8x128xi32, #tpu.memory_space<smem>>
      %c2_i32_133 = arith.constant 2 : i32
      %137 = arith.addi %107, %c2_i32_133 : i32
      %c4_i32_134 = arith.constant 4 : i32
      %c4_i32_135 = arith.constant 4 : i32
      %c0_i32_136 = arith.constant 0 : i32
      %138 = tpu.memref_slice %arg3[%136, %c0_i32_136] : memref<256x128xf32, #tpu.memory_space<any>> -> memref<1x128xf32, #tpu.memory_space<any>>
      %139 = tpu.memref_squeeze %138 : memref<1x128xf32, #tpu.memory_space<any>> -> memref<128xf32, #tpu.memory_space<any>>
      %c0_i32_137 = arith.constant 0 : i32
      %140 = tpu.memref_slice %arg6[%c4_i32_134, %137, %c0_i32_137] : memref<8x128x128xf32, #tpu.memory_space<vmem>> -> memref<1x1x128xf32, #tpu.memory_space<vmem>>
      %141 = tpu.memref_squeeze %140 : memref<1x1x128xf32, #tpu.memory_space<vmem>> -> memref<128xf32, #tpu.memory_space<vmem>>
      %142 = tpu.memref_slice %arg7[%c4_i32_135] : memref<8x!tpu.dma_semaphore, #tpu.memory_space<semaphore_mem>> -> memref<1x!tpu.dma_semaphore, #tpu.memory_space<semaphore_mem>>
      %143 = tpu.memref_squeeze %142 : memref<1x!tpu.dma_semaphore, #tpu.memory_space<semaphore_mem>> -> memref<!tpu.dma_semaphore, #tpu.memory_space<semaphore_mem>>
      tpu.enqueue_dma source(%139 : memref<128xf32, #tpu.memory_space<any>>) target(%141 : memref<128xf32, #tpu.memory_space<vmem>>) target_semaphore(%143 : memref<!tpu.dma_semaphore, #tpu.memory_space<semaphore_mem>>)
      %144 = arith.addi %1, %107 : i32
      %c3_i32_138 = arith.constant 3 : i32
      %145 = arith.addi %144, %c3_i32_138 : i32
      %146 = arith.index_cast %10 : i32 to index
      %147 = arith.index_cast %145 : i32 to index
      %148 = memref.load %arg2[%146, %147] : memref<8x128xi32, #tpu.memory_space<smem>>
      %c3_i32_139 = arith.constant 3 : i32
      %149 = arith.addi %107, %c3_i32_139 : i32
      %c4_i32_140 = arith.constant 4 : i32
      %c4_i32_141 = arith.constant 4 : i32
      %c0_i32_142 = arith.constant 0 : i32
      %150 = tpu.memref_slice %arg3[%148, %c0_i32_142] : memref<256x128xf32, #tpu.memory_space<any>> -> memref<1x128xf32, #tpu.memory_space<any>>
      %151 = tpu.memref_squeeze %150 : memref<1x128xf32, #tpu.memory_space<any>> -> memref<128xf32, #tpu.memory_space<any>>
      %c0_i32_143 = arith.constant 0 : i32
      %152 = tpu.memref_slice %arg6[%c4_i32_140, %149, %c0_i32_143] : memref<8x128x128xf32, #tpu.memory_space<vmem>> -> memref<1x1x128xf32, #tpu.memory_space<vmem>>
      %153 = tpu.memref_squeeze %152 : memref<1x1x128xf32, #tpu.memory_space<vmem>> -> memref<128xf32, #tpu.memory_space<vmem>>
      %154 = tpu.memref_slice %arg7[%c4_i32_141] : memref<8x!tpu.dma_semaphore, #tpu.memory_space<semaphore_mem>> -> memref<1x!tpu.dma_semaphore, #tpu.memory_space<semaphore_mem>>
      %155 = tpu.memref_squeeze %154 : memref<1x!tpu.dma_semaphore, #tpu.memory_space<semaphore_mem>> -> memref<!tpu.dma_semaphore, #tpu.memory_space<semaphore_mem>>
      tpu.enqueue_dma source(%151 : memref<128xf32, #tpu.memory_space<any>>) target(%153 : memref<128xf32, #tpu.memory_space<vmem>>) target_semaphore(%155 : memref<!tpu.dma_semaphore, #tpu.memory_space<semaphore_mem>>)
      %156 = arith.addi %1, %107 : i32
      %c4_i32_144 = arith.constant 4 : i32
      %157 = arith.addi %156, %c4_i32_144 : i32
      %158 = arith.index_cast %10 : i32 to index
      %159 = arith.index_cast %157 : i32 to index
      %160 = memref.load %arg2[%158, %159] : memref<8x128xi32, #tpu.memory_space<smem>>
      %c4_i32_145 = arith.constant 4 : i32
      %161 = arith.addi %107, %c4_i32_145 : i32
      %c4_i32_146 = arith.constant 4 : i32
      %c4_i32_147 = arith.constant 4 : i32
      %c0_i32_148 = arith.constant 0 : i32
      %162 = tpu.memref_slice %arg3[%160, %c0_i32_148] : memref<256x128xf32, #tpu.memory_space<any>> -> memref<1x128xf32, #tpu.memory_space<any>>
      %163 = tpu.memref_squeeze %162 : memref<1x128xf32, #tpu.memory_space<any>> -> memref<128xf32, #tpu.memory_space<any>>
      %c0_i32_149 = arith.constant 0 : i32
      %164 = tpu.memref_slice %arg6[%c4_i32_146, %161, %c0_i32_149] : memref<8x128x128xf32, #tpu.memory_space<vmem>> -> memref<1x1x128xf32, #tpu.memory_space<vmem>>
      %165 = tpu.memref_squeeze %164 : memref<1x1x128xf32, #tpu.memory_space<vmem>> -> memref<128xf32, #tpu.memory_space<vmem>>
      %166 = tpu.memref_slice %arg7[%c4_i32_147] : memref<8x!tpu.dma_semaphore, #tpu.memory_space<semaphore_mem>> -> memref<1x!tpu.dma_semaphore, #tpu.memory_space<semaphore_mem>>
      %167 = tpu.memref_squeeze %166 : memref<1x!tpu.dma_semaphore, #tpu.memory_space<semaphore_mem>> -> memref<!tpu.dma_semaphore, #tpu.memory_space<semaphore_mem>>
      tpu.enqueue_dma source(%163 : memref<128xf32, #tpu.memory_space<any>>) target(%165 : memref<128xf32, #tpu.memory_space<vmem>>) target_semaphore(%167 : memref<!tpu.dma_semaphore, #tpu.memory_space<semaphore_mem>>)
      %168 = arith.addi %1, %107 : i32
      %c5_i32_150 = arith.constant 5 : i32
      %169 = arith.addi %168, %c5_i32_150 : i32
      %170 = arith.index_cast %10 : i32 to index
      %171 = arith.index_cast %169 : i32 to index
      %172 = memref.load %arg2[%170, %171] : memref<8x128xi32, #tpu.memory_space<smem>>
      %c5_i32_151 = arith.constant 5 : i32
      %173 = arith.addi %107, %c5_i32_151 : i32
      %c4_i32_152 = arith.constant 4 : i32
      %c4_i32_153 = arith.constant 4 : i32
      %c0_i32_154 = arith.constant 0 : i32
      %174 = tpu.memref_slice %arg3[%172, %c0_i32_154] : memref<256x128xf32, #tpu.memory_space<any>> -> memref<1x128xf32, #tpu.memory_space<any>>
      %175 = tpu.memref_squeeze %174 : memref<1x128xf32, #tpu.memory_space<any>> -> memref<128xf32, #tpu.memory_space<any>>
      %c0_i32_155 = arith.constant 0 : i32
      %176 = tpu.memref_slice %arg6[%c4_i32_152, %173, %c0_i32_155] : memref<8x128x128xf32, #tpu.memory_space<vmem>> -> memref<1x1x128xf32, #tpu.memory_space<vmem>>
      %177 = tpu.memref_squeeze %176 : memref<1x1x128xf32, #tpu.memory_space<vmem>> -> memref<128xf32, #tpu.memory_space<vmem>>
      %178 = tpu.memref_slice %arg7[%c4_i32_153] : memref<8x!tpu.dma_semaphore, #tpu.memory_space<semaphore_mem>> -> memref<1x!tpu.dma_semaphore, #tpu.memory_space<semaphore_mem>>
      %179 = tpu.memref_squeeze %178 : memref<1x!tpu.dma_semaphore, #tpu.memory_space<semaphore_mem>> -> memref<!tpu.dma_semaphore, #tpu.memory_space<semaphore_mem>>
      tpu.enqueue_dma source(%175 : memref<128xf32, #tpu.memory_space<any>>) target(%177 : memref<128xf32, #tpu.memory_space<vmem>>) target_semaphore(%179 : memref<!tpu.dma_semaphore, #tpu.memory_space<semaphore_mem>>)
      %180 = arith.addi %1, %107 : i32
      %c6_i32_156 = arith.constant 6 : i32
      %181 = arith.addi %180, %c6_i32_156 : i32
      %182 = arith.index_cast %10 : i32 to index
      %183 = arith.index_cast %181 : i32 to index
      %184 = memref.load %arg2[%182, %183] : memref<8x128xi32, #tpu.memory_space<smem>>
      %c6_i32_157 = arith.constant 6 : i32
      %185 = arith.addi %107, %c6_i32_157 : i32
      %c4_i32_158 = arith.constant 4 : i32
      %c4_i32_159 = arith.constant 4 : i32
      %c0_i32_160 = arith.constant 0 : i32
      %186 = tpu.memref_slice %arg3[%184, %c0_i32_160] : memref<256x128xf32, #tpu.memory_space<any>> -> memref<1x128xf32, #tpu.memory_space<any>>
      %187 = tpu.memref_squeeze %186 : memref<1x128xf32, #tpu.memory_space<any>> -> memref<128xf32, #tpu.memory_space<any>>
      %c0_i32_161 = arith.constant 0 : i32
      %188 = tpu.memref_slice %arg6[%c4_i32_158, %185, %c0_i32_161] : memref<8x128x128xf32, #tpu.memory_space<vmem>> -> memref<1x1x128xf32, #tpu.memory_space<vmem>>
      %189 = tpu.memref_squeeze %188 : memref<1x1x128xf32, #tpu.memory_space<vmem>> -> memref<128xf32, #tpu.memory_space<vmem>>
      %190 = tpu.memref_slice %arg7[%c4_i32_159] : memref<8x!tpu.dma_semaphore, #tpu.memory_space<semaphore_mem>> -> memref<1x!tpu.dma_semaphore, #tpu.memory_space<semaphore_mem>>
      %191 = tpu.memref_squeeze %190 : memref<1x!tpu.dma_semaphore, #tpu.memory_space<semaphore_mem>> -> memref<!tpu.dma_semaphore, #tpu.memory_space<semaphore_mem>>
      tpu.enqueue_dma source(%187 : memref<128xf32, #tpu.memory_space<any>>) target(%189 : memref<128xf32, #tpu.memory_space<vmem>>) target_semaphore(%191 : memref<!tpu.dma_semaphore, #tpu.memory_space<semaphore_mem>>)
      %192 = arith.addi %1, %107 : i32
      %c7_i32_162 = arith.constant 7 : i32
      %193 = arith.addi %192, %c7_i32_162 : i32
      %194 = arith.index_cast %10 : i32 to index
      %195 = arith.index_cast %193 : i32 to index
      %196 = memref.load %arg2[%194, %195] : memref<8x128xi32, #tpu.memory_space<smem>>
      %c7_i32_163 = arith.constant 7 : i32
      %197 = arith.addi %107, %c7_i32_163 : i32
      %c4_i32_164 = arith.constant 4 : i32
      %c4_i32_165 = arith.constant 4 : i32
      %c0_i32_166 = arith.constant 0 : i32
      %198 = tpu.memref_slice %arg3[%196, %c0_i32_166] : memref<256x128xf32, #tpu.memory_space<any>> -> memref<1x128xf32, #tpu.memory_space<any>>
      %199 = tpu.memref_squeeze %198 : memref<1x128xf32, #tpu.memory_space<any>> -> memref<128xf32, #tpu.memory_space<any>>
      %c0_i32_167 = arith.constant 0 : i32
      %200 = tpu.memref_slice %arg6[%c4_i32_164, %197, %c0_i32_167] : memref<8x128x128xf32, #tpu.memory_space<vmem>> -> memref<1x1x128xf32, #tpu.memory_space<vmem>>
      %201 = tpu.memref_squeeze %200 : memref<1x1x128xf32, #tpu.memory_space<vmem>> -> memref<128xf32, #tpu.memory_space<vmem>>
      %202 = tpu.memref_slice %arg7[%c4_i32_165] : memref<8x!tpu.dma_semaphore, #tpu.memory_space<semaphore_mem>> -> memref<1x!tpu.dma_semaphore, #tpu.memory_space<semaphore_mem>>
      %203 = tpu.memref_squeeze %202 : memref<1x!tpu.dma_semaphore, #tpu.memory_space<semaphore_mem>> -> memref<!tpu.dma_semaphore, #tpu.memory_space<semaphore_mem>>
      tpu.enqueue_dma source(%199 : memref<128xf32, #tpu.memory_space<any>>) target(%201 : memref<128xf32, #tpu.memory_space<vmem>>) target_semaphore(%203 : memref<!tpu.dma_semaphore, #tpu.memory_space<semaphore_mem>>)
    }
    %c16_i32_18 = arith.constant 16 : i32
    %c5_i32 = arith.constant 5 : i32
    %12 = arith.addi %0, %c5_i32 : i32
    %c0_i32_19 = arith.constant 0 : i32
    %c16_i32_20 = arith.constant 16 : i32
    %13 = arith.addi %c0_i32_19, %c16_i32_20 : i32
    %c1_i32_21 = arith.constant 1 : i32
    scf.for %arg8 = %c0_i32_19 to %13 step %c1_i32_21  : i32 {
      %c8_i32_118 = arith.constant 8 : i32
      %106 = arith.muli %arg8, %c8_i32_118 : i32
      %c0_i32_119 = arith.constant 0 : i32
      %107 = arith.addi %c0_i32_119, %106 : i32
      %108 = arith.addi %1, %107 : i32
      %c0_i32_120 = arith.constant 0 : i32
      %109 = arith.addi %108, %c0_i32_120 : i32
      %110 = arith.index_cast %12 : i32 to index
      %111 = arith.index_cast %109 : i32 to index
      %112 = memref.load %arg2[%110, %111] : memref<8x128xi32, #tpu.memory_space<smem>>
      %c0_i32_121 = arith.constant 0 : i32
      %113 = arith.addi %107, %c0_i32_121 : i32
      %c5_i32_122 = arith.constant 5 : i32
      %c5_i32_123 = arith.constant 5 : i32
      %c0_i32_124 = arith.constant 0 : i32
      %114 = tpu.memref_slice %arg3[%112, %c0_i32_124] : memref<256x128xf32, #tpu.memory_space<any>> -> memref<1x128xf32, #tpu.memory_space<any>>
      %115 = tpu.memref_squeeze %114 : memref<1x128xf32, #tpu.memory_space<any>> -> memref<128xf32, #tpu.memory_space<any>>
      %c0_i32_125 = arith.constant 0 : i32
      %116 = tpu.memref_slice %arg6[%c5_i32_122, %113, %c0_i32_125] : memref<8x128x128xf32, #tpu.memory_space<vmem>> -> memref<1x1x128xf32, #tpu.memory_space<vmem>>
      %117 = tpu.memref_squeeze %116 : memref<1x1x128xf32, #tpu.memory_space<vmem>> -> memref<128xf32, #tpu.memory_space<vmem>>
      %118 = tpu.memref_slice %arg7[%c5_i32_123] : memref<8x!tpu.dma_semaphore, #tpu.memory_space<semaphore_mem>> -> memref<1x!tpu.dma_semaphore, #tpu.memory_space<semaphore_mem>>
      %119 = tpu.memref_squeeze %118 : memref<1x!tpu.dma_semaphore, #tpu.memory_space<semaphore_mem>> -> memref<!tpu.dma_semaphore, #tpu.memory_space<semaphore_mem>>
      tpu.enqueue_dma source(%115 : memref<128xf32, #tpu.memory_space<any>>) target(%117 : memref<128xf32, #tpu.memory_space<vmem>>) target_semaphore(%119 : memref<!tpu.dma_semaphore, #tpu.memory_space<semaphore_mem>>)
      %120 = arith.addi %1, %107 : i32
      %c1_i32_126 = arith.constant 1 : i32
      %121 = arith.addi %120, %c1_i32_126 : i32
      %122 = arith.index_cast %12 : i32 to index
      %123 = arith.index_cast %121 : i32 to index
      %124 = memref.load %arg2[%122, %123] : memref<8x128xi32, #tpu.memory_space<smem>>
      %c1_i32_127 = arith.constant 1 : i32
      %125 = arith.addi %107, %c1_i32_127 : i32
      %c5_i32_128 = arith.constant 5 : i32
      %c5_i32_129 = arith.constant 5 : i32
      %c0_i32_130 = arith.constant 0 : i32
      %126 = tpu.memref_slice %arg3[%124, %c0_i32_130] : memref<256x128xf32, #tpu.memory_space<any>> -> memref<1x128xf32, #tpu.memory_space<any>>
      %127 = tpu.memref_squeeze %126 : memref<1x128xf32, #tpu.memory_space<any>> -> memref<128xf32, #tpu.memory_space<any>>
      %c0_i32_131 = arith.constant 0 : i32
      %128 = tpu.memref_slice %arg6[%c5_i32_128, %125, %c0_i32_131] : memref<8x128x128xf32, #tpu.memory_space<vmem>> -> memref<1x1x128xf32, #tpu.memory_space<vmem>>
      %129 = tpu.memref_squeeze %128 : memref<1x1x128xf32, #tpu.memory_space<vmem>> -> memref<128xf32, #tpu.memory_space<vmem>>
      %130 = tpu.memref_slice %arg7[%c5_i32_129] : memref<8x!tpu.dma_semaphore, #tpu.memory_space<semaphore_mem>> -> memref<1x!tpu.dma_semaphore, #tpu.memory_space<semaphore_mem>>
      %131 = tpu.memref_squeeze %130 : memref<1x!tpu.dma_semaphore, #tpu.memory_space<semaphore_mem>> -> memref<!tpu.dma_semaphore, #tpu.memory_space<semaphore_mem>>
      tpu.enqueue_dma source(%127 : memref<128xf32, #tpu.memory_space<any>>) target(%129 : memref<128xf32, #tpu.memory_space<vmem>>) target_semaphore(%131 : memref<!tpu.dma_semaphore, #tpu.memory_space<semaphore_mem>>)
      %132 = arith.addi %1, %107 : i32
      %c2_i32_132 = arith.constant 2 : i32
      %133 = arith.addi %132, %c2_i32_132 : i32
      %134 = arith.index_cast %12 : i32 to index
      %135 = arith.index_cast %133 : i32 to index
      %136 = memref.load %arg2[%134, %135] : memref<8x128xi32, #tpu.memory_space<smem>>
      %c2_i32_133 = arith.constant 2 : i32
      %137 = arith.addi %107, %c2_i32_133 : i32
      %c5_i32_134 = arith.constant 5 : i32
      %c5_i32_135 = arith.constant 5 : i32
      %c0_i32_136 = arith.constant 0 : i32
      %138 = tpu.memref_slice %arg3[%136, %c0_i32_136] : memref<256x128xf32, #tpu.memory_space<any>> -> memref<1x128xf32, #tpu.memory_space<any>>
      %139 = tpu.memref_squeeze %138 : memref<1x128xf32, #tpu.memory_space<any>> -> memref<128xf32, #tpu.memory_space<any>>
      %c0_i32_137 = arith.constant 0 : i32
      %140 = tpu.memref_slice %arg6[%c5_i32_134, %137, %c0_i32_137] : memref<8x128x128xf32, #tpu.memory_space<vmem>> -> memref<1x1x128xf32, #tpu.memory_space<vmem>>
      %141 = tpu.memref_squeeze %140 : memref<1x1x128xf32, #tpu.memory_space<vmem>> -> memref<128xf32, #tpu.memory_space<vmem>>
      %142 = tpu.memref_slice %arg7[%c5_i32_135] : memref<8x!tpu.dma_semaphore, #tpu.memory_space<semaphore_mem>> -> memref<1x!tpu.dma_semaphore, #tpu.memory_space<semaphore_mem>>
      %143 = tpu.memref_squeeze %142 : memref<1x!tpu.dma_semaphore, #tpu.memory_space<semaphore_mem>> -> memref<!tpu.dma_semaphore, #tpu.memory_space<semaphore_mem>>
      tpu.enqueue_dma source(%139 : memref<128xf32, #tpu.memory_space<any>>) target(%141 : memref<128xf32, #tpu.memory_space<vmem>>) target_semaphore(%143 : memref<!tpu.dma_semaphore, #tpu.memory_space<semaphore_mem>>)
      %144 = arith.addi %1, %107 : i32
      %c3_i32_138 = arith.constant 3 : i32
      %145 = arith.addi %144, %c3_i32_138 : i32
      %146 = arith.index_cast %12 : i32 to index
      %147 = arith.index_cast %145 : i32 to index
      %148 = memref.load %arg2[%146, %147] : memref<8x128xi32, #tpu.memory_space<smem>>
      %c3_i32_139 = arith.constant 3 : i32
      %149 = arith.addi %107, %c3_i32_139 : i32
      %c5_i32_140 = arith.constant 5 : i32
      %c5_i32_141 = arith.constant 5 : i32
      %c0_i32_142 = arith.constant 0 : i32
      %150 = tpu.memref_slice %arg3[%148, %c0_i32_142] : memref<256x128xf32, #tpu.memory_space<any>> -> memref<1x128xf32, #tpu.memory_space<any>>
      %151 = tpu.memref_squeeze %150 : memref<1x128xf32, #tpu.memory_space<any>> -> memref<128xf32, #tpu.memory_space<any>>
      %c0_i32_143 = arith.constant 0 : i32
      %152 = tpu.memref_slice %arg6[%c5_i32_140, %149, %c0_i32_143] : memref<8x128x128xf32, #tpu.memory_space<vmem>> -> memref<1x1x128xf32, #tpu.memory_space<vmem>>
      %153 = tpu.memref_squeeze %152 : memref<1x1x128xf32, #tpu.memory_space<vmem>> -> memref<128xf32, #tpu.memory_space<vmem>>
      %154 = tpu.memref_slice %arg7[%c5_i32_141] : memref<8x!tpu.dma_semaphore, #tpu.memory_space<semaphore_mem>> -> memref<1x!tpu.dma_semaphore, #tpu.memory_space<semaphore_mem>>
      %155 = tpu.memref_squeeze %154 : memref<1x!tpu.dma_semaphore, #tpu.memory_space<semaphore_mem>> -> memref<!tpu.dma_semaphore, #tpu.memory_space<semaphore_mem>>
      tpu.enqueue_dma source(%151 : memref<128xf32, #tpu.memory_space<any>>) target(%153 : memref<128xf32, #tpu.memory_space<vmem>>) target_semaphore(%155 : memref<!tpu.dma_semaphore, #tpu.memory_space<semaphore_mem>>)
      %156 = arith.addi %1, %107 : i32
      %c4_i32_144 = arith.constant 4 : i32
      %157 = arith.addi %156, %c4_i32_144 : i32
      %158 = arith.index_cast %12 : i32 to index
      %159 = arith.index_cast %157 : i32 to index
      %160 = memref.load %arg2[%158, %159] : memref<8x128xi32, #tpu.memory_space<smem>>
      %c4_i32_145 = arith.constant 4 : i32
      %161 = arith.addi %107, %c4_i32_145 : i32
      %c5_i32_146 = arith.constant 5 : i32
      %c5_i32_147 = arith.constant 5 : i32
      %c0_i32_148 = arith.constant 0 : i32
      %162 = tpu.memref_slice %arg3[%160, %c0_i32_148] : memref<256x128xf32, #tpu.memory_space<any>> -> memref<1x128xf32, #tpu.memory_space<any>>
      %163 = tpu.memref_squeeze %162 : memref<1x128xf32, #tpu.memory_space<any>> -> memref<128xf32, #tpu.memory_space<any>>
      %c0_i32_149 = arith.constant 0 : i32
      %164 = tpu.memref_slice %arg6[%c5_i32_146, %161, %c0_i32_149] : memref<8x128x128xf32, #tpu.memory_space<vmem>> -> memref<1x1x128xf32, #tpu.memory_space<vmem>>
      %165 = tpu.memref_squeeze %164 : memref<1x1x128xf32, #tpu.memory_space<vmem>> -> memref<128xf32, #tpu.memory_space<vmem>>
      %166 = tpu.memref_slice %arg7[%c5_i32_147] : memref<8x!tpu.dma_semaphore, #tpu.memory_space<semaphore_mem>> -> memref<1x!tpu.dma_semaphore, #tpu.memory_space<semaphore_mem>>
      %167 = tpu.memref_squeeze %166 : memref<1x!tpu.dma_semaphore, #tpu.memory_space<semaphore_mem>> -> memref<!tpu.dma_semaphore, #tpu.memory_space<semaphore_mem>>
      tpu.enqueue_dma source(%163 : memref<128xf32, #tpu.memory_space<any>>) target(%165 : memref<128xf32, #tpu.memory_space<vmem>>) target_semaphore(%167 : memref<!tpu.dma_semaphore, #tpu.memory_space<semaphore_mem>>)
      %168 = arith.addi %1, %107 : i32
      %c5_i32_150 = arith.constant 5 : i32
      %169 = arith.addi %168, %c5_i32_150 : i32
      %170 = arith.index_cast %12 : i32 to index
      %171 = arith.index_cast %169 : i32 to index
      %172 = memref.load %arg2[%170, %171] : memref<8x128xi32, #tpu.memory_space<smem>>
      %c5_i32_151 = arith.constant 5 : i32
      %173 = arith.addi %107, %c5_i32_151 : i32
      %c5_i32_152 = arith.constant 5 : i32
      %c5_i32_153 = arith.constant 5 : i32
      %c0_i32_154 = arith.constant 0 : i32
      %174 = tpu.memref_slice %arg3[%172, %c0_i32_154] : memref<256x128xf32, #tpu.memory_space<any>> -> memref<1x128xf32, #tpu.memory_space<any>>
      %175 = tpu.memref_squeeze %174 : memref<1x128xf32, #tpu.memory_space<any>> -> memref<128xf32, #tpu.memory_space<any>>
      %c0_i32_155 = arith.constant 0 : i32
      %176 = tpu.memref_slice %arg6[%c5_i32_152, %173, %c0_i32_155] : memref<8x128x128xf32, #tpu.memory_space<vmem>> -> memref<1x1x128xf32, #tpu.memory_space<vmem>>
      %177 = tpu.memref_squeeze %176 : memref<1x1x128xf32, #tpu.memory_space<vmem>> -> memref<128xf32, #tpu.memory_space<vmem>>
      %178 = tpu.memref_slice %arg7[%c5_i32_153] : memref<8x!tpu.dma_semaphore, #tpu.memory_space<semaphore_mem>> -> memref<1x!tpu.dma_semaphore, #tpu.memory_space<semaphore_mem>>
      %179 = tpu.memref_squeeze %178 : memref<1x!tpu.dma_semaphore, #tpu.memory_space<semaphore_mem>> -> memref<!tpu.dma_semaphore, #tpu.memory_space<semaphore_mem>>
      tpu.enqueue_dma source(%175 : memref<128xf32, #tpu.memory_space<any>>) target(%177 : memref<128xf32, #tpu.memory_space<vmem>>) target_semaphore(%179 : memref<!tpu.dma_semaphore, #tpu.memory_space<semaphore_mem>>)
      %180 = arith.addi %1, %107 : i32
      %c6_i32_156 = arith.constant 6 : i32
      %181 = arith.addi %180, %c6_i32_156 : i32
      %182 = arith.index_cast %12 : i32 to index
      %183 = arith.index_cast %181 : i32 to index
      %184 = memref.load %arg2[%182, %183] : memref<8x128xi32, #tpu.memory_space<smem>>
      %c6_i32_157 = arith.constant 6 : i32
      %185 = arith.addi %107, %c6_i32_157 : i32
      %c5_i32_158 = arith.constant 5 : i32
      %c5_i32_159 = arith.constant 5 : i32
      %c0_i32_160 = arith.constant 0 : i32
      %186 = tpu.memref_slice %arg3[%184, %c0_i32_160] : memref<256x128xf32, #tpu.memory_space<any>> -> memref<1x128xf32, #tpu.memory_space<any>>
      %187 = tpu.memref_squeeze %186 : memref<1x128xf32, #tpu.memory_space<any>> -> memref<128xf32, #tpu.memory_space<any>>
      %c0_i32_161 = arith.constant 0 : i32
      %188 = tpu.memref_slice %arg6[%c5_i32_158, %185, %c0_i32_161] : memref<8x128x128xf32, #tpu.memory_space<vmem>> -> memref<1x1x128xf32, #tpu.memory_space<vmem>>
      %189 = tpu.memref_squeeze %188 : memref<1x1x128xf32, #tpu.memory_space<vmem>> -> memref<128xf32, #tpu.memory_space<vmem>>
      %190 = tpu.memref_slice %arg7[%c5_i32_159] : memref<8x!tpu.dma_semaphore, #tpu.memory_space<semaphore_mem>> -> memref<1x!tpu.dma_semaphore, #tpu.memory_space<semaphore_mem>>
      %191 = tpu.memref_squeeze %190 : memref<1x!tpu.dma_semaphore, #tpu.memory_space<semaphore_mem>> -> memref<!tpu.dma_semaphore, #tpu.memory_space<semaphore_mem>>
      tpu.enqueue_dma source(%187 : memref<128xf32, #tpu.memory_space<any>>) target(%189 : memref<128xf32, #tpu.memory_space<vmem>>) target_semaphore(%191 : memref<!tpu.dma_semaphore, #tpu.memory_space<semaphore_mem>>)
      %192 = arith.addi %1, %107 : i32
      %c7_i32_162 = arith.constant 7 : i32
      %193 = arith.addi %192, %c7_i32_162 : i32
      %194 = arith.index_cast %12 : i32 to index
      %195 = arith.index_cast %193 : i32 to index
      %196 = memref.load %arg2[%194, %195] : memref<8x128xi32, #tpu.memory_space<smem>>
      %c7_i32_163 = arith.constant 7 : i32
      %197 = arith.addi %107, %c7_i32_163 : i32
      %c5_i32_164 = arith.constant 5 : i32
      %c5_i32_165 = arith.constant 5 : i32
      %c0_i32_166 = arith.constant 0 : i32
      %198 = tpu.memref_slice %arg3[%196, %c0_i32_166] : memref<256x128xf32, #tpu.memory_space<any>> -> memref<1x128xf32, #tpu.memory_space<any>>
      %199 = tpu.memref_squeeze %198 : memref<1x128xf32, #tpu.memory_space<any>> -> memref<128xf32, #tpu.memory_space<any>>
      %c0_i32_167 = arith.constant 0 : i32
      %200 = tpu.memref_slice %arg6[%c5_i32_164, %197, %c0_i32_167] : memref<8x128x128xf32, #tpu.memory_space<vmem>> -> memref<1x1x128xf32, #tpu.memory_space<vmem>>
      %201 = tpu.memref_squeeze %200 : memref<1x1x128xf32, #tpu.memory_space<vmem>> -> memref<128xf32, #tpu.memory_space<vmem>>
      %202 = tpu.memref_slice %arg7[%c5_i32_165] : memref<8x!tpu.dma_semaphore, #tpu.memory_space<semaphore_mem>> -> memref<1x!tpu.dma_semaphore, #tpu.memory_space<semaphore_mem>>
      %203 = tpu.memref_squeeze %202 : memref<1x!tpu.dma_semaphore, #tpu.memory_space<semaphore_mem>> -> memref<!tpu.dma_semaphore, #tpu.memory_space<semaphore_mem>>
      tpu.enqueue_dma source(%199 : memref<128xf32, #tpu.memory_space<any>>) target(%201 : memref<128xf32, #tpu.memory_space<vmem>>) target_semaphore(%203 : memref<!tpu.dma_semaphore, #tpu.memory_space<semaphore_mem>>)
    }
    %c16_i32_22 = arith.constant 16 : i32
    %c6_i32 = arith.constant 6 : i32
    %14 = arith.addi %0, %c6_i32 : i32
    %c0_i32_23 = arith.constant 0 : i32
    %c16_i32_24 = arith.constant 16 : i32
    %15 = arith.addi %c0_i32_23, %c16_i32_24 : i32
    %c1_i32_25 = arith.constant 1 : i32
    scf.for %arg8 = %c0_i32_23 to %15 step %c1_i32_25  : i32 {
      %c8_i32_118 = arith.constant 8 : i32
      %106 = arith.muli %arg8, %c8_i32_118 : i32
      %c0_i32_119 = arith.constant 0 : i32
      %107 = arith.addi %c0_i32_119, %106 : i32
      %108 = arith.addi %1, %107 : i32
      %c0_i32_120 = arith.constant 0 : i32
      %109 = arith.addi %108, %c0_i32_120 : i32
      %110 = arith.index_cast %14 : i32 to index
      %111 = arith.index_cast %109 : i32 to index
      %112 = memref.load %arg2[%110, %111] : memref<8x128xi32, #tpu.memory_space<smem>>
      %c0_i32_121 = arith.constant 0 : i32
      %113 = arith.addi %107, %c0_i32_121 : i32
      %c6_i32_122 = arith.constant 6 : i32
      %c6_i32_123 = arith.constant 6 : i32
      %c0_i32_124 = arith.constant 0 : i32
      %114 = tpu.memref_slice %arg3[%112, %c0_i32_124] : memref<256x128xf32, #tpu.memory_space<any>> -> memref<1x128xf32, #tpu.memory_space<any>>
      %115 = tpu.memref_squeeze %114 : memref<1x128xf32, #tpu.memory_space<any>> -> memref<128xf32, #tpu.memory_space<any>>
      %c0_i32_125 = arith.constant 0 : i32
      %116 = tpu.memref_slice %arg6[%c6_i32_122, %113, %c0_i32_125] : memref<8x128x128xf32, #tpu.memory_space<vmem>> -> memref<1x1x128xf32, #tpu.memory_space<vmem>>
      %117 = tpu.memref_squeeze %116 : memref<1x1x128xf32, #tpu.memory_space<vmem>> -> memref<128xf32, #tpu.memory_space<vmem>>
      %118 = tpu.memref_slice %arg7[%c6_i32_123] : memref<8x!tpu.dma_semaphore, #tpu.memory_space<semaphore_mem>> -> memref<1x!tpu.dma_semaphore, #tpu.memory_space<semaphore_mem>>
      %119 = tpu.memref_squeeze %118 : memref<1x!tpu.dma_semaphore, #tpu.memory_space<semaphore_mem>> -> memref<!tpu.dma_semaphore, #tpu.memory_space<semaphore_mem>>
      tpu.enqueue_dma source(%115 : memref<128xf32, #tpu.memory_space<any>>) target(%117 : memref<128xf32, #tpu.memory_space<vmem>>) target_semaphore(%119 : memref<!tpu.dma_semaphore, #tpu.memory_space<semaphore_mem>>)
      %120 = arith.addi %1, %107 : i32
      %c1_i32_126 = arith.constant 1 : i32
      %121 = arith.addi %120, %c1_i32_126 : i32
      %122 = arith.index_cast %14 : i32 to index
      %123 = arith.index_cast %121 : i32 to index
      %124 = memref.load %arg2[%122, %123] : memref<8x128xi32, #tpu.memory_space<smem>>
      %c1_i32_127 = arith.constant 1 : i32
      %125 = arith.addi %107, %c1_i32_127 : i32
      %c6_i32_128 = arith.constant 6 : i32
      %c6_i32_129 = arith.constant 6 : i32
      %c0_i32_130 = arith.constant 0 : i32
      %126 = tpu.memref_slice %arg3[%124, %c0_i32_130] : memref<256x128xf32, #tpu.memory_space<any>> -> memref<1x128xf32, #tpu.memory_space<any>>
      %127 = tpu.memref_squeeze %126 : memref<1x128xf32, #tpu.memory_space<any>> -> memref<128xf32, #tpu.memory_space<any>>
      %c0_i32_131 = arith.constant 0 : i32
      %128 = tpu.memref_slice %arg6[%c6_i32_128, %125, %c0_i32_131] : memref<8x128x128xf32, #tpu.memory_space<vmem>> -> memref<1x1x128xf32, #tpu.memory_space<vmem>>
      %129 = tpu.memref_squeeze %128 : memref<1x1x128xf32, #tpu.memory_space<vmem>> -> memref<128xf32, #tpu.memory_space<vmem>>
      %130 = tpu.memref_slice %arg7[%c6_i32_129] : memref<8x!tpu.dma_semaphore, #tpu.memory_space<semaphore_mem>> -> memref<1x!tpu.dma_semaphore, #tpu.memory_space<semaphore_mem>>
      %131 = tpu.memref_squeeze %130 : memref<1x!tpu.dma_semaphore, #tpu.memory_space<semaphore_mem>> -> memref<!tpu.dma_semaphore, #tpu.memory_space<semaphore_mem>>
      tpu.enqueue_dma source(%127 : memref<128xf32, #tpu.memory_space<any>>) target(%129 : memref<128xf32, #tpu.memory_space<vmem>>) target_semaphore(%131 : memref<!tpu.dma_semaphore, #tpu.memory_space<semaphore_mem>>)
      %132 = arith.addi %1, %107 : i32
      %c2_i32_132 = arith.constant 2 : i32
      %133 = arith.addi %132, %c2_i32_132 : i32
      %134 = arith.index_cast %14 : i32 to index
      %135 = arith.index_cast %133 : i32 to index
      %136 = memref.load %arg2[%134, %135] : memref<8x128xi32, #tpu.memory_space<smem>>
      %c2_i32_133 = arith.constant 2 : i32
      %137 = arith.addi %107, %c2_i32_133 : i32
      %c6_i32_134 = arith.constant 6 : i32
      %c6_i32_135 = arith.constant 6 : i32
      %c0_i32_136 = arith.constant 0 : i32
      %138 = tpu.memref_slice %arg3[%136, %c0_i32_136] : memref<256x128xf32, #tpu.memory_space<any>> -> memref<1x128xf32, #tpu.memory_space<any>>
      %139 = tpu.memref_squeeze %138 : memref<1x128xf32, #tpu.memory_space<any>> -> memref<128xf32, #tpu.memory_space<any>>
      %c0_i32_137 = arith.constant 0 : i32
      %140 = tpu.memref_slice %arg6[%c6_i32_134, %137, %c0_i32_137] : memref<8x128x128xf32, #tpu.memory_space<vmem>> -> memref<1x1x128xf32, #tpu.memory_space<vmem>>
      %141 = tpu.memref_squeeze %140 : memref<1x1x128xf32, #tpu.memory_space<vmem>> -> memref<128xf32, #tpu.memory_space<vmem>>
      %142 = tpu.memref_slice %arg7[%c6_i32_135] : memref<8x!tpu.dma_semaphore, #tpu.memory_space<semaphore_mem>> -> memref<1x!tpu.dma_semaphore, #tpu.memory_space<semaphore_mem>>
      %143 = tpu.memref_squeeze %142 : memref<1x!tpu.dma_semaphore, #tpu.memory_space<semaphore_mem>> -> memref<!tpu.dma_semaphore, #tpu.memory_space<semaphore_mem>>
      tpu.enqueue_dma source(%139 : memref<128xf32, #tpu.memory_space<any>>) target(%141 : memref<128xf32, #tpu.memory_space<vmem>>) target_semaphore(%143 : memref<!tpu.dma_semaphore, #tpu.memory_space<semaphore_mem>>)
      %144 = arith.addi %1, %107 : i32
      %c3_i32_138 = arith.constant 3 : i32
      %145 = arith.addi %144, %c3_i32_138 : i32
      %146 = arith.index_cast %14 : i32 to index
      %147 = arith.index_cast %145 : i32 to index
      %148 = memref.load %arg2[%146, %147] : memref<8x128xi32, #tpu.memory_space<smem>>
      %c3_i32_139 = arith.constant 3 : i32
      %149 = arith.addi %107, %c3_i32_139 : i32
      %c6_i32_140 = arith.constant 6 : i32
      %c6_i32_141 = arith.constant 6 : i32
      %c0_i32_142 = arith.constant 0 : i32
      %150 = tpu.memref_slice %arg3[%148, %c0_i32_142] : memref<256x128xf32, #tpu.memory_space<any>> -> memref<1x128xf32, #tpu.memory_space<any>>
      %151 = tpu.memref_squeeze %150 : memref<1x128xf32, #tpu.memory_space<any>> -> memref<128xf32, #tpu.memory_space<any>>
      %c0_i32_143 = arith.constant 0 : i32
      %152 = tpu.memref_slice %arg6[%c6_i32_140, %149, %c0_i32_143] : memref<8x128x128xf32, #tpu.memory_space<vmem>> -> memref<1x1x128xf32, #tpu.memory_space<vmem>>
      %153 = tpu.memref_squeeze %152 : memref<1x1x128xf32, #tpu.memory_space<vmem>> -> memref<128xf32, #tpu.memory_space<vmem>>
      %154 = tpu.memref_slice %arg7[%c6_i32_141] : memref<8x!tpu.dma_semaphore, #tpu.memory_space<semaphore_mem>> -> memref<1x!tpu.dma_semaphore, #tpu.memory_space<semaphore_mem>>
      %155 = tpu.memref_squeeze %154 : memref<1x!tpu.dma_semaphore, #tpu.memory_space<semaphore_mem>> -> memref<!tpu.dma_semaphore, #tpu.memory_space<semaphore_mem>>
      tpu.enqueue_dma source(%151 : memref<128xf32, #tpu.memory_space<any>>) target(%153 : memref<128xf32, #tpu.memory_space<vmem>>) target_semaphore(%155 : memref<!tpu.dma_semaphore, #tpu.memory_space<semaphore_mem>>)
      %156 = arith.addi %1, %107 : i32
      %c4_i32_144 = arith.constant 4 : i32
      %157 = arith.addi %156, %c4_i32_144 : i32
      %158 = arith.index_cast %14 : i32 to index
      %159 = arith.index_cast %157 : i32 to index
      %160 = memref.load %arg2[%158, %159] : memref<8x128xi32, #tpu.memory_space<smem>>
      %c4_i32_145 = arith.constant 4 : i32
      %161 = arith.addi %107, %c4_i32_145 : i32
      %c6_i32_146 = arith.constant 6 : i32
      %c6_i32_147 = arith.constant 6 : i32
      %c0_i32_148 = arith.constant 0 : i32
      %162 = tpu.memref_slice %arg3[%160, %c0_i32_148] : memref<256x128xf32, #tpu.memory_space<any>> -> memref<1x128xf32, #tpu.memory_space<any>>
      %163 = tpu.memref_squeeze %162 : memref<1x128xf32, #tpu.memory_space<any>> -> memref<128xf32, #tpu.memory_space<any>>
      %c0_i32_149 = arith.constant 0 : i32
      %164 = tpu.memref_slice %arg6[%c6_i32_146, %161, %c0_i32_149] : memref<8x128x128xf32, #tpu.memory_space<vmem>> -> memref<1x1x128xf32, #tpu.memory_space<vmem>>
      %165 = tpu.memref_squeeze %164 : memref<1x1x128xf32, #tpu.memory_space<vmem>> -> memref<128xf32, #tpu.memory_space<vmem>>
      %166 = tpu.memref_slice %arg7[%c6_i32_147] : memref<8x!tpu.dma_semaphore, #tpu.memory_space<semaphore_mem>> -> memref<1x!tpu.dma_semaphore, #tpu.memory_space<semaphore_mem>>
      %167 = tpu.memref_squeeze %166 : memref<1x!tpu.dma_semaphore, #tpu.memory_space<semaphore_mem>> -> memref<!tpu.dma_semaphore, #tpu.memory_space<semaphore_mem>>
      tpu.enqueue_dma source(%163 : memref<128xf32, #tpu.memory_space<any>>) target(%165 : memref<128xf32, #tpu.memory_space<vmem>>) target_semaphore(%167 : memref<!tpu.dma_semaphore, #tpu.memory_space<semaphore_mem>>)
      %168 = arith.addi %1, %107 : i32
      %c5_i32_150 = arith.constant 5 : i32
      %169 = arith.addi %168, %c5_i32_150 : i32
      %170 = arith.index_cast %14 : i32 to index
      %171 = arith.index_cast %169 : i32 to index
      %172 = memref.load %arg2[%170, %171] : memref<8x128xi32, #tpu.memory_space<smem>>
      %c5_i32_151 = arith.constant 5 : i32
      %173 = arith.addi %107, %c5_i32_151 : i32
      %c6_i32_152 = arith.constant 6 : i32
      %c6_i32_153 = arith.constant 6 : i32
      %c0_i32_154 = arith.constant 0 : i32
      %174 = tpu.memref_slice %arg3[%172, %c0_i32_154] : memref<256x128xf32, #tpu.memory_space<any>> -> memref<1x128xf32, #tpu.memory_space<any>>
      %175 = tpu.memref_squeeze %174 : memref<1x128xf32, #tpu.memory_space<any>> -> memref<128xf32, #tpu.memory_space<any>>
      %c0_i32_155 = arith.constant 0 : i32
      %176 = tpu.memref_slice %arg6[%c6_i32_152, %173, %c0_i32_155] : memref<8x128x128xf32, #tpu.memory_space<vmem>> -> memref<1x1x128xf32, #tpu.memory_space<vmem>>
      %177 = tpu.memref_squeeze %176 : memref<1x1x128xf32, #tpu.memory_space<vmem>> -> memref<128xf32, #tpu.memory_space<vmem>>
      %178 = tpu.memref_slice %arg7[%c6_i32_153] : memref<8x!tpu.dma_semaphore, #tpu.memory_space<semaphore_mem>> -> memref<1x!tpu.dma_semaphore, #tpu.memory_space<semaphore_mem>>
      %179 = tpu.memref_squeeze %178 : memref<1x!tpu.dma_semaphore, #tpu.memory_space<semaphore_mem>> -> memref<!tpu.dma_semaphore, #tpu.memory_space<semaphore_mem>>
      tpu.enqueue_dma source(%175 : memref<128xf32, #tpu.memory_space<any>>) target(%177 : memref<128xf32, #tpu.memory_space<vmem>>) target_semaphore(%179 : memref<!tpu.dma_semaphore, #tpu.memory_space<semaphore_mem>>)
      %180 = arith.addi %1, %107 : i32
      %c6_i32_156 = arith.constant 6 : i32
      %181 = arith.addi %180, %c6_i32_156 : i32
      %182 = arith.index_cast %14 : i32 to index
      %183 = arith.index_cast %181 : i32 to index
      %184 = memref.load %arg2[%182, %183] : memref<8x128xi32, #tpu.memory_space<smem>>
      %c6_i32_157 = arith.constant 6 : i32
      %185 = arith.addi %107, %c6_i32_157 : i32
      %c6_i32_158 = arith.constant 6 : i32
      %c6_i32_159 = arith.constant 6 : i32
      %c0_i32_160 = arith.constant 0 : i32
      %186 = tpu.memref_slice %arg3[%184, %c0_i32_160] : memref<256x128xf32, #tpu.memory_space<any>> -> memref<1x128xf32, #tpu.memory_space<any>>
      %187 = tpu.memref_squeeze %186 : memref<1x128xf32, #tpu.memory_space<any>> -> memref<128xf32, #tpu.memory_space<any>>
      %c0_i32_161 = arith.constant 0 : i32
      %188 = tpu.memref_slice %arg6[%c6_i32_158, %185, %c0_i32_161] : memref<8x128x128xf32, #tpu.memory_space<vmem>> -> memref<1x1x128xf32, #tpu.memory_space<vmem>>
      %189 = tpu.memref_squeeze %188 : memref<1x1x128xf32, #tpu.memory_space<vmem>> -> memref<128xf32, #tpu.memory_space<vmem>>
      %190 = tpu.memref_slice %arg7[%c6_i32_159] : memref<8x!tpu.dma_semaphore, #tpu.memory_space<semaphore_mem>> -> memref<1x!tpu.dma_semaphore, #tpu.memory_space<semaphore_mem>>
      %191 = tpu.memref_squeeze %190 : memref<1x!tpu.dma_semaphore, #tpu.memory_space<semaphore_mem>> -> memref<!tpu.dma_semaphore, #tpu.memory_space<semaphore_mem>>
      tpu.enqueue_dma source(%187 : memref<128xf32, #tpu.memory_space<any>>) target(%189 : memref<128xf32, #tpu.memory_space<vmem>>) target_semaphore(%191 : memref<!tpu.dma_semaphore, #tpu.memory_space<semaphore_mem>>)
      %192 = arith.addi %1, %107 : i32
      %c7_i32_162 = arith.constant 7 : i32
      %193 = arith.addi %192, %c7_i32_162 : i32
      %194 = arith.index_cast %14 : i32 to index
      %195 = arith.index_cast %193 : i32 to index
      %196 = memref.load %arg2[%194, %195] : memref<8x128xi32, #tpu.memory_space<smem>>
      %c7_i32_163 = arith.constant 7 : i32
      %197 = arith.addi %107, %c7_i32_163 : i32
      %c6_i32_164 = arith.constant 6 : i32
      %c6_i32_165 = arith.constant 6 : i32
      %c0_i32_166 = arith.constant 0 : i32
      %198 = tpu.memref_slice %arg3[%196, %c0_i32_166] : memref<256x128xf32, #tpu.memory_space<any>> -> memref<1x128xf32, #tpu.memory_space<any>>
      %199 = tpu.memref_squeeze %198 : memref<1x128xf32, #tpu.memory_space<any>> -> memref<128xf32, #tpu.memory_space<any>>
      %c0_i32_167 = arith.constant 0 : i32
      %200 = tpu.memref_slice %arg6[%c6_i32_164, %197, %c0_i32_167] : memref<8x128x128xf32, #tpu.memory_space<vmem>> -> memref<1x1x128xf32, #tpu.memory_space<vmem>>
      %201 = tpu.memref_squeeze %200 : memref<1x1x128xf32, #tpu.memory_space<vmem>> -> memref<128xf32, #tpu.memory_space<vmem>>
      %202 = tpu.memref_slice %arg7[%c6_i32_165] : memref<8x!tpu.dma_semaphore, #tpu.memory_space<semaphore_mem>> -> memref<1x!tpu.dma_semaphore, #tpu.memory_space<semaphore_mem>>
      %203 = tpu.memref_squeeze %202 : memref<1x!tpu.dma_semaphore, #tpu.memory_space<semaphore_mem>> -> memref<!tpu.dma_semaphore, #tpu.memory_space<semaphore_mem>>
      tpu.enqueue_dma source(%199 : memref<128xf32, #tpu.memory_space<any>>) target(%201 : memref<128xf32, #tpu.memory_space<vmem>>) target_semaphore(%203 : memref<!tpu.dma_semaphore, #tpu.memory_space<semaphore_mem>>)
    }
    %c16_i32_26 = arith.constant 16 : i32
    %c7_i32 = arith.constant 7 : i32
    %16 = arith.addi %0, %c7_i32 : i32
    %c0_i32_27 = arith.constant 0 : i32
    %c16_i32_28 = arith.constant 16 : i32
    %17 = arith.addi %c0_i32_27, %c16_i32_28 : i32
    %c1_i32_29 = arith.constant 1 : i32
    scf.for %arg8 = %c0_i32_27 to %17 step %c1_i32_29  : i32 {
      %c8_i32_118 = arith.constant 8 : i32
      %106 = arith.muli %arg8, %c8_i32_118 : i32
      %c0_i32_119 = arith.constant 0 : i32
      %107 = arith.addi %c0_i32_119, %106 : i32
      %108 = arith.addi %1, %107 : i32
      %c0_i32_120 = arith.constant 0 : i32
      %109 = arith.addi %108, %c0_i32_120 : i32
      %110 = arith.index_cast %16 : i32 to index
      %111 = arith.index_cast %109 : i32 to index
      %112 = memref.load %arg2[%110, %111] : memref<8x128xi32, #tpu.memory_space<smem>>
      %c0_i32_121 = arith.constant 0 : i32
      %113 = arith.addi %107, %c0_i32_121 : i32
      %c7_i32_122 = arith.constant 7 : i32
      %c7_i32_123 = arith.constant 7 : i32
      %c0_i32_124 = arith.constant 0 : i32
      %114 = tpu.memref_slice %arg3[%112, %c0_i32_124] : memref<256x128xf32, #tpu.memory_space<any>> -> memref<1x128xf32, #tpu.memory_space<any>>
      %115 = tpu.memref_squeeze %114 : memref<1x128xf32, #tpu.memory_space<any>> -> memref<128xf32, #tpu.memory_space<any>>
      %c0_i32_125 = arith.constant 0 : i32
      %116 = tpu.memref_slice %arg6[%c7_i32_122, %113, %c0_i32_125] : memref<8x128x128xf32, #tpu.memory_space<vmem>> -> memref<1x1x128xf32, #tpu.memory_space<vmem>>
      %117 = tpu.memref_squeeze %116 : memref<1x1x128xf32, #tpu.memory_space<vmem>> -> memref<128xf32, #tpu.memory_space<vmem>>
      %118 = tpu.memref_slice %arg7[%c7_i32_123] : memref<8x!tpu.dma_semaphore, #tpu.memory_space<semaphore_mem>> -> memref<1x!tpu.dma_semaphore, #tpu.memory_space<semaphore_mem>>
      %119 = tpu.memref_squeeze %118 : memref<1x!tpu.dma_semaphore, #tpu.memory_space<semaphore_mem>> -> memref<!tpu.dma_semaphore, #tpu.memory_space<semaphore_mem>>
      tpu.enqueue_dma source(%115 : memref<128xf32, #tpu.memory_space<any>>) target(%117 : memref<128xf32, #tpu.memory_space<vmem>>) target_semaphore(%119 : memref<!tpu.dma_semaphore, #tpu.memory_space<semaphore_mem>>)
      %120 = arith.addi %1, %107 : i32
      %c1_i32_126 = arith.constant 1 : i32
      %121 = arith.addi %120, %c1_i32_126 : i32
      %122 = arith.index_cast %16 : i32 to index
      %123 = arith.index_cast %121 : i32 to index
      %124 = memref.load %arg2[%122, %123] : memref<8x128xi32, #tpu.memory_space<smem>>
      %c1_i32_127 = arith.constant 1 : i32
      %125 = arith.addi %107, %c1_i32_127 : i32
      %c7_i32_128 = arith.constant 7 : i32
      %c7_i32_129 = arith.constant 7 : i32
      %c0_i32_130 = arith.constant 0 : i32
      %126 = tpu.memref_slice %arg3[%124, %c0_i32_130] : memref<256x128xf32, #tpu.memory_space<any>> -> memref<1x128xf32, #tpu.memory_space<any>>
      %127 = tpu.memref_squeeze %126 : memref<1x128xf32, #tpu.memory_space<any>> -> memref<128xf32, #tpu.memory_space<any>>
      %c0_i32_131 = arith.constant 0 : i32
      %128 = tpu.memref_slice %arg6[%c7_i32_128, %125, %c0_i32_131] : memref<8x128x128xf32, #tpu.memory_space<vmem>> -> memref<1x1x128xf32, #tpu.memory_space<vmem>>
      %129 = tpu.memref_squeeze %128 : memref<1x1x128xf32, #tpu.memory_space<vmem>> -> memref<128xf32, #tpu.memory_space<vmem>>
      %130 = tpu.memref_slice %arg7[%c7_i32_129] : memref<8x!tpu.dma_semaphore, #tpu.memory_space<semaphore_mem>> -> memref<1x!tpu.dma_semaphore, #tpu.memory_space<semaphore_mem>>
      %131 = tpu.memref_squeeze %130 : memref<1x!tpu.dma_semaphore, #tpu.memory_space<semaphore_mem>> -> memref<!tpu.dma_semaphore, #tpu.memory_space<semaphore_mem>>
      tpu.enqueue_dma source(%127 : memref<128xf32, #tpu.memory_space<any>>) target(%129 : memref<128xf32, #tpu.memory_space<vmem>>) target_semaphore(%131 : memref<!tpu.dma_semaphore, #tpu.memory_space<semaphore_mem>>)
      %132 = arith.addi %1, %107 : i32
      %c2_i32_132 = arith.constant 2 : i32
      %133 = arith.addi %132, %c2_i32_132 : i32
      %134 = arith.index_cast %16 : i32 to index
      %135 = arith.index_cast %133 : i32 to index
      %136 = memref.load %arg2[%134, %135] : memref<8x128xi32, #tpu.memory_space<smem>>
      %c2_i32_133 = arith.constant 2 : i32
      %137 = arith.addi %107, %c2_i32_133 : i32
      %c7_i32_134 = arith.constant 7 : i32
      %c7_i32_135 = arith.constant 7 : i32
      %c0_i32_136 = arith.constant 0 : i32
      %138 = tpu.memref_slice %arg3[%136, %c0_i32_136] : memref<256x128xf32, #tpu.memory_space<any>> -> memref<1x128xf32, #tpu.memory_space<any>>
      %139 = tpu.memref_squeeze %138 : memref<1x128xf32, #tpu.memory_space<any>> -> memref<128xf32, #tpu.memory_space<any>>
      %c0_i32_137 = arith.constant 0 : i32
      %140 = tpu.memref_slice %arg6[%c7_i32_134, %137, %c0_i32_137] : memref<8x128x128xf32, #tpu.memory_space<vmem>> -> memref<1x1x128xf32, #tpu.memory_space<vmem>>
      %141 = tpu.memref_squeeze %140 : memref<1x1x128xf32, #tpu.memory_space<vmem>> -> memref<128xf32, #tpu.memory_space<vmem>>
      %142 = tpu.memref_slice %arg7[%c7_i32_135] : memref<8x!tpu.dma_semaphore, #tpu.memory_space<semaphore_mem>> -> memref<1x!tpu.dma_semaphore, #tpu.memory_space<semaphore_mem>>
      %143 = tpu.memref_squeeze %142 : memref<1x!tpu.dma_semaphore, #tpu.memory_space<semaphore_mem>> -> memref<!tpu.dma_semaphore, #tpu.memory_space<semaphore_mem>>
      tpu.enqueue_dma source(%139 : memref<128xf32, #tpu.memory_space<any>>) target(%141 : memref<128xf32, #tpu.memory_space<vmem>>) target_semaphore(%143 : memref<!tpu.dma_semaphore, #tpu.memory_space<semaphore_mem>>)
      %144 = arith.addi %1, %107 : i32
      %c3_i32_138 = arith.constant 3 : i32
      %145 = arith.addi %144, %c3_i32_138 : i32
      %146 = arith.index_cast %16 : i32 to index
      %147 = arith.index_cast %145 : i32 to index
      %148 = memref.load %arg2[%146, %147] : memref<8x128xi32, #tpu.memory_space<smem>>
      %c3_i32_139 = arith.constant 3 : i32
      %149 = arith.addi %107, %c3_i32_139 : i32
      %c7_i32_140 = arith.constant 7 : i32
      %c7_i32_141 = arith.constant 7 : i32
      %c0_i32_142 = arith.constant 0 : i32
      %150 = tpu.memref_slice %arg3[%148, %c0_i32_142] : memref<256x128xf32, #tpu.memory_space<any>> -> memref<1x128xf32, #tpu.memory_space<any>>
      %151 = tpu.memref_squeeze %150 : memref<1x128xf32, #tpu.memory_space<any>> -> memref<128xf32, #tpu.memory_space<any>>
      %c0_i32_143 = arith.constant 0 : i32
      %152 = tpu.memref_slice %arg6[%c7_i32_140, %149, %c0_i32_143] : memref<8x128x128xf32, #tpu.memory_space<vmem>> -> memref<1x1x128xf32, #tpu.memory_space<vmem>>
      %153 = tpu.memref_squeeze %152 : memref<1x1x128xf32, #tpu.memory_space<vmem>> -> memref<128xf32, #tpu.memory_space<vmem>>
      %154 = tpu.memref_slice %arg7[%c7_i32_141] : memref<8x!tpu.dma_semaphore, #tpu.memory_space<semaphore_mem>> -> memref<1x!tpu.dma_semaphore, #tpu.memory_space<semaphore_mem>>
      %155 = tpu.memref_squeeze %154 : memref<1x!tpu.dma_semaphore, #tpu.memory_space<semaphore_mem>> -> memref<!tpu.dma_semaphore, #tpu.memory_space<semaphore_mem>>
      tpu.enqueue_dma source(%151 : memref<128xf32, #tpu.memory_space<any>>) target(%153 : memref<128xf32, #tpu.memory_space<vmem>>) target_semaphore(%155 : memref<!tpu.dma_semaphore, #tpu.memory_space<semaphore_mem>>)
      %156 = arith.addi %1, %107 : i32
      %c4_i32_144 = arith.constant 4 : i32
      %157 = arith.addi %156, %c4_i32_144 : i32
      %158 = arith.index_cast %16 : i32 to index
      %159 = arith.index_cast %157 : i32 to index
      %160 = memref.load %arg2[%158, %159] : memref<8x128xi32, #tpu.memory_space<smem>>
      %c4_i32_145 = arith.constant 4 : i32
      %161 = arith.addi %107, %c4_i32_145 : i32
      %c7_i32_146 = arith.constant 7 : i32
      %c7_i32_147 = arith.constant 7 : i32
      %c0_i32_148 = arith.constant 0 : i32
      %162 = tpu.memref_slice %arg3[%160, %c0_i32_148] : memref<256x128xf32, #tpu.memory_space<any>> -> memref<1x128xf32, #tpu.memory_space<any>>
      %163 = tpu.memref_squeeze %162 : memref<1x128xf32, #tpu.memory_space<any>> -> memref<128xf32, #tpu.memory_space<any>>
      %c0_i32_149 = arith.constant 0 : i32
      %164 = tpu.memref_slice %arg6[%c7_i32_146, %161, %c0_i32_149] : memref<8x128x128xf32, #tpu.memory_space<vmem>> -> memref<1x1x128xf32, #tpu.memory_space<vmem>>
      %165 = tpu.memref_squeeze %164 : memref<1x1x128xf32, #tpu.memory_space<vmem>> -> memref<128xf32, #tpu.memory_space<vmem>>
      %166 = tpu.memref_slice %arg7[%c7_i32_147] : memref<8x!tpu.dma_semaphore, #tpu.memory_space<semaphore_mem>> -> memref<1x!tpu.dma_semaphore, #tpu.memory_space<semaphore_mem>>
      %167 = tpu.memref_squeeze %166 : memref<1x!tpu.dma_semaphore, #tpu.memory_space<semaphore_mem>> -> memref<!tpu.dma_semaphore, #tpu.memory_space<semaphore_mem>>
      tpu.enqueue_dma source(%163 : memref<128xf32, #tpu.memory_space<any>>) target(%165 : memref<128xf32, #tpu.memory_space<vmem>>) target_semaphore(%167 : memref<!tpu.dma_semaphore, #tpu.memory_space<semaphore_mem>>)
      %168 = arith.addi %1, %107 : i32
      %c5_i32_150 = arith.constant 5 : i32
      %169 = arith.addi %168, %c5_i32_150 : i32
      %170 = arith.index_cast %16 : i32 to index
      %171 = arith.index_cast %169 : i32 to index
      %172 = memref.load %arg2[%170, %171] : memref<8x128xi32, #tpu.memory_space<smem>>
      %c5_i32_151 = arith.constant 5 : i32
      %173 = arith.addi %107, %c5_i32_151 : i32
      %c7_i32_152 = arith.constant 7 : i32
      %c7_i32_153 = arith.constant 7 : i32
      %c0_i32_154 = arith.constant 0 : i32
      %174 = tpu.memref_slice %arg3[%172, %c0_i32_154] : memref<256x128xf32, #tpu.memory_space<any>> -> memref<1x128xf32, #tpu.memory_space<any>>
      %175 = tpu.memref_squeeze %174 : memref<1x128xf32, #tpu.memory_space<any>> -> memref<128xf32, #tpu.memory_space<any>>
      %c0_i32_155 = arith.constant 0 : i32
      %176 = tpu.memref_slice %arg6[%c7_i32_152, %173, %c0_i32_155] : memref<8x128x128xf32, #tpu.memory_space<vmem>> -> memref<1x1x128xf32, #tpu.memory_space<vmem>>
      %177 = tpu.memref_squeeze %176 : memref<1x1x128xf32, #tpu.memory_space<vmem>> -> memref<128xf32, #tpu.memory_space<vmem>>
      %178 = tpu.memref_slice %arg7[%c7_i32_153] : memref<8x!tpu.dma_semaphore, #tpu.memory_space<semaphore_mem>> -> memref<1x!tpu.dma_semaphore, #tpu.memory_space<semaphore_mem>>
      %179 = tpu.memref_squeeze %178 : memref<1x!tpu.dma_semaphore, #tpu.memory_space<semaphore_mem>> -> memref<!tpu.dma_semaphore, #tpu.memory_space<semaphore_mem>>
      tpu.enqueue_dma source(%175 : memref<128xf32, #tpu.memory_space<any>>) target(%177 : memref<128xf32, #tpu.memory_space<vmem>>) target_semaphore(%179 : memref<!tpu.dma_semaphore, #tpu.memory_space<semaphore_mem>>)
      %180 = arith.addi %1, %107 : i32
      %c6_i32_156 = arith.constant 6 : i32
      %181 = arith.addi %180, %c6_i32_156 : i32
      %182 = arith.index_cast %16 : i32 to index
      %183 = arith.index_cast %181 : i32 to index
      %184 = memref.load %arg2[%182, %183] : memref<8x128xi32, #tpu.memory_space<smem>>
      %c6_i32_157 = arith.constant 6 : i32
      %185 = arith.addi %107, %c6_i32_157 : i32
      %c7_i32_158 = arith.constant 7 : i32
      %c7_i32_159 = arith.constant 7 : i32
      %c0_i32_160 = arith.constant 0 : i32
      %186 = tpu.memref_slice %arg3[%184, %c0_i32_160] : memref<256x128xf32, #tpu.memory_space<any>> -> memref<1x128xf32, #tpu.memory_space<any>>
      %187 = tpu.memref_squeeze %186 : memref<1x128xf32, #tpu.memory_space<any>> -> memref<128xf32, #tpu.memory_space<any>>
      %c0_i32_161 = arith.constant 0 : i32
      %188 = tpu.memref_slice %arg6[%c7_i32_158, %185, %c0_i32_161] : memref<8x128x128xf32, #tpu.memory_space<vmem>> -> memref<1x1x128xf32, #tpu.memory_space<vmem>>
      %189 = tpu.memref_squeeze %188 : memref<1x1x128xf32, #tpu.memory_space<vmem>> -> memref<128xf32, #tpu.memory_space<vmem>>
      %190 = tpu.memref_slice %arg7[%c7_i32_159] : memref<8x!tpu.dma_semaphore, #tpu.memory_space<semaphore_mem>> -> memref<1x!tpu.dma_semaphore, #tpu.memory_space<semaphore_mem>>
      %191 = tpu.memref_squeeze %190 : memref<1x!tpu.dma_semaphore, #tpu.memory_space<semaphore_mem>> -> memref<!tpu.dma_semaphore, #tpu.memory_space<semaphore_mem>>
      tpu.enqueue_dma source(%187 : memref<128xf32, #tpu.memory_space<any>>) target(%189 : memref<128xf32, #tpu.memory_space<vmem>>) target_semaphore(%191 : memref<!tpu.dma_semaphore, #tpu.memory_space<semaphore_mem>>)
      %192 = arith.addi %1, %107 : i32
      %c7_i32_162 = arith.constant 7 : i32
      %193 = arith.addi %192, %c7_i32_162 : i32
      %194 = arith.index_cast %16 : i32 to index
      %195 = arith.index_cast %193 : i32 to index
      %196 = memref.load %arg2[%194, %195] : memref<8x128xi32, #tpu.memory_space<smem>>
      %c7_i32_163 = arith.constant 7 : i32
      %197 = arith.addi %107, %c7_i32_163 : i32
      %c7_i32_164 = arith.constant 7 : i32
      %c7_i32_165 = arith.constant 7 : i32
      %c0_i32_166 = arith.constant 0 : i32
      %198 = tpu.memref_slice %arg3[%196, %c0_i32_166] : memref<256x128xf32, #tpu.memory_space<any>> -> memref<1x128xf32, #tpu.memory_space<any>>
      %199 = tpu.memref_squeeze %198 : memref<1x128xf32, #tpu.memory_space<any>> -> memref<128xf32, #tpu.memory_space<any>>
      %c0_i32_167 = arith.constant 0 : i32
      %200 = tpu.memref_slice %arg6[%c7_i32_164, %197, %c0_i32_167] : memref<8x128x128xf32, #tpu.memory_space<vmem>> -> memref<1x1x128xf32, #tpu.memory_space<vmem>>
      %201 = tpu.memref_squeeze %200 : memref<1x1x128xf32, #tpu.memory_space<vmem>> -> memref<128xf32, #tpu.memory_space<vmem>>
      %202 = tpu.memref_slice %arg7[%c7_i32_165] : memref<8x!tpu.dma_semaphore, #tpu.memory_space<semaphore_mem>> -> memref<1x!tpu.dma_semaphore, #tpu.memory_space<semaphore_mem>>
      %203 = tpu.memref_squeeze %202 : memref<1x!tpu.dma_semaphore, #tpu.memory_space<semaphore_mem>> -> memref<!tpu.dma_semaphore, #tpu.memory_space<semaphore_mem>>
      tpu.enqueue_dma source(%199 : memref<128xf32, #tpu.memory_space<any>>) target(%201 : memref<128xf32, #tpu.memory_space<vmem>>) target_semaphore(%203 : memref<!tpu.dma_semaphore, #tpu.memory_space<semaphore_mem>>)
    }
    %c16_i32_30 = arith.constant 16 : i32
    %c0_i32_31 = arith.constant 0 : i32
    %c16_i32_32 = arith.constant 16 : i32
    %18 = arith.addi %c0_i32_31, %c16_i32_32 : i32
    %c1_i32_33 = arith.constant 1 : i32
    scf.for %arg8 = %c0_i32_31 to %18 step %c1_i32_33  : i32 {
      %c0_i32_118 = arith.constant 0 : i32
      %c0_i32_119 = arith.constant 0 : i32
      %c0_i32_120 = arith.constant 0 : i32
      %c0_i32_121 = arith.constant 0 : i32
      %c0_i32_122 = arith.constant 0 : i32
      %106 = tpu.memref_slice %arg3[%c0_i32_118, %c0_i32_122] : memref<256x128xf32, #tpu.memory_space<any>> -> memref<1x128xf32, #tpu.memory_space<any>>
      %107 = tpu.memref_squeeze %106 : memref<1x128xf32, #tpu.memory_space<any>> -> memref<128xf32, #tpu.memory_space<any>>
      %c0_i32_123 = arith.constant 0 : i32
      %108 = tpu.memref_slice %arg6[%c0_i32_119, %c0_i32_120, %c0_i32_123] : memref<8x128x128xf32, #tpu.memory_space<vmem>> -> memref<1x1x128xf32, #tpu.memory_space<vmem>>
      %109 = tpu.memref_squeeze %108 : memref<1x1x128xf32, #tpu.memory_space<vmem>> -> memref<128xf32, #tpu.memory_space<vmem>>
      %110 = tpu.memref_slice %arg7[%c0_i32_121] : memref<8x!tpu.dma_semaphore, #tpu.memory_space<semaphore_mem>> -> memref<1x!tpu.dma_semaphore, #tpu.memory_space<semaphore_mem>>
      %111 = tpu.memref_squeeze %110 : memref<1x!tpu.dma_semaphore, #tpu.memory_space<semaphore_mem>> -> memref<!tpu.dma_semaphore, #tpu.memory_space<semaphore_mem>>
      tpu.wait_dma2 semaphore(%111 : memref<!tpu.dma_semaphore, #tpu.memory_space<semaphore_mem>>) src(%107 : memref<128xf32, #tpu.memory_space<any>>) dst(%109 : memref<128xf32, #tpu.memory_space<vmem>>)
      %c0_i32_124 = arith.constant 0 : i32
      %c0_i32_125 = arith.constant 0 : i32
      %c0_i32_126 = arith.constant 0 : i32
      %c0_i32_127 = arith.constant 0 : i32
      %c0_i32_128 = arith.constant 0 : i32
      %112 = tpu.memref_slice %arg3[%c0_i32_124, %c0_i32_128] : memref<256x128xf32, #tpu.memory_space<any>> -> memref<1x128xf32, #tpu.memory_space<any>>
      %113 = tpu.memref_squeeze %112 : memref<1x128xf32, #tpu.memory_space<any>> -> memref<128xf32, #tpu.memory_space<any>>
      %c0_i32_129 = arith.constant 0 : i32
      %114 = tpu.memref_slice %arg6[%c0_i32_125, %c0_i32_126, %c0_i32_129] : memref<8x128x128xf32, #tpu.memory_space<vmem>> -> memref<1x1x128xf32, #tpu.memory_space<vmem>>
      %115 = tpu.memref_squeeze %114 : memref<1x1x128xf32, #tpu.memory_space<vmem>> -> memref<128xf32, #tpu.memory_space<vmem>>
      %116 = tpu.memref_slice %arg7[%c0_i32_127] : memref<8x!tpu.dma_semaphore, #tpu.memory_space<semaphore_mem>> -> memref<1x!tpu.dma_semaphore, #tpu.memory_space<semaphore_mem>>
      %117 = tpu.memref_squeeze %116 : memref<1x!tpu.dma_semaphore, #tpu.memory_space<semaphore_mem>> -> memref<!tpu.dma_semaphore, #tpu.memory_space<semaphore_mem>>
      tpu.wait_dma2 semaphore(%117 : memref<!tpu.dma_semaphore, #tpu.memory_space<semaphore_mem>>) src(%113 : memref<128xf32, #tpu.memory_space<any>>) dst(%115 : memref<128xf32, #tpu.memory_space<vmem>>)
      %c0_i32_130 = arith.constant 0 : i32
      %c0_i32_131 = arith.constant 0 : i32
      %c0_i32_132 = arith.constant 0 : i32
      %c0_i32_133 = arith.constant 0 : i32
      %c0_i32_134 = arith.constant 0 : i32
      %118 = tpu.memref_slice %arg3[%c0_i32_130, %c0_i32_134] : memref<256x128xf32, #tpu.memory_space<any>> -> memref<1x128xf32, #tpu.memory_space<any>>
      %119 = tpu.memref_squeeze %118 : memref<1x128xf32, #tpu.memory_space<any>> -> memref<128xf32, #tpu.memory_space<any>>
      %c0_i32_135 = arith.constant 0 : i32
      %120 = tpu.memref_slice %arg6[%c0_i32_131, %c0_i32_132, %c0_i32_135] : memref<8x128x128xf32, #tpu.memory_space<vmem>> -> memref<1x1x128xf32, #tpu.memory_space<vmem>>
      %121 = tpu.memref_squeeze %120 : memref<1x1x128xf32, #tpu.memory_space<vmem>> -> memref<128xf32, #tpu.memory_space<vmem>>
      %122 = tpu.memref_slice %arg7[%c0_i32_133] : memref<8x!tpu.dma_semaphore, #tpu.memory_space<semaphore_mem>> -> memref<1x!tpu.dma_semaphore, #tpu.memory_space<semaphore_mem>>
      %123 = tpu.memref_squeeze %122 : memref<1x!tpu.dma_semaphore, #tpu.memory_space<semaphore_mem>> -> memref<!tpu.dma_semaphore, #tpu.memory_space<semaphore_mem>>
      tpu.wait_dma2 semaphore(%123 : memref<!tpu.dma_semaphore, #tpu.memory_space<semaphore_mem>>) src(%119 : memref<128xf32, #tpu.memory_space<any>>) dst(%121 : memref<128xf32, #tpu.memory_space<vmem>>)
      %c0_i32_136 = arith.constant 0 : i32
      %c0_i32_137 = arith.constant 0 : i32
      %c0_i32_138 = arith.constant 0 : i32
      %c0_i32_139 = arith.constant 0 : i32
      %c0_i32_140 = arith.constant 0 : i32
      %124 = tpu.memref_slice %arg3[%c0_i32_136, %c0_i32_140] : memref<256x128xf32, #tpu.memory_space<any>> -> memref<1x128xf32, #tpu.memory_space<any>>
      %125 = tpu.memref_squeeze %124 : memref<1x128xf32, #tpu.memory_space<any>> -> memref<128xf32, #tpu.memory_space<any>>
      %c0_i32_141 = arith.constant 0 : i32
      %126 = tpu.memref_slice %arg6[%c0_i32_137, %c0_i32_138, %c0_i32_141] : memref<8x128x128xf32, #tpu.memory_space<vmem>> -> memref<1x1x128xf32, #tpu.memory_space<vmem>>
      %127 = tpu.memref_squeeze %126 : memref<1x1x128xf32, #tpu.memory_space<vmem>> -> memref<128xf32, #tpu.memory_space<vmem>>
      %128 = tpu.memref_slice %arg7[%c0_i32_139] : memref<8x!tpu.dma_semaphore, #tpu.memory_space<semaphore_mem>> -> memref<1x!tpu.dma_semaphore, #tpu.memory_space<semaphore_mem>>
      %129 = tpu.memref_squeeze %128 : memref<1x!tpu.dma_semaphore, #tpu.memory_space<semaphore_mem>> -> memref<!tpu.dma_semaphore, #tpu.memory_space<semaphore_mem>>
      tpu.wait_dma2 semaphore(%129 : memref<!tpu.dma_semaphore, #tpu.memory_space<semaphore_mem>>) src(%125 : memref<128xf32, #tpu.memory_space<any>>) dst(%127 : memref<128xf32, #tpu.memory_space<vmem>>)
      %c0_i32_142 = arith.constant 0 : i32
      %c0_i32_143 = arith.constant 0 : i32
      %c0_i32_144 = arith.constant 0 : i32
      %c0_i32_145 = arith.constant 0 : i32
      %c0_i32_146 = arith.constant 0 : i32
      %130 = tpu.memref_slice %arg3[%c0_i32_142, %c0_i32_146] : memref<256x128xf32, #tpu.memory_space<any>> -> memref<1x128xf32, #tpu.memory_space<any>>
      %131 = tpu.memref_squeeze %130 : memref<1x128xf32, #tpu.memory_space<any>> -> memref<128xf32, #tpu.memory_space<any>>
      %c0_i32_147 = arith.constant 0 : i32
      %132 = tpu.memref_slice %arg6[%c0_i32_143, %c0_i32_144, %c0_i32_147] : memref<8x128x128xf32, #tpu.memory_space<vmem>> -> memref<1x1x128xf32, #tpu.memory_space<vmem>>
      %133 = tpu.memref_squeeze %132 : memref<1x1x128xf32, #tpu.memory_space<vmem>> -> memref<128xf32, #tpu.memory_space<vmem>>
      %134 = tpu.memref_slice %arg7[%c0_i32_145] : memref<8x!tpu.dma_semaphore, #tpu.memory_space<semaphore_mem>> -> memref<1x!tpu.dma_semaphore, #tpu.memory_space<semaphore_mem>>
      %135 = tpu.memref_squeeze %134 : memref<1x!tpu.dma_semaphore, #tpu.memory_space<semaphore_mem>> -> memref<!tpu.dma_semaphore, #tpu.memory_space<semaphore_mem>>
      tpu.wait_dma2 semaphore(%135 : memref<!tpu.dma_semaphore, #tpu.memory_space<semaphore_mem>>) src(%131 : memref<128xf32, #tpu.memory_space<any>>) dst(%133 : memref<128xf32, #tpu.memory_space<vmem>>)
      %c0_i32_148 = arith.constant 0 : i32
      %c0_i32_149 = arith.constant 0 : i32
      %c0_i32_150 = arith.constant 0 : i32
      %c0_i32_151 = arith.constant 0 : i32
      %c0_i32_152 = arith.constant 0 : i32
      %136 = tpu.memref_slice %arg3[%c0_i32_148, %c0_i32_152] : memref<256x128xf32, #tpu.memory_space<any>> -> memref<1x128xf32, #tpu.memory_space<any>>
      %137 = tpu.memref_squeeze %136 : memref<1x128xf32, #tpu.memory_space<any>> -> memref<128xf32, #tpu.memory_space<any>>
      %c0_i32_153 = arith.constant 0 : i32
      %138 = tpu.memref_slice %arg6[%c0_i32_149, %c0_i32_150, %c0_i32_153] : memref<8x128x128xf32, #tpu.memory_space<vmem>> -> memref<1x1x128xf32, #tpu.memory_space<vmem>>
      %139 = tpu.memref_squeeze %138 : memref<1x1x128xf32, #tpu.memory_space<vmem>> -> memref<128xf32, #tpu.memory_space<vmem>>
      %140 = tpu.memref_slice %arg7[%c0_i32_151] : memref<8x!tpu.dma_semaphore, #tpu.memory_space<semaphore_mem>> -> memref<1x!tpu.dma_semaphore, #tpu.memory_space<semaphore_mem>>
      %141 = tpu.memref_squeeze %140 : memref<1x!tpu.dma_semaphore, #tpu.memory_space<semaphore_mem>> -> memref<!tpu.dma_semaphore, #tpu.memory_space<semaphore_mem>>
      tpu.wait_dma2 semaphore(%141 : memref<!tpu.dma_semaphore, #tpu.memory_space<semaphore_mem>>) src(%137 : memref<128xf32, #tpu.memory_space<any>>) dst(%139 : memref<128xf32, #tpu.memory_space<vmem>>)
      %c0_i32_154 = arith.constant 0 : i32
      %c0_i32_155 = arith.constant 0 : i32
      %c0_i32_156 = arith.constant 0 : i32
      %c0_i32_157 = arith.constant 0 : i32
      %c0_i32_158 = arith.constant 0 : i32
      %142 = tpu.memref_slice %arg3[%c0_i32_154, %c0_i32_158] : memref<256x128xf32, #tpu.memory_space<any>> -> memref<1x128xf32, #tpu.memory_space<any>>
      %143 = tpu.memref_squeeze %142 : memref<1x128xf32, #tpu.memory_space<any>> -> memref<128xf32, #tpu.memory_space<any>>
      %c0_i32_159 = arith.constant 0 : i32
      %144 = tpu.memref_slice %arg6[%c0_i32_155, %c0_i32_156, %c0_i32_159] : memref<8x128x128xf32, #tpu.memory_space<vmem>> -> memref<1x1x128xf32, #tpu.memory_space<vmem>>
      %145 = tpu.memref_squeeze %144 : memref<1x1x128xf32, #tpu.memory_space<vmem>> -> memref<128xf32, #tpu.memory_space<vmem>>
      %146 = tpu.memref_slice %arg7[%c0_i32_157] : memref<8x!tpu.dma_semaphore, #tpu.memory_space<semaphore_mem>> -> memref<1x!tpu.dma_semaphore, #tpu.memory_space<semaphore_mem>>
      %147 = tpu.memref_squeeze %146 : memref<1x!tpu.dma_semaphore, #tpu.memory_space<semaphore_mem>> -> memref<!tpu.dma_semaphore, #tpu.memory_space<semaphore_mem>>
      tpu.wait_dma2 semaphore(%147 : memref<!tpu.dma_semaphore, #tpu.memory_space<semaphore_mem>>) src(%143 : memref<128xf32, #tpu.memory_space<any>>) dst(%145 : memref<128xf32, #tpu.memory_space<vmem>>)
      %c0_i32_160 = arith.constant 0 : i32
      %c0_i32_161 = arith.constant 0 : i32
      %c0_i32_162 = arith.constant 0 : i32
      %c0_i32_163 = arith.constant 0 : i32
      %c0_i32_164 = arith.constant 0 : i32
      %148 = tpu.memref_slice %arg3[%c0_i32_160, %c0_i32_164] : memref<256x128xf32, #tpu.memory_space<any>> -> memref<1x128xf32, #tpu.memory_space<any>>
      %149 = tpu.memref_squeeze %148 : memref<1x128xf32, #tpu.memory_space<any>> -> memref<128xf32, #tpu.memory_space<any>>
      %c0_i32_165 = arith.constant 0 : i32
      %150 = tpu.memref_slice %arg6[%c0_i32_161, %c0_i32_162, %c0_i32_165] : memref<8x128x128xf32, #tpu.memory_space<vmem>> -> memref<1x1x128xf32, #tpu.memory_space<vmem>>
      %151 = tpu.memref_squeeze %150 : memref<1x1x128xf32, #tpu.memory_space<vmem>> -> memref<128xf32, #tpu.memory_space<vmem>>
      %152 = tpu.memref_slice %arg7[%c0_i32_163] : memref<8x!tpu.dma_semaphore, #tpu.memory_space<semaphore_mem>> -> memref<1x!tpu.dma_semaphore, #tpu.memory_space<semaphore_mem>>
      %153 = tpu.memref_squeeze %152 : memref<1x!tpu.dma_semaphore, #tpu.memory_space<semaphore_mem>> -> memref<!tpu.dma_semaphore, #tpu.memory_space<semaphore_mem>>
      tpu.wait_dma2 semaphore(%153 : memref<!tpu.dma_semaphore, #tpu.memory_space<semaphore_mem>>) src(%149 : memref<128xf32, #tpu.memory_space<any>>) dst(%151 : memref<128xf32, #tpu.memory_space<vmem>>)
    }
    %c0 = arith.constant 0 : index
    %c0_34 = arith.constant 0 : index
    %c0_35 = arith.constant 0 : index
    %19 = vector.load %arg6[%c0, %c0_34, %c0_35] : memref<8x128x128xf32, #tpu.memory_space<vmem>>, vector<1x128x128xf32>
    %c0_36 = arith.constant 0 : index
    %c0_37 = arith.constant 0 : index
    %20 = vector.load %arg4[%c0_36, %c0_37] : memref<8x128xf32, #tpu.memory_space<vmem>>, vector<1x128xf32>
    %21 = vector.shape_cast %20 : vector<1x128xf32> to vector<1x1x128xf32>
    %22 = vector.broadcast %21 : vector<1x1x128xf32> to vector<1x128x128xf32>
    %23 = arith.mulf %19, %22 : vector<1x128x128xf32>
    %cst = arith.constant dense<0.000000e+00> : vector<1x128xf32>
    %24 = vector.multi_reduction <add>, %23, %cst [2] : vector<1x128x128xf32> to vector<1x128xf32>
    %cst_38 = arith.constant 14.2857141 : f32
    %25 = vector.broadcast %cst_38 : f32 to vector<1x128xf32>
    %26 = arith.mulf %24, %25 : vector<1x128xf32>
    %27 = math.exp %26 : vector<1x128xf32>
    %c0_39 = arith.constant 0 : index
    %c0_40 = arith.constant 0 : index
    %28 = vector.load %arg5[%c0_39, %c0_40] : memref<8x128xf32, #tpu.memory_space<vmem>>, vector<1x128xf32>
    tpu.vector_store %arg5[%c0_39, %c0_40], %27 {strides = array<i32>} : memref<8x128xf32, #tpu.memory_space<vmem>>, vector<1x128xf32>,
    %c0_i32_41 = arith.constant 0 : i32
    %c16_i32_42 = arith.constant 16 : i32
    %29 = arith.addi %c0_i32_41, %c16_i32_42 : i32
    %c1_i32_43 = arith.constant 1 : i32
    scf.for %arg8 = %c0_i32_41 to %29 step %c1_i32_43  : i32 {
      %c0_i32_118 = arith.constant 0 : i32
      %c1_i32_119 = arith.constant 1 : i32
      %c0_i32_120 = arith.constant 0 : i32
      %c1_i32_121 = arith.constant 1 : i32
      %c0_i32_122 = arith.constant 0 : i32
      %106 = tpu.memref_slice %arg3[%c0_i32_118, %c0_i32_122] : memref<256x128xf32, #tpu.memory_space<any>> -> memref<1x128xf32, #tpu.memory_space<any>>
      %107 = tpu.memref_squeeze %106 : memref<1x128xf32, #tpu.memory_space<any>> -> memref<128xf32, #tpu.memory_space<any>>
      %c0_i32_123 = arith.constant 0 : i32
      %108 = tpu.memref_slice %arg6[%c1_i32_119, %c0_i32_120, %c0_i32_123] : memref<8x128x128xf32, #tpu.memory_space<vmem>> -> memref<1x1x128xf32, #tpu.memory_space<vmem>>
      %109 = tpu.memref_squeeze %108 : memref<1x1x128xf32, #tpu.memory_space<vmem>> -> memref<128xf32, #tpu.memory_space<vmem>>
      %110 = tpu.memref_slice %arg7[%c1_i32_121] : memref<8x!tpu.dma_semaphore, #tpu.memory_space<semaphore_mem>> -> memref<1x!tpu.dma_semaphore, #tpu.memory_space<semaphore_mem>>
      %111 = tpu.memref_squeeze %110 : memref<1x!tpu.dma_semaphore, #tpu.memory_space<semaphore_mem>> -> memref<!tpu.dma_semaphore, #tpu.memory_space<semaphore_mem>>
      tpu.wait_dma2 semaphore(%111 : memref<!tpu.dma_semaphore, #tpu.memory_space<semaphore_mem>>) src(%107 : memref<128xf32, #tpu.memory_space<any>>) dst(%109 : memref<128xf32, #tpu.memory_space<vmem>>)
      %c0_i32_124 = arith.constant 0 : i32
      %c1_i32_125 = arith.constant 1 : i32
      %c0_i32_126 = arith.constant 0 : i32
      %c1_i32_127 = arith.constant 1 : i32
      %c0_i32_128 = arith.constant 0 : i32
      %112 = tpu.memref_slice %arg3[%c0_i32_124, %c0_i32_128] : memref<256x128xf32, #tpu.memory_space<any>> -> memref<1x128xf32, #tpu.memory_space<any>>
      %113 = tpu.memref_squeeze %112 : memref<1x128xf32, #tpu.memory_space<any>> -> memref<128xf32, #tpu.memory_space<any>>
      %c0_i32_129 = arith.constant 0 : i32
      %114 = tpu.memref_slice %arg6[%c1_i32_125, %c0_i32_126, %c0_i32_129] : memref<8x128x128xf32, #tpu.memory_space<vmem>> -> memref<1x1x128xf32, #tpu.memory_space<vmem>>
      %115 = tpu.memref_squeeze %114 : memref<1x1x128xf32, #tpu.memory_space<vmem>> -> memref<128xf32, #tpu.memory_space<vmem>>
      %116 = tpu.memref_slice %arg7[%c1_i32_127] : memref<8x!tpu.dma_semaphore, #tpu.memory_space<semaphore_mem>> -> memref<1x!tpu.dma_semaphore, #tpu.memory_space<semaphore_mem>>
      %117 = tpu.memref_squeeze %116 : memref<1x!tpu.dma_semaphore, #tpu.memory_space<semaphore_mem>> -> memref<!tpu.dma_semaphore, #tpu.memory_space<semaphore_mem>>
      tpu.wait_dma2 semaphore(%117 : memref<!tpu.dma_semaphore, #tpu.memory_space<semaphore_mem>>) src(%113 : memref<128xf32, #tpu.memory_space<any>>) dst(%115 : memref<128xf32, #tpu.memory_space<vmem>>)
      %c0_i32_130 = arith.constant 0 : i32
      %c1_i32_131 = arith.constant 1 : i32
      %c0_i32_132 = arith.constant 0 : i32
      %c1_i32_133 = arith.constant 1 : i32
      %c0_i32_134 = arith.constant 0 : i32
      %118 = tpu.memref_slice %arg3[%c0_i32_130, %c0_i32_134] : memref<256x128xf32, #tpu.memory_space<any>> -> memref<1x128xf32, #tpu.memory_space<any>>
      %119 = tpu.memref_squeeze %118 : memref<1x128xf32, #tpu.memory_space<any>> -> memref<128xf32, #tpu.memory_space<any>>
      %c0_i32_135 = arith.constant 0 : i32
      %120 = tpu.memref_slice %arg6[%c1_i32_131, %c0_i32_132, %c0_i32_135] : memref<8x128x128xf32, #tpu.memory_space<vmem>> -> memref<1x1x128xf32, #tpu.memory_space<vmem>>
      %121 = tpu.memref_squeeze %120 : memref<1x1x128xf32, #tpu.memory_space<vmem>> -> memref<128xf32, #tpu.memory_space<vmem>>
      %122 = tpu.memref_slice %arg7[%c1_i32_133] : memref<8x!tpu.dma_semaphore, #tpu.memory_space<semaphore_mem>> -> memref<1x!tpu.dma_semaphore, #tpu.memory_space<semaphore_mem>>
      %123 = tpu.memref_squeeze %122 : memref<1x!tpu.dma_semaphore, #tpu.memory_space<semaphore_mem>> -> memref<!tpu.dma_semaphore, #tpu.memory_space<semaphore_mem>>
      tpu.wait_dma2 semaphore(%123 : memref<!tpu.dma_semaphore, #tpu.memory_space<semaphore_mem>>) src(%119 : memref<128xf32, #tpu.memory_space<any>>) dst(%121 : memref<128xf32, #tpu.memory_space<vmem>>)
      %c0_i32_136 = arith.constant 0 : i32
      %c1_i32_137 = arith.constant 1 : i32
      %c0_i32_138 = arith.constant 0 : i32
      %c1_i32_139 = arith.constant 1 : i32
      %c0_i32_140 = arith.constant 0 : i32
      %124 = tpu.memref_slice %arg3[%c0_i32_136, %c0_i32_140] : memref<256x128xf32, #tpu.memory_space<any>> -> memref<1x128xf32, #tpu.memory_space<any>>
      %125 = tpu.memref_squeeze %124 : memref<1x128xf32, #tpu.memory_space<any>> -> memref<128xf32, #tpu.memory_space<any>>
      %c0_i32_141 = arith.constant 0 : i32
      %126 = tpu.memref_slice %arg6[%c1_i32_137, %c0_i32_138, %c0_i32_141] : memref<8x128x128xf32, #tpu.memory_space<vmem>> -> memref<1x1x128xf32, #tpu.memory_space<vmem>>
      %127 = tpu.memref_squeeze %126 : memref<1x1x128xf32, #tpu.memory_space<vmem>> -> memref<128xf32, #tpu.memory_space<vmem>>
      %128 = tpu.memref_slice %arg7[%c1_i32_139] : memref<8x!tpu.dma_semaphore, #tpu.memory_space<semaphore_mem>> -> memref<1x!tpu.dma_semaphore, #tpu.memory_space<semaphore_mem>>
      %129 = tpu.memref_squeeze %128 : memref<1x!tpu.dma_semaphore, #tpu.memory_space<semaphore_mem>> -> memref<!tpu.dma_semaphore, #tpu.memory_space<semaphore_mem>>
      tpu.wait_dma2 semaphore(%129 : memref<!tpu.dma_semaphore, #tpu.memory_space<semaphore_mem>>) src(%125 : memref<128xf32, #tpu.memory_space<any>>) dst(%127 : memref<128xf32, #tpu.memory_space<vmem>>)
      %c0_i32_142 = arith.constant 0 : i32
      %c1_i32_143 = arith.constant 1 : i32
      %c0_i32_144 = arith.constant 0 : i32
      %c1_i32_145 = arith.constant 1 : i32
      %c0_i32_146 = arith.constant 0 : i32
      %130 = tpu.memref_slice %arg3[%c0_i32_142, %c0_i32_146] : memref<256x128xf32, #tpu.memory_space<any>> -> memref<1x128xf32, #tpu.memory_space<any>>
      %131 = tpu.memref_squeeze %130 : memref<1x128xf32, #tpu.memory_space<any>> -> memref<128xf32, #tpu.memory_space<any>>
      %c0_i32_147 = arith.constant 0 : i32
      %132 = tpu.memref_slice %arg6[%c1_i32_143, %c0_i32_144, %c0_i32_147] : memref<8x128x128xf32, #tpu.memory_space<vmem>> -> memref<1x1x128xf32, #tpu.memory_space<vmem>>
      %133 = tpu.memref_squeeze %132 : memref<1x1x128xf32, #tpu.memory_space<vmem>> -> memref<128xf32, #tpu.memory_space<vmem>>
      %134 = tpu.memref_slice %arg7[%c1_i32_145] : memref<8x!tpu.dma_semaphore, #tpu.memory_space<semaphore_mem>> -> memref<1x!tpu.dma_semaphore, #tpu.memory_space<semaphore_mem>>
      %135 = tpu.memref_squeeze %134 : memref<1x!tpu.dma_semaphore, #tpu.memory_space<semaphore_mem>> -> memref<!tpu.dma_semaphore, #tpu.memory_space<semaphore_mem>>
      tpu.wait_dma2 semaphore(%135 : memref<!tpu.dma_semaphore, #tpu.memory_space<semaphore_mem>>) src(%131 : memref<128xf32, #tpu.memory_space<any>>) dst(%133 : memref<128xf32, #tpu.memory_space<vmem>>)
      %c0_i32_148 = arith.constant 0 : i32
      %c1_i32_149 = arith.constant 1 : i32
      %c0_i32_150 = arith.constant 0 : i32
      %c1_i32_151 = arith.constant 1 : i32
      %c0_i32_152 = arith.constant 0 : i32
      %136 = tpu.memref_slice %arg3[%c0_i32_148, %c0_i32_152] : memref<256x128xf32, #tpu.memory_space<any>> -> memref<1x128xf32, #tpu.memory_space<any>>
      %137 = tpu.memref_squeeze %136 : memref<1x128xf32, #tpu.memory_space<any>> -> memref<128xf32, #tpu.memory_space<any>>
      %c0_i32_153 = arith.constant 0 : i32
      %138 = tpu.memref_slice %arg6[%c1_i32_149, %c0_i32_150, %c0_i32_153] : memref<8x128x128xf32, #tpu.memory_space<vmem>> -> memref<1x1x128xf32, #tpu.memory_space<vmem>>
      %139 = tpu.memref_squeeze %138 : memref<1x1x128xf32, #tpu.memory_space<vmem>> -> memref<128xf32, #tpu.memory_space<vmem>>
      %140 = tpu.memref_slice %arg7[%c1_i32_151] : memref<8x!tpu.dma_semaphore, #tpu.memory_space<semaphore_mem>> -> memref<1x!tpu.dma_semaphore, #tpu.memory_space<semaphore_mem>>
      %141 = tpu.memref_squeeze %140 : memref<1x!tpu.dma_semaphore, #tpu.memory_space<semaphore_mem>> -> memref<!tpu.dma_semaphore, #tpu.memory_space<semaphore_mem>>
      tpu.wait_dma2 semaphore(%141 : memref<!tpu.dma_semaphore, #tpu.memory_space<semaphore_mem>>) src(%137 : memref<128xf32, #tpu.memory_space<any>>) dst(%139 : memref<128xf32, #tpu.memory_space<vmem>>)
      %c0_i32_154 = arith.constant 0 : i32
      %c1_i32_155 = arith.constant 1 : i32
      %c0_i32_156 = arith.constant 0 : i32
      %c1_i32_157 = arith.constant 1 : i32
      %c0_i32_158 = arith.constant 0 : i32
      %142 = tpu.memref_slice %arg3[%c0_i32_154, %c0_i32_158] : memref<256x128xf32, #tpu.memory_space<any>> -> memref<1x128xf32, #tpu.memory_space<any>>
      %143 = tpu.memref_squeeze %142 : memref<1x128xf32, #tpu.memory_space<any>> -> memref<128xf32, #tpu.memory_space<any>>
      %c0_i32_159 = arith.constant 0 : i32
      %144 = tpu.memref_slice %arg6[%c1_i32_155, %c0_i32_156, %c0_i32_159] : memref<8x128x128xf32, #tpu.memory_space<vmem>> -> memref<1x1x128xf32, #tpu.memory_space<vmem>>
      %145 = tpu.memref_squeeze %144 : memref<1x1x128xf32, #tpu.memory_space<vmem>> -> memref<128xf32, #tpu.memory_space<vmem>>
      %146 = tpu.memref_slice %arg7[%c1_i32_157] : memref<8x!tpu.dma_semaphore, #tpu.memory_space<semaphore_mem>> -> memref<1x!tpu.dma_semaphore, #tpu.memory_space<semaphore_mem>>
      %147 = tpu.memref_squeeze %146 : memref<1x!tpu.dma_semaphore, #tpu.memory_space<semaphore_mem>> -> memref<!tpu.dma_semaphore, #tpu.memory_space<semaphore_mem>>
      tpu.wait_dma2 semaphore(%147 : memref<!tpu.dma_semaphore, #tpu.memory_space<semaphore_mem>>) src(%143 : memref<128xf32, #tpu.memory_space<any>>) dst(%145 : memref<128xf32, #tpu.memory_space<vmem>>)
      %c0_i32_160 = arith.constant 0 : i32
      %c1_i32_161 = arith.constant 1 : i32
      %c0_i32_162 = arith.constant 0 : i32
      %c1_i32_163 = arith.constant 1 : i32
      %c0_i32_164 = arith.constant 0 : i32
      %148 = tpu.memref_slice %arg3[%c0_i32_160, %c0_i32_164] : memref<256x128xf32, #tpu.memory_space<any>> -> memref<1x128xf32, #tpu.memory_space<any>>
      %149 = tpu.memref_squeeze %148 : memref<1x128xf32, #tpu.memory_space<any>> -> memref<128xf32, #tpu.memory_space<any>>
      %c0_i32_165 = arith.constant 0 : i32
      %150 = tpu.memref_slice %arg6[%c1_i32_161, %c0_i32_162, %c0_i32_165] : memref<8x128x128xf32, #tpu.memory_space<vmem>> -> memref<1x1x128xf32, #tpu.memory_space<vmem>>
      %151 = tpu.memref_squeeze %150 : memref<1x1x128xf32, #tpu.memory_space<vmem>> -> memref<128xf32, #tpu.memory_space<vmem>>
      %152 = tpu.memref_slice %arg7[%c1_i32_163] : memref<8x!tpu.dma_semaphore, #tpu.memory_space<semaphore_mem>> -> memref<1x!tpu.dma_semaphore, #tpu.memory_space<semaphore_mem>>
      %153 = tpu.memref_squeeze %152 : memref<1x!tpu.dma_semaphore, #tpu.memory_space<semaphore_mem>> -> memref<!tpu.dma_semaphore, #tpu.memory_space<semaphore_mem>>
      tpu.wait_dma2 semaphore(%153 : memref<!tpu.dma_semaphore, #tpu.memory_space<semaphore_mem>>) src(%149 : memref<128xf32, #tpu.memory_space<any>>) dst(%151 : memref<128xf32, #tpu.memory_space<vmem>>)
    }
    %c1 = arith.constant 1 : index
    %c0_44 = arith.constant 0 : index
    %c0_45 = arith.constant 0 : index
    %30 = vector.load %arg6[%c1, %c0_44, %c0_45] : memref<8x128x128xf32, #tpu.memory_space<vmem>>, vector<1x128x128xf32>
    %c1_46 = arith.constant 1 : index
    %c0_47 = arith.constant 0 : index
    %31 = vector.load %arg4[%c1_46, %c0_47] : memref<8x128xf32, #tpu.memory_space<vmem>>, vector<1x128xf32>
    %32 = vector.shape_cast %31 : vector<1x128xf32> to vector<1x1x128xf32>
    %33 = vector.broadcast %32 : vector<1x1x128xf32> to vector<1x128x128xf32>
    %34 = arith.mulf %30, %33 : vector<1x128x128xf32>
    %cst_48 = arith.constant dense<0.000000e+00> : vector<1x128xf32>
    %35 = vector.multi_reduction <add>, %34, %cst_48 [2] : vector<1x128x128xf32> to vector<1x128xf32>
    %cst_49 = arith.constant 14.2857141 : f32
    %36 = vector.broadcast %cst_49 : f32 to vector<1x128xf32>
    %37 = arith.mulf %35, %36 : vector<1x128xf32>
    %38 = math.exp %37 : vector<1x128xf32>
    %c1_50 = arith.constant 1 : index
    %c0_51 = arith.constant 0 : index
    %39 = vector.load %arg5[%c1_50, %c0_51] : memref<8x128xf32, #tpu.memory_space<vmem>>, vector<1x128xf32>
    tpu.vector_store %arg5[%c1_50, %c0_51], %38 {strides = array<i32>} : memref<8x128xf32, #tpu.memory_space<vmem>>, vector<1x128xf32>,
    %c0_i32_52 = arith.constant 0 : i32
    %c16_i32_53 = arith.constant 16 : i32
    %40 = arith.addi %c0_i32_52, %c16_i32_53 : i32
    %c1_i32_54 = arith.constant 1 : i32
    scf.for %arg8 = %c0_i32_52 to %40 step %c1_i32_54  : i32 {
      %c0_i32_118 = arith.constant 0 : i32
      %c2_i32_119 = arith.constant 2 : i32
      %c0_i32_120 = arith.constant 0 : i32
      %c2_i32_121 = arith.constant 2 : i32
      %c0_i32_122 = arith.constant 0 : i32
      %106 = tpu.memref_slice %arg3[%c0_i32_118, %c0_i32_122] : memref<256x128xf32, #tpu.memory_space<any>> -> memref<1x128xf32, #tpu.memory_space<any>>
      %107 = tpu.memref_squeeze %106 : memref<1x128xf32, #tpu.memory_space<any>> -> memref<128xf32, #tpu.memory_space<any>>
      %c0_i32_123 = arith.constant 0 : i32
      %108 = tpu.memref_slice %arg6[%c2_i32_119, %c0_i32_120, %c0_i32_123] : memref<8x128x128xf32, #tpu.memory_space<vmem>> -> memref<1x1x128xf32, #tpu.memory_space<vmem>>
      %109 = tpu.memref_squeeze %108 : memref<1x1x128xf32, #tpu.memory_space<vmem>> -> memref<128xf32, #tpu.memory_space<vmem>>
      %110 = tpu.memref_slice %arg7[%c2_i32_121] : memref<8x!tpu.dma_semaphore, #tpu.memory_space<semaphore_mem>> -> memref<1x!tpu.dma_semaphore, #tpu.memory_space<semaphore_mem>>
      %111 = tpu.memref_squeeze %110 : memref<1x!tpu.dma_semaphore, #tpu.memory_space<semaphore_mem>> -> memref<!tpu.dma_semaphore, #tpu.memory_space<semaphore_mem>>
      tpu.wait_dma2 semaphore(%111 : memref<!tpu.dma_semaphore, #tpu.memory_space<semaphore_mem>>) src(%107 : memref<128xf32, #tpu.memory_space<any>>) dst(%109 : memref<128xf32, #tpu.memory_space<vmem>>)
      %c0_i32_124 = arith.constant 0 : i32
      %c2_i32_125 = arith.constant 2 : i32
      %c0_i32_126 = arith.constant 0 : i32
      %c2_i32_127 = arith.constant 2 : i32
      %c0_i32_128 = arith.constant 0 : i32
      %112 = tpu.memref_slice %arg3[%c0_i32_124, %c0_i32_128] : memref<256x128xf32, #tpu.memory_space<any>> -> memref<1x128xf32, #tpu.memory_space<any>>
      %113 = tpu.memref_squeeze %112 : memref<1x128xf32, #tpu.memory_space<any>> -> memref<128xf32, #tpu.memory_space<any>>
      %c0_i32_129 = arith.constant 0 : i32
      %114 = tpu.memref_slice %arg6[%c2_i32_125, %c0_i32_126, %c0_i32_129] : memref<8x128x128xf32, #tpu.memory_space<vmem>> -> memref<1x1x128xf32, #tpu.memory_space<vmem>>
      %115 = tpu.memref_squeeze %114 : memref<1x1x128xf32, #tpu.memory_space<vmem>> -> memref<128xf32, #tpu.memory_space<vmem>>
      %116 = tpu.memref_slice %arg7[%c2_i32_127] : memref<8x!tpu.dma_semaphore, #tpu.memory_space<semaphore_mem>> -> memref<1x!tpu.dma_semaphore, #tpu.memory_space<semaphore_mem>>
      %117 = tpu.memref_squeeze %116 : memref<1x!tpu.dma_semaphore, #tpu.memory_space<semaphore_mem>> -> memref<!tpu.dma_semaphore, #tpu.memory_space<semaphore_mem>>
      tpu.wait_dma2 semaphore(%117 : memref<!tpu.dma_semaphore, #tpu.memory_space<semaphore_mem>>) src(%113 : memref<128xf32, #tpu.memory_space<any>>) dst(%115 : memref<128xf32, #tpu.memory_space<vmem>>)
      %c0_i32_130 = arith.constant 0 : i32
      %c2_i32_131 = arith.constant 2 : i32
      %c0_i32_132 = arith.constant 0 : i32
      %c2_i32_133 = arith.constant 2 : i32
      %c0_i32_134 = arith.constant 0 : i32
      %118 = tpu.memref_slice %arg3[%c0_i32_130, %c0_i32_134] : memref<256x128xf32, #tpu.memory_space<any>> -> memref<1x128xf32, #tpu.memory_space<any>>
      %119 = tpu.memref_squeeze %118 : memref<1x128xf32, #tpu.memory_space<any>> -> memref<128xf32, #tpu.memory_space<any>>
      %c0_i32_135 = arith.constant 0 : i32
      %120 = tpu.memref_slice %arg6[%c2_i32_131, %c0_i32_132, %c0_i32_135] : memref<8x128x128xf32, #tpu.memory_space<vmem>> -> memref<1x1x128xf32, #tpu.memory_space<vmem>>
      %121 = tpu.memref_squeeze %120 : memref<1x1x128xf32, #tpu.memory_space<vmem>> -> memref<128xf32, #tpu.memory_space<vmem>>
      %122 = tpu.memref_slice %arg7[%c2_i32_133] : memref<8x!tpu.dma_semaphore, #tpu.memory_space<semaphore_mem>> -> memref<1x!tpu.dma_semaphore, #tpu.memory_space<semaphore_mem>>
      %123 = tpu.memref_squeeze %122 : memref<1x!tpu.dma_semaphore, #tpu.memory_space<semaphore_mem>> -> memref<!tpu.dma_semaphore, #tpu.memory_space<semaphore_mem>>
      tpu.wait_dma2 semaphore(%123 : memref<!tpu.dma_semaphore, #tpu.memory_space<semaphore_mem>>) src(%119 : memref<128xf32, #tpu.memory_space<any>>) dst(%121 : memref<128xf32, #tpu.memory_space<vmem>>)
      %c0_i32_136 = arith.constant 0 : i32
      %c2_i32_137 = arith.constant 2 : i32
      %c0_i32_138 = arith.constant 0 : i32
      %c2_i32_139 = arith.constant 2 : i32
      %c0_i32_140 = arith.constant 0 : i32
      %124 = tpu.memref_slice %arg3[%c0_i32_136, %c0_i32_140] : memref<256x128xf32, #tpu.memory_space<any>> -> memref<1x128xf32, #tpu.memory_space<any>>
      %125 = tpu.memref_squeeze %124 : memref<1x128xf32, #tpu.memory_space<any>> -> memref<128xf32, #tpu.memory_space<any>>
      %c0_i32_141 = arith.constant 0 : i32
      %126 = tpu.memref_slice %arg6[%c2_i32_137, %c0_i32_138, %c0_i32_141] : memref<8x128x128xf32, #tpu.memory_space<vmem>> -> memref<1x1x128xf32, #tpu.memory_space<vmem>>
      %127 = tpu.memref_squeeze %126 : memref<1x1x128xf32, #tpu.memory_space<vmem>> -> memref<128xf32, #tpu.memory_space<vmem>>
      %128 = tpu.memref_slice %arg7[%c2_i32_139] : memref<8x!tpu.dma_semaphore, #tpu.memory_space<semaphore_mem>> -> memref<1x!tpu.dma_semaphore, #tpu.memory_space<semaphore_mem>>
      %129 = tpu.memref_squeeze %128 : memref<1x!tpu.dma_semaphore, #tpu.memory_space<semaphore_mem>> -> memref<!tpu.dma_semaphore, #tpu.memory_space<semaphore_mem>>
      tpu.wait_dma2 semaphore(%129 : memref<!tpu.dma_semaphore, #tpu.memory_space<semaphore_mem>>) src(%125 : memref<128xf32, #tpu.memory_space<any>>) dst(%127 : memref<128xf32, #tpu.memory_space<vmem>>)
      %c0_i32_142 = arith.constant 0 : i32
      %c2_i32_143 = arith.constant 2 : i32
      %c0_i32_144 = arith.constant 0 : i32
      %c2_i32_145 = arith.constant 2 : i32
      %c0_i32_146 = arith.constant 0 : i32
      %130 = tpu.memref_slice %arg3[%c0_i32_142, %c0_i32_146] : memref<256x128xf32, #tpu.memory_space<any>> -> memref<1x128xf32, #tpu.memory_space<any>>
      %131 = tpu.memref_squeeze %130 : memref<1x128xf32, #tpu.memory_space<any>> -> memref<128xf32, #tpu.memory_space<any>>
      %c0_i32_147 = arith.constant 0 : i32
      %132 = tpu.memref_slice %arg6[%c2_i32_143, %c0_i32_144, %c0_i32_147] : memref<8x128x128xf32, #tpu.memory_space<vmem>> -> memref<1x1x128xf32, #tpu.memory_space<vmem>>
      %133 = tpu.memref_squeeze %132 : memref<1x1x128xf32, #tpu.memory_space<vmem>> -> memref<128xf32, #tpu.memory_space<vmem>>
      %134 = tpu.memref_slice %arg7[%c2_i32_145] : memref<8x!tpu.dma_semaphore, #tpu.memory_space<semaphore_mem>> -> memref<1x!tpu.dma_semaphore, #tpu.memory_space<semaphore_mem>>
      %135 = tpu.memref_squeeze %134 : memref<1x!tpu.dma_semaphore, #tpu.memory_space<semaphore_mem>> -> memref<!tpu.dma_semaphore, #tpu.memory_space<semaphore_mem>>
      tpu.wait_dma2 semaphore(%135 : memref<!tpu.dma_semaphore, #tpu.memory_space<semaphore_mem>>) src(%131 : memref<128xf32, #tpu.memory_space<any>>) dst(%133 : memref<128xf32, #tpu.memory_space<vmem>>)
      %c0_i32_148 = arith.constant 0 : i32
      %c2_i32_149 = arith.constant 2 : i32
      %c0_i32_150 = arith.constant 0 : i32
      %c2_i32_151 = arith.constant 2 : i32
      %c0_i32_152 = arith.constant 0 : i32
      %136 = tpu.memref_slice %arg3[%c0_i32_148, %c0_i32_152] : memref<256x128xf32, #tpu.memory_space<any>> -> memref<1x128xf32, #tpu.memory_space<any>>
      %137 = tpu.memref_squeeze %136 : memref<1x128xf32, #tpu.memory_space<any>> -> memref<128xf32, #tpu.memory_space<any>>
      %c0_i32_153 = arith.constant 0 : i32
      %138 = tpu.memref_slice %arg6[%c2_i32_149, %c0_i32_150, %c0_i32_153] : memref<8x128x128xf32, #tpu.memory_space<vmem>> -> memref<1x1x128xf32, #tpu.memory_space<vmem>>
      %139 = tpu.memref_squeeze %138 : memref<1x1x128xf32, #tpu.memory_space<vmem>> -> memref<128xf32, #tpu.memory_space<vmem>>
      %140 = tpu.memref_slice %arg7[%c2_i32_151] : memref<8x!tpu.dma_semaphore, #tpu.memory_space<semaphore_mem>> -> memref<1x!tpu.dma_semaphore, #tpu.memory_space<semaphore_mem>>
      %141 = tpu.memref_squeeze %140 : memref<1x!tpu.dma_semaphore, #tpu.memory_space<semaphore_mem>> -> memref<!tpu.dma_semaphore, #tpu.memory_space<semaphore_mem>>
      tpu.wait_dma2 semaphore(%141 : memref<!tpu.dma_semaphore, #tpu.memory_space<semaphore_mem>>) src(%137 : memref<128xf32, #tpu.memory_space<any>>) dst(%139 : memref<128xf32, #tpu.memory_space<vmem>>)
      %c0_i32_154 = arith.constant 0 : i32
      %c2_i32_155 = arith.constant 2 : i32
      %c0_i32_156 = arith.constant 0 : i32
      %c2_i32_157 = arith.constant 2 : i32
      %c0_i32_158 = arith.constant 0 : i32
      %142 = tpu.memref_slice %arg3[%c0_i32_154, %c0_i32_158] : memref<256x128xf32, #tpu.memory_space<any>> -> memref<1x128xf32, #tpu.memory_space<any>>
      %143 = tpu.memref_squeeze %142 : memref<1x128xf32, #tpu.memory_space<any>> -> memref<128xf32, #tpu.memory_space<any>>
      %c0_i32_159 = arith.constant 0 : i32
      %144 = tpu.memref_slice %arg6[%c2_i32_155, %c0_i32_156, %c0_i32_159] : memref<8x128x128xf32, #tpu.memory_space<vmem>> -> memref<1x1x128xf32, #tpu.memory_space<vmem>>
      %145 = tpu.memref_squeeze %144 : memref<1x1x128xf32, #tpu.memory_space<vmem>> -> memref<128xf32, #tpu.memory_space<vmem>>
      %146 = tpu.memref_slice %arg7[%c2_i32_157] : memref<8x!tpu.dma_semaphore, #tpu.memory_space<semaphore_mem>> -> memref<1x!tpu.dma_semaphore, #tpu.memory_space<semaphore_mem>>
      %147 = tpu.memref_squeeze %146 : memref<1x!tpu.dma_semaphore, #tpu.memory_space<semaphore_mem>> -> memref<!tpu.dma_semaphore, #tpu.memory_space<semaphore_mem>>
      tpu.wait_dma2 semaphore(%147 : memref<!tpu.dma_semaphore, #tpu.memory_space<semaphore_mem>>) src(%143 : memref<128xf32, #tpu.memory_space<any>>) dst(%145 : memref<128xf32, #tpu.memory_space<vmem>>)
      %c0_i32_160 = arith.constant 0 : i32
      %c2_i32_161 = arith.constant 2 : i32
      %c0_i32_162 = arith.constant 0 : i32
      %c2_i32_163 = arith.constant 2 : i32
      %c0_i32_164 = arith.constant 0 : i32
      %148 = tpu.memref_slice %arg3[%c0_i32_160, %c0_i32_164] : memref<256x128xf32, #tpu.memory_space<any>> -> memref<1x128xf32, #tpu.memory_space<any>>
      %149 = tpu.memref_squeeze %148 : memref<1x128xf32, #tpu.memory_space<any>> -> memref<128xf32, #tpu.memory_space<any>>
      %c0_i32_165 = arith.constant 0 : i32
      %150 = tpu.memref_slice %arg6[%c2_i32_161, %c0_i32_162, %c0_i32_165] : memref<8x128x128xf32, #tpu.memory_space<vmem>> -> memref<1x1x128xf32, #tpu.memory_space<vmem>>
      %151 = tpu.memref_squeeze %150 : memref<1x1x128xf32, #tpu.memory_space<vmem>> -> memref<128xf32, #tpu.memory_space<vmem>>
      %152 = tpu.memref_slice %arg7[%c2_i32_163] : memref<8x!tpu.dma_semaphore, #tpu.memory_space<semaphore_mem>> -> memref<1x!tpu.dma_semaphore, #tpu.memory_space<semaphore_mem>>
      %153 = tpu.memref_squeeze %152 : memref<1x!tpu.dma_semaphore, #tpu.memory_space<semaphore_mem>> -> memref<!tpu.dma_semaphore, #tpu.memory_space<semaphore_mem>>
      tpu.wait_dma2 semaphore(%153 : memref<!tpu.dma_semaphore, #tpu.memory_space<semaphore_mem>>) src(%149 : memref<128xf32, #tpu.memory_space<any>>) dst(%151 : memref<128xf32, #tpu.memory_space<vmem>>)
    }
    %c2 = arith.constant 2 : index
    %c0_55 = arith.constant 0 : index
    %c0_56 = arith.constant 0 : index
    %41 = vector.load %arg6[%c2, %c0_55, %c0_56] : memref<8x128x128xf32, #tpu.memory_space<vmem>>, vector<1x128x128xf32>
    %c2_57 = arith.constant 2 : index
    %c0_58 = arith.constant 0 : index
    %42 = vector.load %arg4[%c2_57, %c0_58] : memref<8x128xf32, #tpu.memory_space<vmem>>, vector<1x128xf32>
    %43 = vector.shape_cast %42 : vector<1x128xf32> to vector<1x1x128xf32>
    %44 = vector.broadcast %43 : vector<1x1x128xf32> to vector<1x128x128xf32>
    %45 = arith.mulf %41, %44 : vector<1x128x128xf32>
    %cst_59 = arith.constant dense<0.000000e+00> : vector<1x128xf32>
    %46 = vector.multi_reduction <add>, %45, %cst_59 [2] : vector<1x128x128xf32> to vector<1x128xf32>
    %cst_60 = arith.constant 14.2857141 : f32
    %47 = vector.broadcast %cst_60 : f32 to vector<1x128xf32>
    %48 = arith.mulf %46, %47 : vector<1x128xf32>
    %49 = math.exp %48 : vector<1x128xf32>
    %c2_61 = arith.constant 2 : index
    %c0_62 = arith.constant 0 : index
    %50 = vector.load %arg5[%c2_61, %c0_62] : memref<8x128xf32, #tpu.memory_space<vmem>>, vector<1x128xf32>
    tpu.vector_store %arg5[%c2_61, %c0_62], %49 {strides = array<i32>} : memref<8x128xf32, #tpu.memory_space<vmem>>, vector<1x128xf32>,
    %c0_i32_63 = arith.constant 0 : i32
    %c16_i32_64 = arith.constant 16 : i32
    %51 = arith.addi %c0_i32_63, %c16_i32_64 : i32
    %c1_i32_65 = arith.constant 1 : i32
    scf.for %arg8 = %c0_i32_63 to %51 step %c1_i32_65  : i32 {
      %c0_i32_118 = arith.constant 0 : i32
      %c3_i32_119 = arith.constant 3 : i32
      %c0_i32_120 = arith.constant 0 : i32
      %c3_i32_121 = arith.constant 3 : i32
      %c0_i32_122 = arith.constant 0 : i32
      %106 = tpu.memref_slice %arg3[%c0_i32_118, %c0_i32_122] : memref<256x128xf32, #tpu.memory_space<any>> -> memref<1x128xf32, #tpu.memory_space<any>>
      %107 = tpu.memref_squeeze %106 : memref<1x128xf32, #tpu.memory_space<any>> -> memref<128xf32, #tpu.memory_space<any>>
      %c0_i32_123 = arith.constant 0 : i32
      %108 = tpu.memref_slice %arg6[%c3_i32_119, %c0_i32_120, %c0_i32_123] : memref<8x128x128xf32, #tpu.memory_space<vmem>> -> memref<1x1x128xf32, #tpu.memory_space<vmem>>
      %109 = tpu.memref_squeeze %108 : memref<1x1x128xf32, #tpu.memory_space<vmem>> -> memref<128xf32, #tpu.memory_space<vmem>>
      %110 = tpu.memref_slice %arg7[%c3_i32_121] : memref<8x!tpu.dma_semaphore, #tpu.memory_space<semaphore_mem>> -> memref<1x!tpu.dma_semaphore, #tpu.memory_space<semaphore_mem>>
      %111 = tpu.memref_squeeze %110 : memref<1x!tpu.dma_semaphore, #tpu.memory_space<semaphore_mem>> -> memref<!tpu.dma_semaphore, #tpu.memory_space<semaphore_mem>>
      tpu.wait_dma2 semaphore(%111 : memref<!tpu.dma_semaphore, #tpu.memory_space<semaphore_mem>>) src(%107 : memref<128xf32, #tpu.memory_space<any>>) dst(%109 : memref<128xf32, #tpu.memory_space<vmem>>)
      %c0_i32_124 = arith.constant 0 : i32
      %c3_i32_125 = arith.constant 3 : i32
      %c0_i32_126 = arith.constant 0 : i32
      %c3_i32_127 = arith.constant 3 : i32
      %c0_i32_128 = arith.constant 0 : i32
      %112 = tpu.memref_slice %arg3[%c0_i32_124, %c0_i32_128] : memref<256x128xf32, #tpu.memory_space<any>> -> memref<1x128xf32, #tpu.memory_space<any>>
      %113 = tpu.memref_squeeze %112 : memref<1x128xf32, #tpu.memory_space<any>> -> memref<128xf32, #tpu.memory_space<any>>
      %c0_i32_129 = arith.constant 0 : i32
      %114 = tpu.memref_slice %arg6[%c3_i32_125, %c0_i32_126, %c0_i32_129] : memref<8x128x128xf32, #tpu.memory_space<vmem>> -> memref<1x1x128xf32, #tpu.memory_space<vmem>>
      %115 = tpu.memref_squeeze %114 : memref<1x1x128xf32, #tpu.memory_space<vmem>> -> memref<128xf32, #tpu.memory_space<vmem>>
      %116 = tpu.memref_slice %arg7[%c3_i32_127] : memref<8x!tpu.dma_semaphore, #tpu.memory_space<semaphore_mem>> -> memref<1x!tpu.dma_semaphore, #tpu.memory_space<semaphore_mem>>
      %117 = tpu.memref_squeeze %116 : memref<1x!tpu.dma_semaphore, #tpu.memory_space<semaphore_mem>> -> memref<!tpu.dma_semaphore, #tpu.memory_space<semaphore_mem>>
      tpu.wait_dma2 semaphore(%117 : memref<!tpu.dma_semaphore, #tpu.memory_space<semaphore_mem>>) src(%113 : memref<128xf32, #tpu.memory_space<any>>) dst(%115 : memref<128xf32, #tpu.memory_space<vmem>>)
      %c0_i32_130 = arith.constant 0 : i32
      %c3_i32_131 = arith.constant 3 : i32
      %c0_i32_132 = arith.constant 0 : i32
      %c3_i32_133 = arith.constant 3 : i32
      %c0_i32_134 = arith.constant 0 : i32
      %118 = tpu.memref_slice %arg3[%c0_i32_130, %c0_i32_134] : memref<256x128xf32, #tpu.memory_space<any>> -> memref<1x128xf32, #tpu.memory_space<any>>
      %119 = tpu.memref_squeeze %118 : memref<1x128xf32, #tpu.memory_space<any>> -> memref<128xf32, #tpu.memory_space<any>>
      %c0_i32_135 = arith.constant 0 : i32
      %120 = tpu.memref_slice %arg6[%c3_i32_131, %c0_i32_132, %c0_i32_135] : memref<8x128x128xf32, #tpu.memory_space<vmem>> -> memref<1x1x128xf32, #tpu.memory_space<vmem>>
      %121 = tpu.memref_squeeze %120 : memref<1x1x128xf32, #tpu.memory_space<vmem>> -> memref<128xf32, #tpu.memory_space<vmem>>
      %122 = tpu.memref_slice %arg7[%c3_i32_133] : memref<8x!tpu.dma_semaphore, #tpu.memory_space<semaphore_mem>> -> memref<1x!tpu.dma_semaphore, #tpu.memory_space<semaphore_mem>>
      %123 = tpu.memref_squeeze %122 : memref<1x!tpu.dma_semaphore, #tpu.memory_space<semaphore_mem>> -> memref<!tpu.dma_semaphore, #tpu.memory_space<semaphore_mem>>
      tpu.wait_dma2 semaphore(%123 : memref<!tpu.dma_semaphore, #tpu.memory_space<semaphore_mem>>) src(%119 : memref<128xf32, #tpu.memory_space<any>>) dst(%121 : memref<128xf32, #tpu.memory_space<vmem>>)
      %c0_i32_136 = arith.constant 0 : i32
      %c3_i32_137 = arith.constant 3 : i32
      %c0_i32_138 = arith.constant 0 : i32
      %c3_i32_139 = arith.constant 3 : i32
      %c0_i32_140 = arith.constant 0 : i32
      %124 = tpu.memref_slice %arg3[%c0_i32_136, %c0_i32_140] : memref<256x128xf32, #tpu.memory_space<any>> -> memref<1x128xf32, #tpu.memory_space<any>>
      %125 = tpu.memref_squeeze %124 : memref<1x128xf32, #tpu.memory_space<any>> -> memref<128xf32, #tpu.memory_space<any>>
      %c0_i32_141 = arith.constant 0 : i32
      %126 = tpu.memref_slice %arg6[%c3_i32_137, %c0_i32_138, %c0_i32_141] : memref<8x128x128xf32, #tpu.memory_space<vmem>> -> memref<1x1x128xf32, #tpu.memory_space<vmem>>
      %127 = tpu.memref_squeeze %126 : memref<1x1x128xf32, #tpu.memory_space<vmem>> -> memref<128xf32, #tpu.memory_space<vmem>>
      %128 = tpu.memref_slice %arg7[%c3_i32_139] : memref<8x!tpu.dma_semaphore, #tpu.memory_space<semaphore_mem>> -> memref<1x!tpu.dma_semaphore, #tpu.memory_space<semaphore_mem>>
      %129 = tpu.memref_squeeze %128 : memref<1x!tpu.dma_semaphore, #tpu.memory_space<semaphore_mem>> -> memref<!tpu.dma_semaphore, #tpu.memory_space<semaphore_mem>>
      tpu.wait_dma2 semaphore(%129 : memref<!tpu.dma_semaphore, #tpu.memory_space<semaphore_mem>>) src(%125 : memref<128xf32, #tpu.memory_space<any>>) dst(%127 : memref<128xf32, #tpu.memory_space<vmem>>)
      %c0_i32_142 = arith.constant 0 : i32
      %c3_i32_143 = arith.constant 3 : i32
      %c0_i32_144 = arith.constant 0 : i32
      %c3_i32_145 = arith.constant 3 : i32
      %c0_i32_146 = arith.constant 0 : i32
      %130 = tpu.memref_slice %arg3[%c0_i32_142, %c0_i32_146] : memref<256x128xf32, #tpu.memory_space<any>> -> memref<1x128xf32, #tpu.memory_space<any>>
      %131 = tpu.memref_squeeze %130 : memref<1x128xf32, #tpu.memory_space<any>> -> memref<128xf32, #tpu.memory_space<any>>
      %c0_i32_147 = arith.constant 0 : i32
      %132 = tpu.memref_slice %arg6[%c3_i32_143, %c0_i32_144, %c0_i32_147] : memref<8x128x128xf32, #tpu.memory_space<vmem>> -> memref<1x1x128xf32, #tpu.memory_space<vmem>>
      %133 = tpu.memref_squeeze %132 : memref<1x1x128xf32, #tpu.memory_space<vmem>> -> memref<128xf32, #tpu.memory_space<vmem>>
      %134 = tpu.memref_slice %arg7[%c3_i32_145] : memref<8x!tpu.dma_semaphore, #tpu.memory_space<semaphore_mem>> -> memref<1x!tpu.dma_semaphore, #tpu.memory_space<semaphore_mem>>
      %135 = tpu.memref_squeeze %134 : memref<1x!tpu.dma_semaphore, #tpu.memory_space<semaphore_mem>> -> memref<!tpu.dma_semaphore, #tpu.memory_space<semaphore_mem>>
      tpu.wait_dma2 semaphore(%135 : memref<!tpu.dma_semaphore, #tpu.memory_space<semaphore_mem>>) src(%131 : memref<128xf32, #tpu.memory_space<any>>) dst(%133 : memref<128xf32, #tpu.memory_space<vmem>>)
      %c0_i32_148 = arith.constant 0 : i32
      %c3_i32_149 = arith.constant 3 : i32
      %c0_i32_150 = arith.constant 0 : i32
      %c3_i32_151 = arith.constant 3 : i32
      %c0_i32_152 = arith.constant 0 : i32
      %136 = tpu.memref_slice %arg3[%c0_i32_148, %c0_i32_152] : memref<256x128xf32, #tpu.memory_space<any>> -> memref<1x128xf32, #tpu.memory_space<any>>
      %137 = tpu.memref_squeeze %136 : memref<1x128xf32, #tpu.memory_space<any>> -> memref<128xf32, #tpu.memory_space<any>>
      %c0_i32_153 = arith.constant 0 : i32
      %138 = tpu.memref_slice %arg6[%c3_i32_149, %c0_i32_150, %c0_i32_153] : memref<8x128x128xf32, #tpu.memory_space<vmem>> -> memref<1x1x128xf32, #tpu.memory_space<vmem>>
      %139 = tpu.memref_squeeze %138 : memref<1x1x128xf32, #tpu.memory_space<vmem>> -> memref<128xf32, #tpu.memory_space<vmem>>
      %140 = tpu.memref_slice %arg7[%c3_i32_151] : memref<8x!tpu.dma_semaphore, #tpu.memory_space<semaphore_mem>> -> memref<1x!tpu.dma_semaphore, #tpu.memory_space<semaphore_mem>>
      %141 = tpu.memref_squeeze %140 : memref<1x!tpu.dma_semaphore, #tpu.memory_space<semaphore_mem>> -> memref<!tpu.dma_semaphore, #tpu.memory_space<semaphore_mem>>
      tpu.wait_dma2 semaphore(%141 : memref<!tpu.dma_semaphore, #tpu.memory_space<semaphore_mem>>) src(%137 : memref<128xf32, #tpu.memory_space<any>>) dst(%139 : memref<128xf32, #tpu.memory_space<vmem>>)
      %c0_i32_154 = arith.constant 0 : i32
      %c3_i32_155 = arith.constant 3 : i32
      %c0_i32_156 = arith.constant 0 : i32
      %c3_i32_157 = arith.constant 3 : i32
      %c0_i32_158 = arith.constant 0 : i32
      %142 = tpu.memref_slice %arg3[%c0_i32_154, %c0_i32_158] : memref<256x128xf32, #tpu.memory_space<any>> -> memref<1x128xf32, #tpu.memory_space<any>>
      %143 = tpu.memref_squeeze %142 : memref<1x128xf32, #tpu.memory_space<any>> -> memref<128xf32, #tpu.memory_space<any>>
      %c0_i32_159 = arith.constant 0 : i32
      %144 = tpu.memref_slice %arg6[%c3_i32_155, %c0_i32_156, %c0_i32_159] : memref<8x128x128xf32, #tpu.memory_space<vmem>> -> memref<1x1x128xf32, #tpu.memory_space<vmem>>
      %145 = tpu.memref_squeeze %144 : memref<1x1x128xf32, #tpu.memory_space<vmem>> -> memref<128xf32, #tpu.memory_space<vmem>>
      %146 = tpu.memref_slice %arg7[%c3_i32_157] : memref<8x!tpu.dma_semaphore, #tpu.memory_space<semaphore_mem>> -> memref<1x!tpu.dma_semaphore, #tpu.memory_space<semaphore_mem>>
      %147 = tpu.memref_squeeze %146 : memref<1x!tpu.dma_semaphore, #tpu.memory_space<semaphore_mem>> -> memref<!tpu.dma_semaphore, #tpu.memory_space<semaphore_mem>>
      tpu.wait_dma2 semaphore(%147 : memref<!tpu.dma_semaphore, #tpu.memory_space<semaphore_mem>>) src(%143 : memref<128xf32, #tpu.memory_space<any>>) dst(%145 : memref<128xf32, #tpu.memory_space<vmem>>)
      %c0_i32_160 = arith.constant 0 : i32
      %c3_i32_161 = arith.constant 3 : i32
      %c0_i32_162 = arith.constant 0 : i32
      %c3_i32_163 = arith.constant 3 : i32
      %c0_i32_164 = arith.constant 0 : i32
      %148 = tpu.memref_slice %arg3[%c0_i32_160, %c0_i32_164] : memref<256x128xf32, #tpu.memory_space<any>> -> memref<1x128xf32, #tpu.memory_space<any>>
      %149 = tpu.memref_squeeze %148 : memref<1x128xf32, #tpu.memory_space<any>> -> memref<128xf32, #tpu.memory_space<any>>
      %c0_i32_165 = arith.constant 0 : i32
      %150 = tpu.memref_slice %arg6[%c3_i32_161, %c0_i32_162, %c0_i32_165] : memref<8x128x128xf32, #tpu.memory_space<vmem>> -> memref<1x1x128xf32, #tpu.memory_space<vmem>>
      %151 = tpu.memref_squeeze %150 : memref<1x1x128xf32, #tpu.memory_space<vmem>> -> memref<128xf32, #tpu.memory_space<vmem>>
      %152 = tpu.memref_slice %arg7[%c3_i32_163] : memref<8x!tpu.dma_semaphore, #tpu.memory_space<semaphore_mem>> -> memref<1x!tpu.dma_semaphore, #tpu.memory_space<semaphore_mem>>
      %153 = tpu.memref_squeeze %152 : memref<1x!tpu.dma_semaphore, #tpu.memory_space<semaphore_mem>> -> memref<!tpu.dma_semaphore, #tpu.memory_space<semaphore_mem>>
      tpu.wait_dma2 semaphore(%153 : memref<!tpu.dma_semaphore, #tpu.memory_space<semaphore_mem>>) src(%149 : memref<128xf32, #tpu.memory_space<any>>) dst(%151 : memref<128xf32, #tpu.memory_space<vmem>>)
    }
    %c3 = arith.constant 3 : index
    %c0_66 = arith.constant 0 : index
    %c0_67 = arith.constant 0 : index
    %52 = vector.load %arg6[%c3, %c0_66, %c0_67] : memref<8x128x128xf32, #tpu.memory_space<vmem>>, vector<1x128x128xf32>
    %c3_68 = arith.constant 3 : index
    %c0_69 = arith.constant 0 : index
    %53 = vector.load %arg4[%c3_68, %c0_69] : memref<8x128xf32, #tpu.memory_space<vmem>>, vector<1x128xf32>
    %54 = vector.shape_cast %53 : vector<1x128xf32> to vector<1x1x128xf32>
    %55 = vector.broadcast %54 : vector<1x1x128xf32> to vector<1x128x128xf32>
    %56 = arith.mulf %52, %55 : vector<1x128x128xf32>
    %cst_70 = arith.constant dense<0.000000e+00> : vector<1x128xf32>
    %57 = vector.multi_reduction <add>, %56, %cst_70 [2] : vector<1x128x128xf32> to vector<1x128xf32>
    %cst_71 = arith.constant 14.2857141 : f32
    %58 = vector.broadcast %cst_71 : f32 to vector<1x128xf32>
    %59 = arith.mulf %57, %58 : vector<1x128xf32>
    %60 = math.exp %59 : vector<1x128xf32>
    %c3_72 = arith.constant 3 : index
    %c0_73 = arith.constant 0 : index
    %61 = vector.load %arg5[%c3_72, %c0_73] : memref<8x128xf32, #tpu.memory_space<vmem>>, vector<1x128xf32>
    tpu.vector_store %arg5[%c3_72, %c0_73], %60 {strides = array<i32>} : memref<8x128xf32, #tpu.memory_space<vmem>>, vector<1x128xf32>,
    %c0_i32_74 = arith.constant 0 : i32
    %c16_i32_75 = arith.constant 16 : i32
    %62 = arith.addi %c0_i32_74, %c16_i32_75 : i32
    %c1_i32_76 = arith.constant 1 : i32
    scf.for %arg8 = %c0_i32_74 to %62 step %c1_i32_76  : i32 {
      %c0_i32_118 = arith.constant 0 : i32
      %c4_i32_119 = arith.constant 4 : i32
      %c0_i32_120 = arith.constant 0 : i32
      %c4_i32_121 = arith.constant 4 : i32
      %c0_i32_122 = arith.constant 0 : i32
      %106 = tpu.memref_slice %arg3[%c0_i32_118, %c0_i32_122] : memref<256x128xf32, #tpu.memory_space<any>> -> memref<1x128xf32, #tpu.memory_space<any>>
      %107 = tpu.memref_squeeze %106 : memref<1x128xf32, #tpu.memory_space<any>> -> memref<128xf32, #tpu.memory_space<any>>
      %c0_i32_123 = arith.constant 0 : i32
      %108 = tpu.memref_slice %arg6[%c4_i32_119, %c0_i32_120, %c0_i32_123] : memref<8x128x128xf32, #tpu.memory_space<vmem>> -> memref<1x1x128xf32, #tpu.memory_space<vmem>>
      %109 = tpu.memref_squeeze %108 : memref<1x1x128xf32, #tpu.memory_space<vmem>> -> memref<128xf32, #tpu.memory_space<vmem>>
      %110 = tpu.memref_slice %arg7[%c4_i32_121] : memref<8x!tpu.dma_semaphore, #tpu.memory_space<semaphore_mem>> -> memref<1x!tpu.dma_semaphore, #tpu.memory_space<semaphore_mem>>
      %111 = tpu.memref_squeeze %110 : memref<1x!tpu.dma_semaphore, #tpu.memory_space<semaphore_mem>> -> memref<!tpu.dma_semaphore, #tpu.memory_space<semaphore_mem>>
      tpu.wait_dma2 semaphore(%111 : memref<!tpu.dma_semaphore, #tpu.memory_space<semaphore_mem>>) src(%107 : memref<128xf32, #tpu.memory_space<any>>) dst(%109 : memref<128xf32, #tpu.memory_space<vmem>>)
      %c0_i32_124 = arith.constant 0 : i32
      %c4_i32_125 = arith.constant 4 : i32
      %c0_i32_126 = arith.constant 0 : i32
      %c4_i32_127 = arith.constant 4 : i32
      %c0_i32_128 = arith.constant 0 : i32
      %112 = tpu.memref_slice %arg3[%c0_i32_124, %c0_i32_128] : memref<256x128xf32, #tpu.memory_space<any>> -> memref<1x128xf32, #tpu.memory_space<any>>
      %113 = tpu.memref_squeeze %112 : memref<1x128xf32, #tpu.memory_space<any>> -> memref<128xf32, #tpu.memory_space<any>>
      %c0_i32_129 = arith.constant 0 : i32
      %114 = tpu.memref_slice %arg6[%c4_i32_125, %c0_i32_126, %c0_i32_129] : memref<8x128x128xf32, #tpu.memory_space<vmem>> -> memref<1x1x128xf32, #tpu.memory_space<vmem>>
      %115 = tpu.memref_squeeze %114 : memref<1x1x128xf32, #tpu.memory_space<vmem>> -> memref<128xf32, #tpu.memory_space<vmem>>
      %116 = tpu.memref_slice %arg7[%c4_i32_127] : memref<8x!tpu.dma_semaphore, #tpu.memory_space<semaphore_mem>> -> memref<1x!tpu.dma_semaphore, #tpu.memory_space<semaphore_mem>>
      %117 = tpu.memref_squeeze %116 : memref<1x!tpu.dma_semaphore, #tpu.memory_space<semaphore_mem>> -> memref<!tpu.dma_semaphore, #tpu.memory_space<semaphore_mem>>
      tpu.wait_dma2 semaphore(%117 : memref<!tpu.dma_semaphore, #tpu.memory_space<semaphore_mem>>) src(%113 : memref<128xf32, #tpu.memory_space<any>>) dst(%115 : memref<128xf32, #tpu.memory_space<vmem>>)
      %c0_i32_130 = arith.constant 0 : i32
      %c4_i32_131 = arith.constant 4 : i32
      %c0_i32_132 = arith.constant 0 : i32
      %c4_i32_133 = arith.constant 4 : i32
      %c0_i32_134 = arith.constant 0 : i32
      %118 = tpu.memref_slice %arg3[%c0_i32_130, %c0_i32_134] : memref<256x128xf32, #tpu.memory_space<any>> -> memref<1x128xf32, #tpu.memory_space<any>>
      %119 = tpu.memref_squeeze %118 : memref<1x128xf32, #tpu.memory_space<any>> -> memref<128xf32, #tpu.memory_space<any>>
      %c0_i32_135 = arith.constant 0 : i32
      %120 = tpu.memref_slice %arg6[%c4_i32_131, %c0_i32_132, %c0_i32_135] : memref<8x128x128xf32, #tpu.memory_space<vmem>> -> memref<1x1x128xf32, #tpu.memory_space<vmem>>
      %121 = tpu.memref_squeeze %120 : memref<1x1x128xf32, #tpu.memory_space<vmem>> -> memref<128xf32, #tpu.memory_space<vmem>>
      %122 = tpu.memref_slice %arg7[%c4_i32_133] : memref<8x!tpu.dma_semaphore, #tpu.memory_space<semaphore_mem>> -> memref<1x!tpu.dma_semaphore, #tpu.memory_space<semaphore_mem>>
      %123 = tpu.memref_squeeze %122 : memref<1x!tpu.dma_semaphore, #tpu.memory_space<semaphore_mem>> -> memref<!tpu.dma_semaphore, #tpu.memory_space<semaphore_mem>>
      tpu.wait_dma2 semaphore(%123 : memref<!tpu.dma_semaphore, #tpu.memory_space<semaphore_mem>>) src(%119 : memref<128xf32, #tpu.memory_space<any>>) dst(%121 : memref<128xf32, #tpu.memory_space<vmem>>)
      %c0_i32_136 = arith.constant 0 : i32
      %c4_i32_137 = arith.constant 4 : i32
      %c0_i32_138 = arith.constant 0 : i32
      %c4_i32_139 = arith.constant 4 : i32
      %c0_i32_140 = arith.constant 0 : i32
      %124 = tpu.memref_slice %arg3[%c0_i32_136, %c0_i32_140] : memref<256x128xf32, #tpu.memory_space<any>> -> memref<1x128xf32, #tpu.memory_space<any>>
      %125 = tpu.memref_squeeze %124 : memref<1x128xf32, #tpu.memory_space<any>> -> memref<128xf32, #tpu.memory_space<any>>
      %c0_i32_141 = arith.constant 0 : i32
      %126 = tpu.memref_slice %arg6[%c4_i32_137, %c0_i32_138, %c0_i32_141] : memref<8x128x128xf32, #tpu.memory_space<vmem>> -> memref<1x1x128xf32, #tpu.memory_space<vmem>>
      %127 = tpu.memref_squeeze %126 : memref<1x1x128xf32, #tpu.memory_space<vmem>> -> memref<128xf32, #tpu.memory_space<vmem>>
      %128 = tpu.memref_slice %arg7[%c4_i32_139] : memref<8x!tpu.dma_semaphore, #tpu.memory_space<semaphore_mem>> -> memref<1x!tpu.dma_semaphore, #tpu.memory_space<semaphore_mem>>
      %129 = tpu.memref_squeeze %128 : memref<1x!tpu.dma_semaphore, #tpu.memory_space<semaphore_mem>> -> memref<!tpu.dma_semaphore, #tpu.memory_space<semaphore_mem>>
      tpu.wait_dma2 semaphore(%129 : memref<!tpu.dma_semaphore, #tpu.memory_space<semaphore_mem>>) src(%125 : memref<128xf32, #tpu.memory_space<any>>) dst(%127 : memref<128xf32, #tpu.memory_space<vmem>>)
      %c0_i32_142 = arith.constant 0 : i32
      %c4_i32_143 = arith.constant 4 : i32
      %c0_i32_144 = arith.constant 0 : i32
      %c4_i32_145 = arith.constant 4 : i32
      %c0_i32_146 = arith.constant 0 : i32
      %130 = tpu.memref_slice %arg3[%c0_i32_142, %c0_i32_146] : memref<256x128xf32, #tpu.memory_space<any>> -> memref<1x128xf32, #tpu.memory_space<any>>
      %131 = tpu.memref_squeeze %130 : memref<1x128xf32, #tpu.memory_space<any>> -> memref<128xf32, #tpu.memory_space<any>>
      %c0_i32_147 = arith.constant 0 : i32
      %132 = tpu.memref_slice %arg6[%c4_i32_143, %c0_i32_144, %c0_i32_147] : memref<8x128x128xf32, #tpu.memory_space<vmem>> -> memref<1x1x128xf32, #tpu.memory_space<vmem>>
      %133 = tpu.memref_squeeze %132 : memref<1x1x128xf32, #tpu.memory_space<vmem>> -> memref<128xf32, #tpu.memory_space<vmem>>
      %134 = tpu.memref_slice %arg7[%c4_i32_145] : memref<8x!tpu.dma_semaphore, #tpu.memory_space<semaphore_mem>> -> memref<1x!tpu.dma_semaphore, #tpu.memory_space<semaphore_mem>>
      %135 = tpu.memref_squeeze %134 : memref<1x!tpu.dma_semaphore, #tpu.memory_space<semaphore_mem>> -> memref<!tpu.dma_semaphore, #tpu.memory_space<semaphore_mem>>
      tpu.wait_dma2 semaphore(%135 : memref<!tpu.dma_semaphore, #tpu.memory_space<semaphore_mem>>) src(%131 : memref<128xf32, #tpu.memory_space<any>>) dst(%133 : memref<128xf32, #tpu.memory_space<vmem>>)
      %c0_i32_148 = arith.constant 0 : i32
      %c4_i32_149 = arith.constant 4 : i32
      %c0_i32_150 = arith.constant 0 : i32
      %c4_i32_151 = arith.constant 4 : i32
      %c0_i32_152 = arith.constant 0 : i32
      %136 = tpu.memref_slice %arg3[%c0_i32_148, %c0_i32_152] : memref<256x128xf32, #tpu.memory_space<any>> -> memref<1x128xf32, #tpu.memory_space<any>>
      %137 = tpu.memref_squeeze %136 : memref<1x128xf32, #tpu.memory_space<any>> -> memref<128xf32, #tpu.memory_space<any>>
      %c0_i32_153 = arith.constant 0 : i32
      %138 = tpu.memref_slice %arg6[%c4_i32_149, %c0_i32_150, %c0_i32_153] : memref<8x128x128xf32, #tpu.memory_space<vmem>> -> memref<1x1x128xf32, #tpu.memory_space<vmem>>
      %139 = tpu.memref_squeeze %138 : memref<1x1x128xf32, #tpu.memory_space<vmem>> -> memref<128xf32, #tpu.memory_space<vmem>>
      %140 = tpu.memref_slice %arg7[%c4_i32_151] : memref<8x!tpu.dma_semaphore, #tpu.memory_space<semaphore_mem>> -> memref<1x!tpu.dma_semaphore, #tpu.memory_space<semaphore_mem>>
      %141 = tpu.memref_squeeze %140 : memref<1x!tpu.dma_semaphore, #tpu.memory_space<semaphore_mem>> -> memref<!tpu.dma_semaphore, #tpu.memory_space<semaphore_mem>>
      tpu.wait_dma2 semaphore(%141 : memref<!tpu.dma_semaphore, #tpu.memory_space<semaphore_mem>>) src(%137 : memref<128xf32, #tpu.memory_space<any>>) dst(%139 : memref<128xf32, #tpu.memory_space<vmem>>)
      %c0_i32_154 = arith.constant 0 : i32
      %c4_i32_155 = arith.constant 4 : i32
      %c0_i32_156 = arith.constant 0 : i32
      %c4_i32_157 = arith.constant 4 : i32
      %c0_i32_158 = arith.constant 0 : i32
      %142 = tpu.memref_slice %arg3[%c0_i32_154, %c0_i32_158] : memref<256x128xf32, #tpu.memory_space<any>> -> memref<1x128xf32, #tpu.memory_space<any>>
      %143 = tpu.memref_squeeze %142 : memref<1x128xf32, #tpu.memory_space<any>> -> memref<128xf32, #tpu.memory_space<any>>
      %c0_i32_159 = arith.constant 0 : i32
      %144 = tpu.memref_slice %arg6[%c4_i32_155, %c0_i32_156, %c0_i32_159] : memref<8x128x128xf32, #tpu.memory_space<vmem>> -> memref<1x1x128xf32, #tpu.memory_space<vmem>>
      %145 = tpu.memref_squeeze %144 : memref<1x1x128xf32, #tpu.memory_space<vmem>> -> memref<128xf32, #tpu.memory_space<vmem>>
      %146 = tpu.memref_slice %arg7[%c4_i32_157] : memref<8x!tpu.dma_semaphore, #tpu.memory_space<semaphore_mem>> -> memref<1x!tpu.dma_semaphore, #tpu.memory_space<semaphore_mem>>
      %147 = tpu.memref_squeeze %146 : memref<1x!tpu.dma_semaphore, #tpu.memory_space<semaphore_mem>> -> memref<!tpu.dma_semaphore, #tpu.memory_space<semaphore_mem>>
      tpu.wait_dma2 semaphore(%147 : memref<!tpu.dma_semaphore, #tpu.memory_space<semaphore_mem>>) src(%143 : memref<128xf32, #tpu.memory_space<any>>) dst(%145 : memref<128xf32, #tpu.memory_space<vmem>>)
      %c0_i32_160 = arith.constant 0 : i32
      %c4_i32_161 = arith.constant 4 : i32
      %c0_i32_162 = arith.constant 0 : i32
      %c4_i32_163 = arith.constant 4 : i32
      %c0_i32_164 = arith.constant 0 : i32
      %148 = tpu.memref_slice %arg3[%c0_i32_160, %c0_i32_164] : memref<256x128xf32, #tpu.memory_space<any>> -> memref<1x128xf32, #tpu.memory_space<any>>
      %149 = tpu.memref_squeeze %148 : memref<1x128xf32, #tpu.memory_space<any>> -> memref<128xf32, #tpu.memory_space<any>>
      %c0_i32_165 = arith.constant 0 : i32
      %150 = tpu.memref_slice %arg6[%c4_i32_161, %c0_i32_162, %c0_i32_165] : memref<8x128x128xf32, #tpu.memory_space<vmem>> -> memref<1x1x128xf32, #tpu.memory_space<vmem>>
      %151 = tpu.memref_squeeze %150 : memref<1x1x128xf32, #tpu.memory_space<vmem>> -> memref<128xf32, #tpu.memory_space<vmem>>
      %152 = tpu.memref_slice %arg7[%c4_i32_163] : memref<8x!tpu.dma_semaphore, #tpu.memory_space<semaphore_mem>> -> memref<1x!tpu.dma_semaphore, #tpu.memory_space<semaphore_mem>>
      %153 = tpu.memref_squeeze %152 : memref<1x!tpu.dma_semaphore, #tpu.memory_space<semaphore_mem>> -> memref<!tpu.dma_semaphore, #tpu.memory_space<semaphore_mem>>
      tpu.wait_dma2 semaphore(%153 : memref<!tpu.dma_semaphore, #tpu.memory_space<semaphore_mem>>) src(%149 : memref<128xf32, #tpu.memory_space<any>>) dst(%151 : memref<128xf32, #tpu.memory_space<vmem>>)
    }
    %c4 = arith.constant 4 : index
    %c0_77 = arith.constant 0 : index
    %c0_78 = arith.constant 0 : index
    %63 = vector.load %arg6[%c4, %c0_77, %c0_78] : memref<8x128x128xf32, #tpu.memory_space<vmem>>, vector<1x128x128xf32>
    %c4_79 = arith.constant 4 : index
    %c0_80 = arith.constant 0 : index
    %64 = vector.load %arg4[%c4_79, %c0_80] : memref<8x128xf32, #tpu.memory_space<vmem>>, vector<1x128xf32>
    %65 = vector.shape_cast %64 : vector<1x128xf32> to vector<1x1x128xf32>
    %66 = vector.broadcast %65 : vector<1x1x128xf32> to vector<1x128x128xf32>
    %67 = arith.mulf %63, %66 : vector<1x128x128xf32>
    %cst_81 = arith.constant dense<0.000000e+00> : vector<1x128xf32>
    %68 = vector.multi_reduction <add>, %67, %cst_81 [2] : vector<1x128x128xf32> to vector<1x128xf32>
    %cst_82 = arith.constant 14.2857141 : f32
    %69 = vector.broadcast %cst_82 : f32 to vector<1x128xf32>
    %70 = arith.mulf %68, %69 : vector<1x128xf32>
    %71 = math.exp %70 : vector<1x128xf32>
    %c4_83 = arith.constant 4 : index
    %c0_84 = arith.constant 0 : index
    %72 = vector.load %arg5[%c4_83, %c0_84] : memref<8x128xf32, #tpu.memory_space<vmem>>, vector<1x128xf32>
    tpu.vector_store %arg5[%c4_83, %c0_84], %71 {strides = array<i32>} : memref<8x128xf32, #tpu.memory_space<vmem>>, vector<1x128xf32>,
    %c0_i32_85 = arith.constant 0 : i32
    %c16_i32_86 = arith.constant 16 : i32
    %73 = arith.addi %c0_i32_85, %c16_i32_86 : i32
    %c1_i32_87 = arith.constant 1 : i32
    scf.for %arg8 = %c0_i32_85 to %73 step %c1_i32_87  : i32 {
      %c0_i32_118 = arith.constant 0 : i32
      %c5_i32_119 = arith.constant 5 : i32
      %c0_i32_120 = arith.constant 0 : i32
      %c5_i32_121 = arith.constant 5 : i32
      %c0_i32_122 = arith.constant 0 : i32
      %106 = tpu.memref_slice %arg3[%c0_i32_118, %c0_i32_122] : memref<256x128xf32, #tpu.memory_space<any>> -> memref<1x128xf32, #tpu.memory_space<any>>
      %107 = tpu.memref_squeeze %106 : memref<1x128xf32, #tpu.memory_space<any>> -> memref<128xf32, #tpu.memory_space<any>>
      %c0_i32_123 = arith.constant 0 : i32
      %108 = tpu.memref_slice %arg6[%c5_i32_119, %c0_i32_120, %c0_i32_123] : memref<8x128x128xf32, #tpu.memory_space<vmem>> -> memref<1x1x128xf32, #tpu.memory_space<vmem>>
      %109 = tpu.memref_squeeze %108 : memref<1x1x128xf32, #tpu.memory_space<vmem>> -> memref<128xf32, #tpu.memory_space<vmem>>
      %110 = tpu.memref_slice %arg7[%c5_i32_121] : memref<8x!tpu.dma_semaphore, #tpu.memory_space<semaphore_mem>> -> memref<1x!tpu.dma_semaphore, #tpu.memory_space<semaphore_mem>>
      %111 = tpu.memref_squeeze %110 : memref<1x!tpu.dma_semaphore, #tpu.memory_space<semaphore_mem>> -> memref<!tpu.dma_semaphore, #tpu.memory_space<semaphore_mem>>
      tpu.wait_dma2 semaphore(%111 : memref<!tpu.dma_semaphore, #tpu.memory_space<semaphore_mem>>) src(%107 : memref<128xf32, #tpu.memory_space<any>>) dst(%109 : memref<128xf32, #tpu.memory_space<vmem>>)
      %c0_i32_124 = arith.constant 0 : i32
      %c5_i32_125 = arith.constant 5 : i32
      %c0_i32_126 = arith.constant 0 : i32
      %c5_i32_127 = arith.constant 5 : i32
      %c0_i32_128 = arith.constant 0 : i32
      %112 = tpu.memref_slice %arg3[%c0_i32_124, %c0_i32_128] : memref<256x128xf32, #tpu.memory_space<any>> -> memref<1x128xf32, #tpu.memory_space<any>>
      %113 = tpu.memref_squeeze %112 : memref<1x128xf32, #tpu.memory_space<any>> -> memref<128xf32, #tpu.memory_space<any>>
      %c0_i32_129 = arith.constant 0 : i32
      %114 = tpu.memref_slice %arg6[%c5_i32_125, %c0_i32_126, %c0_i32_129] : memref<8x128x128xf32, #tpu.memory_space<vmem>> -> memref<1x1x128xf32, #tpu.memory_space<vmem>>
      %115 = tpu.memref_squeeze %114 : memref<1x1x128xf32, #tpu.memory_space<vmem>> -> memref<128xf32, #tpu.memory_space<vmem>>
      %116 = tpu.memref_slice %arg7[%c5_i32_127] : memref<8x!tpu.dma_semaphore, #tpu.memory_space<semaphore_mem>> -> memref<1x!tpu.dma_semaphore, #tpu.memory_space<semaphore_mem>>
      %117 = tpu.memref_squeeze %116 : memref<1x!tpu.dma_semaphore, #tpu.memory_space<semaphore_mem>> -> memref<!tpu.dma_semaphore, #tpu.memory_space<semaphore_mem>>
      tpu.wait_dma2 semaphore(%117 : memref<!tpu.dma_semaphore, #tpu.memory_space<semaphore_mem>>) src(%113 : memref<128xf32, #tpu.memory_space<any>>) dst(%115 : memref<128xf32, #tpu.memory_space<vmem>>)
      %c0_i32_130 = arith.constant 0 : i32
      %c5_i32_131 = arith.constant 5 : i32
      %c0_i32_132 = arith.constant 0 : i32
      %c5_i32_133 = arith.constant 5 : i32
      %c0_i32_134 = arith.constant 0 : i32
      %118 = tpu.memref_slice %arg3[%c0_i32_130, %c0_i32_134] : memref<256x128xf32, #tpu.memory_space<any>> -> memref<1x128xf32, #tpu.memory_space<any>>
      %119 = tpu.memref_squeeze %118 : memref<1x128xf32, #tpu.memory_space<any>> -> memref<128xf32, #tpu.memory_space<any>>
      %c0_i32_135 = arith.constant 0 : i32
      %120 = tpu.memref_slice %arg6[%c5_i32_131, %c0_i32_132, %c0_i32_135] : memref<8x128x128xf32, #tpu.memory_space<vmem>> -> memref<1x1x128xf32, #tpu.memory_space<vmem>>
      %121 = tpu.memref_squeeze %120 : memref<1x1x128xf32, #tpu.memory_space<vmem>> -> memref<128xf32, #tpu.memory_space<vmem>>
      %122 = tpu.memref_slice %arg7[%c5_i32_133] : memref<8x!tpu.dma_semaphore, #tpu.memory_space<semaphore_mem>> -> memref<1x!tpu.dma_semaphore, #tpu.memory_space<semaphore_mem>>
      %123 = tpu.memref_squeeze %122 : memref<1x!tpu.dma_semaphore, #tpu.memory_space<semaphore_mem>> -> memref<!tpu.dma_semaphore, #tpu.memory_space<semaphore_mem>>
      tpu.wait_dma2 semaphore(%123 : memref<!tpu.dma_semaphore, #tpu.memory_space<semaphore_mem>>) src(%119 : memref<128xf32, #tpu.memory_space<any>>) dst(%121 : memref<128xf32, #tpu.memory_space<vmem>>)
      %c0_i32_136 = arith.constant 0 : i32
      %c5_i32_137 = arith.constant 5 : i32
      %c0_i32_138 = arith.constant 0 : i32
      %c5_i32_139 = arith.constant 5 : i32
      %c0_i32_140 = arith.constant 0 : i32
      %124 = tpu.memref_slice %arg3[%c0_i32_136, %c0_i32_140] : memref<256x128xf32, #tpu.memory_space<any>> -> memref<1x128xf32, #tpu.memory_space<any>>
      %125 = tpu.memref_squeeze %124 : memref<1x128xf32, #tpu.memory_space<any>> -> memref<128xf32, #tpu.memory_space<any>>
      %c0_i32_141 = arith.constant 0 : i32
      %126 = tpu.memref_slice %arg6[%c5_i32_137, %c0_i32_138, %c0_i32_141] : memref<8x128x128xf32, #tpu.memory_space<vmem>> -> memref<1x1x128xf32, #tpu.memory_space<vmem>>
      %127 = tpu.memref_squeeze %126 : memref<1x1x128xf32, #tpu.memory_space<vmem>> -> memref<128xf32, #tpu.memory_space<vmem>>
      %128 = tpu.memref_slice %arg7[%c5_i32_139] : memref<8x!tpu.dma_semaphore, #tpu.memory_space<semaphore_mem>> -> memref<1x!tpu.dma_semaphore, #tpu.memory_space<semaphore_mem>>
      %129 = tpu.memref_squeeze %128 : memref<1x!tpu.dma_semaphore, #tpu.memory_space<semaphore_mem>> -> memref<!tpu.dma_semaphore, #tpu.memory_space<semaphore_mem>>
      tpu.wait_dma2 semaphore(%129 : memref<!tpu.dma_semaphore, #tpu.memory_space<semaphore_mem>>) src(%125 : memref<128xf32, #tpu.memory_space<any>>) dst(%127 : memref<128xf32, #tpu.memory_space<vmem>>)
      %c0_i32_142 = arith.constant 0 : i32
      %c5_i32_143 = arith.constant 5 : i32
      %c0_i32_144 = arith.constant 0 : i32
      %c5_i32_145 = arith.constant 5 : i32
      %c0_i32_146 = arith.constant 0 : i32
      %130 = tpu.memref_slice %arg3[%c0_i32_142, %c0_i32_146] : memref<256x128xf32, #tpu.memory_space<any>> -> memref<1x128xf32, #tpu.memory_space<any>>
      %131 = tpu.memref_squeeze %130 : memref<1x128xf32, #tpu.memory_space<any>> -> memref<128xf32, #tpu.memory_space<any>>
      %c0_i32_147 = arith.constant 0 : i32
      %132 = tpu.memref_slice %arg6[%c5_i32_143, %c0_i32_144, %c0_i32_147] : memref<8x128x128xf32, #tpu.memory_space<vmem>> -> memref<1x1x128xf32, #tpu.memory_space<vmem>>
      %133 = tpu.memref_squeeze %132 : memref<1x1x128xf32, #tpu.memory_space<vmem>> -> memref<128xf32, #tpu.memory_space<vmem>>
      %134 = tpu.memref_slice %arg7[%c5_i32_145] : memref<8x!tpu.dma_semaphore, #tpu.memory_space<semaphore_mem>> -> memref<1x!tpu.dma_semaphore, #tpu.memory_space<semaphore_mem>>
      %135 = tpu.memref_squeeze %134 : memref<1x!tpu.dma_semaphore, #tpu.memory_space<semaphore_mem>> -> memref<!tpu.dma_semaphore, #tpu.memory_space<semaphore_mem>>
      tpu.wait_dma2 semaphore(%135 : memref<!tpu.dma_semaphore, #tpu.memory_space<semaphore_mem>>) src(%131 : memref<128xf32, #tpu.memory_space<any>>) dst(%133 : memref<128xf32, #tpu.memory_space<vmem>>)
      %c0_i32_148 = arith.constant 0 : i32
      %c5_i32_149 = arith.constant 5 : i32
      %c0_i32_150 = arith.constant 0 : i32
      %c5_i32_151 = arith.constant 5 : i32
      %c0_i32_152 = arith.constant 0 : i32
      %136 = tpu.memref_slice %arg3[%c0_i32_148, %c0_i32_152] : memref<256x128xf32, #tpu.memory_space<any>> -> memref<1x128xf32, #tpu.memory_space<any>>
      %137 = tpu.memref_squeeze %136 : memref<1x128xf32, #tpu.memory_space<any>> -> memref<128xf32, #tpu.memory_space<any>>
      %c0_i32_153 = arith.constant 0 : i32
      %138 = tpu.memref_slice %arg6[%c5_i32_149, %c0_i32_150, %c0_i32_153] : memref<8x128x128xf32, #tpu.memory_space<vmem>> -> memref<1x1x128xf32, #tpu.memory_space<vmem>>
      %139 = tpu.memref_squeeze %138 : memref<1x1x128xf32, #tpu.memory_space<vmem>> -> memref<128xf32, #tpu.memory_space<vmem>>
      %140 = tpu.memref_slice %arg7[%c5_i32_151] : memref<8x!tpu.dma_semaphore, #tpu.memory_space<semaphore_mem>> -> memref<1x!tpu.dma_semaphore, #tpu.memory_space<semaphore_mem>>
      %141 = tpu.memref_squeeze %140 : memref<1x!tpu.dma_semaphore, #tpu.memory_space<semaphore_mem>> -> memref<!tpu.dma_semaphore, #tpu.memory_space<semaphore_mem>>
      tpu.wait_dma2 semaphore(%141 : memref<!tpu.dma_semaphore, #tpu.memory_space<semaphore_mem>>) src(%137 : memref<128xf32, #tpu.memory_space<any>>) dst(%139 : memref<128xf32, #tpu.memory_space<vmem>>)
      %c0_i32_154 = arith.constant 0 : i32
      %c5_i32_155 = arith.constant 5 : i32
      %c0_i32_156 = arith.constant 0 : i32
      %c5_i32_157 = arith.constant 5 : i32
      %c0_i32_158 = arith.constant 0 : i32
      %142 = tpu.memref_slice %arg3[%c0_i32_154, %c0_i32_158] : memref<256x128xf32, #tpu.memory_space<any>> -> memref<1x128xf32, #tpu.memory_space<any>>
      %143 = tpu.memref_squeeze %142 : memref<1x128xf32, #tpu.memory_space<any>> -> memref<128xf32, #tpu.memory_space<any>>
      %c0_i32_159 = arith.constant 0 : i32
      %144 = tpu.memref_slice %arg6[%c5_i32_155, %c0_i32_156, %c0_i32_159] : memref<8x128x128xf32, #tpu.memory_space<vmem>> -> memref<1x1x128xf32, #tpu.memory_space<vmem>>
      %145 = tpu.memref_squeeze %144 : memref<1x1x128xf32, #tpu.memory_space<vmem>> -> memref<128xf32, #tpu.memory_space<vmem>>
      %146 = tpu.memref_slice %arg7[%c5_i32_157] : memref<8x!tpu.dma_semaphore, #tpu.memory_space<semaphore_mem>> -> memref<1x!tpu.dma_semaphore, #tpu.memory_space<semaphore_mem>>
      %147 = tpu.memref_squeeze %146 : memref<1x!tpu.dma_semaphore, #tpu.memory_space<semaphore_mem>> -> memref<!tpu.dma_semaphore, #tpu.memory_space<semaphore_mem>>
      tpu.wait_dma2 semaphore(%147 : memref<!tpu.dma_semaphore, #tpu.memory_space<semaphore_mem>>) src(%143 : memref<128xf32, #tpu.memory_space<any>>) dst(%145 : memref<128xf32, #tpu.memory_space<vmem>>)
      %c0_i32_160 = arith.constant 0 : i32
      %c5_i32_161 = arith.constant 5 : i32
      %c0_i32_162 = arith.constant 0 : i32
      %c5_i32_163 = arith.constant 5 : i32
      %c0_i32_164 = arith.constant 0 : i32
      %148 = tpu.memref_slice %arg3[%c0_i32_160, %c0_i32_164] : memref<256x128xf32, #tpu.memory_space<any>> -> memref<1x128xf32, #tpu.memory_space<any>>
      %149 = tpu.memref_squeeze %148 : memref<1x128xf32, #tpu.memory_space<any>> -> memref<128xf32, #tpu.memory_space<any>>
      %c0_i32_165 = arith.constant 0 : i32
      %150 = tpu.memref_slice %arg6[%c5_i32_161, %c0_i32_162, %c0_i32_165] : memref<8x128x128xf32, #tpu.memory_space<vmem>> -> memref<1x1x128xf32, #tpu.memory_space<vmem>>
      %151 = tpu.memref_squeeze %150 : memref<1x1x128xf32, #tpu.memory_space<vmem>> -> memref<128xf32, #tpu.memory_space<vmem>>
      %152 = tpu.memref_slice %arg7[%c5_i32_163] : memref<8x!tpu.dma_semaphore, #tpu.memory_space<semaphore_mem>> -> memref<1x!tpu.dma_semaphore, #tpu.memory_space<semaphore_mem>>
      %153 = tpu.memref_squeeze %152 : memref<1x!tpu.dma_semaphore, #tpu.memory_space<semaphore_mem>> -> memref<!tpu.dma_semaphore, #tpu.memory_space<semaphore_mem>>
      tpu.wait_dma2 semaphore(%153 : memref<!tpu.dma_semaphore, #tpu.memory_space<semaphore_mem>>) src(%149 : memref<128xf32, #tpu.memory_space<any>>) dst(%151 : memref<128xf32, #tpu.memory_space<vmem>>)
    }
    %c5 = arith.constant 5 : index
    %c0_88 = arith.constant 0 : index
    %c0_89 = arith.constant 0 : index
    %74 = vector.load %arg6[%c5, %c0_88, %c0_89] : memref<8x128x128xf32, #tpu.memory_space<vmem>>, vector<1x128x128xf32>
    %c5_90 = arith.constant 5 : index
    %c0_91 = arith.constant 0 : index
    %75 = vector.load %arg4[%c5_90, %c0_91] : memref<8x128xf32, #tpu.memory_space<vmem>>, vector<1x128xf32>
    %76 = vector.shape_cast %75 : vector<1x128xf32> to vector<1x1x128xf32>
    %77 = vector.broadcast %76 : vector<1x1x128xf32> to vector<1x128x128xf32>
    %78 = arith.mulf %74, %77 : vector<1x128x128xf32>
    %cst_92 = arith.constant dense<0.000000e+00> : vector<1x128xf32>
    %79 = vector.multi_reduction <add>, %78, %cst_92 [2] : vector<1x128x128xf32> to vector<1x128xf32>
    %cst_93 = arith.constant 14.2857141 : f32
    %80 = vector.broadcast %cst_93 : f32 to vector<1x128xf32>
    %81 = arith.mulf %79, %80 : vector<1x128xf32>
    %82 = math.exp %81 : vector<1x128xf32>
    %c5_94 = arith.constant 5 : index
    %c0_95 = arith.constant 0 : index
    %83 = vector.load %arg5[%c5_94, %c0_95] : memref<8x128xf32, #tpu.memory_space<vmem>>, vector<1x128xf32>
    tpu.vector_store %arg5[%c5_94, %c0_95], %82 {strides = array<i32>} : memref<8x128xf32, #tpu.memory_space<vmem>>, vector<1x128xf32>,
    %c0_i32_96 = arith.constant 0 : i32
    %c16_i32_97 = arith.constant 16 : i32
    %84 = arith.addi %c0_i32_96, %c16_i32_97 : i32
    %c1_i32_98 = arith.constant 1 : i32
    scf.for %arg8 = %c0_i32_96 to %84 step %c1_i32_98  : i32 {
      %c0_i32_118 = arith.constant 0 : i32
      %c6_i32_119 = arith.constant 6 : i32
      %c0_i32_120 = arith.constant 0 : i32
      %c6_i32_121 = arith.constant 6 : i32
      %c0_i32_122 = arith.constant 0 : i32
      %106 = tpu.memref_slice %arg3[%c0_i32_118, %c0_i32_122] : memref<256x128xf32, #tpu.memory_space<any>> -> memref<1x128xf32, #tpu.memory_space<any>>
      %107 = tpu.memref_squeeze %106 : memref<1x128xf32, #tpu.memory_space<any>> -> memref<128xf32, #tpu.memory_space<any>>
      %c0_i32_123 = arith.constant 0 : i32
      %108 = tpu.memref_slice %arg6[%c6_i32_119, %c0_i32_120, %c0_i32_123] : memref<8x128x128xf32, #tpu.memory_space<vmem>> -> memref<1x1x128xf32, #tpu.memory_space<vmem>>
      %109 = tpu.memref_squeeze %108 : memref<1x1x128xf32, #tpu.memory_space<vmem>> -> memref<128xf32, #tpu.memory_space<vmem>>
      %110 = tpu.memref_slice %arg7[%c6_i32_121] : memref<8x!tpu.dma_semaphore, #tpu.memory_space<semaphore_mem>> -> memref<1x!tpu.dma_semaphore, #tpu.memory_space<semaphore_mem>>
      %111 = tpu.memref_squeeze %110 : memref<1x!tpu.dma_semaphore, #tpu.memory_space<semaphore_mem>> -> memref<!tpu.dma_semaphore, #tpu.memory_space<semaphore_mem>>
      tpu.wait_dma2 semaphore(%111 : memref<!tpu.dma_semaphore, #tpu.memory_space<semaphore_mem>>) src(%107 : memref<128xf32, #tpu.memory_space<any>>) dst(%109 : memref<128xf32, #tpu.memory_space<vmem>>)
      %c0_i32_124 = arith.constant 0 : i32
      %c6_i32_125 = arith.constant 6 : i32
      %c0_i32_126 = arith.constant 0 : i32
      %c6_i32_127 = arith.constant 6 : i32
      %c0_i32_128 = arith.constant 0 : i32
      %112 = tpu.memref_slice %arg3[%c0_i32_124, %c0_i32_128] : memref<256x128xf32, #tpu.memory_space<any>> -> memref<1x128xf32, #tpu.memory_space<any>>
      %113 = tpu.memref_squeeze %112 : memref<1x128xf32, #tpu.memory_space<any>> -> memref<128xf32, #tpu.memory_space<any>>
      %c0_i32_129 = arith.constant 0 : i32
      %114 = tpu.memref_slice %arg6[%c6_i32_125, %c0_i32_126, %c0_i32_129] : memref<8x128x128xf32, #tpu.memory_space<vmem>> -> memref<1x1x128xf32, #tpu.memory_space<vmem>>
      %115 = tpu.memref_squeeze %114 : memref<1x1x128xf32, #tpu.memory_space<vmem>> -> memref<128xf32, #tpu.memory_space<vmem>>
      %116 = tpu.memref_slice %arg7[%c6_i32_127] : memref<8x!tpu.dma_semaphore, #tpu.memory_space<semaphore_mem>> -> memref<1x!tpu.dma_semaphore, #tpu.memory_space<semaphore_mem>>
      %117 = tpu.memref_squeeze %116 : memref<1x!tpu.dma_semaphore, #tpu.memory_space<semaphore_mem>> -> memref<!tpu.dma_semaphore, #tpu.memory_space<semaphore_mem>>
      tpu.wait_dma2 semaphore(%117 : memref<!tpu.dma_semaphore, #tpu.memory_space<semaphore_mem>>) src(%113 : memref<128xf32, #tpu.memory_space<any>>) dst(%115 : memref<128xf32, #tpu.memory_space<vmem>>)
      %c0_i32_130 = arith.constant 0 : i32
      %c6_i32_131 = arith.constant 6 : i32
      %c0_i32_132 = arith.constant 0 : i32
      %c6_i32_133 = arith.constant 6 : i32
      %c0_i32_134 = arith.constant 0 : i32
      %118 = tpu.memref_slice %arg3[%c0_i32_130, %c0_i32_134] : memref<256x128xf32, #tpu.memory_space<any>> -> memref<1x128xf32, #tpu.memory_space<any>>
      %119 = tpu.memref_squeeze %118 : memref<1x128xf32, #tpu.memory_space<any>> -> memref<128xf32, #tpu.memory_space<any>>
      %c0_i32_135 = arith.constant 0 : i32
      %120 = tpu.memref_slice %arg6[%c6_i32_131, %c0_i32_132, %c0_i32_135] : memref<8x128x128xf32, #tpu.memory_space<vmem>> -> memref<1x1x128xf32, #tpu.memory_space<vmem>>
      %121 = tpu.memref_squeeze %120 : memref<1x1x128xf32, #tpu.memory_space<vmem>> -> memref<128xf32, #tpu.memory_space<vmem>>
      %122 = tpu.memref_slice %arg7[%c6_i32_133] : memref<8x!tpu.dma_semaphore, #tpu.memory_space<semaphore_mem>> -> memref<1x!tpu.dma_semaphore, #tpu.memory_space<semaphore_mem>>
      %123 = tpu.memref_squeeze %122 : memref<1x!tpu.dma_semaphore, #tpu.memory_space<semaphore_mem>> -> memref<!tpu.dma_semaphore, #tpu.memory_space<semaphore_mem>>
      tpu.wait_dma2 semaphore(%123 : memref<!tpu.dma_semaphore, #tpu.memory_space<semaphore_mem>>) src(%119 : memref<128xf32, #tpu.memory_space<any>>) dst(%121 : memref<128xf32, #tpu.memory_space<vmem>>)
      %c0_i32_136 = arith.constant 0 : i32
      %c6_i32_137 = arith.constant 6 : i32
      %c0_i32_138 = arith.constant 0 : i32
      %c6_i32_139 = arith.constant 6 : i32
      %c0_i32_140 = arith.constant 0 : i32
      %124 = tpu.memref_slice %arg3[%c0_i32_136, %c0_i32_140] : memref<256x128xf32, #tpu.memory_space<any>> -> memref<1x128xf32, #tpu.memory_space<any>>
      %125 = tpu.memref_squeeze %124 : memref<1x128xf32, #tpu.memory_space<any>> -> memref<128xf32, #tpu.memory_space<any>>
      %c0_i32_141 = arith.constant 0 : i32
      %126 = tpu.memref_slice %arg6[%c6_i32_137, %c0_i32_138, %c0_i32_141] : memref<8x128x128xf32, #tpu.memory_space<vmem>> -> memref<1x1x128xf32, #tpu.memory_space<vmem>>
      %127 = tpu.memref_squeeze %126 : memref<1x1x128xf32, #tpu.memory_space<vmem>> -> memref<128xf32, #tpu.memory_space<vmem>>
      %128 = tpu.memref_slice %arg7[%c6_i32_139] : memref<8x!tpu.dma_semaphore, #tpu.memory_space<semaphore_mem>> -> memref<1x!tpu.dma_semaphore, #tpu.memory_space<semaphore_mem>>
      %129 = tpu.memref_squeeze %128 : memref<1x!tpu.dma_semaphore, #tpu.memory_space<semaphore_mem>> -> memref<!tpu.dma_semaphore, #tpu.memory_space<semaphore_mem>>
      tpu.wait_dma2 semaphore(%129 : memref<!tpu.dma_semaphore, #tpu.memory_space<semaphore_mem>>) src(%125 : memref<128xf32, #tpu.memory_space<any>>) dst(%127 : memref<128xf32, #tpu.memory_space<vmem>>)
      %c0_i32_142 = arith.constant 0 : i32
      %c6_i32_143 = arith.constant 6 : i32
      %c0_i32_144 = arith.constant 0 : i32
      %c6_i32_145 = arith.constant 6 : i32
      %c0_i32_146 = arith.constant 0 : i32
      %130 = tpu.memref_slice %arg3[%c0_i32_142, %c0_i32_146] : memref<256x128xf32, #tpu.memory_space<any>> -> memref<1x128xf32, #tpu.memory_space<any>>
      %131 = tpu.memref_squeeze %130 : memref<1x128xf32, #tpu.memory_space<any>> -> memref<128xf32, #tpu.memory_space<any>>
      %c0_i32_147 = arith.constant 0 : i32
      %132 = tpu.memref_slice %arg6[%c6_i32_143, %c0_i32_144, %c0_i32_147] : memref<8x128x128xf32, #tpu.memory_space<vmem>> -> memref<1x1x128xf32, #tpu.memory_space<vmem>>
      %133 = tpu.memref_squeeze %132 : memref<1x1x128xf32, #tpu.memory_space<vmem>> -> memref<128xf32, #tpu.memory_space<vmem>>
      %134 = tpu.memref_slice %arg7[%c6_i32_145] : memref<8x!tpu.dma_semaphore, #tpu.memory_space<semaphore_mem>> -> memref<1x!tpu.dma_semaphore, #tpu.memory_space<semaphore_mem>>
      %135 = tpu.memref_squeeze %134 : memref<1x!tpu.dma_semaphore, #tpu.memory_space<semaphore_mem>> -> memref<!tpu.dma_semaphore, #tpu.memory_space<semaphore_mem>>
      tpu.wait_dma2 semaphore(%135 : memref<!tpu.dma_semaphore, #tpu.memory_space<semaphore_mem>>) src(%131 : memref<128xf32, #tpu.memory_space<any>>) dst(%133 : memref<128xf32, #tpu.memory_space<vmem>>)
      %c0_i32_148 = arith.constant 0 : i32
      %c6_i32_149 = arith.constant 6 : i32
      %c0_i32_150 = arith.constant 0 : i32
      %c6_i32_151 = arith.constant 6 : i32
      %c0_i32_152 = arith.constant 0 : i32
      %136 = tpu.memref_slice %arg3[%c0_i32_148, %c0_i32_152] : memref<256x128xf32, #tpu.memory_space<any>> -> memref<1x128xf32, #tpu.memory_space<any>>
      %137 = tpu.memref_squeeze %136 : memref<1x128xf32, #tpu.memory_space<any>> -> memref<128xf32, #tpu.memory_space<any>>
      %c0_i32_153 = arith.constant 0 : i32
      %138 = tpu.memref_slice %arg6[%c6_i32_149, %c0_i32_150, %c0_i32_153] : memref<8x128x128xf32, #tpu.memory_space<vmem>> -> memref<1x1x128xf32, #tpu.memory_space<vmem>>
      %139 = tpu.memref_squeeze %138 : memref<1x1x128xf32, #tpu.memory_space<vmem>> -> memref<128xf32, #tpu.memory_space<vmem>>
      %140 = tpu.memref_slice %arg7[%c6_i32_151] : memref<8x!tpu.dma_semaphore, #tpu.memory_space<semaphore_mem>> -> memref<1x!tpu.dma_semaphore, #tpu.memory_space<semaphore_mem>>
      %141 = tpu.memref_squeeze %140 : memref<1x!tpu.dma_semaphore, #tpu.memory_space<semaphore_mem>> -> memref<!tpu.dma_semaphore, #tpu.memory_space<semaphore_mem>>
      tpu.wait_dma2 semaphore(%141 : memref<!tpu.dma_semaphore, #tpu.memory_space<semaphore_mem>>) src(%137 : memref<128xf32, #tpu.memory_space<any>>) dst(%139 : memref<128xf32, #tpu.memory_space<vmem>>)
      %c0_i32_154 = arith.constant 0 : i32
      %c6_i32_155 = arith.constant 6 : i32
      %c0_i32_156 = arith.constant 0 : i32
      %c6_i32_157 = arith.constant 6 : i32
      %c0_i32_158 = arith.constant 0 : i32
      %142 = tpu.memref_slice %arg3[%c0_i32_154, %c0_i32_158] : memref<256x128xf32, #tpu.memory_space<any>> -> memref<1x128xf32, #tpu.memory_space<any>>
      %143 = tpu.memref_squeeze %142 : memref<1x128xf32, #tpu.memory_space<any>> -> memref<128xf32, #tpu.memory_space<any>>
      %c0_i32_159 = arith.constant 0 : i32
      %144 = tpu.memref_slice %arg6[%c6_i32_155, %c0_i32_156, %c0_i32_159] : memref<8x128x128xf32, #tpu.memory_space<vmem>> -> memref<1x1x128xf32, #tpu.memory_space<vmem>>
      %145 = tpu.memref_squeeze %144 : memref<1x1x128xf32, #tpu.memory_space<vmem>> -> memref<128xf32, #tpu.memory_space<vmem>>
      %146 = tpu.memref_slice %arg7[%c6_i32_157] : memref<8x!tpu.dma_semaphore, #tpu.memory_space<semaphore_mem>> -> memref<1x!tpu.dma_semaphore, #tpu.memory_space<semaphore_mem>>
      %147 = tpu.memref_squeeze %146 : memref<1x!tpu.dma_semaphore, #tpu.memory_space<semaphore_mem>> -> memref<!tpu.dma_semaphore, #tpu.memory_space<semaphore_mem>>
      tpu.wait_dma2 semaphore(%147 : memref<!tpu.dma_semaphore, #tpu.memory_space<semaphore_mem>>) src(%143 : memref<128xf32, #tpu.memory_space<any>>) dst(%145 : memref<128xf32, #tpu.memory_space<vmem>>)
      %c0_i32_160 = arith.constant 0 : i32
      %c6_i32_161 = arith.constant 6 : i32
      %c0_i32_162 = arith.constant 0 : i32
      %c6_i32_163 = arith.constant 6 : i32
      %c0_i32_164 = arith.constant 0 : i32
      %148 = tpu.memref_slice %arg3[%c0_i32_160, %c0_i32_164] : memref<256x128xf32, #tpu.memory_space<any>> -> memref<1x128xf32, #tpu.memory_space<any>>
      %149 = tpu.memref_squeeze %148 : memref<1x128xf32, #tpu.memory_space<any>> -> memref<128xf32, #tpu.memory_space<any>>
      %c0_i32_165 = arith.constant 0 : i32
      %150 = tpu.memref_slice %arg6[%c6_i32_161, %c0_i32_162, %c0_i32_165] : memref<8x128x128xf32, #tpu.memory_space<vmem>> -> memref<1x1x128xf32, #tpu.memory_space<vmem>>
      %151 = tpu.memref_squeeze %150 : memref<1x1x128xf32, #tpu.memory_space<vmem>> -> memref<128xf32, #tpu.memory_space<vmem>>
      %152 = tpu.memref_slice %arg7[%c6_i32_163] : memref<8x!tpu.dma_semaphore, #tpu.memory_space<semaphore_mem>> -> memref<1x!tpu.dma_semaphore, #tpu.memory_space<semaphore_mem>>
      %153 = tpu.memref_squeeze %152 : memref<1x!tpu.dma_semaphore, #tpu.memory_space<semaphore_mem>> -> memref<!tpu.dma_semaphore, #tpu.memory_space<semaphore_mem>>
      tpu.wait_dma2 semaphore(%153 : memref<!tpu.dma_semaphore, #tpu.memory_space<semaphore_mem>>) src(%149 : memref<128xf32, #tpu.memory_space<any>>) dst(%151 : memref<128xf32, #tpu.memory_space<vmem>>)
    }
    %c6 = arith.constant 6 : index
    %c0_99 = arith.constant 0 : index
    %c0_100 = arith.constant 0 : index
    %85 = vector.load %arg6[%c6, %c0_99, %c0_100] : memref<8x128x128xf32, #tpu.memory_space<vmem>>, vector<1x128x128xf32>
    %c6_101 = arith.constant 6 : index
    %c0_102 = arith.constant 0 : index
    %86 = vector.load %arg4[%c6_101, %c0_102] : memref<8x128xf32, #tpu.memory_space<vmem>>, vector<1x128xf32>
    %87 = vector.shape_cast %86 : vector<1x128xf32> to vector<1x1x128xf32>
    %88 = vector.broadcast %87 : vector<1x1x128xf32> to vector<1x128x128xf32>
    %89 = arith.mulf %85, %88 : vector<1x128x128xf32>
    %cst_103 = arith.constant dense<0.000000e+00> : vector<1x128xf32>
    %90 = vector.multi_reduction <add>, %89, %cst_103 [2] : vector<1x128x128xf32> to vector<1x128xf32>
    %cst_104 = arith.constant 14.2857141 : f32
    %91 = vector.broadcast %cst_104 : f32 to vector<1x128xf32>
    %92 = arith.mulf %90, %91 : vector<1x128xf32>
    %93 = math.exp %92 : vector<1x128xf32>
    %c6_105 = arith.constant 6 : index
    %c0_106 = arith.constant 0 : index
    %94 = vector.load %arg5[%c6_105, %c0_106] : memref<8x128xf32, #tpu.memory_space<vmem>>, vector<1x128xf32>
    tpu.vector_store %arg5[%c6_105, %c0_106], %93 {strides = array<i32>} : memref<8x128xf32, #tpu.memory_space<vmem>>, vector<1x128xf32>,
    %c0_i32_107 = arith.constant 0 : i32
    %c16_i32_108 = arith.constant 16 : i32
    %95 = arith.addi %c0_i32_107, %c16_i32_108 : i32
    %c1_i32_109 = arith.constant 1 : i32
    scf.for %arg8 = %c0_i32_107 to %95 step %c1_i32_109  : i32 {
      %c0_i32_118 = arith.constant 0 : i32
      %c7_i32_119 = arith.constant 7 : i32
      %c0_i32_120 = arith.constant 0 : i32
      %c7_i32_121 = arith.constant 7 : i32
      %c0_i32_122 = arith.constant 0 : i32
      %106 = tpu.memref_slice %arg3[%c0_i32_118, %c0_i32_122] : memref<256x128xf32, #tpu.memory_space<any>> -> memref<1x128xf32, #tpu.memory_space<any>>
      %107 = tpu.memref_squeeze %106 : memref<1x128xf32, #tpu.memory_space<any>> -> memref<128xf32, #tpu.memory_space<any>>
      %c0_i32_123 = arith.constant 0 : i32
      %108 = tpu.memref_slice %arg6[%c7_i32_119, %c0_i32_120, %c0_i32_123] : memref<8x128x128xf32, #tpu.memory_space<vmem>> -> memref<1x1x128xf32, #tpu.memory_space<vmem>>
      %109 = tpu.memref_squeeze %108 : memref<1x1x128xf32, #tpu.memory_space<vmem>> -> memref<128xf32, #tpu.memory_space<vmem>>
      %110 = tpu.memref_slice %arg7[%c7_i32_121] : memref<8x!tpu.dma_semaphore, #tpu.memory_space<semaphore_mem>> -> memref<1x!tpu.dma_semaphore, #tpu.memory_space<semaphore_mem>>
      %111 = tpu.memref_squeeze %110 : memref<1x!tpu.dma_semaphore, #tpu.memory_space<semaphore_mem>> -> memref<!tpu.dma_semaphore, #tpu.memory_space<semaphore_mem>>
      tpu.wait_dma2 semaphore(%111 : memref<!tpu.dma_semaphore, #tpu.memory_space<semaphore_mem>>) src(%107 : memref<128xf32, #tpu.memory_space<any>>) dst(%109 : memref<128xf32, #tpu.memory_space<vmem>>)
      %c0_i32_124 = arith.constant 0 : i32
      %c7_i32_125 = arith.constant 7 : i32
      %c0_i32_126 = arith.constant 0 : i32
      %c7_i32_127 = arith.constant 7 : i32
      %c0_i32_128 = arith.constant 0 : i32
      %112 = tpu.memref_slice %arg3[%c0_i32_124, %c0_i32_128] : memref<256x128xf32, #tpu.memory_space<any>> -> memref<1x128xf32, #tpu.memory_space<any>>
      %113 = tpu.memref_squeeze %112 : memref<1x128xf32, #tpu.memory_space<any>> -> memref<128xf32, #tpu.memory_space<any>>
      %c0_i32_129 = arith.constant 0 : i32
      %114 = tpu.memref_slice %arg6[%c7_i32_125, %c0_i32_126, %c0_i32_129] : memref<8x128x128xf32, #tpu.memory_space<vmem>> -> memref<1x1x128xf32, #tpu.memory_space<vmem>>
      %115 = tpu.memref_squeeze %114 : memref<1x1x128xf32, #tpu.memory_space<vmem>> -> memref<128xf32, #tpu.memory_space<vmem>>
      %116 = tpu.memref_slice %arg7[%c7_i32_127] : memref<8x!tpu.dma_semaphore, #tpu.memory_space<semaphore_mem>> -> memref<1x!tpu.dma_semaphore, #tpu.memory_space<semaphore_mem>>
      %117 = tpu.memref_squeeze %116 : memref<1x!tpu.dma_semaphore, #tpu.memory_space<semaphore_mem>> -> memref<!tpu.dma_semaphore, #tpu.memory_space<semaphore_mem>>
      tpu.wait_dma2 semaphore(%117 : memref<!tpu.dma_semaphore, #tpu.memory_space<semaphore_mem>>) src(%113 : memref<128xf32, #tpu.memory_space<any>>) dst(%115 : memref<128xf32, #tpu.memory_space<vmem>>)
      %c0_i32_130 = arith.constant 0 : i32
      %c7_i32_131 = arith.constant 7 : i32
      %c0_i32_132 = arith.constant 0 : i32
      %c7_i32_133 = arith.constant 7 : i32
      %c0_i32_134 = arith.constant 0 : i32
      %118 = tpu.memref_slice %arg3[%c0_i32_130, %c0_i32_134] : memref<256x128xf32, #tpu.memory_space<any>> -> memref<1x128xf32, #tpu.memory_space<any>>
      %119 = tpu.memref_squeeze %118 : memref<1x128xf32, #tpu.memory_space<any>> -> memref<128xf32, #tpu.memory_space<any>>
      %c0_i32_135 = arith.constant 0 : i32
      %120 = tpu.memref_slice %arg6[%c7_i32_131, %c0_i32_132, %c0_i32_135] : memref<8x128x128xf32, #tpu.memory_space<vmem>> -> memref<1x1x128xf32, #tpu.memory_space<vmem>>
      %121 = tpu.memref_squeeze %120 : memref<1x1x128xf32, #tpu.memory_space<vmem>> -> memref<128xf32, #tpu.memory_space<vmem>>
      %122 = tpu.memref_slice %arg7[%c7_i32_133] : memref<8x!tpu.dma_semaphore, #tpu.memory_space<semaphore_mem>> -> memref<1x!tpu.dma_semaphore, #tpu.memory_space<semaphore_mem>>
      %123 = tpu.memref_squeeze %122 : memref<1x!tpu.dma_semaphore, #tpu.memory_space<semaphore_mem>> -> memref<!tpu.dma_semaphore, #tpu.memory_space<semaphore_mem>>
      tpu.wait_dma2 semaphore(%123 : memref<!tpu.dma_semaphore, #tpu.memory_space<semaphore_mem>>) src(%119 : memref<128xf32, #tpu.memory_space<any>>) dst(%121 : memref<128xf32, #tpu.memory_space<vmem>>)
      %c0_i32_136 = arith.constant 0 : i32
      %c7_i32_137 = arith.constant 7 : i32
      %c0_i32_138 = arith.constant 0 : i32
      %c7_i32_139 = arith.constant 7 : i32
      %c0_i32_140 = arith.constant 0 : i32
      %124 = tpu.memref_slice %arg3[%c0_i32_136, %c0_i32_140] : memref<256x128xf32, #tpu.memory_space<any>> -> memref<1x128xf32, #tpu.memory_space<any>>
      %125 = tpu.memref_squeeze %124 : memref<1x128xf32, #tpu.memory_space<any>> -> memref<128xf32, #tpu.memory_space<any>>
      %c0_i32_141 = arith.constant 0 : i32
      %126 = tpu.memref_slice %arg6[%c7_i32_137, %c0_i32_138, %c0_i32_141] : memref<8x128x128xf32, #tpu.memory_space<vmem>> -> memref<1x1x128xf32, #tpu.memory_space<vmem>>
      %127 = tpu.memref_squeeze %126 : memref<1x1x128xf32, #tpu.memory_space<vmem>> -> memref<128xf32, #tpu.memory_space<vmem>>
      %128 = tpu.memref_slice %arg7[%c7_i32_139] : memref<8x!tpu.dma_semaphore, #tpu.memory_space<semaphore_mem>> -> memref<1x!tpu.dma_semaphore, #tpu.memory_space<semaphore_mem>>
      %129 = tpu.memref_squeeze %128 : memref<1x!tpu.dma_semaphore, #tpu.memory_space<semaphore_mem>> -> memref<!tpu.dma_semaphore, #tpu.memory_space<semaphore_mem>>
      tpu.wait_dma2 semaphore(%129 : memref<!tpu.dma_semaphore, #tpu.memory_space<semaphore_mem>>) src(%125 : memref<128xf32, #tpu.memory_space<any>>) dst(%127 : memref<128xf32, #tpu.memory_space<vmem>>)
      %c0_i32_142 = arith.constant 0 : i32
      %c7_i32_143 = arith.constant 7 : i32
      %c0_i32_144 = arith.constant 0 : i32
      %c7_i32_145 = arith.constant 7 : i32
      %c0_i32_146 = arith.constant 0 : i32
      %130 = tpu.memref_slice %arg3[%c0_i32_142, %c0_i32_146] : memref<256x128xf32, #tpu.memory_space<any>> -> memref<1x128xf32, #tpu.memory_space<any>>
      %131 = tpu.memref_squeeze %130 : memref<1x128xf32, #tpu.memory_space<any>> -> memref<128xf32, #tpu.memory_space<any>>
      %c0_i32_147 = arith.constant 0 : i32
      %132 = tpu.memref_slice %arg6[%c7_i32_143, %c0_i32_144, %c0_i32_147] : memref<8x128x128xf32, #tpu.memory_space<vmem>> -> memref<1x1x128xf32, #tpu.memory_space<vmem>>
      %133 = tpu.memref_squeeze %132 : memref<1x1x128xf32, #tpu.memory_space<vmem>> -> memref<128xf32, #tpu.memory_space<vmem>>
      %134 = tpu.memref_slice %arg7[%c7_i32_145] : memref<8x!tpu.dma_semaphore, #tpu.memory_space<semaphore_mem>> -> memref<1x!tpu.dma_semaphore, #tpu.memory_space<semaphore_mem>>
      %135 = tpu.memref_squeeze %134 : memref<1x!tpu.dma_semaphore, #tpu.memory_space<semaphore_mem>> -> memref<!tpu.dma_semaphore, #tpu.memory_space<semaphore_mem>>
      tpu.wait_dma2 semaphore(%135 : memref<!tpu.dma_semaphore, #tpu.memory_space<semaphore_mem>>) src(%131 : memref<128xf32, #tpu.memory_space<any>>) dst(%133 : memref<128xf32, #tpu.memory_space<vmem>>)
      %c0_i32_148 = arith.constant 0 : i32
      %c7_i32_149 = arith.constant 7 : i32
      %c0_i32_150 = arith.constant 0 : i32
      %c7_i32_151 = arith.constant 7 : i32
      %c0_i32_152 = arith.constant 0 : i32
      %136 = tpu.memref_slice %arg3[%c0_i32_148, %c0_i32_152] : memref<256x128xf32, #tpu.memory_space<any>> -> memref<1x128xf32, #tpu.memory_space<any>>
      %137 = tpu.memref_squeeze %136 : memref<1x128xf32, #tpu.memory_space<any>> -> memref<128xf32, #tpu.memory_space<any>>
      %c0_i32_153 = arith.constant 0 : i32
      %138 = tpu.memref_slice %arg6[%c7_i32_149, %c0_i32_150, %c0_i32_153] : memref<8x128x128xf32, #tpu.memory_space<vmem>> -> memref<1x1x128xf32, #tpu.memory_space<vmem>>
      %139 = tpu.memref_squeeze %138 : memref<1x1x128xf32, #tpu.memory_space<vmem>> -> memref<128xf32, #tpu.memory_space<vmem>>
      %140 = tpu.memref_slice %arg7[%c7_i32_151] : memref<8x!tpu.dma_semaphore, #tpu.memory_space<semaphore_mem>> -> memref<1x!tpu.dma_semaphore, #tpu.memory_space<semaphore_mem>>
      %141 = tpu.memref_squeeze %140 : memref<1x!tpu.dma_semaphore, #tpu.memory_space<semaphore_mem>> -> memref<!tpu.dma_semaphore, #tpu.memory_space<semaphore_mem>>
      tpu.wait_dma2 semaphore(%141 : memref<!tpu.dma_semaphore, #tpu.memory_space<semaphore_mem>>) src(%137 : memref<128xf32, #tpu.memory_space<any>>) dst(%139 : memref<128xf32, #tpu.memory_space<vmem>>)
      %c0_i32_154 = arith.constant 0 : i32
      %c7_i32_155 = arith.constant 7 : i32
      %c0_i32_156 = arith.constant 0 : i32
      %c7_i32_157 = arith.constant 7 : i32
      %c0_i32_158 = arith.constant 0 : i32
      %142 = tpu.memref_slice %arg3[%c0_i32_154, %c0_i32_158] : memref<256x128xf32, #tpu.memory_space<any>> -> memref<1x128xf32, #tpu.memory_space<any>>
      %143 = tpu.memref_squeeze %142 : memref<1x128xf32, #tpu.memory_space<any>> -> memref<128xf32, #tpu.memory_space<any>>
      %c0_i32_159 = arith.constant 0 : i32
      %144 = tpu.memref_slice %arg6[%c7_i32_155, %c0_i32_156, %c0_i32_159] : memref<8x128x128xf32, #tpu.memory_space<vmem>> -> memref<1x1x128xf32, #tpu.memory_space<vmem>>
      %145 = tpu.memref_squeeze %144 : memref<1x1x128xf32, #tpu.memory_space<vmem>> -> memref<128xf32, #tpu.memory_space<vmem>>
      %146 = tpu.memref_slice %arg7[%c7_i32_157] : memref<8x!tpu.dma_semaphore, #tpu.memory_space<semaphore_mem>> -> memref<1x!tpu.dma_semaphore, #tpu.memory_space<semaphore_mem>>
      %147 = tpu.memref_squeeze %146 : memref<1x!tpu.dma_semaphore, #tpu.memory_space<semaphore_mem>> -> memref<!tpu.dma_semaphore, #tpu.memory_space<semaphore_mem>>
      tpu.wait_dma2 semaphore(%147 : memref<!tpu.dma_semaphore, #tpu.memory_space<semaphore_mem>>) src(%143 : memref<128xf32, #tpu.memory_space<any>>) dst(%145 : memref<128xf32, #tpu.memory_space<vmem>>)
      %c0_i32_160 = arith.constant 0 : i32
      %c7_i32_161 = arith.constant 7 : i32
      %c0_i32_162 = arith.constant 0 : i32
      %c7_i32_163 = arith.constant 7 : i32
      %c0_i32_164 = arith.constant 0 : i32
      %148 = tpu.memref_slice %arg3[%c0_i32_160, %c0_i32_164] : memref<256x128xf32, #tpu.memory_space<any>> -> memref<1x128xf32, #tpu.memory_space<any>>
      %149 = tpu.memref_squeeze %148 : memref<1x128xf32, #tpu.memory_space<any>> -> memref<128xf32, #tpu.memory_space<any>>
      %c0_i32_165 = arith.constant 0 : i32
      %150 = tpu.memref_slice %arg6[%c7_i32_161, %c0_i32_162, %c0_i32_165] : memref<8x128x128xf32, #tpu.memory_space<vmem>> -> memref<1x1x128xf32, #tpu.memory_space<vmem>>
      %151 = tpu.memref_squeeze %150 : memref<1x1x128xf32, #tpu.memory_space<vmem>> -> memref<128xf32, #tpu.memory_space<vmem>>
      %152 = tpu.memref_slice %arg7[%c7_i32_163] : memref<8x!tpu.dma_semaphore, #tpu.memory_space<semaphore_mem>> -> memref<1x!tpu.dma_semaphore, #tpu.memory_space<semaphore_mem>>
      %153 = tpu.memref_squeeze %152 : memref<1x!tpu.dma_semaphore, #tpu.memory_space<semaphore_mem>> -> memref<!tpu.dma_semaphore, #tpu.memory_space<semaphore_mem>>
      tpu.wait_dma2 semaphore(%153 : memref<!tpu.dma_semaphore, #tpu.memory_space<semaphore_mem>>) src(%149 : memref<128xf32, #tpu.memory_space<any>>) dst(%151 : memref<128xf32, #tpu.memory_space<vmem>>)
    }
    %c7 = arith.constant 7 : index
    %c0_110 = arith.constant 0 : index
    %c0_111 = arith.constant 0 : index
    %96 = vector.load %arg6[%c7, %c0_110, %c0_111] : memref<8x128x128xf32, #tpu.memory_space<vmem>>, vector<1x128x128xf32>
    %c7_112 = arith.constant 7 : index
    %c0_113 = arith.constant 0 : index
    %97 = vector.load %arg4[%c7_112, %c0_113] : memref<8x128xf32, #tpu.memory_space<vmem>>, vector<1x128xf32>
    %98 = vector.shape_cast %97 : vector<1x128xf32> to vector<1x1x128xf32>
    %99 = vector.broadcast %98 : vector<1x1x128xf32> to vector<1x128x128xf32>
    %100 = arith.mulf %96, %99 : vector<1x128x128xf32>
    %cst_114 = arith.constant dense<0.000000e+00> : vector<1x128xf32>
    %101 = vector.multi_reduction <add>, %100, %cst_114 [2] : vector<1x128x128xf32> to vector<1x128xf32>
    %cst_115 = arith.constant 14.2857141 : f32
    %102 = vector.broadcast %cst_115 : f32 to vector<1x128xf32>
    %103 = arith.mulf %101, %102 : vector<1x128xf32>
    %104 = math.exp %103 : vector<1x128xf32>
    %c7_116 = arith.constant 7 : index
    %c0_117 = arith.constant 0 : index
    %105 = vector.load %arg5[%c7_116, %c0_117] : memref<8x128xf32, #tpu.memory_space<vmem>>, vector<1x128xf32>
    tpu.vector_store %arg5[%c7_116, %c0_117], %104 {strides = array<i32>} : memref<8x128xf32, #tpu.memory_space<vmem>>, vector<1x128xf32>,
    return
  }
  func.func @transform_1(%arg0: i32, %arg1: i32, %arg2: memref<8x128xi32, #tpu.memory_space<smem>>) -> (i32, i32) {
    %c0_i32 = arith.constant 0 : i32
    %c0_i32_0 = arith.constant 0 : i32
    return %arg0, %c0_i32 : i32, i32
  }
  func.func @transform_2(%arg0: i32, %arg1: i32, %arg2: memref<8x128xi32, #tpu.memory_space<smem>>) -> (i32, i32) {
    %c0_i32 = arith.constant 0 : i32
    return %arg0, %arg1 : i32, i32
  }
}

</mosaic_0001>

<bundles_post_ra>
// kernel: memory_insdis_step.1
= control target key start
LH: loop header
LB: loop body
LE: loop exit
PB: predicated region body
PF: predicated region fallthrough
CT: control target
= control target key end

     0   :  { %s8032_s0 = inlined_call_operand.vmem [shape: s32[8,128], index: 0, kind: input, shape index: {}]   ;;  %s8033_s1 = inlined_call_operand.hbm [shape: f32[256,128], index: 1, kind: input, shape index: {}]   ;;  %s8034_s2 = inlined_call_operand.hbm [shape: f32[8,128], index: 2, kind: input, shape index: {}]   ;;  %s8035_s3 = inlined_call_operand.vmem [shape: f32[8,128], index: 3, kind: output, shape index: {}]  }
   0x1   :  { %s8_s14 = sshll.u32 %s8032_s0, 4  ;;  %s9_s14 = int_to_ptr.vmem [resolvable:$true] %s8_s14 }
   0x2   :  { %s4790_s15 = scalar_lea.vmem %s9_s14, 128  ;;  %p4795_p1 = scmp.lt.s32.totalorder %s9_s14, %s9_s14 }
   0x3   :  { %p4791_p0 = scmp.ne.s32.totalorder %s9_s14, %s4790_s15  ;;  %p4796_p2 = scmp.lt.s32.totalorder %s4790_s15, %s4790_s15 }
   0x5   :  { %p4797_p3 = por %p4796_p2, %p4795_p1 }
   0x7   :  { %p4798_p4 = pnand %p4797_p3, %p4791_p0 }
   0x9   :  { %4801 = shalt.err (!%p4798_p4)  }
   0xa   :  { %s6508_s16 = smov [#allocation5]  }
   0xb   :  { %11 = dma.vmem_to_smem %s9_s14, 128, %s6508_s16, [#allocation4] }
   0xc   :  { %6424 = dma.done.wait [#allocation4], 128 }
   0xd   :  { %6425 = vsyncadd [#allocation4], 4294967168 }
   0xe   :  { %13 = sfence }
   0xf   :  { %14 = vsyncpa [#allocation7], 0  ;;  %s6509_s17 = smov [#allocation6]   ;;  %s4802_s0 = scalar_lea.hbm %s8034_s2, 128 }
  0x10   :  { %s21_s18 = sshll.u32 %s6509_s17, 4  ;;  %p4803_p5 = scmp.ne.s32.totalorder %s8034_s2, %s4802_s0  ;;  %s22_s18 = int_to_ptr.vmem [resolvable:$true] %s21_s18 }
  0x11   :  { %p4806_p6 = scmp.lt.u32.totalorder %s4802_s0, %s8034_s2 }
  0x13   :  { %p4808_p7 = pnand %p4806_p6, %p4803_p5 }
  0x15   :  { %4811 = shalt.err (!%p4808_p7)
}
  0x16   :  { %s4812_s25 = scalar_lea.vmem %s22_s18, 128  ;;  %p4817_p9 = scmp.lt.s32.totalorder %s22_s18, %s22_s18 }
  0x17   :  { %p4813_p8 = scmp.ne.s32.totalorder %s22_s18, %s4812_s25  ;;  %p4818_p10 = scmp.lt.s32.totalorder %s4812_s25, %s4812_s25 }
  0x19   :  { %p4819_p11 = por %p4818_p10, %p4817_p9 }
  0x1b   :  { %p4820_p12 = pnand %p4819_p11, %p4813_p8 }
  0x1d   :  { %4823 = shalt.err (!%p4820_p12)
}
  0x1e   :  { %24 = dma.hbm_to_vmem [thread:$0]  %s8034_s2, 128, %s22_s18, [#allocation7]  }
  0x1f   :  { %6426 = dma.done.wait [#allocation7], 128  }
  0x20   :  { %6427 = vsyncadd [#allocation7], 4294967168  ;;  %s6546_s28 = smov 0  }
  0x21 LB: > { %s6552_s29 = sshll.u32 %s6446_s28, 3  ;;  %s6575_s26 = scalar_lea.hbm %s8033_s1, 4096  ;;  %s6446_s28 = sphi %s6546_s28, %s35_s28  }
  0x22   : > { %s38_s30 = sshra.s32 %s6552_s29, 7  ;;  %s43_s4 = sand.u32 127, %s6552_s29 }
  0x23   : > { %s4078_s2 = sshll.u32 %s38_s30, 7  ;;  %s6557_s6 = scalar_lea.vmem [#allocation2], %s6552_s29 }
  0x24   : > { %s44_s5 = sadd.s32 %s4078_s2, %s43_s4  ;;  %s56_s7 = sshll.u32 %s6557_s6, 4  ;;  %s6560_s7 = int_to_ptr.vmem [resolvable:$true] %s56_s7 }
  0x25   : > { %s45_s8 = sld [smem:[#allocation5 + %s44_s5]]  ;;  %s60_s9 = sadd.s32 1, %s6552_s29 }
  0x26   : > { %s3686_s10 = scalar_lea.vmem %s6557_s6, 1 [#allocation2]  ;;  %s61_s11 = sshra.s32 %s60_s9, 7 }
  0x27   : > { %s66_s12 = sand.u32 127, %s60_s9  ;;  %s4080_s13 = sshll.u32 %s61_s11, 7 }
  0x28   : > { %s80_s14 = sshll.u32 %s3686_s10, 4  ;;  %s67_s15 = sadd.s32 %s4080_s13, %s66_s12  ;;  %s6564_s14 = int_to_ptr.vmem [resolvable:$true] %s80_s14 }
  0x29   : > { %s6566_s16 = sld [smem:[#allocation5 + %s67_s15]]  ;;  %s84_s17 = sadd.s32 2, %s6552_s29 }
  0x2a   : > { %s85_s19 = sshra.s32 %s84_s17, 7 }
  0x2b   : > { %s4079_s18 = sshll.u32 %s45_s8, 4  ;;  %s4083_s22 = sshll.u32 %s85_s19, 7 }
  0x2c   : > { %s47_s21 = scalar_lea.hbm %s8033_s1, %s4079_s18 }
  0x2d   : > { %s4824_s23 = scalar_lea.hbm %s47_s21, 16  ;;  %p4827_p0 = scmp.lt.u32.totalorder %s47_s21, %s8033_s1 }
  0x2e   : > { %p4825_p13 = scmp.ne.s32.totalorder %s47_s21, %s4824_s23  ;;  %p4828_p1 = scmp.lt.u32.totalorder %s6575_s26, %s4824_s23 }
  0x2f   : > { %p4830_p3 = scmp.lt.u32.totalorder %s4824_s23, %s47_s21 }
  0x30   : > { %p4829_p2 = por %p4828_p1, %p4827_p0 }
  0x32   : > { %p4831_p4 = por %p4830_p3, %p4829_p2 }
  0x34   : > { %p4832_p5 = pnand %p4831_p4, %p4825_p13 }
  0x36   : > { %4835 = shalt.err (!%p4832_p5)  }
  0x37   : > { %s4836_s4 = scalar_lea.vmem %s6560_s7, 16  ;;  %s6510_s2 = smov [#allocation2]  }
  0x38   : > { %p4837_p6 = scmp.ne.s32.totalorder %s6560_s7, %s4836_s4  ;;  %s4838_s5 = sshll.u32 %s6510_s2, 4  ;;  %s6583_s5 = int_to_ptr.vmem [resolvable:$false] %s4838_s5 }
  0x39   : > { %s6586_s8 = scalar_lea.vmem %s6583_s5, 16384  ;;  %p4841_p7 = scmp.lt.s32.totalorder %s6560_s7, %s6583_s5 }
  0x3a   : > { %p4842_p8 = scmp.lt.s32.totalorder %s6586_s8, %s4836_s4 }
  0x3c   : > { %p4843_p9 = por %p4842_p8, %p4841_p7 }
  0x3e   : > { %p4844_p10 = pnand %p4843_p9, %p4837_p6 }
  0x40   : > { %4847 = shalt.err (!%p4844_p10)  }
  0x41   : > { %59 = dma.hbm_to_vmem [thread:$0]  %s47_s21, 16, %s6560_s7, [#allocation3] }
  0x42   : > { %s90_s9 = sand.u32 127, %s84_s17  ;;  %s3691_s10 = scalar_lea.vmem %s6557_s6, 2 [#allocation2] }
  0x43   : > { %s91_s11 = sadd.s32 %s4083_s22, %s90_s9  ;;  %s104_s12 = sshll.u32 %s3691_s10, 4  ;;  %s6599_s12 = int_to_ptr.vmem [resolvable:$true] %s104_s12 }
  0x44   : > { %s4081_s13 = sshll.u32 %s6566_s16, 4  ;;  %s6594_s15 = sld [smem:[#allocation5 + %s91_s11]] }
  0x45   : > { %s71_s20 = scalar_lea.hbm %s8033_s1, %s4081_s13 }
  0x46   : > { %s4848_s0 = scalar_lea.hbm %s71_s20, 16  ;;  %p4851_p12 = scmp.lt.u32.totalorder %s71_s20, %s8033_s1 }
  0x47   : > { %p4849_p11 = scmp.ne.s32.totalorder %s71_s20, %s4848_s0  ;;  %p4852_p13 = scmp.lt.u32.totalorder %s6575_s26, %s4848_s0 }
  0x48   : > { %p4854_p1 = scmp.lt.u32.totalorder %s4848_s0, %s71_s20 }
  0x49   : > { %p4853_p0 = por %p4852_p13, %p4851_p12 }
  0x4b   : > { %p4855_p2 = por %p4854_p1, %p4853_p0 }
  0x4d   : > { %p4856_p3 = pnand %p4855_p2, %p4849_p11 }
  0x4f   : > { %4859 = shalt.err (!%p4856_p3)  }
  0x50   : > { %s4860_s7 = scalar_lea.vmem %s6564_s14, 16  ;;  %p4865_p5 = scmp.lt.s32.totalorder %s6564_s14, %s6583_s5 }
  0x51   : > { %p4861_p4 = scmp.ne.s32.totalorder %s6564_s14, %s4860_s7  ;;  %p4866_p6 = scmp.lt.s32.totalorder %s6586_s8, %s4860_s7 }
  0x53   : > { %p4867_p7 = por %p4866_p6, %p4865_p5 }
  0x55   : > { %p4868_p8 = pnand %p4867_p7, %p4861_p4 }
  0x57   : > { %4871 = shalt.err (!%p4868_p8)  }
  0x58   : > { %83 = dma.hbm_to_vmem [thread:$0]  %s71_s20, 16, %s6564_s14, [#allocation3] }
  0x59   : > { %s108_s16 = sadd.s32 3, %s6552_s29  ;;  %s3696_s17 = scalar_lea.vmem %s6557_s6, 3 [#allocation2] }
  0x5a   : > { %s109_s21 = sshra.s32 %s108_s16, 7  ;;  %s114_s22 = sand.u32 127, %s108_s16 }
  0x5b   : > { %s4086_s25 = sshll.u32 %s109_s21, 7  ;;  %s128_s27 = sshll.u32 %s3696_s17, 4  ;;  %s129_s27 = int_to_ptr.vmem [resolvable:$true] %s128_s27 }
  0x5c   : > { %s4084_s30 = sshll.u32 %s6594_s15, 4  ;;  %s115_s4 = sadd.s32 %s4086_s25, %s114_s22 }
  0x5d   : > { %s95_s10 = scalar_lea.hbm %s8033_s1, %s4084_s30  ;;  %s6617_s11 = sld [smem:[#allocation5 + %s115_s4]] }
  0x5e   : > { %s4872_s13 = scalar_lea.hbm %s95_s10, 16  ;;  %p4875_p10 = scmp.lt.u32.totalorder %s95_s10, %s8033_s1 }
  0x5f   : > { %p4873_p9 = scmp.ne.s32.totalorder %s95_s10, %s4872_s13  ;;  %p4876_p11 = scmp.lt.u32.totalorder %s6575_s26, %s4872_s13 }
  0x60   : > { %p4878_p13 = scmp.lt.u32.totalorder %s4872_s13, %s95_s10 }
  0x61   : > { %p4877_p12 = por %p4876_p11, %p4875_p10 }
  0x63   : > { %p4879_p0 = por %p4878_p13, %p4877_p12 }
  0x65   : > { %p4880_p1 = pnand %p4879_p0, %p4873_p9 }
  0x67   : > { %4883 = shalt.err (!%p4880_p1)  }
  0x68   : > { %s4884_s14 = scalar_lea.vmem %s6599_s12, 16  ;;  %p4889_p3 = scmp.lt.s32.totalorder %s6599_s12, %s6583_s5 }
  0x69   : > { %p4885_p2 = scmp.ne.s32.totalorder %s6599_s12, %s4884_s14  ;;  %p4890_p4 = scmp.lt.s32.totalorder %s6586_s8, %s4884_s14 }
  0x6b   : > { %p4891_p5 = por %p4890_p4, %p4889_p3 }
  0x6d   : > { %p4892_p6 = pnand %p4891_p5, %p4885_p2 }
  0x6f   : > { %4895 = shalt.err (!%p4892_p6)  }
  0x70   : > { %107 = dma.hbm_to_vmem [thread:$0]  %s95_s10, 16, %s6599_s12, [#allocation3] }
  0x71   : > { %s132_s15 = sadd.s32 4, %s6552_s29  ;;  %s3701_s24 = scalar_lea.vmem %s6557_s6, 4 [#allocation2] }
  0x72   : > { %s133_s20 = sshra.s32 %s132_s15, 7  ;;  %s138_s0 = sand.u32 127, %s132_s15 }
  0x73   : > { %s4089_s23 = sshll.u32 %s133_s20, 7  ;;  %s152_s16 = sshll.u32 %s3701_s24, 4  ;;  %s6637_s16 = int_to_ptr.vmem [resolvable:$true] %s152_s16 }
  0x74   : > { %s139_s7 = sadd.s32 %s4089_s23, %s138_s0  ;;  %s4087_s17 = sshll.u32 %s6617_s11, 4 }
  0x75   : > { %s6632_s21 = sld [smem:[#allocation5 + %s139_s7]]  ;;  %s119_s30 = scalar_lea.hbm %s8033_s1, %s4087_s17 }
  0x76   : > { %s4896_s4 = scalar_lea.hbm %s119_s30, 16  ;;  %p4899_p8 = scmp.lt.u32.totalorder %s119_s30, %s8033_s1 }
  0x77   : > { %p4897_p7 = scmp.ne.s32.totalorder %s119_s30, %s4896_s4  ;;  %p4900_p9 = scmp.lt.u32.totalorder %s6575_s26, %s4896_s4 }
  0x78   : > { %p4902_p11 = scmp.lt.u32.totalorder %s4896_s4, %s119_s30 }
  0x79   : > { %p4901_p10 = por %p4900_p9, %p4899_p8 }
  0x7b   : > { %p4903_p12 = por %p4902_p11, %p4901_p10 }
  0x7d   : > { %p4904_p13 = pnand %p4903_p12, %p4897_p7 }
  0x7f   : > { %4907 = shalt.err (!%p4904_p13)  }
  0x80   : > { %s4908_s9 = scalar_lea.vmem %s129_s27, 16  ;;  %p4913_p1 = scmp.lt.s32.totalorder %s129_s27, %s6583_s5 }
  0x81   : > { %p4909_p0 = scmp.ne.s32.totalorder %s129_s27, %s4908_s9  ;;  %p4914_p2 = scmp.lt.s32.totalorder %s6586_s8, %s4908_s9 }
  0x83   : > { %p4915_p3 = por %p4914_p2, %p4913_p1 }
  0x85   : > { %p4916_p4 = pnand %p4915_p3, %p4909_p0 }
  0x87   : > { %4919 = shalt.err (!%p4916_p4)  }
  0x88   : > { %131 = dma.hbm_to_vmem [thread:$0]  %s119_s30, 16, %s129_s27, [#allocation3] }
  0x89   : > { %s156_s10 = sadd.s32 5, %s6552_s29  ;;  %s3706_s11 = scalar_lea.vmem %s6557_s6, 5 [#allocation2] }
  0x8a   : > { %s157_s13 = sshra.s32 %s156_s10, 7  ;;  %s162_s18 = sand.u32 127, %s156_s10 }
  0x8b   : > { %s4092_s19 = sshll.u32 %s157_s13, 7  ;;  %s176_s14 = sshll.u32 %s3706_s11, 4  ;;  %s177_s14 = int_to_ptr.vmem [resolvable:$true] %s176_s14 }
  0x8c   : > { %s4090_s15 = sshll.u32 %s6632_s21, 4  ;;  %s163_s20 = sadd.s32 %s4092_s19, %s162_s18 }
  0x8d   : > { %s143_s24 = scalar_lea.hbm %s8033_s1, %s4090_s15  ;;  %s6651_s7 = sld [smem:[#allocation5 + %s163_s20]] }
  0x8e   : > { %s4920_s17 = scalar_lea.hbm %s143_s24, 16  ;;  %p4923_p6 = scmp.lt.u32.totalorder %s143_s24, %s8033_s1 }
  0x8f   : > { %p4921_p5 = scmp.ne.s32.totalorder %s143_s24, %s4920_s17  ;;  %p4924_p7 = scmp.lt.u32.totalorder %s6575_s26, %s4920_s17 }
  0x90   : > { %p4926_p9 = scmp.lt.u32.totalorder %s4920_s17, %s143_s24 }
  0x91   : > { %p4925_p8 = por %p4924_p7, %p4923_p6 }
  0x93   : > { %p4927_p10 = por %p4926_p9, %p4925_p8 }
  0x95   : > { %p4928_p11 = pnand %p4927_p10, %p4921_p5 }
  0x97   : > { %4931 = shalt.err (!%p4928_p11)  }
  0x98   : > { %s4932_s21 = scalar_lea.vmem %s6637_s16, 16  ;;  %p4937_p13 = scmp.lt.s32.totalorder %s6637_s16, %s6583_s5 }
  0x99   : > { %p4933_p12 = scmp.ne.s32.totalorder %s6637_s16, %s4932_s21  ;;  %p4938_p0 = scmp.lt.s32.totalorder %s6586_s8, %s4932_s21 }
  0x9b   : > { %p4939_p1 = por %p4938_p0, %p4937_p13 }
  0x9d   : > { %p4940_p2 = pnand %p4939_p1, %p4933_p12 }
  0x9f   : > { %4943 = shalt.err (!%p4940_p2)  }
  0xa0   : > { %155 = dma.hbm_to_vmem [thread:$0]  %s143_s24, 16, %s6637_s16, [#allocation3] }
  0xa1   : > { %s180_s25 = sadd.s32 6, %s6552_s29  ;;  %s3711_s2 = scalar_lea.vmem %s6557_s6, 6 [#allocation2] }
  0xa2   : > { %s181_s30 = sshra.s32 %s180_s25, 7  ;;  %s186_s4 = sand.u32 127, %s180_s25 }
  0xa3   : > { %s4095_s12 = sshll.u32 %s181_s30, 7  ;;  %s200_s10 = sshll.u32 %s3711_s2, 4  ;;  %s201_s10 = int_to_ptr.vmem [resolvable:$true] %s200_s10 }
  0xa4   : > { %s187_s9 = sadd.s32 %s4095_s12, %s186_s4  ;;  %s4093_s11 = sshll.u32 %s6651_s7, 4 }
  0xa5   : > { %s188_s13 = sld [smem:[#allocation5 + %s187_s9]]  ;;  %s167_s15 = scalar_lea.hbm %s8033_s1, %s4093_s11 }
  0xa6   : > { %s4944_s20 = scalar_lea.hbm %s167_s15, 16  ;;  %p4947_p4 = scmp.lt.u32.totalorder %s167_s15, %s8033_s1 }
  0xa7   : > { %p4945_p3 = scmp.ne.s32.totalorder %s167_s15, %s4944_s20  ;;  %p4948_p5 = scmp.lt.u32.totalorder %s6575_s26, %s4944_s20 }
  0xa8   : > { %p4950_p7 = scmp.lt.u32.totalorder %s4944_s20, %s167_s15 }
  0xa9   : > { %p4949_p6 = por %p4948_p5, %p4947_p4 }
  0xab   : > { %p4951_p8 = por %p4950_p7, %p4949_p6 }
  0xad   : > { %p4952_p9 = pnand %p4951_p8, %p4945_p3 }
  0xaf   : > { %4955 = shalt.err (!%p4952_p9)  }
  0xb0   : > { %s4956_s16 = scalar_lea.vmem %s177_s14, 16  ;;  %p4961_p11 = scmp.lt.s32.totalorder %s177_s14, %s6583_s5 }
  0xb1   : > { %p4957_p10 = scmp.ne.s32.totalorder %s177_s14, %s4956_s16  ;;  %p4962_p12 = scmp.lt.s32.totalorder %s6586_s8, %s4956_s16 }
  0xb3   : > { %p4963_p13 = por %p4962_p12, %p4961_p11 }
  0xb5   : > { %p4964_p0 = pnand %p4963_p13, %p4957_p10 }
  0xb7   : > { %4967 = shalt.err (!%p4964_p0)  }
  0xb8   : > { %179 = dma.hbm_to_vmem [thread:$0]  %s167_s15, 16, %s177_s14, [#allocation3] }
  0xb9   : > { %s204_s24 = sadd.s32 7, %s6552_s29  ;;  %s3716_s22 = scalar_lea.vmem %s6557_s6, 7 [#allocation2] }
  0xba   : > { %s205_s7 = sshra.s32 %s204_s24, 7  ;;  %s210_s17 = sand.u32 127, %s204_s24 }
  0xbb   : > { %s4098_s27 = sshll.u32 %s205_s7, 7  ;;  %s4096_s21 = sshll.u32 %s188_s13, 4 }
  0xbc   : > { %s211_s25 = sadd.s32 %s4098_s27, %s210_s17  ;;  %s191_s12 = scalar_lea.hbm %s8033_s1, %s4096_s21 }
  0xbd   : > { %s212_s2 = sld [smem:[#allocation5 + %s211_s25]]  ;;  %s4968_s9 = scalar_lea.hbm %s191_s12, 16 }
  0xbe   : > { %p4969_p1 = scmp.ne.s32.totalorder %s191_s12, %s4968_s9  ;;  %p4971_p2 = scmp.lt.u32.totalorder %s191_s12, %s8033_s1 }
  0xbf   : > { %p4972_p3 = scmp.lt.u32.totalorder %s6575_s26, %s4968_s9  ;;  %p4974_p5 = scmp.lt.u32.totalorder %s4968_s9, %s191_s12 }
  0xc1   : > { %p4973_p4 = por %p4972_p3, %p4971_p2 }
  0xc3   : > { %p4975_p6 = por %p4974_p5, %p4973_p4 }
  0xc5   : > { %p4976_p7 = pnand %p4975_p6, %p4969_p1 }
  0xc7   : > { %4979 = shalt.err (!%p4976_p7)  }
  0xc8   : > { %s4980_s29 = scalar_lea.vmem %s201_s10, 16  ;;  %p4985_p9 = scmp.lt.s32.totalorder %s201_s10, %s6583_s5 }
  0xc9   : > { %p4981_p8 = scmp.ne.s32.totalorder %s201_s10, %s4980_s29  ;;  %p4986_p10 = scmp.lt.s32.totalorder %s6586_s8, %s4980_s29 }
  0xcb   : > { %p4987_p11 = por %p4986_p10, %p4985_p9 }
  0xcd   : > { %p4988_p12 = pnand %p4987_p11, %p4981_p8 }
  0xcf   : > { %4991 = shalt.err (!%p4988_p12)  }
  0xd0   : > { %203 = dma.hbm_to_vmem [thread:$0]  %s191_s12, 16, %s201_s10, [#allocation3] }
  0xd1   : > { %s224_s6 = sshll.u32 %s3716_s22, 4  ;;  %s4099_s13 = sshll.u32 %s212_s2, 4  ;;  %s225_s6 = int_to_ptr.vmem [resolvable:$true] %s224_s6 }
  0xd2   : > { %s215_s15 = scalar_lea.hbm %s8033_s1, %s4099_s13 }
  0xd3   : > { %s4992_s20 = scalar_lea.hbm %s215_s15, 16  ;;  %p4995_p0 = scmp.lt.u32.totalorder %s215_s15, %s8033_s1 }
  0xd4   : > { %p4993_p13 = scmp.ne.s32.totalorder %s215_s15, %s4992_s20  ;;  %p4996_p1 = scmp.lt.u32.totalorder %s6575_s26, %s4992_s20 }
  0xd5   : > { %p4998_p3 = scmp.lt.u32.totalorder %s4992_s20, %s215_s15 }
  0xd6   : > { %p4997_p2 = por %p4996_p1, %p4995_p0 }
  0xd8   : > { %p4999_p4 = por %p4998_p3, %p4997_p2 }
  0xda   : > { %p5000_p5 = pnand %p4999_p4, %p4993_p13 }
  0xdc   : > { %5003 = shalt.err (!%p5000_p5)  }
  0xdd   : > { %s5004_s10 = scalar_lea.vmem %s225_s6, 16  ;;  %p5009_p7 = scmp.lt.s32.totalorder %s225_s6, %s6583_s5 }
  0xde   : > { %p5005_p6 = scmp.ne.s32.totalorder %s225_s6, %s5004_s10  ;;  %p5010_p8 = scmp.lt.s32.totalorder %s6586_s8, %s5004_s10 }
  0xe0   : > { %p5011_p9 = por %p5010_p8, %p5009_p7 }
  0xe2   : > { %p5012_p10 = pnand %p5011_p9, %p5005_p6 }
  0xe4   : > { %5015 = shalt.err (!%p5012_p10)  }
  0xe5   : > { %227 = dma.hbm_to_vmem [thread:$0]  %s215_s15, 16, %s225_s6, [#allocation3] }
  0xe6   : > { %s35_s28 = sadd.s32 1, %s6446_s28  }
  0xe7   : > { %p32_p11 = scmp.ge.s32.totalorder %s35_s28, 16  }
  0xe8   :  { %s6698_s16 = smov (%p32_p11), 0  }
  0xe9   :  { %34 = sbr.rel (!%p32_p11) target bundleno = 33 (0x21), region = 552 }
  0xf0 LB: > { %s6704_s24 = sshll.u32 %s6450_s16, 3  ;;  %s6450_s16 = sphi %s6698_s16, %s234_s16  }
  0xf1   : > { %s237_s7 = sshra.s32 %s6704_s24, 7  ;;  %s242_s17 = sand.u32 127, %s6704_s24 }
  0xf2   : > { %s4292_s27 = sshll.u32 %s237_s7, 7  ;;  %s6709_s28 = scalar_lea.vmem [#allocation2], %s6704_s24 }
  0xf3   : > { %s4293_s22 = sadd.s32 128, %s4292_s27  ;;  %s3721_s21 = scalar_lea.vmem %s6709_s28, 128 [#allocation2] }
  0xf4   : > { %s243_s25 = sadd.s32 %s4293_s22, %s242_s17  ;;  %s257_s30 = sshll.u32 %s3721_s21, 4  ;;  %s6712_s30 = int_to_ptr.vmem [resolvable:$true] %s257_s30 }
  0xf5   : > { %s244_s4 = sld [smem:[#allocation5 + %s243_s25]]  ;;  %s261_s12 = sadd.s32 1, %s6704_s24 }
  0xf6   : > { %s3726_s2 = scalar_lea.vmem %s6709_s28, 129 [#allocation2]  ;;  %s262_s9 = sshra.s32 %s261_s12, 7 }
  0xf7   : > { %s267_s11 = sand.u32 127, %s261_s12  ;;  %s4294_s14 = sshll.u32 %s262_s9, 7 }
  0xf8   : > { %s282_s29 = sshll.u32 %s3726_s2, 4  ;;  %s4295_s6 = sadd.s32 128, %s4294_s14  ;;  %s6716_s29 = int_to_ptr.vmem [resolvable:$true] %s282_s29 }
  0xf9   : > { %s268_s13 = sadd.s32 %s4295_s6, %s267_s11  ;;  %s286_s18 = sadd.s32 2, %s6704_s24 }
  0xfa   : > { %s6719_s15 = sld [smem:[#allocation5 + %s268_s13]]  ;;  %s287_s10 = sshra.s32 %s286_s18, 7 }
  0xfb   : > { %s4103_s19 = sshll.u32 %s244_s4, 4 }
  0xfc   : > { %s246_s23 = scalar_lea.hbm %s8033_s1, %s4103_s19 }
  0xfd   : > { %s5016_s7 = scalar_lea.hbm %s246_s23, 16  ;;  %p5019_p13 = scmp.lt.u32.totalorder %s246_s23, %s8033_s1 }
  0xfe   : > { %p5017_p12 = scmp.ne.s32.totalorder %s246_s23, %s5016_s7  ;;  %p5020_p0 = scmp.lt.u32.totalorder %s6575_s26, %s5016_s7 }
  0xff   : > { %p5022_p2 = scmp.lt.u32.totalorder %s5016_s7, %s246_s23 }
 0x100   : > { %p5021_p1 = por %p5020_p0, %p5019_p13 }
 0x102   : > { %p5023_p3 = por %p5022_p2, %p5021_p1 }
 0x104   : > { %p5024_p4 = pnand %p5023_p3, %p5017_p12 }
 0x106   : > { %5027 = shalt.err (!%p5024_p4)  }
 0x107   : > { %s5028_s22 = scalar_lea.vmem %s6712_s30, 16  ;;  %p5033_p6 = scmp.lt.s32.totalorder %s6712_s30, %s6583_s5 }
 0x108   : > { %p5029_p5 = scmp.ne.s32.totalorder %s6712_s30, %s5028_s22  ;;  %p5034_p7 = scmp.lt.s32.totalorder %s6586_s8, %s5028_s22 }
 0x10a   : > { %p5035_p8 = por %p5034_p7, %p5033_p6 }
 0x10c   : > { %p5036_p9 = pnand %p5035_p8, %p5029_p5 }
 0x10e   : > { %5039 = shalt.err (!%p5036_p9)  }
 0x10f   : > { %260 = dma.hbm_to_vmem [thread:$0]  %s246_s23, 16, %s6712_s30, [#allocation3 + $0x1] }
 0x110   : > { %s4296_s21 = sshll.u32 %s287_s10, 7  ;;  %s292_s25 = sand.u32 127, %s286_s18 }
 0x111   : > { %s4297_s4 = sadd.s32 128, %s4296_s21  ;;  %s3731_s12 = scalar_lea.vmem %s6709_s28, 130 [#allocation2] }
 0x112   : > { %s293_s2 = sadd.s32 %s4297_s4, %s292_s25  ;;  %s307_s9 = sshll.u32 %s3731_s12, 4  ;;  %s6741_s9 = int_to_ptr.vmem [resolvable:$true] %s307_s9 }
 0x113   : > { %s4106_s11 = sshll.u32 %s6719_s15, 4  ;;  %s6736_s14 = sld [smem:[#allocation5 + %s293_s2]] }
 0x114   : > { %s272_s19 = scalar_lea.hbm %s8033_s1, %s4106_s11 }
 0x115   : > { %s5040_s20 = scalar_lea.hbm %s272_s19, 16  ;;  %p5043_p11 = scmp.lt.u32.totalorder %s272_s19, %s8033_s1 }
 0x116   : > { %p5041_p10 = scmp.ne.s32.totalorder %s272_s19, %s5040_s20  ;;  %p5044_p12 = scmp.lt.u32.totalorder %s6575_s26, %s5040_s20 }
 0x117   : > { %p5046_p0 = scmp.lt.u32.totalorder %s5040_s20, %s272_s19 }
 0x118   : > { %p5045_p13 = por %p5044_p12, %p5043_p11 }
 0x11a   : > { %p5047_p1 = por %p5046_p0, %p5045_p13 }
 0x11c   : > { %p5048_p2 = pnand %p5047_p1, %p5041_p10 }
 0x11e   : > { %5051 = shalt.err (!%p5048_p2)  }
 0x11f   : > { %s5052_s30 = scalar_lea.vmem %s6716_s29, 16  ;;  %p5057_p4 = scmp.lt.s32.totalorder %s6716_s29, %s6583_s5 }
 0x120   : > { %p5053_p3 = scmp.ne.s32.totalorder %s6716_s29, %s5052_s30  ;;  %p5058_p5 = scmp.lt.s32.totalorder %s6586_s8, %s5052_s30 }
 0x122   : > { %p5059_p6 = por %p5058_p5, %p5057_p4 }
 0x124   : > { %p5060_p7 = pnand %p5059_p6, %p5053_p3 }
 0x126   : > { %5063 = shalt.err (!%p5060_p7)  }
 0x127   : > { %285 = dma.hbm_to_vmem [thread:$0]  %s272_s19, 16, %s6716_s29, [#allocation3 + $0x1] }
 0x128   : > { %s311_s18 = sadd.s32 3, %s6704_s24  ;;  %s3736_s15 = scalar_lea.vmem %s6709_s28, 131 [#allocation2] }
 0x129   : > { %s312_s23 = sshra.s32 %s311_s18, 7  ;;  %s317_s10 = sand.u32 127, %s311_s18 }
 0x12a   : > { %s4298_s17 = sshll.u32 %s312_s23, 7  ;;  %s332_s27 = sshll.u32 %s3736_s15, 4  ;;  %s6769_s27 = int_to_ptr.vmem [resolvable:$true] %s332_s27 }
 0x12b   : > { %s4109_s22 = sshll.u32 %s6736_s14, 4  ;;  %s4299_s21 = sadd.s32 128, %s4298_s17 }
 0x12c   : > { %s297_s12 = scalar_lea.hbm %s8033_s1, %s4109_s22  ;;  %s318_s2 = sadd.s32 %s4299_s21, %s317_s10 }
 0x12d   : > { %s5064_s11 = scalar_lea.hbm %s297_s12, 16  ;;  %p5067_p9 = scmp.lt.u32.totalorder %s297_s12, %s8033_s1 }
 0x12e   : > { %p5065_p8 = scmp.ne.s32.totalorder %s297_s12, %s5064_s11  ;;  %p5068_p10 = scmp.lt.u32.totalorder %s6575_s26, %s5064_s11 }
 0x12f   : > { %p5070_p12 = scmp.lt.u32.totalorder %s5064_s11, %s297_s12 }
 0x130   : > { %p5069_p11 = por %p5068_p10, %p5067_p9 }
 0x132   : > { %p5071_p13 = por %p5070_p12, %p5069_p11 }
 0x134   : > { %p5072_p0 = pnand %p5071_p13, %p5065_p8 }
 0x136   : > { %5075 = shalt.err (!%p5072_p0)  }
 0x137   : > { %s5076_s29 = scalar_lea.vmem %s6741_s9, 16  ;;  %p5081_p2 = scmp.lt.s32.totalorder %s6741_s9, %s6583_s5 }
 0x138   : > { %p5077_p1 = scmp.ne.s32.totalorder %s6741_s9, %s5076_s29  ;;  %p5082_p3 = scmp.lt.s32.totalorder %s6586_s8, %s5076_s29 }
 0x13a   : > { %p5083_p4 = por %p5082_p3, %p5081_p2 }
 0x13c   : > { %p5084_p5 = pnand %p5083_p4, %p5077_p1 }
 0x13e   : > { %5087 = shalt.err (!%p5084_p5)  }
 0x13f   : > { %310 = dma.hbm_to_vmem [thread:$0]  %s297_s12, 16, %s6741_s9, [#allocation3 + $0x1] }
 0x140   : > { %s319_s14 = sld [smem:[#allocation5 + %s318_s2]]  ;;  %s336_s19 = sadd.s32 4, %s6704_s24 }
 0x141   : > { %s3741_s20 = scalar_lea.vmem %s6709_s28, 132 [#allocation2]  ;;  %s337_s0 = sshra.s32 %s336_s19, 7 }
 0x142   : > { %s342_s7 = sand.u32 127, %s336_s19  ;;  %s4300_s30 = sshll.u32 %s337_s0, 7 }
 0x143   : > { %s357_s18 = sshll.u32 %s3741_s20, 4  ;;  %s4301_s15 = sadd.s32 128, %s4300_s30  ;;  %s6773_s18 = int_to_ptr.vmem [resolvable:$true] %s357_s18 }
 0x144   : > { %s343_s23 = sadd.s32 %s4301_s15, %s342_s7  ;;  %s361_s10 = sadd.s32 5, %s6704_s24 }
 0x145   : > { %s6776_s22 = sld [smem:[#allocation5 + %s343_s23]]  ;;  %s362_s4 = sshra.s32 %s361_s10, 7 }
 0x146   : > { %s4112_s17 = sshll.u32 %s319_s14, 4 }
 0x147   : > { %s322_s25 = scalar_lea.hbm %s8033_s1, %s4112_s17 }
 0x148   : > { %s5088_s12 = scalar_lea.hbm %s322_s25, 16  ;;  %p5091_p7 = scmp.lt.u32.totalorder %s322_s25, %s8033_s1 }
 0x149   : > { %p5089_p6 = scmp.ne.s32.totalorder %s322_s25, %s5088_s12  ;;  %p5092_p8 = scmp.lt.u32.totalorder %s6575_s26, %s5088_s12 }
 0x14a   : > { %p5094_p10 = scmp.lt.u32.totalorder %s5088_s12, %s322_s25 }
 0x14b   : > { %p5093_p9 = por %p5092_p8, %p5091_p7 }
 0x14d   : > { %p5095_p11 = por %p5094_p10, %p5093_p9 }
 0x14f   : > { %p5096_p12 = pnand %p5095_p11, %p5089_p6 }
 0x151   : > { %5099 = shalt.err (!%p5096_p12)  }
 0x152   : > { %s5100_s6 = scalar_lea.vmem %s6769_s27, 16  ;;  %p5105_p0 = scmp.lt.s32.totalorder %s6769_s27, %s6583_s5 }
 0x153   : > { %p5101_p13 = scmp.ne.s32.totalorder %s6769_s27, %s5100_s6  ;;  %p5106_p1 = scmp.lt.s32.totalorder %s6586_s8, %s5100_s6 }
 0x155   : > { %p5107_p2 = por %p5106_p1, %p5105_p0 }
 0x157   : > { %p5108_p3 = pnand %p5107_p2, %p5101_p13 }
 0x159   : > { %5111 = shalt.err (!%p5108_p3)  }
 0x15a   : > { %335 = dma.hbm_to_vmem [thread:$0]  %s322_s25, 16, %s6769_s27, [#allocation3 + $0x1] }
 0x15b   : > { %s4302_s13 = sshll.u32 %s362_s4, 7  ;;  %s367_s29 = sand.u32 127, %s361_s10 }
 0x15c   : > { %s4303_s14 = sadd.s32 128, %s4302_s13  ;;  %s3746_s19 = scalar_lea.vmem %s6709_s28, 133 [#allocation2] }
 0x15d   : > { %s368_s20 = sadd.s32 %s4303_s14, %s367_s29  ;;  %s382_s0 = sshll.u32 %s3746_s19, 4  ;;  %s383_s0 = int_to_ptr.vmem [resolvable:$true] %s382_s0 }
 0x15e   : > { %s4115_s7 = sshll.u32 %s6776_s22, 4  ;;  %s369_s30 = sld [smem:[#allocation5 + %s368_s20]] }
 0x15f   : > { %s347_s17 = scalar_lea.hbm %s8033_s1, %s4115_s7 }
 0x160   : > { %s5112_s21 = scalar_lea.hbm %s347_s17, 16  ;;  %p5115_p5 = scmp.lt.u32.totalorder %s347_s17, %s8033_s1 }
 0x161   : > { %p5113_p4 = scmp.ne.s32.totalorder %s347_s17, %s5112_s21  ;;  %p5116_p6 = scmp.lt.u32.totalorder %s6575_s26, %s5112_s21 }
 0x162   : > { %p5118_p8 = scmp.lt.u32.totalorder %s5112_s21, %s347_s17 }
 0x163   : > { %p5117_p7 = por %p5116_p6, %p5115_p5 }
 0x165   : > { %p5119_p9 = por %p5118_p8, %p5117_p7 }
 0x167   : > { %p5120_p10 = pnand %p5119_p9, %p5113_p4 }
 0x169   : > { %5123 = shalt.err (!%p5120_p10)  }
 0x16a   : > { %s5124_s27 = scalar_lea.vmem %s6773_s18, 16  ;;  %p5129_p12 = scmp.lt.s32.totalorder %s6773_s18, %s6583_s5 }
 0x16b   : > { %p5125_p11 = scmp.ne.s32.totalorder %s6773_s18, %s5124_s27  ;;  %p5130_p13 = scmp.lt.s32.totalorder %s6586_s8, %s5124_s27 }
 0x16d   : > { %p5131_p0 = por %p5130_p13, %p5129_p12 }
 0x16f   : > { %p5132_p1 = pnand %p5131_p0, %p5125_p11 }
 0x171   : > { %5135 = shalt.err (!%p5132_p1)  }
 0x172   : > { %360 = dma.hbm_to_vmem [thread:$0]  %s347_s17, 16, %s6773_s18, [#allocation3 + $0x1] }
 0x173   : > { %s386_s10 = sadd.s32 6, %s6704_s24  ;;  %s3751_s2 = scalar_lea.vmem %s6709_s28, 134 [#allocation2] }
 0x174   : > { %s387_s22 = sshra.s32 %s386_s10, 7  ;;  %s392_s25 = sand.u32 127, %s386_s10 }
 0x175   : > { %s4304_s4 = sshll.u32 %s387_s22, 7  ;;  %s4118_s11 = sshll.u32 %s369_s30, 4 }
 0x176   : > { %s4305_s6 = sadd.s32 128, %s4304_s4  ;;  %s372_s14 = scalar_lea.hbm %s8033_s1, %s4118_s11 }
 0x177   : > { %s393_s19 = sadd.s32 %s4305_s6, %s392_s25  ;;  %s5136_s20 = scalar_lea.hbm %s372_s14, 16 }
 0x178   : > { %p5137_p2 = scmp.ne.s32.totalorder %s372_s14, %s5136_s20  ;;  %p5139_p3 = scmp.lt.u32.totalorder %s372_s14, %s8033_s1 }
 0x179   : > { %p5140_p4 = scmp.lt.u32.totalorder %s6575_s26, %s5136_s20  ;;  %p5142_p6 = scmp.lt.u32.totalorder %s5136_s20, %s372_s14 }
 0x17b   : > { %p5141_p5 = por %p5140_p4, %p5139_p3 }
 0x17d   : > { %p5143_p7 = por %p5142_p6, %p5141_p5 }
 0x17f   : > { %p5144_p8 = pnand %p5143_p7, %p5137_p2 }
 0x181   : > { %5147 = shalt.err (!%p5144_p8)  }
 0x182   : > { %s5148_s18 = scalar_lea.vmem %s383_s0, 16  ;;  %p5153_p10 = scmp.lt.s32.totalorder %s383_s0, %s6583_s5 }
 0x183   : > { %p5149_p9 = scmp.ne.s32.totalorder %s383_s0, %s5148_s18  ;;  %p5154_p11 = scmp.lt.s32.totalorder %s6586_s8, %s5148_s18 }
 0x185   : > { %p5155_p12 = por %p5154_p11, %p5153_p10 }
 0x187   : > { %p5156_p13 = pnand %p5155_p12, %p5149_p9 }
 0x189   : > { %5159 = shalt.err (!%p5156_p13)  }
 0x18a   : > { %385 = dma.hbm_to_vmem [thread:$0]  %s372_s14, 16, %s383_s0, [#allocation3 + $0x1] }
 0x18b   : > { %s394_s30 = sld [smem:[#allocation5 + %s393_s19]]  ;;  %s407_s23 = sshll.u32 %s3751_s2, 4  ;;  %s408_s23 = int_to_ptr.vmem [resolvable:$true] %s407_s23 }
 0x18c   : > { %s411_s17 = sadd.s32 7, %s6704_s24  ;;  %s3756_s10 = scalar_lea.vmem %s6709_s28, 135 [#allocation2] }
 0x18d   : > { %s412_s21 = sshra.s32 %s411_s17, 7  ;;  %s417_s9 = sand.u32 127, %s411_s17 }
 0x18e   : > { %s4306_s12 = sshll.u32 %s412_s21, 7  ;;  %s432_s0 = sshll.u32 %s3756_s10, 4  ;;  %s433_s0 = int_to_ptr.vmem [resolvable:$true] %s432_s0 }
 0x18f   : > { %s4307_s27 = sadd.s32 128, %s4306_s12 }
 0x190   : > { %s418_s22 = sadd.s32 %s4307_s27, %s417_s9 }
 0x191   : > { %s4121_s25 = sshll.u32 %s394_s30, 4  ;;  %s419_s4 = sld [smem:[#allocation5 + %s418_s22]] }
 0x192   : > { %s397_s13 = scalar_lea.hbm %s8033_s1, %s4121_s25 }
 0x193   : > { %s5160_s29 = scalar_lea.hbm %s397_s13, 16  ;;  %p5163_p1 = scmp.lt.u32.totalorder %s397_s13, %s8033_s1 }
 0x194   : > { %p5161_p0 = scmp.ne.s32.totalorder %s397_s13, %s5160_s29  ;;  %p5164_p2 = scmp.lt.u32.totalorder %s6575_s26, %s5160_s29 }
 0x195   : > { %p5166_p4 = scmp.lt.u32.totalorder %s5160_s29, %s397_s13 }
 0x196   : > { %p5165_p3 = por %p5164_p2, %p5163_p1 }
 0x198   : > { %p5167_p5 = por %p5166_p4, %p5165_p3 }
 0x19a   : > { %p5168_p6 = pnand %p5167_p5, %p5161_p0 }
 0x19c   : > { %5171 = shalt.err (!%p5168_p6)  }
 0x19d   : > { %s5172_s24 = scalar_lea.vmem %s408_s23, 16  ;;  %p5177_p8 = scmp.lt.s32.totalorder %s408_s23, %s6583_s5 }
 0x19e   : > { %p5173_p7 = scmp.ne.s32.totalorder %s408_s23, %s5172_s24  ;;  %p5178_p9 = scmp.lt.s32.totalorder %s6586_s8, %s5172_s24 }
 0x1a0   : > { %p5179_p10 = por %p5178_p9, %p5177_p8 }
 0x1a2   : > { %p5180_p11 = pnand %p5179_p10, %p5173_p7 }
 0x1a4   : > { %5183 = shalt.err (!%p5180_p11)  }
 0x1a5   : > { %410 = dma.hbm_to_vmem [thread:$0]  %s397_s13, 16, %s408_s23, [#allocation3 + $0x1] }
 0x1a6   : > { %s4124_s28 = sshll.u32 %s419_s4, 4 }
 0x1a7   : > { %s422_s7 = scalar_lea.hbm %s8033_s1, %s4124_s28 }
 0x1a8   : > { %s5184_s15 = scalar_lea.hbm %s422_s7, 16  ;;  %p5187_p13 = scmp.lt.u32.totalorder %s422_s7, %s8033_s1 }
 0x1a9   : > { %p5185_p12 = scmp.ne.s32.totalorder %s422_s7, %s5184_s15  ;;  %p5188_p0 = scmp.lt.u32.totalorder %s6575_s26, %s5184_s15 }
 0x1aa   : > { %p5190_p2 = scmp.lt.u32.totalorder %s5184_s15, %s422_s7 }
 0x1ab   : > { %p5189_p1 = por %p5188_p0, %p5187_p13 }
 0x1ad   : > { %p5191_p3 = por %p5190_p2, %p5189_p1 }
 0x1af   : > { %p5192_p4 = pnand %p5191_p3, %p5185_p12 }
 0x1b1   : > { %5195 = shalt.err (!%p5192_p4)  }
 0x1b2   : > { %s5196_s23 = scalar_lea.vmem %s433_s0, 16  ;;  %p5201_p6 = scmp.lt.s32.totalorder %s433_s0, %s6583_s5 }
 0x1b3   : > { %p5197_p5 = scmp.ne.s32.totalorder %s433_s0, %s5196_s23  ;;  %p5202_p7 = scmp.lt.s32.totalorder %s6586_s8, %s5196_s23 }
 0x1b5   : > { %p5203_p8 = por %p5202_p7, %p5201_p6 }
 0x1b7   : > { %p5204_p9 = pnand %p5203_p8, %p5197_p5 }
 0x1b9   : > { %5207 = shalt.err (!%p5204_p9)  }
 0x1ba   : > { %435 = dma.hbm_to_vmem [thread:$0]  %s422_s7, 16, %s433_s0, [#allocation3 + $0x1] }
 0x1bb   : > { %s234_s16 = sadd.s32 1, %s6450_s16  }
 0x1bc   : > { %p231_p10 = scmp.ge.s32.totalorder %s234_s16, 16  }
 0x1bd   :  { %s6840_s17 = smov (%p231_p10), 0  }
 0x1be   :  { %233 = sbr.rel (!%p231_p10) target bundleno = 240 (0xf0), region = 563 }
 0x1c5 LB: > { %s6846_s21 = sshll.u32 %s6454_s17, 3  ;;  %s6454_s17 = sphi %s6840_s17, %s442_s17  }
 0x1c6   : > { %s445_s9 = sshra.s32 %s6846_s21, 7  ;;  %s450_s12 = sand.u32 127, %s6846_s21 }
 0x1c7   : > { %s4308_s27 = sshll.u32 %s445_s9, 7  ;;  %s6851_s16 = scalar_lea.vmem [#allocation2], %s6846_s21 }
 0x1c8   : > { %s4309_s10 = sadd.s32 256, %s4308_s27  ;;  %s3761_s22 = scalar_lea.vmem %s6851_s16, 256 [#allocation2] }
 0x1c9   : > { %s451_s25 = sadd.s32 %s4309_s10, %s450_s12  ;;  %s465_s4 = sshll.u32 %s3761_s22, 4  ;;  %s6854_s4 = int_to_ptr.vmem [resolvable:$true] %s465_s4 }
 0x1ca   : > { %s452_s11 = sld [smem:[#allocation5 + %s451_s25]]  ;;  %s469_s6 = sadd.s32 1, %s6846_s21 }
 0x1cb   : > { %s3766_s13 = scalar_lea.vmem %s6851_s16, 257 [#allocation2]  ;;  %s470_s0 = sshra.s32 %s469_s6, 7 }
 0x1cc   : > { %s475_s29 = sand.u32 127, %s469_s6  ;;  %s4310_s14 = sshll.u32 %s470_s0, 7 }
 0x1cd   : > { %s490_s2 = sshll.u32 %s3766_s13, 4  ;;  %s4311_s24 = sadd.s32 256, %s4310_s14  ;;  %s6858_s2 = int_to_ptr.vmem [resolvable:$true] %s490_s2 }
 0x1ce   : > { %s476_s28 = sadd.s32 %s4311_s24, %s475_s29  ;;  %s494_s19 = sadd.s32 2, %s6846_s21 }
 0x1cf   : > { %s6861_s7 = sld [smem:[#allocation5 + %s476_s28]]  ;;  %s495_s23 = sshra.s32 %s494_s19, 7 }
 0x1d0   : > { %s4128_s20 = sshll.u32 %s452_s11, 4 }
 0x1d1   : > { %s454_s30 = scalar_lea.hbm %s8033_s1, %s4128_s20 }
 0x1d2   : > { %s5208_s9 = scalar_lea.hbm %s454_s30, 16  ;;  %p5211_p12 = scmp.lt.u32.totalorder %s454_s30, %s8033_s1 }
 0x1d3   : > { %p5209_p11 = scmp.ne.s32.totalorder %s454_s30, %s5208_s9  ;;  %p5212_p13 = scmp.lt.u32.totalorder %s6575_s26, %s5208_s9 }
 0x1d4   : > { %p5214_p1 = scmp.lt.u32.totalorder %s5208_s9, %s454_s30 }
 0x1d5   : > { %p5213_p0 = por %p5212_p13, %p5211_p12 }
 0x1d7   : > { %p5215_p2 = por %p5214_p1, %p5213_p0 }
 0x1d9   : > { %p5216_p3 = pnand %p5215_p2, %p5209_p11 }
 0x1db   : > { %5219 = shalt.err (!%p5216_p3)  }
 0x1dc   : > { %s5220_s10 = scalar_lea.vmem %s6854_s4, 16  ;;  %p5225_p5 = scmp.lt.s32.totalorder %s6854_s4, %s6583_s5 }
 0x1dd   : > { %p5221_p4 = scmp.ne.s32.totalorder %s6854_s4, %s5220_s10  ;;  %p5226_p6 = scmp.lt.s32.totalorder %s6586_s8, %s5220_s10 }
 0x1df   : > { %p5227_p7 = por %p5226_p6, %p5225_p5 }
 0x1e1   : > { %p5228_p8 = pnand %p5227_p7, %p5221_p4 }
 0x1e3   : > { %5231 = shalt.err (!%p5228_p8)  }
 0x1e4   : > { %468 = dma.hbm_to_vmem [thread:$0]  %s454_s30, 16, %s6854_s4, [#allocation3 + $0x2] }
 0x1e5   : > { %s4312_s22 = sshll.u32 %s495_s23, 7  ;;  %s500_s25 = sand.u32 127, %s494_s19 }
 0x1e6   : > { %s4313_s11 = sadd.s32 256, %s4312_s22  ;;  %s3771_s6 = scalar_lea.vmem %s6851_s16, 258 [#allocation2] }
 0x1e7   : > { %s501_s13 = sadd.s32 %s4313_s11, %s500_s25  ;;  %s515_s0 = sshll.u32 %s3771_s6, 4  ;;  %s6883_s0 = int_to_ptr.vmem [resolvable:$true] %s515_s0 }
 0x1e8   : > { %s4131_s29 = sshll.u32 %s6861_s7, 4  ;;  %s6878_s14 = sld [smem:[#allocation5 + %s501_s13]] }
 0x1e9   : > { %s480_s20 = scalar_lea.hbm %s8033_s1, %s4131_s29 }
 0x1ea   : > { %s5232_s15 = scalar_lea.hbm %s480_s20, 16  ;;  %p5235_p10 = scmp.lt.u32.totalorder %s480_s20, %s8033_s1 }
 0x1eb   : > { %p5233_p9 = scmp.ne.s32.totalorder %s480_s20, %s5232_s15  ;;  %p5236_p11 = scmp.lt.u32.totalorder %s6575_s26, %s5232_s15 }
 0x1ec   : > { %p5238_p13 = scmp.lt.u32.totalorder %s5232_s15, %s480_s20 }
 0x1ed   : > { %p5237_p12 = por %p5236_p11, %p5235_p10 }
 0x1ef   : > { %p5239_p0 = por %p5238_p13, %p5237_p12 }
 0x1f1   : > { %p5240_p1 = pnand %p5239_p0, %p5233_p9 }
 0x1f3   : > { %5243 = shalt.err (!%p5240_p1)  }
 0x1f4   : > { %s5244_s4 = scalar_lea.vmem %s6858_s2, 16  ;;  %p5249_p3 = scmp.lt.s32.totalorder %s6858_s2, %s6583_s5 }
 0x1f5   : > { %p5245_p2 = scmp.ne.s32.totalorder %s6858_s2, %s5244_s4  ;;  %p5250_p4 = scmp.lt.s32.totalorder %s6586_s8, %s5244_s4 }
 0x1f7   : > { %p5251_p5 = por %p5250_p4, %p5249_p3 }
 0x1f9   : > { %p5252_p6 = pnand %p5251_p5, %p5245_p2 }
 0x1fb   : > { %5255 = shalt.err (!%p5252_p6)  }
 0x1fc   : > { %493 = dma.hbm_to_vmem [thread:$0]  %s480_s20, 16, %s6858_s2, [#allocation3 + $0x2] }
 0x1fd   : > { %s519_s19 = sadd.s32 3, %s6846_s21  ;;  %s3776_s7 = scalar_lea.vmem %s6851_s16, 259 [#allocation2] }
 0x1fe   : > { %s520_s30 = sshra.s32 %s519_s19, 7  ;;  %s525_s23 = sand.u32 127, %s519_s19 }
 0x1ff   : > { %s4314_s12 = sshll.u32 %s520_s30, 7  ;;  %s540_s27 = sshll.u32 %s3776_s7, 4  ;;  %s6911_s27 = int_to_ptr.vmem [resolvable:$true] %s540_s27 }
 0x200   : > { %s4134_s10 = sshll.u32 %s6878_s14, 4  ;;  %s4315_s22 = sadd.s32 256, %s4314_s12 }
 0x201   : > { %s505_s6 = scalar_lea.hbm %s8033_s1, %s4134_s10  ;;  %s526_s13 = sadd.s32 %s4315_s22, %s525_s23 }
 0x202   : > { %s5256_s29 = scalar_lea.hbm %s505_s6, 16  ;;  %p5259_p8 = scmp.lt.u32.totalorder %s505_s6, %s8033_s1 }
 0x203   : > { %p5257_p7 = scmp.ne.s32.totalorder %s505_s6, %s5256_s29  ;;  %p5260_p9 = scmp.lt.u32.totalorder %s6575_s26, %s5256_s29 }
 0x204   : > { %p5262_p11 = scmp.lt.u32.totalorder %s5256_s29, %s505_s6 }
 0x205   : > { %p5261_p10 = por %p5260_p9, %p5259_p8 }
 0x207   : > { %p5263_p12 = por %p5262_p11, %p5261_p10 }
 0x209   : > { %p5264_p13 = pnand %p5263_p12, %p5257_p7 }
 0x20b   : > { %5267 = shalt.err (!%p5264_p13)  }
 0x20c   : > { %s5268_s2 = scalar_lea.vmem %s6883_s0, 16  ;;  %p5273_p1 = scmp.lt.s32.totalorder %s6883_s0, %s6583_s5 }
 0x20d   : > { %p5269_p0 = scmp.ne.s32.totalorder %s6883_s0, %s5268_s2  ;;  %p5274_p2 = scmp.lt.s32.totalorder %s6586_s8, %s5268_s2 }
 0x20f   : > { %p5275_p3 = por %p5274_p2, %p5273_p1 }
 0x211   : > { %p5276_p4 = pnand %p5275_p3, %p5269_p0 }
 0x213   : > { %5279 = shalt.err (!%p5276_p4)  }
 0x214   : > { %518 = dma.hbm_to_vmem [thread:$0]  %s505_s6, 16, %s6883_s0, [#allocation3 + $0x2] }
 0x215   : > { %s527_s14 = sld [smem:[#allocation5 + %s526_s13]]  ;;  %s544_s20 = sadd.s32 4, %s6846_s21 }
 0x216   : > { %s3781_s15 = scalar_lea.vmem %s6851_s16, 260 [#allocation2]  ;;  %s545_s18 = sshra.s32 %s544_s20, 7 }
 0x217   : > { %s550_s9 = sand.u32 127, %s544_s20  ;;  %s4316_s4 = sshll.u32 %s545_s18, 7 }
 0x218   : > { %s565_s19 = sshll.u32 %s3781_s15, 4  ;;  %s4317_s7 = sadd.s32 256, %s4316_s4  ;;  %s6915_s19 = int_to_ptr.vmem [resolvable:$true] %s565_s19 }
 0x219   : > { %s551_s30 = sadd.s32 %s4317_s7, %s550_s9  ;;  %s569_s23 = sadd.s32 5, %s6846_s21 }
 0x21a   : > { %s6918_s10 = sld [smem:[#allocation5 + %s551_s30]]  ;;  %s570_s11 = sshra.s32 %s569_s23, 7 }
 0x21b   : > { %s4137_s12 = sshll.u32 %s527_s14, 4 }
 0x21c   : > { %s530_s25 = scalar_lea.hbm %s8033_s1, %s4137_s12 }
 0x21d   : > { %s5280_s6 = scalar_lea.hbm %s530_s25, 16  ;;  %p5283_p6 = scmp.lt.u32.totalorder %s530_s25, %s8033_s1 }
 0x21e   : > { %p5281_p5 = scmp.ne.s32.totalorder %s530_s25, %s5280_s6  ;;  %p5284_p7 = scmp.lt.u32.totalorder %s6575_s26, %s5280_s6 }
 0x21f   : > { %p5286_p9 = scmp.lt.u32.totalorder %s5280_s6, %s530_s25 }
 0x220   : > { %p5285_p8 = por %p5284_p7, %p5283_p6 }
 0x222   : > { %p5287_p10 = por %p5286_p9, %p5285_p8 }
 0x224   : > { %p5288_p11 = pnand %p5287_p10, %p5281_p5 }
 0x226   : > { %5291 = shalt.err (!%p5288_p11)  }
 0x227   : > { %s5292_s24 = scalar_lea.vmem %s6911_s27, 16  ;;  %p5297_p13 = scmp.lt.s32.totalorder %s6911_s27, %s6583_s5 }
 0x228   : > { %p5293_p12 = scmp.ne.s32.totalorder %s6911_s27, %s5292_s24  ;;  %p5298_p0 = scmp.lt.s32.totalorder %s6586_s8, %s5292_s24 }
 0x22a   : > { %p5299_p1 = por %p5298_p0, %p5297_p13 }
 0x22c   : > { %p5300_p2 = pnand %p5299_p1, %p5293_p12 }
 0x22e   : > { %5303 = shalt.err (!%p5300_p2)  }
 0x22f   : > { %543 = dma.hbm_to_vmem [thread:$0]  %s530_s25, 16, %s6911_s27, [#allocation3 + $0x2] }
 0x230   : > { %s4318_s28 = sshll.u32 %s570_s11, 7  ;;  %s575_s2 = sand.u32 127, %s569_s23 }
 0x231   : > { %s4319_s14 = sadd.s32 256, %s4318_s28  ;;  %s3786_s20 = scalar_lea.vmem %s6851_s16, 261 [#allocation2] }
 0x232   : > { %s576_s15 = sadd.s32 %s4319_s14, %s575_s2  ;;  %s590_s18 = sshll.u32 %s3786_s20, 4  ;;  %s591_s18 = int_to_ptr.vmem [resolvable:$true] %s590_s18 }
 0x233   : > { %s4140_s9 = sshll.u32 %s6918_s10, 4  ;;  %s577_s4 = sld [smem:[#allocation5 + %s576_s15]] }
 0x234   : > { %s555_s12 = scalar_lea.hbm %s8033_s1, %s4140_s9 }
 0x235   : > { %s5304_s22 = scalar_lea.hbm %s555_s12, 16  ;;  %p5307_p4 = scmp.lt.u32.totalorder %s555_s12, %s8033_s1 }
 0x236   : > { %p5305_p3 = scmp.ne.s32.totalorder %s555_s12, %s5304_s22  ;;  %p5308_p5 = scmp.lt.u32.totalorder %s6575_s26, %s5304_s22 }
 0x237   : > { %p5310_p7 = scmp.lt.u32.totalorder %s5304_s22, %s555_s12 }
 0x238   : > { %p5309_p6 = por %p5308_p5, %p5307_p4 }
 0x23a   : > { %p5311_p8 = por %p5310_p7, %p5309_p6 }
 0x23c   : > { %p5312_p9 = pnand %p5311_p8, %p5305_p3 }
 0x23e   : > { %5315 = shalt.err (!%p5312_p9)  }
 0x23f   : > { %s5316_s27 = scalar_lea.vmem %s6915_s19, 16  ;;  %p5321_p11 = scmp.lt.s32.totalorder %s6915_s19, %s6583_s5 }
 0x240   : > { %p5317_p10 = scmp.ne.s32.totalorder %s6915_s19, %s5316_s27  ;;  %p5322_p12 = scmp.lt.s32.totalorder %s6586_s8, %s5316_s27 }
 0x242   : > { %p5323_p13 = por %p5322_p12, %p5321_p11 }
 0x244   : > { %p5324_p0 = pnand %p5323_p13, %p5317_p10 }
 0x246   : > { %5327 = shalt.err (!%p5324_p0)  }
 0x247   : > { %568 = dma.hbm_to_vmem [thread:$0]  %s555_s12, 16, %s6915_s19, [#allocation3 + $0x2] }
 0x248   : > { %s594_s23 = sadd.s32 6, %s6846_s21  ;;  %s3791_s13 = scalar_lea.vmem %s6851_s16, 262 [#allocation2] }
 0x249   : > { %s595_s10 = sshra.s32 %s594_s23, 7  ;;  %s600_s25 = sand.u32 127, %s594_s23 }
 0x24a   : > { %s4320_s11 = sshll.u32 %s595_s10, 7  ;;  %s4143_s29 = sshll.u32 %s577_s4, 4 }
 0x24b   : > { %s4321_s24 = sadd.s32 256, %s4320_s11  ;;  %s580_s14 = scalar_lea.hbm %s8033_s1, %s4143_s29 }
 0x24c   : > { %s601_s20 = sadd.s32 %s4321_s24, %s600_s25  ;;  %s5328_s15 = scalar_lea.hbm %s580_s14, 16 }
 0x24d   : > { %p5329_p1 = scmp.ne.s32.totalorder %s580_s14, %s5328_s15  ;;  %p5331_p2 = scmp.lt.u32.totalorder %s580_s14, %s8033_s1 }
 0x24e   : > { %p5332_p3 = scmp.lt.u32.totalorder %s6575_s26, %s5328_s15  ;;  %p5334_p5 = scmp.lt.u32.totalorder %s5328_s15, %s580_s14 }
 0x250   : > { %p5333_p4 = por %p5332_p3, %p5331_p2 }
 0x252   : > { %p5335_p6 = por %p5334_p5, %p5333_p4 }
 0x254   : > { %p5336_p7 = pnand %p5335_p6, %p5329_p1 }
 0x256   : > { %5339 = shalt.err (!%p5336_p7)  }
 0x257   : > { %s5340_s19 = scalar_lea.vmem %s591_s18, 16  ;;  %p5345_p9 = scmp.lt.s32.totalorder %s591_s18, %s6583_s5 }
 0x258   : > { %p5341_p8 = scmp.ne.s32.totalorder %s591_s18, %s5340_s19  ;;  %p5346_p10 = scmp.lt.s32.totalorder %s6586_s8, %s5340_s19 }
 0x25a   : > { %p5347_p11 = por %p5346_p10, %p5345_p9 }
 0x25c   : > { %p5348_p12 = pnand %p5347_p11, %p5341_p8 }
 0x25e   : > { %5351 = shalt.err (!%p5348_p12)  }
 0x25f   : > { %593 = dma.hbm_to_vmem [thread:$0]  %s580_s14, 16, %s591_s18, [#allocation3 + $0x2] }
 0x260   : > { %s602_s4 = sld [smem:[#allocation5 + %s601_s20]]  ;;  %s615_s30 = sshll.u32 %s3791_s13, 4  ;;  %s616_s30 = int_to_ptr.vmem [resolvable:$true] %s615_s30 }
 0x261   : > { %s619_s12 = sadd.s32 7, %s6846_s21  ;;  %s3796_s23 = scalar_lea.vmem %s6851_s16, 263 [#allocation2] }
 0x262   : > { %s620_s22 = sshra.s32 %s619_s12, 7  ;;  %s625_s0 = sand.u32 127, %s619_s12 }
 0x263   : > { %s4322_s6 = sshll.u32 %s620_s22, 7  ;;  %s640_s18 = sshll.u32 %s3796_s23, 4  ;;  %s641_s18 = int_to_ptr.vmem [resolvable:$true] %s640_s18 }
 0x264   : > { %s4323_s27 = sadd.s32 256, %s4322_s6 }
 0x265   : > { %s626_s10 = sadd.s32 %s4323_s27, %s625_s0 }
 0x266   : > { %s4146_s25 = sshll.u32 %s602_s4, 4  ;;  %s627_s11 = sld [smem:[#allocation5 + %s626_s10]] }
 0x267   : > { %s605_s28 = scalar_lea.hbm %s8033_s1, %s4146_s25 }
 0x268   : > { %s5352_s2 = scalar_lea.hbm %s605_s28, 16  ;;  %p5355_p0 = scmp.lt.u32.totalorder %s605_s28, %s8033_s1 }
 0x269   : > { %p5353_p13 = scmp.ne.s32.totalorder %s605_s28, %s5352_s2  ;;  %p5356_p1 = scmp.lt.u32.totalorder %s6575_s26, %s5352_s2 }
 0x26a   : > { %p5358_p3 = scmp.lt.u32.totalorder %s5352_s2, %s605_s28 }
 0x26b   : > { %p5357_p2 = por %p5356_p1, %p5355_p0 }
 0x26d   : > { %p5359_p4 = por %p5358_p3, %p5357_p2 }
 0x26f   : > { %p5360_p5 = pnand %p5359_p4, %p5353_p13 }
 0x271   : > { %5363 = shalt.err (!%p5360_p5)  }
 0x272   : > { %s5364_s21 = scalar_lea.vmem %s616_s30, 16  ;;  %p5369_p7 = scmp.lt.s32.totalorder %s616_s30, %s6583_s5 }
 0x273   : > { %p5365_p6 = scmp.ne.s32.totalorder %s616_s30, %s5364_s21  ;;  %p5370_p8 = scmp.lt.s32.totalorder %s6586_s8, %s5364_s21 }
 0x275   : > { %p5371_p9 = por %p5370_p8, %p5369_p7 }
 0x277   : > { %p5372_p10 = pnand %p5371_p9, %p5365_p6 }
 0x279   : > { %5375 = shalt.err (!%p5372_p10)  }
 0x27a   : > { %618 = dma.hbm_to_vmem [thread:$0]  %s605_s28, 16, %s616_s30, [#allocation3 + $0x2] }
 0x27b   : > { %s4149_s16 = sshll.u32 %s627_s11, 4 }
 0x27c   : > { %s630_s9 = scalar_lea.hbm %s8033_s1, %s4149_s16 }
 0x27d   : > { %s5376_s7 = scalar_lea.hbm %s630_s9, 16  ;;  %p5379_p12 = scmp.lt.u32.totalorder %s630_s9, %s8033_s1 }
 0x27e   : > { %p5377_p11 = scmp.ne.s32.totalorder %s630_s9, %s5376_s7  ;;  %p5380_p13 = scmp.lt.u32.totalorder %s6575_s26, %s5376_s7 }
 0x27f   : > { %p5382_p1 = scmp.lt.u32.totalorder %s5376_s7, %s630_s9 }
 0x280   : > { %p5381_p0 = por %p5380_p13, %p5379_p12 }
 0x282   : > { %p5383_p2 = por %p5382_p1, %p5381_p0 }
 0x284   : > { %p5384_p3 = pnand %p5383_p2, %p5377_p11 }
 0x286   : > { %5387 = shalt.err (!%p5384_p3)  }
 0x287   : > { %s5388_s30 = scalar_lea.vmem %s641_s18, 16  ;;  %p5393_p5 = scmp.lt.s32.totalorder %s641_s18, %s6583_s5 }
 0x288   : > { %p5389_p4 = scmp.ne.s32.totalorder %s641_s18, %s5388_s30  ;;  %p5394_p6 = scmp.lt.s32.totalorder %s6586_s8, %s5388_s30 }
 0x28a   : > { %p5395_p7 = por %p5394_p6, %p5393_p5 }
 0x28c   : > { %p5396_p8 = pnand %p5395_p7, %p5389_p4 }
 0x28e   : > { %5399 = shalt.err (!%p5396_p8)  }
 0x28f   : > { %643 = dma.hbm_to_vmem [thread:$0]  %s630_s9, 16, %s641_s18, [#allocation3 + $0x2] }
 0x290   : > { %s442_s17 = sadd.s32 1, %s6454_s17  }
 0x291   : > { %p439_p9 = scmp.ge.s32.totalorder %s442_s17, 16  }
 0x292   :  { %s6982_s12 = smov (%p439_p9), 0  }
 0x293   :  { %441 = sbr.rel (!%p439_p9) target bundleno = 453 (0x1c5), region = 574 }
 0x29a LB: > { %s6988_s22 = sshll.u32 %s6458_s12, 3  ;;  %s6458_s12 = sphi %s6982_s12, %s650_s12  }
 0x29b   : > { %s653_s0 = sshra.s32 %s6988_s22, 7  ;;  %s658_s6 = sand.u32 127, %s6988_s22 }
 0x29c   : > { %s4324_s27 = sshll.u32 %s653_s0, 7  ;;  %s6993_s17 = scalar_lea.vmem [#allocation2], %s6988_s22 }
 0x29d   : > { %s4325_s23 = sadd.s32 384, %s4324_s27  ;;  %s3801_s10 = scalar_lea.vmem %s6993_s17, 384 [#allocation2] }
 0x29e   : > { %s659_s25 = sadd.s32 %s4325_s23, %s658_s6  ;;  %s673_s11 = sshll.u32 %s3801_s10, 4  ;;  %s6996_s11 = int_to_ptr.vmem [resolvable:$true] %s673_s11 }
 0x29f   : > { %s660_s29 = sld [smem:[#allocation5 + %s659_s25]]  ;;  %s677_s24 = sadd.s32 1, %s6988_s22 }
 0x2a0   : > { %s3806_s28 = scalar_lea.vmem %s6993_s17, 385 [#allocation2]  ;;  %s678_s18 = sshra.s32 %s677_s24, 7 }
 0x2a1   : > { %s683_s2 = sand.u32 127, %s677_s24  ;;  %s4326_s14 = sshll.u32 %s678_s18, 7 }
 0x2a2   : > { %s698_s13 = sshll.u32 %s3806_s28, 4  ;;  %s4327_s21 = sadd.s32 384, %s4326_s14  ;;  %s7000_s13 = int_to_ptr.vmem [resolvable:$true] %s698_s13 }
 0x2a3   : > { %s684_s16 = sadd.s32 %s4327_s21, %s683_s2  ;;  %s702_s20 = sadd.s32 2, %s6988_s22 }
 0x2a4   : > { %s7003_s9 = sld [smem:[#allocation5 + %s684_s16]]  ;;  %s703_s30 = sshra.s32 %s702_s20, 7 }
 0x2a5   : > { %s4153_s15 = sshll.u32 %s660_s29, 4 }
 0x2a6   : > { %s662_s4 = scalar_lea.hbm %s8033_s1, %s4153_s15 }
 0x2a7   : > { %s5400_s0 = scalar_lea.hbm %s662_s4, 16  ;;  %p5403_p11 = scmp.lt.u32.totalorder %s662_s4, %s8033_s1 }
 0x2a8   : > { %p5401_p10 = scmp.ne.s32.totalorder %s662_s4, %s5400_s0  ;;  %p5404_p12 = scmp.lt.u32.totalorder %s6575_s26, %s5400_s0 }
 0x2a9   : > { %p5406_p0 = scmp.lt.u32.totalorder %s5400_s0, %s662_s4 }
 0x2aa   : > { %p5405_p13 = por %p5404_p12, %p5403_p11 }
 0x2ac   : > { %p5407_p1 = por %p5406_p0, %p5405_p13 }
 0x2ae   : > { %p5408_p2 = pnand %p5407_p1, %p5401_p10 }
 0x2b0   : > { %5411 = shalt.err (!%p5408_p2)  }
 0x2b1   : > { %s5412_s23 = scalar_lea.vmem %s6996_s11, 16  ;;  %p5417_p4 = scmp.lt.s32.totalorder %s6996_s11, %s6583_s5 }
 0x2b2   : > { %p5413_p3 = scmp.ne.s32.totalorder %s6996_s11, %s5412_s23  ;;  %p5418_p5 = scmp.lt.s32.totalorder %s6586_s8, %s5412_s23 }
 0x2b4   : > { %p5419_p6 = por %p5418_p5, %p5417_p4 }
 0x2b6   : > { %p5420_p7 = pnand %p5419_p6, %p5413_p3 }
 0x2b8   : > { %5423 = shalt.err (!%p5420_p7)  }
 0x2b9   : > { %676 = dma.hbm_to_vmem [thread:$0]  %s662_s4, 16, %s6996_s11, [#allocation3 + $0x3] }
 0x2ba   : > { %s4328_s10 = sshll.u32 %s703_s30, 7  ;;  %s708_s25 = sand.u32 127, %s702_s20 }
 0x2bb   : > { %s4329_s29 = sadd.s32 384, %s4328_s10  ;;  %s3811_s24 = scalar_lea.vmem %s6993_s17, 386 [#allocation2] }
 0x2bc   : > { %s709_s28 = sadd.s32 %s4329_s29, %s708_s25  ;;  %s723_s18 = sshll.u32 %s3811_s24, 4  ;;  %s7025_s18 = int_to_ptr.vmem [resolvable:$true] %s723_s18 }
 0x2bd   : > { %s4156_s2 = sshll.u32 %s7003_s9, 4  ;;  %s7020_s14 = sld [smem:[#allocation5 + %s709_s28]] }
 0x2be   : > { %s688_s15 = scalar_lea.hbm %s8033_s1, %s4156_s2 }
 0x2bf   : > { %s5424_s7 = scalar_lea.hbm %s688_s15, 16  ;;  %p5427_p9 = scmp.lt.u32.totalorder %s688_s15, %s8033_s1 }
 0x2c0   : > { %p5425_p8 = scmp.ne.s32.totalorder %s688_s15, %s5424_s7  ;;  %p5428_p10 = scmp.lt.u32.totalorder %s6575_s26, %s5424_s7 }
 0x2c1   : > { %p5430_p12 = scmp.lt.u32.totalorder %s5424_s7, %s688_s15 }
 0x2c2   : > { %p5429_p11 = por %p5428_p10, %p5427_p9 }
 0x2c4   : > { %p5431_p13 = por %p5430_p12, %p5429_p11 }
 0x2c6   : > { %p5432_p0 = pnand %p5431_p13, %p5425_p8 }
 0x2c8   : > { %5435 = shalt.err (!%p5432_p0)  }
 0x2c9   : > { %s5436_s11 = scalar_lea.vmem %s7000_s13, 16  ;;  %p5441_p2 = scmp.lt.s32.totalorder %s7000_s13, %s6583_s5 }
 0x2ca   : > { %p5437_p1 = scmp.ne.s32.totalorder %s7000_s13, %s5436_s11  ;;  %p5442_p3 = scmp.lt.s32.totalorder %s6586_s8, %s5436_s11 }
 0x2cc   : > { %p5443_p4 = por %p5442_p3, %p5441_p2 }
 0x2ce   : > { %p5444_p5 = pnand %p5443_p4, %p5437_p1 }
 0x2d0   : > { %5447 = shalt.err (!%p5444_p5)  }
 0x2d1   : > { %701 = dma.hbm_to_vmem [thread:$0]  %s688_s15, 16, %s7000_s13, [#allocation3 + $0x3] }
 0x2d2   : > { %s727_s20 = sadd.s32 3, %s6988_s22  ;;  %s3816_s9 = scalar_lea.vmem %s6993_s17, 387 [#allocation2] }
 0x2d3   : > { %s728_s4 = sshra.s32 %s727_s20, 7  ;;  %s733_s30 = sand.u32 127, %s727_s20 }
 0x2d4   : > { %s4330_s6 = sshll.u32 %s728_s4, 7  ;;  %s748_s27 = sshll.u32 %s3816_s9, 4  ;;  %s7053_s27 = int_to_ptr.vmem [resolvable:$true] %s748_s27 }
 0x2d5   : > { %s4159_s23 = sshll.u32 %s7020_s14, 4  ;;  %s4331_s10 = sadd.s32 384, %s4330_s6 }
 0x2d6   : > { %s713_s24 = scalar_lea.hbm %s8033_s1, %s4159_s23  ;;  %s734_s28 = sadd.s32 %s4331_s10, %s733_s30 }
 0x2d7   : > { %s5448_s2 = scalar_lea.hbm %s713_s24, 16  ;;  %p5451_p7 = scmp.lt.u32.totalorder %s713_s24, %s8033_s1 }
 0x2d8   : > { %p5449_p6 = scmp.ne.s32.totalorder %s713_s24, %s5448_s2  ;;  %p5452_p8 = scmp.lt.u32.totalorder %s6575_s26, %s5448_s2 }
 0x2d9   : > { %p5454_p10 = scmp.lt.u32.totalorder %s5448_s2, %s713_s24 }
 0x2da   : > { %p5453_p9 = por %p5452_p8, %p5451_p7 }
 0x2dc   : > { %p5455_p11 = por %p5454_p10, %p5453_p9 }
 0x2de   : > { %p5456_p12 = pnand %p5455_p11, %p5449_p6 }
 0x2e0   : > { %5459 = shalt.err (!%p5456_p12)  }
 0x2e1   : > { %s5460_s13 = scalar_lea.vmem %s7025_s18, 16  ;;  %p5465_p0 = scmp.lt.s32.totalorder %s7025_s18, %s6583_s5 }
 0x2e2   : > { %p5461_p13 = scmp.ne.s32.totalorder %s7025_s18, %s5460_s13  ;;  %p5466_p1 = scmp.lt.s32.totalorder %s6586_s8, %s5460_s13 }
 0x2e4   : > { %p5467_p2 = por %p5466_p1, %p5465_p0 }
 0x2e6   : > { %p5468_p3 = pnand %p5467_p2, %p5461_p13 }
 0x2e8   : > { %5471 = shalt.err (!%p5468_p3)  }
 0x2e9   : > { %726 = dma.hbm_to_vmem [thread:$0]  %s713_s24, 16, %s7025_s18, [#allocation3 + $0x3] }
 0x2ea   : > { %s735_s14 = sld [smem:[#allocation5 + %s734_s28]]  ;;  %s752_s15 = sadd.s32 4, %s6988_s22 }
 0x2eb   : > { %s3821_s7 = scalar_lea.vmem %s6993_s17, 388 [#allocation2]  ;;  %s753_s19 = sshra.s32 %s752_s15, 7 }
 0x2ec   : > { %s758_s0 = sand.u32 127, %s752_s15  ;;  %s4332_s11 = sshll.u32 %s753_s19, 7 }
 0x2ed   : > { %s773_s20 = sshll.u32 %s3821_s7, 4  ;;  %s4333_s9 = sadd.s32 384, %s4332_s11  ;;  %s7057_s20 = int_to_ptr.vmem [resolvable:$true] %s773_s20 }
 0x2ee   : > { %s759_s4 = sadd.s32 %s4333_s9, %s758_s0  ;;  %s777_s30 = sadd.s32 5, %s6988_s22 }
 0x2ef   : > { %s7060_s23 = sld [smem:[#allocation5 + %s759_s4]]  ;;  %s778_s29 = sshra.s32 %s777_s30, 7 }
 0x2f0   : > { %s4162_s6 = sshll.u32 %s735_s14, 4 }
 0x2f1   : > { %s738_s25 = scalar_lea.hbm %s8033_s1, %s4162_s6 }
 0x2f2   : > { %s5472_s24 = scalar_lea.hbm %s738_s25, 16  ;;  %p5475_p5 = scmp.lt.u32.totalorder %s738_s25, %s8033_s1 }
 0x2f3   : > { %p5473_p4 = scmp.ne.s32.totalorder %s738_s25, %s5472_s24  ;;  %p5476_p6 = scmp.lt.u32.totalorder %s6575_s26, %s5472_s24 }
 0x2f4   : > { %p5478_p8 = scmp.lt.u32.totalorder %s5472_s24, %s738_s25 }
 0x2f5   : > { %p5477_p7 = por %p5476_p6, %p5475_p5 }
 0x2f7   : > { %p5479_p9 = por %p5478_p8, %p5477_p7 }
 0x2f9   : > { %p5480_p10 = pnand %p5479_p9, %p5473_p4 }
 0x2fb   : > { %5483 = shalt.err (!%p5480_p10)  }
 0x2fc   : > { %s5484_s21 = scalar_lea.vmem %s7053_s27, 16  ;;  %p5489_p12 = scmp.lt.s32.totalorder %s7053_s27, %s6583_s5 }
 0x2fd   : > { %p5485_p11 = scmp.ne.s32.totalorder %s7053_s27, %s5484_s21  ;;  %p5490_p13 = scmp.lt.s32.totalorder %s6586_s8, %s5484_s21 }
 0x2ff   : > { %p5491_p0 = por %p5490_p13, %p5489_p12 }
 0x301   : > { %p5492_p1 = pnand %p5491_p0, %p5485_p11 }
 0x303   : > { %5495 = shalt.err (!%p5492_p1)  }
 0x304   : > { %751 = dma.hbm_to_vmem [thread:$0]  %s738_s25, 16, %s7053_s27, [#allocation3 + $0x3] }
 0x305   : > { %s4334_s16 = sshll.u32 %s778_s29, 7  ;;  %s783_s13 = sand.u32 127, %s777_s30 }
 0x306   : > { %s4335_s14 = sadd.s32 384, %s4334_s16  ;;  %s3826_s15 = scalar_lea.vmem %s6993_s17, 389 [#allocation2] }
 0x307   : > { %s784_s7 = sadd.s32 %s4335_s14, %s783_s13  ;;  %s798_s19 = sshll.u32 %s3826_s15, 4  ;;  %s799_s19 = int_to_ptr.vmem [resolvable:$true] %s798_s19 }
 0x308   : > { %s4165_s0 = sshll.u32 %s7060_s23, 4  ;;  %s785_s11 = sld [smem:[#allocation5 + %s784_s7]] }
 0x309   : > { %s763_s6 = scalar_lea.hbm %s8033_s1, %s4165_s0 }
 0x30a   : > { %s5496_s10 = scalar_lea.hbm %s763_s6, 16  ;;  %p5499_p3 = scmp.lt.u32.totalorder %s763_s6, %s8033_s1 }
 0x30b   : > { %p5497_p2 = scmp.ne.s32.totalorder %s763_s6, %s5496_s10  ;;  %p5500_p4 = scmp.lt.u32.totalorder %s6575_s26, %s5496_s10 }
 0x30c   : > { %p5502_p6 = scmp.lt.u32.totalorder %s5496_s10, %s763_s6 }
 0x30d   : > { %p5501_p5 = por %p5500_p4, %p5499_p3 }
 0x30f   : > { %p5503_p7 = por %p5502_p6, %p5501_p5 }
 0x311   : > { %p5504_p8 = pnand %p5503_p7, %p5497_p2 }
 0x313   : > { %5507 = shalt.err (!%p5504_p8)  }
 0x314   : > { %s5508_s27 = scalar_lea.vmem %s7057_s20, 16  ;;  %p5513_p10 = scmp.lt.s32.totalorder %s7057_s20, %s6583_s5 }
 0x315   : > { %p5509_p9 = scmp.ne.s32.totalorder %s7057_s20, %s5508_s27  ;;  %p5514_p11 = scmp.lt.s32.totalorder %s6586_s8, %s5508_s27 }
 0x317   : > { %p5515_p12 = por %p5514_p11, %p5513_p10 }
 0x319   : > { %p5516_p13 = pnand %p5515_p12, %p5509_p9 }
 0x31b   : > { %5519 = shalt.err (!%p5516_p13)  }
 0x31c   : > { %776 = dma.hbm_to_vmem [thread:$0]  %s763_s6, 16, %s7057_s20, [#allocation3 + $0x3] }
 0x31d   : > { %s802_s30 = sadd.s32 6, %s6988_s22  ;;  %s3831_s28 = scalar_lea.vmem %s6993_s17, 390 [#allocation2] }
 0x31e   : > { %s803_s23 = sshra.s32 %s802_s30, 7  ;;  %s808_s25 = sand.u32 127, %s802_s30 }
 0x31f   : > { %s4336_s29 = sshll.u32 %s803_s23, 7  ;;  %s4168_s2 = sshll.u32 %s785_s11, 4 }
 0x320   : > { %s4337_s21 = sadd.s32 384, %s4336_s29  ;;  %s788_s14 = scalar_lea.hbm %s8033_s1, %s4168_s2 }
 0x321   : > { %s809_s15 = sadd.s32 %s4337_s21, %s808_s25  ;;  %s5520_s7 = scalar_lea.hbm %s788_s14, 16 }
 0x322   : > { %p5521_p0 = scmp.ne.s32.totalorder %s788_s14, %s5520_s7  ;;  %p5523_p1 = scmp.lt.u32.totalorder %s788_s14, %s8033_s1 }
 0x323   : > { %p5524_p2 = scmp.lt.u32.totalorder %s6575_s26, %s5520_s7  ;;  %p5526_p4 = scmp.lt.u32.totalorder %s5520_s7, %s788_s14 }
 0x325   : > { %p5525_p3 = por %p5524_p2, %p5523_p1 }
 0x327   : > { %p5527_p5 = por %p5526_p4, %p5525_p3 }
 0x329   : > { %p5528_p6 = pnand %p5527_p5, %p5521_p0 }
 0x32b   : > { %5531 = shalt.err (!%p5528_p6)  }
 0x32c   : > { %s5532_s20 = scalar_lea.vmem %s799_s19, 16  ;;  %p5537_p8 = scmp.lt.s32.totalorder %s799_s19, %s6583_s5 }
 0x32d   : > { %p5533_p7 = scmp.ne.s32.totalorder %s799_s19, %s5532_s20  ;;  %p5538_p9 = scmp.lt.s32.totalorder %s6586_s8, %s5532_s20 }
 0x32f   : > { %p5539_p10 = por %p5538_p9, %p5537_p8 }
 0x331   : > { %p5540_p11 = pnand %p5539_p10, %p5533_p7 }
 0x333   : > { %5543 = shalt.err (!%p5540_p11)  }
 0x334   : > { %801 = dma.hbm_to_vmem [thread:$0]  %s788_s14, 16, %s799_s19, [#allocation3 + $0x3] }
 0x335   : > { %s810_s11 = sld [smem:[#allocation5 + %s809_s15]]  ;;  %s823_s4 = sshll.u32 %s3831_s28, 4  ;;  %s824_s4 = int_to_ptr.vmem [resolvable:$true] %s823_s4 }
 0x336   : > { %s827_s6 = sadd.s32 7, %s6988_s22  ;;  %s3836_s30 = scalar_lea.vmem %s6993_s17, 391 [#allocation2] }
 0x337   : > { %s828_s10 = sshra.s32 %s827_s6, 7  ;;  %s833_s18 = sand.u32 127, %s827_s6 }
 0x338   : > { %s4338_s24 = sshll.u32 %s828_s10, 7  ;;  %s848_s19 = sshll.u32 %s3836_s30, 4  ;;  %s849_s19 = int_to_ptr.vmem [resolvable:$true] %s848_s19 }
 0x339   : > { %s4339_s27 = sadd.s32 384, %s4338_s24 }
 0x33a   : > { %s834_s23 = sadd.s32 %s4339_s27, %s833_s18 }
 0x33b   : > { %s4171_s25 = sshll.u32 %s810_s11, 4  ;;  %s835_s29 = sld [smem:[#allocation5 + %s834_s23]] }
 0x33c   : > { %s813_s16 = scalar_lea.hbm %s8033_s1, %s4171_s25 }
 0x33d   : > { %s5544_s13 = scalar_lea.hbm %s813_s16, 16  ;;  %p5547_p13 = scmp.lt.u32.totalorder %s813_s16, %s8033_s1 }
 0x33e   : > { %p5545_p12 = scmp.ne.s32.totalorder %s813_s16, %s5544_s13  ;;  %p5548_p0 = scmp.lt.u32.totalorder %s6575_s26, %s5544_s13 }
 0x33f   : > { %p5550_p2 = scmp.lt.u32.totalorder %s5544_s13, %s813_s16 }
 0x340   : > { %p5549_p1 = por %p5548_p0, %p5547_p13 }
 0x342   : > { %p5551_p3 = por %p5550_p2, %p5549_p1 }
 0x344   : > { %p5552_p4 = pnand %p5551_p3, %p5545_p12 }
 0x346   : > { %5555 = shalt.err (!%p5552_p4)  }
 0x347   : > { %s5556_s22 = scalar_lea.vmem %s824_s4, 16  ;;  %p5561_p6 = scmp.lt.s32.totalorder %s824_s4, %s6583_s5 }
 0x348   : > { %p5557_p5 = scmp.ne.s32.totalorder %s824_s4, %s5556_s22  ;;  %p5562_p7 = scmp.lt.s32.totalorder %s6586_s8, %s5556_s22 }
 0x34a   : > { %p5563_p8 = por %p5562_p7, %p5561_p6 }
 0x34c   : > { %p5564_p9 = pnand %p5563_p8, %p5557_p5 }
 0x34e   : > { %5567 = shalt.err (!%p5564_p9)  }
 0x34f   : > { %826 = dma.hbm_to_vmem [thread:$0]  %s813_s16, 16, %s824_s4, [#allocation3 + $0x3] }
 0x350   : > { %s4174_s17 = sshll.u32 %s835_s29, 4 }
 0x351   : > { %s838_s0 = scalar_lea.hbm %s8033_s1, %s4174_s17 }
 0x352   : > { %s5568_s9 = scalar_lea.hbm %s838_s0, 16  ;;  %p5571_p11 = scmp.lt.u32.totalorder %s838_s0, %s8033_s1 }
 0x353   : > { %p5569_p10 = scmp.ne.s32.totalorder %s838_s0, %s5568_s9  ;;  %p5572_p12 = scmp.lt.u32.totalorder %s6575_s26, %s5568_s9 }
 0x354   : > { %p5574_p0 = scmp.lt.u32.totalorder %s5568_s9, %s838_s0 }
 0x355   : > { %p5573_p13 = por %p5572_p12, %p5571_p11 }
 0x357   : > { %p5575_p1 = por %p5574_p0, %p5573_p13 }
 0x359   : > { %p5576_p2 = pnand %p5575_p1, %p5569_p10 }
 0x35b   : > { %5579 = shalt.err (!%p5576_p2)  }
 0x35c   : > { %s5580_s4 = scalar_lea.vmem %s849_s19, 16  ;;  %p5585_p4 = scmp.lt.s32.totalorder %s849_s19, %s6583_s5 }
 0x35d   : > { %p5581_p3 = scmp.ne.s32.totalorder %s849_s19, %s5580_s4  ;;  %p5586_p5 = scmp.lt.s32.totalorder %s6586_s8, %s5580_s4 }
 0x35f   : > { %p5587_p6 = por %p5586_p5, %p5585_p4 }
 0x361   : > { %p5588_p7 = pnand %p5587_p6, %p5581_p3 }
 0x363   : > { %5591 = shalt.err (!%p5588_p7)  }
 0x364   : > { %851 = dma.hbm_to_vmem [thread:$0]  %s838_s0, 16, %s849_s19, [#allocation3 + $0x3] }
 0x365   : > { %s650_s12 = sadd.s32 1, %s6458_s12  }
 0x366   : > { %p647_p8 = scmp.ge.s32.totalorder %s650_s12, 16  }
 0x367   :  { %s7124_s6 = smov (%p647_p8), 0  }
 0x368   :  { %649 = sbr.rel (!%p647_p8) target bundleno = 666 (0x29a), region = 585 }
 0x36f LB: > { %s7130_s10 = sshll.u32 %s6462_s6, 3  ;;  %s6462_s6 = sphi %s7124_s6, %s858_s6  }
 0x370   : > { %s861_s18 = sshra.s32 %s7130_s10, 7  ;;  %s866_s24 = sand.u32 127, %s7130_s10 }
 0x371   : > { %s4340_s27 = sshll.u32 %s861_s18, 7  ;;  %s7135_s12 = scalar_lea.vmem [#allocation2], %s7130_s10 }
 0x372   : > { %s4341_s30 = sadd.s32 512, %s4340_s27  ;;  %s3841_s23 = scalar_lea.vmem %s7135_s12, 512 [#allocation2] }
 0x373   : > { %s867_s25 = sadd.s32 %s4341_s30, %s866_s24  ;;  %s881_s29 = sshll.u32 %s3841_s23, 4  ;;  %s7138_s29 = int_to_ptr.vmem [resolvable:$true] %s881_s29 }
 0x374   : > { %s868_s2 = sld [smem:[#allocation5 + %s867_s25]]  ;;  %s885_s21 = sadd.s32 1, %s7130_s10 }
 0x375   : > { %s3846_s16 = scalar_lea.vmem %s7135_s12, 513 [#allocation2]  ;;  %s886_s19 = sshra.s32 %s885_s21, 7 }
 0x376   : > { %s891_s13 = sand.u32 127, %s885_s21  ;;  %s4342_s14 = sshll.u32 %s886_s19, 7 }
 0x377   : > { %s906_s28 = sshll.u32 %s3846_s16, 4  ;;  %s4343_s22 = sadd.s32 512, %s4342_s14  ;;  %s7142_s28 = int_to_ptr.vmem [resolvable:$true] %s906_s28 }
 0x378   : > { %s892_s17 = sadd.s32 %s4343_s22, %s891_s13  ;;  %s910_s15 = sadd.s32 2, %s7130_s10 }
 0x379   : > { %s7145_s0 = sld [smem:[#allocation5 + %s892_s17]]  ;;  %s911_s4 = sshra.s32 %s910_s15, 7 }
 0x37a   : > { %s4178_s7 = sshll.u32 %s868_s2, 4 }
 0x37b   : > { %s870_s11 = scalar_lea.hbm %s8033_s1, %s4178_s7 }
 0x37c   : > { %s5592_s18 = scalar_lea.hbm %s870_s11, 16  ;;  %p5595_p10 = scmp.lt.u32.totalorder %s870_s11, %s8033_s1 }
 0x37d   : > { %p5593_p9 = scmp.ne.s32.totalorder %s870_s11, %s5592_s18  ;;  %p5596_p11 = scmp.lt.u32.totalorder %s6575_s26, %s5592_s18 }
 0x37e   : > { %p5598_p13 = scmp.lt.u32.totalorder %s5592_s18, %s870_s11 }
 0x37f   : > { %p5597_p12 = por %p5596_p11, %p5595_p10 }
 0x381   : > { %p5599_p0 = por %p5598_p13, %p5597_p12 }
 0x383   : > { %p5600_p1 = pnand %p5599_p0, %p5593_p9 }
 0x385   : > { %5603 = shalt.err (!%p5600_p1)  }
 0x386   : > { %s5604_s30 = scalar_lea.vmem %s7138_s29, 16  ;;  %p5609_p3 = scmp.lt.s32.totalorder %s7138_s29, %s6583_s5 }
 0x387   : > { %p5605_p2 = scmp.ne.s32.totalorder %s7138_s29, %s5604_s30  ;;  %p5610_p4 = scmp.lt.s32.totalorder %s6586_s8, %s5604_s30 }
 0x389   : > { %p5611_p5 = por %p5610_p4, %p5609_p3 }
 0x38b   : > { %p5612_p6 = pnand %p5611_p5, %p5605_p2 }
 0x38d   : > { %5615 = shalt.err (!%p5612_p6)  }
 0x38e   : > { %884 = dma.hbm_to_vmem [thread:$0]  %s870_s11, 16, %s7138_s29, [#allocation3 + $0x4] }
 0x38f   : > { %s4344_s23 = sshll.u32 %s911_s4, 7  ;;  %s916_s25 = sand.u32 127, %s910_s15 }
 0x390   : > { %s4345_s2 = sadd.s32 512, %s4344_s23  ;;  %s3851_s21 = scalar_lea.vmem %s7135_s12, 514 [#allocation2] }
 0x391   : > { %s917_s16 = sadd.s32 %s4345_s2, %s916_s25  ;;  %s931_s19 = sshll.u32 %s3851_s21, 4  ;;  %s7167_s19 = int_to_ptr.vmem [resolvable:$true] %s931_s19 }
 0x392   : > { %s4181_s13 = sshll.u32 %s7145_s0, 4  ;;  %s7162_s14 = sld [smem:[#allocation5 + %s917_s16]] }
 0x393   : > { %s896_s7 = scalar_lea.hbm %s8033_s1, %s4181_s13 }
 0x394   : > { %s5616_s9 = scalar_lea.hbm %s896_s7, 16  ;;  %p5619_p8 = scmp.lt.u32.totalorder %s896_s7, %s8033_s1 }
 0x395   : > { %p5617_p7 = scmp.ne.s32.totalorder %s896_s7, %s5616_s9  ;;  %p5620_p9 = scmp.lt.u32.totalorder %s6575_s26, %s5616_s9 }
 0x396   : > { %p5622_p11 = scmp.lt.u32.totalorder %s5616_s9, %s896_s7 }
 0x397   : > { %p5621_p10 = por %p5620_p9, %p5619_p8 }
 0x399   : > { %p5623_p12 = por %p5622_p11, %p5621_p10 }
 0x39b   : > { %p5624_p13 = pnand %p5623_p12, %p5617_p7 }
 0x39d   : > { %5627 = shalt.err (!%p5624_p13)  }
 0x39e   : > { %s5628_s29 = scalar_lea.vmem %s7142_s28, 16  ;;  %p5633_p1 = scmp.lt.s32.totalorder %s7142_s28, %s6583_s5 }
 0x39f   : > { %p5629_p0 = scmp.ne.s32.totalorder %s7142_s28, %s5628_s29  ;;  %p5634_p2 = scmp.lt.s32.totalorder %s6586_s8, %s5628_s29 }
 0x3a1   : > { %p5635_p3 = por %p5634_p2, %p5633_p1 }
 0x3a3   : > { %p5636_p4 = pnand %p5635_p3, %p5629_p0 }
 0x3a5   : > { %5639 = shalt.err (!%p5636_p4)  }
 0x3a6   : > { %909 = dma.hbm_to_vmem [thread:$0]  %s896_s7, 16, %s7142_s28, [#allocation3 + $0x4] }
 0x3a7   : > { %s935_s15 = sadd.s32 3, %s7130_s10  ;;  %s3856_s0 = scalar_lea.vmem %s7135_s12, 515 [#allocation2] }
 0x3a8   : > { %s936_s11 = sshra.s32 %s935_s15, 7  ;;  %s941_s4 = sand.u32 127, %s935_s15 }
 0x3a9   : > { %s4346_s24 = sshll.u32 %s936_s11, 7  ;;  %s956_s27 = sshll.u32 %s3856_s0, 4  ;;  %s7195_s27 = int_to_ptr.vmem [resolvable:$true] %s956_s27 }
 0x3aa   : > { %s4184_s30 = sshll.u32 %s7162_s14, 4  ;;  %s4347_s23 = sadd.s32 512, %s4346_s24 }
 0x3ab   : > { %s921_s21 = scalar_lea.hbm %s8033_s1, %s4184_s30  ;;  %s942_s16 = sadd.s32 %s4347_s23, %s941_s4 }
 0x3ac   : > { %s5640_s13 = scalar_lea.hbm %s921_s21, 16  ;;  %p5643_p6 = scmp.lt.u32.totalorder %s921_s21, %s8033_s1 }
 0x3ad   : > { %p5641_p5 = scmp.ne.s32.totalorder %s921_s21, %s5640_s13  ;;  %p5644_p7 = scmp.lt.u32.totalorder %s6575_s26, %s5640_s13 }
 0x3ae   : > { %p5646_p9 = scmp.lt.u32.totalorder %s5640_s13, %s921_s21 }
 0x3af   : > { %p5645_p8 = por %p5644_p7, %p5643_p6 }
 0x3b1   : > { %p5647_p10 = por %p5646_p9, %p5645_p8 }
 0x3b3   : > { %p5648_p11 = pnand %p5647_p10, %p5641_p5 }
 0x3b5   : > { %5651 = shalt.err (!%p5648_p11)  }
 0x3b6   : > { %s5652_s28 = scalar_lea.vmem %s7167_s19, 16  ;;  %p5657_p13 = scmp.lt.s32.totalorder %s7167_s19, %s6583_s5 }
 0x3b7   : > { %p5653_p12 = scmp.ne.s32.totalorder %s7167_s19, %s5652_s28  ;;  %p5658_p0 = scmp.lt.s32.totalorder %s6586_s8, %s5652_s28 }
 0x3b9   : > { %p5659_p1 = por %p5658_p0, %p5657_p13 }
 0x3bb   : > { %p5660_p2 = pnand %p5659_p1, %p5653_p12 }
 0x3bd   : > { %5663 = shalt.err (!%p5660_p2)  }
 0x3be   : > { %934 = dma.hbm_to_vmem [thread:$0]  %s921_s21, 16, %s7167_s19, [#allocation3 + $0x4] }
 0x3bf   : > { %s943_s14 = sld [smem:[#allocation5 + %s942_s16]]  ;;  %s960_s7 = sadd.s32 4, %s7130_s10 }
 0x3c0   : > { %s3861_s9 = scalar_lea.vmem %s7135_s12, 516 [#allocation2]  ;;  %s961_s20 = sshra.s32 %s960_s7, 7 }
 0x3c1   : > { %s966_s18 = sand.u32 127, %s960_s7  ;;  %s4348_s29 = sshll.u32 %s961_s20, 7 }
 0x3c2   : > { %s981_s15 = sshll.u32 %s3861_s9, 4  ;;  %s4349_s0 = sadd.s32 512, %s4348_s29  ;;  %s7199_s15 = int_to_ptr.vmem [resolvable:$true] %s981_s15 }
 0x3c3   : > { %s967_s11 = sadd.s32 %s4349_s0, %s966_s18  ;;  %s985_s4 = sadd.s32 5, %s7130_s10 }
 0x3c4   : > { %s7202_s30 = sld [smem:[#allocation5 + %s967_s11]]  ;;  %s986_s2 = sshra.s32 %s985_s4, 7 }
 0x3c5   : > { %s4187_s24 = sshll.u32 %s943_s14, 4 }
 0x3c6   : > { %s946_s25 = scalar_lea.hbm %s8033_s1, %s4187_s24 }
 0x3c7   : > { %s5664_s21 = scalar_lea.hbm %s946_s25, 16  ;;  %p5667_p4 = scmp.lt.u32.totalorder %s946_s25, %s8033_s1 }
 0x3c8   : > { %p5665_p3 = scmp.ne.s32.totalorder %s946_s25, %s5664_s21  ;;  %p5668_p5 = scmp.lt.u32.totalorder %s6575_s26, %s5664_s21 }
 0x3c9   : > { %p5670_p7 = scmp.lt.u32.totalorder %s5664_s21, %s946_s25 }
 0x3ca   : > { %p5669_p6 = por %p5668_p5, %p5667_p4 }
 0x3cc   : > { %p5671_p8 = por %p5670_p7, %p5669_p6 }
 0x3ce   : > { %p5672_p9 = pnand %p5671_p8, %p5665_p3 }
 0x3d0   : > { %5675 = shalt.err (!%p5672_p9)  }
 0x3d1   : > { %s5676_s22 = scalar_lea.vmem %s7195_s27, 16  ;;  %p5681_p11 = scmp.lt.s32.totalorder %s7195_s27, %s6583_s5 }
 0x3d2   : > { %p5677_p10 = scmp.ne.s32.totalorder %s7195_s27, %s5676_s22  ;;  %p5682_p12 = scmp.lt.s32.totalorder %s6586_s8, %s5676_s22 }
 0x3d4   : > { %p5683_p13 = por %p5682_p12, %p5681_p11 }
 0x3d6   : > { %p5684_p0 = pnand %p5683_p13, %p5677_p10 }
 0x3d8   : > { %5687 = shalt.err (!%p5684_p0)  }
 0x3d9   : > { %959 = dma.hbm_to_vmem [thread:$0]  %s946_s25, 16, %s7195_s27, [#allocation3 + $0x4] }
 0x3da   : > { %s4350_s17 = sshll.u32 %s986_s2, 7  ;;  %s991_s28 = sand.u32 127, %s985_s4 }
 0x3db   : > { %s4351_s14 = sadd.s32 512, %s4350_s17  ;;  %s3866_s7 = scalar_lea.vmem %s7135_s12, 517 [#allocation2] }
 0x3dc   : > { %s992_s9 = sadd.s32 %s4351_s14, %s991_s28  ;;  %s1006_s20 = sshll.u32 %s3866_s7, 4  ;;  %s1007_s20 = int_to_ptr.vmem [resolvable:$true] %s1006_s20 }
 0x3dd   : > { %s4190_s18 = sshll.u32 %s7202_s30, 4  ;;  %s993_s29 = sld [smem:[#allocation5 + %s992_s9]] }
 0x3de   : > { %s971_s24 = scalar_lea.hbm %s8033_s1, %s4190_s18 }
 0x3df   : > { %s5688_s23 = scalar_lea.hbm %s971_s24, 16  ;;  %p5691_p2 = scmp.lt.u32.totalorder %s971_s24, %s8033_s1 }
 0x3e0   : > { %p5689_p1 = scmp.ne.s32.totalorder %s971_s24, %s5688_s23  ;;  %p5692_p3 = scmp.lt.u32.totalorder %s6575_s26, %s5688_s23 }
 0x3e1   : > { %p5694_p5 = scmp.lt.u32.totalorder %s5688_s23, %s971_s24 }
 0x3e2   : > { %p5693_p4 = por %p5692_p3, %p5691_p2 }
 0x3e4   : > { %p5695_p6 = por %p5694_p5, %p5693_p4 }
 0x3e6   : > { %p5696_p7 = pnand %p5695_p6, %p5689_p1 }
 0x3e8   : > { %5699 = shalt.err (!%p5696_p7)  }
 0x3e9   : > { %s5700_s27 = scalar_lea.vmem %s7199_s15, 16  ;;  %p5705_p9 = scmp.lt.s32.totalorder %s7199_s15, %s6583_s5 }
 0x3ea   : > { %p5701_p8 = scmp.ne.s32.totalorder %s7199_s15, %s5700_s27  ;;  %p5706_p10 = scmp.lt.s32.totalorder %s6586_s8, %s5700_s27 }
 0x3ec   : > { %p5707_p11 = por %p5706_p10, %p5705_p9 }
 0x3ee   : > { %p5708_p12 = pnand %p5707_p11, %p5701_p8 }
 0x3f0   : > { %5711 = shalt.err (!%p5708_p12)  }
 0x3f1   : > { %984 = dma.hbm_to_vmem [thread:$0]  %s971_s24, 16, %s7199_s15, [#allocation3 + $0x4] }
 0x3f2   : > { %s1010_s4 = sadd.s32 6, %s7130_s10  ;;  %s3871_s16 = scalar_lea.vmem %s7135_s12, 518 [#allocation2] }
 0x3f3   : > { %s1011_s30 = sshra.s32 %s1010_s4, 7  ;;  %s1016_s25 = sand.u32 127, %s1010_s4 }
 0x3f4   : > { %s4352_s2 = sshll.u32 %s1011_s30, 7  ;;  %s4193_s13 = sshll.u32 %s993_s29, 4 }
 0x3f5   : > { %s4353_s22 = sadd.s32 512, %s4352_s2  ;;  %s996_s14 = scalar_lea.hbm %s8033_s1, %s4193_s13 }
 0x3f6   : > { %s1017_s7 = sadd.s32 %s4353_s22, %s1016_s25  ;;  %s5712_s9 = scalar_lea.hbm %s996_s14, 16 }
 0x3f7   : > { %p5713_p13 = scmp.ne.s32.totalorder %s996_s14, %s5712_s9  ;;  %p5715_p0 = scmp.lt.u32.totalorder %s996_s14, %s8033_s1 }
 0x3f8   : > { %p5716_p1 = scmp.lt.u32.totalorder %s6575_s26, %s5712_s9  ;;  %p5718_p3 = scmp.lt.u32.totalorder %s5712_s9, %s996_s14 }
 0x3fa   : > { %p5717_p2 = por %p5716_p1, %p5715_p0 }
 0x3fc   : > { %p5719_p4 = por %p5718_p3, %p5717_p2 }
 0x3fe   : > { %p5720_p5 = pnand %p5719_p4, %p5713_p13 }
 0x400   : > { %5723 = shalt.err (!%p5720_p5)  }
 0x401   : > { %s5724_s15 = scalar_lea.vmem %s1007_s20, 16  ;;  %p5729_p7 = scmp.lt.s32.totalorder %s1007_s20, %s6583_s5 }
 0x402   : > { %p5725_p6 = scmp.ne.s32.totalorder %s1007_s20, %s5724_s15  ;;  %p5730_p8 = scmp.lt.s32.totalorder %s6586_s8, %s5724_s15 }
 0x404   : > { %p5731_p9 = por %p5730_p8, %p5729_p7 }
 0x406   : > { %p5732_p10 = pnand %p5731_p9, %p5725_p6 }
 0x408   : > { %5735 = shalt.err (!%p5732_p10)  }
 0x409   : > { %1009 = dma.hbm_to_vmem [thread:$0]  %s996_s14, 16, %s1007_s20, [#allocation3 + $0x4] }
 0x40a   : > { %s1018_s29 = sld [smem:[#allocation5 + %s1017_s7]]  ;;  %s1031_s11 = sshll.u32 %s3871_s16, 4  ;;  %s1032_s11 = int_to_ptr.vmem [resolvable:$true] %s1031_s11 }
 0x40b   : > { %s1035_s24 = sadd.s32 7, %s7130_s10  ;;  %s3876_s4 = scalar_lea.vmem %s7135_s12, 519 [#allocation2] }
 0x40c   : > { %s1036_s23 = sshra.s32 %s1035_s24, 7  ;;  %s1041_s19 = sand.u32 127, %s1035_s24 }
 0x40d   : > { %s4354_s21 = sshll.u32 %s1036_s23, 7  ;;  %s1056_s20 = sshll.u32 %s3876_s4, 4  ;;  %s1057_s20 = int_to_ptr.vmem [resolvable:$true] %s1056_s20 }
 0x40e   : > { %s4355_s27 = sadd.s32 512, %s4354_s21 }
 0x40f   : > { %s1042_s30 = sadd.s32 %s4355_s27, %s1041_s19 }
 0x410   : > { %s4196_s25 = sshll.u32 %s1018_s29, 4  ;;  %s1043_s2 = sld [smem:[#allocation5 + %s1042_s30]] }
 0x411   : > { %s1021_s17 = scalar_lea.hbm %s8033_s1, %s4196_s25 }
 0x412   : > { %s5736_s28 = scalar_lea.hbm %s1021_s17, 16  ;;  %p5739_p12 = scmp.lt.u32.totalorder %s1021_s17, %s8033_s1 }
 0x413   : > { %p5737_p11 = scmp.ne.s32.totalorder %s1021_s17, %s5736_s28  ;;  %p5740_p13 = scmp.lt.u32.totalorder %s6575_s26, %s5736_s28 }
 0x414   : > { %p5742_p1 = scmp.lt.u32.totalorder %s5736_s28, %s1021_s17 }
 0x415   : > { %p5741_p0 = por %p5740_p13, %p5739_p12 }
 0x417   : > { %p5743_p2 = por %p5742_p1, %p5741_p0 }
 0x419   : > { %p5744_p3 = pnand %p5743_p2, %p5737_p11 }
 0x41b   : > { %5747 = shalt.err (!%p5744_p3)  }
 0x41c   : > { %s5748_s10 = scalar_lea.vmem %s1032_s11, 16  ;;  %p5753_p5 = scmp.lt.s32.totalorder %s1032_s11, %s6583_s5 }
 0x41d   : > { %p5749_p4 = scmp.ne.s32.totalorder %s1032_s11, %s5748_s10  ;;  %p5754_p6 = scmp.lt.s32.totalorder %s6586_s8, %s5748_s10 }
 0x41f   : > { %p5755_p7 = por %p5754_p6, %p5753_p5 }
 0x421   : > { %p5756_p8 = pnand %p5755_p7, %p5749_p4 }
 0x423   : > { %5759 = shalt.err (!%p5756_p8)  }
 0x424   : > { %1034 = dma.hbm_to_vmem [thread:$0]  %s1021_s17, 16, %s1032_s11, [#allocation3 + $0x4] }
 0x425   : > { %s4199_s12 = sshll.u32 %s1043_s2, 4 }
 0x426   : > { %s1046_s18 = scalar_lea.hbm %s8033_s1, %s4199_s12 }
 0x427   : > { %s5760_s0 = scalar_lea.hbm %s1046_s18, 16  ;;  %p5763_p10 = scmp.lt.u32.totalorder %s1046_s18, %s8033_s1 }
 0x428   : > { %p5761_p9 = scmp.ne.s32.totalorder %s1046_s18, %s5760_s0  ;;  %p5764_p11 = scmp.lt.u32.totalorder %s6575_s26, %s5760_s0 }
 0x429   : > { %p5766_p13 = scmp.lt.u32.totalorder %s5760_s0, %s1046_s18 }
 0x42a   : > { %p5765_p12 = por %p5764_p11, %p5763_p10 }
 0x42c   : > { %p5767_p0 = por %p5766_p13, %p5765_p12 }
 0x42e   : > { %p5768_p1 = pnand %p5767_p0, %p5761_p9 }
 0x430   : > { %5771 = shalt.err (!%p5768_p1)  }
 0x431   : > { %s5772_s11 = scalar_lea.vmem %s1057_s20, 16  ;;  %p5777_p3 = scmp.lt.s32.totalorder %s1057_s20, %s6583_s5 }
 0x432   : > { %p5773_p2 = scmp.ne.s32.totalorder %s1057_s20, %s5772_s11  ;;  %p5778_p4 = scmp.lt.s32.totalorder %s6586_s8, %s5772_s11 }
 0x434   : > { %p5779_p5 = por %p5778_p4, %p5777_p3 }
 0x436   : > { %p5780_p6 = pnand %p5779_p5, %p5773_p2 }
 0x438   : > { %5783 = shalt.err (!%p5780_p6)  }
 0x439   : > { %1059 = dma.hbm_to_vmem [thread:$0]  %s1046_s18, 16, %s1057_s20, [#allocation3 + $0x4] }
 0x43a   : > { %s858_s6 = sadd.s32 1, %s6462_s6  }
 0x43b   : > { %p855_p7 = scmp.ge.s32.totalorder %s858_s6, 16  }
 0x43c   :  { %s7266_s24 = smov (%p855_p7), 0  }
 0x43d   :  { %857 = sbr.rel (!%p855_p7) target bundleno = 879 (0x36f), region = 596 }
 0x444 LB: > { %s7272_s23 = sshll.u32 %s6466_s24, 3  ;;  %s6466_s24 = sphi %s7266_s24, %s1066_s24  }
 0x445   : > { %s1069_s19 = sshra.s32 %s7272_s23, 7  ;;  %s1074_s21 = sand.u32 127, %s7272_s23 }
 0x446   : > { %s4356_s27 = sshll.u32 %s1069_s19, 7  ;;  %s7277_s6 = scalar_lea.vmem [#allocation2], %s7272_s23 }
 0x447   : > { %s4357_s4 = sadd.s32 640, %s4356_s27  ;;  %s3881_s30 = scalar_lea.vmem %s7277_s6, 640 [#allocation2] }
 0x448   : > { %s1075_s25 = sadd.s32 %s4357_s4, %s1074_s21  ;;  %s1089_s2 = sshll.u32 %s3881_s30, 4  ;;  %s7280_s2 = int_to_ptr.vmem [resolvable:$true] %s1089_s2 }
 0x449   : > { %s1076_s13 = sld [smem:[#allocation5 + %s1075_s25]]  ;;  %s1093_s22 = sadd.s32 1, %s7272_s23 }
 0x44a   : > { %s3886_s17 = scalar_lea.vmem %s7277_s6, 641 [#allocation2]  ;;  %s1094_s20 = sshra.s32 %s1093_s22, 7 }
 0x44b   : > { %s1099_s28 = sand.u32 127, %s1093_s22  ;;  %s4358_s14 = sshll.u32 %s1094_s20, 7 }
 0x44c   : > { %s1114_s16 = sshll.u32 %s3886_s17, 4  ;;  %s4359_s10 = sadd.s32 640, %s4358_s14  ;;  %s7284_s16 = int_to_ptr.vmem [resolvable:$true] %s1114_s16 }
 0x44d   : > { %s1100_s12 = sadd.s32 %s4359_s10, %s1099_s28  ;;  %s1118_s7 = sadd.s32 2, %s7272_s23 }
 0x44e   : > { %s7287_s18 = sld [smem:[#allocation5 + %s1100_s12]]  ;;  %s1119_s11 = sshra.s32 %s1118_s7, 7 }
 0x44f   : > { %s4203_s9 = sshll.u32 %s1076_s13, 4 }
 0x450   : > { %s1078_s29 = scalar_lea.hbm %s8033_s1, %s4203_s9 }
 0x451   : > { %s5784_s19 = scalar_lea.hbm %s1078_s29, 16  ;;  %p5787_p9 = scmp.lt.u32.totalorder %s1078_s29, %s8033_s1 }
 0x452   : > { %p5785_p8 = scmp.ne.s32.totalorder %s1078_s29, %s5784_s19  ;;  %p5788_p10 = scmp.lt.u32.totalorder %s6575_s26, %s5784_s19 }
 0x453   : > { %p5790_p12 = scmp.lt.u32.totalorder %s5784_s19, %s1078_s29 }
 0x454   : > { %p5789_p11 = por %p5788_p10, %p5787_p9 }
 0x456   : > { %p5791_p13 = por %p5790_p12, %p5789_p11 }
 0x458   : > { %p5792_p0 = pnand %p5791_p13, %p5785_p8 }
 0x45a   : > { %5795 = shalt.err (!%p5792_p0)  }
 0x45b   : > { %s5796_s4 = scalar_lea.vmem %s7280_s2, 16  ;;  %p5801_p2 = scmp.lt.s32.totalorder %s7280_s2, %s6583_s5 }
 0x45c   : > { %p5797_p1 = scmp.ne.s32.totalorder %s7280_s2, %s5796_s4  ;;  %p5802_p3 = scmp.lt.s32.totalorder %s6586_s8, %s5796_s4 }
 0x45e   : > { %p5803_p4 = por %p5802_p3, %p5801_p2 }
 0x460   : > { %p5804_p5 = pnand %p5803_p4, %p5797_p1 }
 0x462   : > { %5807 = shalt.err (!%p5804_p5)  }
 0x463   : > { %1092 = dma.hbm_to_vmem [thread:$0]  %s1078_s29, 16, %s7280_s2, [#allocation3 + $0x5] }
 0x464   : > { %s4360_s30 = sshll.u32 %s1119_s11, 7  ;;  %s1124_s25 = sand.u32 127, %s1118_s7 }
 0x465   : > { %s4361_s13 = sadd.s32 640, %s4360_s30  ;;  %s3891_s22 = scalar_lea.vmem %s7277_s6, 642 [#allocation2] }
 0x466   : > { %s1125_s17 = sadd.s32 %s4361_s13, %s1124_s25  ;;  %s1139_s20 = sshll.u32 %s3891_s22, 4  ;;  %s7309_s20 = int_to_ptr.vmem [resolvable:$true] %s1139_s20 }
 0x467   : > { %s4206_s28 = sshll.u32 %s7287_s18, 4  ;;  %s7304_s14 = sld [smem:[#allocation5 + %s1125_s17]] }
 0x468   : > { %s1104_s9 = scalar_lea.hbm %s8033_s1, %s4206_s28 }
 0x469   : > { %s5808_s0 = scalar_lea.hbm %s1104_s9, 16  ;;  %p5811_p7 = scmp.lt.u32.totalorder %s1104_s9, %s8033_s1 }
 0x46a   : > { %p5809_p6 = scmp.ne.s32.totalorder %s1104_s9, %s5808_s0  ;;  %p5812_p8 = scmp.lt.u32.totalorder %s6575_s26, %s5808_s0 }
 0x46b   : > { %p5814_p10 = scmp.lt.u32.totalorder %s5808_s0, %s1104_s9 }
 0x46c   : > { %p5813_p9 = por %p5812_p8, %p5811_p7 }
 0x46e   : > { %p5815_p11 = por %p5814_p10, %p5813_p9 }
 0x470   : > { %p5816_p12 = pnand %p5815_p11, %p5809_p6 }
 0x472   : > { %5819 = shalt.err (!%p5816_p12)  }
 0x473   : > { %s5820_s2 = scalar_lea.vmem %s7284_s16, 16  ;;  %p5825_p0 = scmp.lt.s32.totalorder %s7284_s16, %s6583_s5 }
 0x474   : > { %p5821_p13 = scmp.ne.s32.totalorder %s7284_s16, %s5820_s2  ;;  %p5826_p1 = scmp.lt.s32.totalorder %s6586_s8, %s5820_s2 }
 0x476   : > { %p5827_p2 = por %p5826_p1, %p5825_p0 }
 0x478   : > { %p5828_p3 = pnand %p5827_p2, %p5821_p13 }
 0x47a   : > { %5831 = shalt.err (!%p5828_p3)  }
 0x47b   : > { %1117 = dma.hbm_to_vmem [thread:$0]  %s1104_s9, 16, %s7284_s16, [#allocation3 + $0x5] }
 0x47c   : > { %s1143_s7 = sadd.s32 3, %s7272_s23  ;;  %s3896_s18 = scalar_lea.vmem %s7277_s6, 643 [#allocation2] }
 0x47d   : > { %s1144_s29 = sshra.s32 %s1143_s7, 7  ;;  %s1149_s11 = sand.u32 127, %s1143_s7 }
 0x47e   : > { %s4362_s21 = sshll.u32 %s1144_s29, 7  ;;  %s1164_s27 = sshll.u32 %s3896_s18, 4  ;;  %s7337_s27 = int_to_ptr.vmem [resolvable:$true] %s1164_s27 }
 0x47f   : > { %s4209_s4 = sshll.u32 %s7304_s14, 4  ;;  %s4363_s30 = sadd.s32 640, %s4362_s21 }
 0x480   : > { %s1129_s22 = scalar_lea.hbm %s8033_s1, %s4209_s4  ;;  %s1150_s17 = sadd.s32 %s4363_s30, %s1149_s11 }
 0x481   : > { %s5832_s28 = scalar_lea.hbm %s1129_s22, 16  ;;  %p5835_p5 = scmp.lt.u32.totalorder %s1129_s22, %s8033_s1 }
 0x482   : > { %p5833_p4 = scmp.ne.s32.totalorder %s1129_s22, %s5832_s28  ;;  %p5836_p6 = scmp.lt.u32.totalorder %s6575_s26, %s5832_s28 }
 0x483   : > { %p5838_p8 = scmp.lt.u32.totalorder %s5832_s28, %s1129_s22 }
 0x484   : > { %p5837_p7 = por %p5836_p6, %p5835_p5 }
 0x486   : > { %p5839_p9 = por %p5838_p8, %p5837_p7 }
 0x488   : > { %p5840_p10 = pnand %p5839_p9, %p5833_p4 }
 0x48a   : > { %5843 = shalt.err (!%p5840_p10)  }
 0x48b   : > { %s5844_s16 = scalar_lea.vmem %s7309_s20, 16  ;;  %p5849_p12 = scmp.lt.s32.totalorder %s7309_s20, %s6583_s5 }
 0x48c   : > { %p5845_p11 = scmp.ne.s32.totalorder %s7309_s20, %s5844_s16  ;;  %p5850_p13 = scmp.lt.s32.totalorder %s6586_s8, %s5844_s16 }
 0x48e   : > { %p5851_p0 = por %p5850_p13, %p5849_p12 }
 0x490   : > { %p5852_p1 = pnand %p5851_p0, %p5845_p11 }
 0x492   : > { %5855 = shalt.err (!%p5852_p1)  }
 0x493   : > { %1142 = dma.hbm_to_vmem [thread:$0]  %s1129_s22, 16, %s7309_s20, [#allocation3 + $0x5] }
 0x494   : > { %s1151_s14 = sld [smem:[#allocation5 + %s1150_s17]]  ;;  %s1168_s9 = sadd.s32 4, %s7272_s23 }
 0x495   : > { %s3901_s0 = scalar_lea.vmem %s7277_s6, 644 [#allocation2]  ;;  %s1169_s15 = sshra.s32 %s1168_s9, 7 }
 0x496   : > { %s1174_s19 = sand.u32 127, %s1168_s9  ;;  %s4364_s2 = sshll.u32 %s1169_s15, 7 }
 0x497   : > { %s1189_s7 = sshll.u32 %s3901_s0, 4  ;;  %s4365_s18 = sadd.s32 640, %s4364_s2  ;;  %s7341_s7 = int_to_ptr.vmem [resolvable:$true] %s1189_s7 }
 0x498   : > { %s1175_s29 = sadd.s32 %s4365_s18, %s1174_s19  ;;  %s1193_s11 = sadd.s32 5, %s7272_s23 }
 0x499   : > { %s7344_s4 = sld [smem:[#allocation5 + %s1175_s29]]  ;;  %s1194_s13 = sshra.s32 %s1193_s11, 7 }
 0x49a   : > { %s4212_s21 = sshll.u32 %s1151_s14, 4 }
 0x49b   : > { %s1154_s25 = scalar_lea.hbm %s8033_s1, %s4212_s21 }
 0x49c   : > { %s5856_s22 = scalar_lea.hbm %s1154_s25, 16  ;;  %p5859_p3 = scmp.lt.u32.totalorder %s1154_s25, %s8033_s1 }
 0x49d   : > { %p5857_p2 = scmp.ne.s32.totalorder %s1154_s25, %s5856_s22  ;;  %p5860_p4 = scmp.lt.u32.totalorder %s6575_s26, %s5856_s22 }
 0x49e   : > { %p5862_p6 = scmp.lt.u32.totalorder %s5856_s22, %s1154_s25 }
 0x49f   : > { %p5861_p5 = por %p5860_p4, %p5859_p3 }
 0x4a1   : > { %p5863_p7 = por %p5862_p6, %p5861_p5 }
 0x4a3   : > { %p5864_p8 = pnand %p5863_p7, %p5857_p2 }
 0x4a5   : > { %5867 = shalt.err (!%p5864_p8)  }
 0x4a6   : > { %s5868_s10 = scalar_lea.vmem %s7337_s27, 16  ;;  %p5873_p10 = scmp.lt.s32.totalorder %s7337_s27, %s6583_s5 }
 0x4a7   : > { %p5869_p9 = scmp.ne.s32.totalorder %s7337_s27, %s5868_s10  ;;  %p5874_p11 = scmp.lt.s32.totalorder %s6586_s8, %s5868_s10 }
 0x4a9   : > { %p5875_p12 = por %p5874_p11, %p5873_p10 }
 0x4ab   : > { %p5876_p13 = pnand %p5875_p12, %p5869_p9 }
 0x4ad   : > { %5879 = shalt.err (!%p5876_p13)  }
 0x4ae   : > { %1167 = dma.hbm_to_vmem [thread:$0]  %s1154_s25, 16, %s7337_s27, [#allocation3 + $0x5] }
 0x4af   : > { %s4366_s12 = sshll.u32 %s1194_s13, 7  ;;  %s1199_s16 = sand.u32 127, %s1193_s11 }
 0x4b0   : > { %s4367_s14 = sadd.s32 640, %s4366_s12  ;;  %s3906_s9 = scalar_lea.vmem %s7277_s6, 645 [#allocation2] }
 0x4b1   : > { %s1200_s0 = sadd.s32 %s4367_s14, %s1199_s16  ;;  %s1214_s15 = sshll.u32 %s3906_s9, 4  ;;  %s1215_s15 = int_to_ptr.vmem [resolvable:$true] %s1214_s15 }
 0x4b2   : > { %s4215_s19 = sshll.u32 %s7344_s4, 4  ;;  %s1201_s2 = sld [smem:[#allocation5 + %s1200_s0]] }
 0x4b3   : > { %s1179_s21 = scalar_lea.hbm %s8033_s1, %s4215_s19 }
 0x4b4   : > { %s5880_s30 = scalar_lea.hbm %s1179_s21, 16  ;;  %p5883_p1 = scmp.lt.u32.totalorder %s1179_s21, %s8033_s1 }
 0x4b5   : > { %p5881_p0 = scmp.ne.s32.totalorder %s1179_s21, %s5880_s30  ;;  %p5884_p2 = scmp.lt.u32.totalorder %s6575_s26, %s5880_s30 }
 0x4b6   : > { %p5886_p4 = scmp.lt.u32.totalorder %s5880_s30, %s1179_s21 }
 0x4b7   : > { %p5885_p3 = por %p5884_p2, %p5883_p1 }
 0x4b9   : > { %p5887_p5 = por %p5886_p4, %p5885_p3 }
 0x4bb   : > { %p5888_p6 = pnand %p5887_p5, %p5881_p0 }
 0x4bd   : > { %5891 = shalt.err (!%p5888_p6)  }
 0x4be   : > { %s5892_s27 = scalar_lea.vmem %s7341_s7, 16  ;;  %p5897_p8 = scmp.lt.s32.totalorder %s7341_s7, %s6583_s5 }
 0x4bf   : > { %p5893_p7 = scmp.ne.s32.totalorder %s7341_s7, %s5892_s27  ;;  %p5898_p9 = scmp.lt.s32.totalorder %s6586_s8, %s5892_s27 }
 0x4c1   : > { %p5899_p10 = por %p5898_p9, %p5897_p8 }
 0x4c3   : > { %p5900_p11 = pnand %p5899_p10, %p5893_p7 }
 0x4c5   : > { %5903 = shalt.err (!%p5900_p11)  }
 0x4c6   : > { %1192 = dma.hbm_to_vmem [thread:$0]  %s1179_s21, 16, %s7341_s7, [#allocation3 + $0x5] }
 0x4c7   : > { %s1218_s11 = sadd.s32 6, %s7272_s23  ;;  %s3911_s17 = scalar_lea.vmem %s7277_s6, 646 [#allocation2] }
 0x4c8   : > { %s1219_s4 = sshra.s32 %s1218_s11, 7  ;;  %s1224_s25 = sand.u32 127, %s1218_s11 }
 0x4c9   : > { %s4368_s13 = sshll.u32 %s1219_s4, 7  ;;  %s4218_s28 = sshll.u32 %s1201_s2, 4 }
 0x4ca   : > { %s4369_s10 = sadd.s32 640, %s4368_s13  ;;  %s1204_s14 = scalar_lea.hbm %s8033_s1, %s4218_s28 }
 0x4cb   : > { %s1225_s9 = sadd.s32 %s4369_s10, %s1224_s25  ;;  %s5904_s0 = scalar_lea.hbm %s1204_s14, 16 }
 0x4cc   : > { %p5905_p12 = scmp.ne.s32.totalorder %s1204_s14, %s5904_s0  ;;  %p5907_p13 = scmp.lt.u32.totalorder %s1204_s14, %s8033_s1 }
 0x4cd   : > { %p5908_p0 = scmp.lt.u32.totalorder %s6575_s26, %s5904_s0  ;;  %p5910_p2 = scmp.lt.u32.totalorder %s5904_s0, %s1204_s14 }
 0x4cf   : > { %p5909_p1 = por %p5908_p0, %p5907_p13 }
 0x4d1   : > { %p5911_p3 = por %p5910_p2, %p5909_p1 }
 0x4d3   : > { %p5912_p4 = pnand %p5911_p3, %p5905_p12 }
 0x4d5   : > { %5915 = shalt.err (!%p5912_p4)  }
 0x4d6   : > { %s5916_s7 = scalar_lea.vmem %s1215_s15, 16  ;;  %p5921_p6 = scmp.lt.s32.totalorder %s1215_s15, %s6583_s5 }
 0x4d7   : > { %p5917_p5 = scmp.ne.s32.totalorder %s1215_s15, %s5916_s7  ;;  %p5922_p7 = scmp.lt.s32.totalorder %s6586_s8, %s5916_s7 }
 0x4d9   : > { %p5923_p8 = por %p5922_p7, %p5921_p6 }
 0x4db   : > { %p5924_p9 = pnand %p5923_p8, %p5917_p5 }
 0x4dd   : > { %5927 = shalt.err (!%p5924_p9)  }
 0x4de   : > { %1217 = dma.hbm_to_vmem [thread:$0]  %s1204_s14, 16, %s1215_s15, [#allocation3 + $0x5] }
 0x4df   : > { %s1226_s2 = sld [smem:[#allocation5 + %s1225_s9]]  ;;  %s1239_s29 = sshll.u32 %s3911_s17, 4  ;;  %s1240_s29 = int_to_ptr.vmem [resolvable:$true] %s1239_s29 }
 0x4e0   : > { %s1243_s21 = sadd.s32 7, %s7272_s23  ;;  %s3916_s11 = scalar_lea.vmem %s7277_s6, 647 [#allocation2] }
 0x4e1   : > { %s1244_s30 = sshra.s32 %s1243_s21, 7  ;;  %s1249_s20 = sand.u32 127, %s1243_s21 }
 0x4e2   : > { %s4370_s22 = sshll.u32 %s1244_s30, 7  ;;  %s1264_s15 = sshll.u32 %s3916_s11, 4  ;;  %s1265_s15 = int_to_ptr.vmem [resolvable:$true] %s1264_s15 }
 0x4e3   : > { %s4371_s27 = sadd.s32 640, %s4370_s22 }
 0x4e4   : > { %s1250_s4 = sadd.s32 %s4371_s27, %s1249_s20 }
 0x4e5   : > { %s4221_s25 = sshll.u32 %s1226_s2, 4  ;;  %s1251_s13 = sld [smem:[#allocation5 + %s1250_s4]] }
 0x4e6   : > { %s1229_s12 = scalar_lea.hbm %s8033_s1, %s4221_s25 }
 0x4e7   : > { %s5928_s16 = scalar_lea.hbm %s1229_s12, 16  ;;  %p5931_p11 = scmp.lt.u32.totalorder %s1229_s12, %s8033_s1 }
 0x4e8   : > { %p5929_p10 = scmp.ne.s32.totalorder %s1229_s12, %s5928_s16  ;;  %p5932_p12 = scmp.lt.u32.totalorder %s6575_s26, %s5928_s16 }
 0x4e9   : > { %p5934_p0 = scmp.lt.u32.totalorder %s5928_s16, %s1229_s12 }
 0x4ea   : > { %p5933_p13 = por %p5932_p12, %p5931_p11 }
 0x4ec   : > { %p5935_p1 = por %p5934_p0, %p5933_p13 }
 0x4ee   : > { %p5936_p2 = pnand %p5935_p1, %p5929_p10 }
 0x4f0   : > { %5939 = shalt.err (!%p5936_p2)  }
 0x4f1   : > { %s5940_s23 = scalar_lea.vmem %s1240_s29, 16  ;;  %p5945_p4 = scmp.lt.s32.totalorder %s1240_s29, %s6583_s5 }
 0x4f2   : > { %p5941_p3 = scmp.ne.s32.totalorder %s1240_s29, %s5940_s23  ;;  %p5946_p5 = scmp.lt.s32.totalorder %s6586_s8, %s5940_s23 }
 0x4f4   : > { %p5947_p6 = por %p5946_p5, %p5945_p4 }
 0x4f6   : > { %p5948_p7 = pnand %p5947_p6, %p5941_p3 }
 0x4f8   : > { %5951 = shalt.err (!%p5948_p7)  }
 0x4f9   : > { %1242 = dma.hbm_to_vmem [thread:$0]  %s1229_s12, 16, %s1240_s29, [#allocation3 + $0x5] }
 0x4fa   : > { %s4224_s6 = sshll.u32 %s1251_s13, 4 }
 0x4fb   : > { %s1254_s19 = scalar_lea.hbm %s8033_s1, %s4224_s6 }
 0x4fc   : > { %s5952_s18 = scalar_lea.hbm %s1254_s19, 16  ;;  %p5955_p9 = scmp.lt.u32.totalorder %s1254_s19, %s8033_s1 }
 0x4fd   : > { %p5953_p8 = scmp.ne.s32.totalorder %s1254_s19, %s5952_s18  ;;  %p5956_p10 = scmp.lt.u32.totalorder %s6575_s26, %s5952_s18 }
 0x4fe   : > { %p5958_p12 = scmp.lt.u32.totalorder %s5952_s18, %s1254_s19 }
 0x4ff   : > { %p5957_p11 = por %p5956_p10, %p5955_p9 }
 0x501   : > { %p5959_p13 = por %p5958_p12, %p5957_p11 }
 0x503   : > { %p5960_p0 = pnand %p5959_p13, %p5953_p8 }
 0x505   : > { %5963 = shalt.err (!%p5960_p0)  }
 0x506   : > { %s5964_s29 = scalar_lea.vmem %s1265_s15, 16  ;;  %p5969_p2 = scmp.lt.s32.totalorder %s1265_s15, %s6583_s5 }
 0x507   : > { %p5965_p1 = scmp.ne.s32.totalorder %s1265_s15, %s5964_s29  ;;  %p5970_p3 = scmp.lt.s32.totalorder %s6586_s8, %s5964_s29 }
 0x509   : > { %p5971_p4 = por %p5970_p3, %p5969_p2 }
 0x50b   : > { %p5972_p5 = pnand %p5971_p4, %p5965_p1 }
 0x50d   : > { %5975 = shalt.err (!%p5972_p5)  }
 0x50e   : > { %1267 = dma.hbm_to_vmem [thread:$0]  %s1254_s19, 16, %s1265_s15, [#allocation3 + $0x5] }
 0x50f   : > { %s1066_s24 = sadd.s32 1, %s6466_s24  }
 0x510   : > { %p1063_p6 = scmp.ge.s32.totalorder %s1066_s24, 16  }
 0x511   :  { %s7408_s21 = smov (%p1063_p6), 0  }
 0x512   :  { %1065 = sbr.rel (!%p1063_p6) target bundleno = 1092 (0x444), region = 607 }
 0x519 LB: > { %s7414_s30 = sshll.u32 %s6470_s21, 3  ;;  %s6470_s21 = sphi %s7408_s21, %s1274_s21  }
 0x51a   : > { %s1277_s20 = sshra.s32 %s7414_s30, 7  ;;  %s1282_s22 = sand.u32 127, %s7414_s30 }
 0x51b   : > { %s4372_s27 = sshll.u32 %s1277_s20, 7  ;;  %s7419_s24 = scalar_lea.vmem [#allocation2], %s7414_s30 }
 0x51c   : > { %s4373_s11 = sadd.s32 768, %s4372_s27  ;;  %s3921_s4 = scalar_lea.vmem %s7419_s24, 768 [#allocation2] }
 0x51d   : > { %s1283_s25 = sadd.s32 %s4373_s11, %s1282_s22  ;;  %s1297_s13 = sshll.u32 %s3921_s4, 4  ;;  %s7422_s13 = int_to_ptr.vmem [resolvable:$true] %s1297_s13 }
 0x51e   : > { %s1284_s28 = sld [smem:[#allocation5 + %s1283_s25]]  ;;  %s1301_s10 = sadd.s32 1, %s7414_s30 }
 0x51f   : > { %s3926_s12 = scalar_lea.vmem %s7419_s24, 769 [#allocation2]  ;;  %s1302_s15 = sshra.s32 %s1301_s10, 7 }
 0x520   : > { %s1307_s16 = sand.u32 127, %s1301_s10  ;;  %s4374_s14 = sshll.u32 %s1302_s15, 7 }
 0x521   : > { %s1322_s17 = sshll.u32 %s3926_s12, 4  ;;  %s4375_s23 = sadd.s32 768, %s4374_s14  ;;  %s7426_s17 = int_to_ptr.vmem [resolvable:$true] %s1322_s17 }
 0x522   : > { %s1308_s6 = sadd.s32 %s4375_s23, %s1307_s16  ;;  %s1326_s9 = sadd.s32 2, %s7414_s30 }
 0x523   : > { %s7429_s19 = sld [smem:[#allocation5 + %s1308_s6]]  ;;  %s1327_s29 = sshra.s32 %s1326_s9, 7 }
 0x524   : > { %s4228_s0 = sshll.u32 %s1284_s28, 4 }
 0x525   : > { %s1286_s2 = scalar_lea.hbm %s8033_s1, %s4228_s0 }
 0x526   : > { %s5976_s20 = scalar_lea.hbm %s1286_s2, 16  ;;  %p5979_p8 = scmp.lt.u32.totalorder %s1286_s2, %s8033_s1 }
 0x527   : > { %p5977_p7 = scmp.ne.s32.totalorder %s1286_s2, %s5976_s20  ;;  %p5980_p9 = scmp.lt.u32.totalorder %s6575_s26, %s5976_s20 }
 0x528   : > { %p5982_p11 = scmp.lt.u32.totalorder %s5976_s20, %s1286_s2 }
 0x529   : > { %p5981_p10 = por %p5980_p9, %p5979_p8 }
 0x52b   : > { %p5983_p12 = por %p5982_p11, %p5981_p10 }
 0x52d   : > { %p5984_p13 = pnand %p5983_p12, %p5977_p7 }
 0x52f   : > { %5987 = shalt.err (!%p5984_p13)  }
 0x530   : > { %s5988_s11 = scalar_lea.vmem %s7422_s13, 16  ;;  %p5993_p1 = scmp.lt.s32.totalorder %s7422_s13, %s6583_s5 }
 0x531   : > { %p5989_p0 = scmp.ne.s32.totalorder %s7422_s13, %s5988_s11  ;;  %p5994_p2 = scmp.lt.s32.totalorder %s6586_s8, %s5988_s11 }
 0x533   : > { %p5995_p3 = por %p5994_p2, %p5993_p1 }
 0x535   : > { %p5996_p4 = pnand %p5995_p3, %p5989_p0 }
 0x537   : > { %5999 = shalt.err (!%p5996_p4)  }
 0x538   : > { %1300 = dma.hbm_to_vmem [thread:$0]  %s1286_s2, 16, %s7422_s13, [#allocation3 + $0x6] }
 0x539   : > { %s4376_s4 = sshll.u32 %s1327_s29, 7  ;;  %s1332_s25 = sand.u32 127, %s1326_s9 }
 0x53a   : > { %s4377_s28 = sadd.s32 768, %s4376_s4  ;;  %s3931_s10 = scalar_lea.vmem %s7419_s24, 770 [#allocation2] }
 0x53b   : > { %s1333_s12 = sadd.s32 %s4377_s28, %s1332_s25  ;;  %s1347_s15 = sshll.u32 %s3931_s10, 4  ;;  %s7451_s15 = int_to_ptr.vmem [resolvable:$true] %s1347_s15 }
 0x53c   : > { %s4231_s16 = sshll.u32 %s7429_s19, 4  ;;  %s7446_s14 = sld [smem:[#allocation5 + %s1333_s12]] }
 0x53d   : > { %s1312_s0 = scalar_lea.hbm %s8033_s1, %s4231_s16 }
 0x53e   : > { %s6000_s18 = scalar_lea.hbm %s1312_s0, 16  ;;  %p6003_p6 = scmp.lt.u32.totalorder %s1312_s0, %s8033_s1 }
 0x53f   : > { %p6001_p5 = scmp.ne.s32.totalorder %s1312_s0, %s6000_s18  ;;  %p6004_p7 = scmp.lt.u32.totalorder %s6575_s26, %s6000_s18 }
 0x540   : > { %p6006_p9 = scmp.lt.u32.totalorder %s6000_s18, %s1312_s0 }
 0x541   : > { %p6005_p8 = por %p6004_p7, %p6003_p6 }
 0x543   : > { %p6007_p10 = por %p6006_p9, %p6005_p8 }
 0x545   : > { %p6008_p11 = pnand %p6007_p10, %p6001_p5 }
 0x547   : > { %6011 = shalt.err (!%p6008_p11)  }
 0x548   : > { %s6012_s13 = scalar_lea.vmem %s7426_s17, 16  ;;  %p6017_p13 = scmp.lt.s32.totalorder %s7426_s17, %s6583_s5 }
 0x549   : > { %p6013_p12 = scmp.ne.s32.totalorder %s7426_s17, %s6012_s13  ;;  %p6018_p0 = scmp.lt.s32.totalorder %s6586_s8, %s6012_s13 }
 0x54b   : > { %p6019_p1 = por %p6018_p0, %p6017_p13 }
 0x54d   : > { %p6020_p2 = pnand %p6019_p1, %p6013_p12 }
 0x54f   : > { %6023 = shalt.err (!%p6020_p2)  }
 0x550   : > { %1325 = dma.hbm_to_vmem [thread:$0]  %s1312_s0, 16, %s7426_s17, [#allocation3 + $0x6] }
 0x551   : > { %s1351_s9 = sadd.s32 3, %s7414_s30  ;;  %s3936_s19 = scalar_lea.vmem %s7419_s24, 771 [#allocation2] }
 0x552   : > { %s1352_s2 = sshra.s32 %s1351_s9, 7  ;;  %s1357_s29 = sand.u32 127, %s1351_s9 }
 0x553   : > { %s4378_s22 = sshll.u32 %s1352_s2, 7  ;;  %s1372_s27 = sshll.u32 %s3936_s19, 4  ;;  %s7479_s27 = int_to_ptr.vmem [resolvable:$true] %s1372_s27 }
 0x554   : > { %s4234_s11 = sshll.u32 %s7446_s14, 4  ;;  %s4379_s4 = sadd.s32 768, %s4378_s22 }
 0x555   : > { %s1337_s10 = scalar_lea.hbm %s8033_s1, %s4234_s11  ;;  %s1358_s12 = sadd.s32 %s4379_s4, %s1357_s29 }
 0x556   : > { %s6024_s16 = scalar_lea.hbm %s1337_s10, 16  ;;  %p6027_p4 = scmp.lt.u32.totalorder %s1337_s10, %s8033_s1 }
 0x557   : > { %p6025_p3 = scmp.ne.s32.totalorder %s1337_s10, %s6024_s16  ;;  %p6028_p5 = scmp.lt.u32.totalorder %s6575_s26, %s6024_s16 }
 0x558   : > { %p6030_p7 = scmp.lt.u32.totalorder %s6024_s16, %s1337_s10 }
 0x559   : > { %p6029_p6 = por %p6028_p5, %p6027_p4 }
 0x55b   : > { %p6031_p8 = por %p6030_p7, %p6029_p6 }
 0x55d   : > { %p6032_p9 = pnand %p6031_p8, %p6025_p3 }
 0x55f   : > { %6035 = shalt.err (!%p6032_p9)  }
 0x560   : > { %s6036_s17 = scalar_lea.vmem %s7451_s15, 16  ;;  %p6041_p11 = scmp.lt.s32.totalorder %s7451_s15, %s6583_s5 }
 0x561   : > { %p6037_p10 = scmp.ne.s32.totalorder %s7451_s15, %s6036_s17  ;;  %p6042_p12 = scmp.lt.s32.totalorder %s6586_s8, %s6036_s17 }
 0x563   : > { %p6043_p13 = por %p6042_p12, %p6041_p11 }
 0x565   : > { %p6044_p0 = pnand %p6043_p13, %p6037_p10 }
 0x567   : > { %6047 = shalt.err (!%p6044_p0)  }
 0x568   : > { %1350 = dma.hbm_to_vmem [thread:$0]  %s1337_s10, 16, %s7451_s15, [#allocation3 + $0x6] }
 0x569   : > { %s1359_s14 = sld [smem:[#allocation5 + %s1358_s12]]  ;;  %s1376_s0 = sadd.s32 4, %s7414_s30 }
 0x56a   : > { %s3941_s18 = scalar_lea.vmem %s7419_s24, 772 [#allocation2]  ;;  %s1377_s7 = sshra.s32 %s1376_s0, 7 }
 0x56b   : > { %s1382_s20 = sand.u32 127, %s1376_s0  ;;  %s4380_s13 = sshll.u32 %s1377_s7, 7 }
 0x56c   : > { %s1397_s9 = sshll.u32 %s3941_s18, 4  ;;  %s4381_s19 = sadd.s32 768, %s4380_s13  ;;  %s7483_s9 = int_to_ptr.vmem [resolvable:$true] %s1397_s9 }
 0x56d   : > { %s1383_s2 = sadd.s32 %s4381_s19, %s1382_s20  ;;  %s1401_s29 = sadd.s32 5, %s7414_s30 }
 0x56e   : > { %s7486_s11 = sld [smem:[#allocation5 + %s1383_s2]]  ;;  %s1402_s28 = sshra.s32 %s1401_s29, 7 }
 0x56f   : > { %s4237_s22 = sshll.u32 %s1359_s14, 4 }
 0x570   : > { %s1362_s25 = scalar_lea.hbm %s8033_s1, %s4237_s22 }
 0x571   : > { %s6048_s10 = scalar_lea.hbm %s1362_s25, 16  ;;  %p6051_p2 = scmp.lt.u32.totalorder %s1362_s25, %s8033_s1 }
 0x572   : > { %p6049_p1 = scmp.ne.s32.totalorder %s1362_s25, %s6048_s10  ;;  %p6052_p3 = scmp.lt.u32.totalorder %s6575_s26, %s6048_s10 }
 0x573   : > { %p6054_p5 = scmp.lt.u32.totalorder %s6048_s10, %s1362_s25 }
 0x574   : > { %p6053_p4 = por %p6052_p3, %p6051_p2 }
 0x576   : > { %p6055_p6 = por %p6054_p5, %p6053_p4 }
 0x578   : > { %p6056_p7 = pnand %p6055_p6, %p6049_p1 }
 0x57a   : > { %6059 = shalt.err (!%p6056_p7)  }
 0x57b   : > { %s6060_s23 = scalar_lea.vmem %s7479_s27, 16  ;;  %p6065_p9 = scmp.lt.s32.totalorder %s7479_s27, %s6583_s5 }
 0x57c   : > { %p6061_p8 = scmp.ne.s32.totalorder %s7479_s27, %s6060_s23  ;;  %p6066_p10 = scmp.lt.s32.totalorder %s6586_s8, %s6060_s23 }
 0x57e   : > { %p6067_p11 = por %p6066_p10, %p6065_p9 }
 0x580   : > { %p6068_p12 = pnand %p6067_p11, %p6061_p8 }
 0x582   : > { %6071 = shalt.err (!%p6068_p12)  }
 0x583   : > { %1375 = dma.hbm_to_vmem [thread:$0]  %s1362_s25, 16, %s7479_s27, [#allocation3 + $0x6] }
 0x584   : > { %s4382_s6 = sshll.u32 %s1402_s28, 7  ;;  %s1407_s17 = sand.u32 127, %s1401_s29 }
 0x585   : > { %s4383_s14 = sadd.s32 768, %s4382_s6  ;;  %s3946_s0 = scalar_lea.vmem %s7419_s24, 773 [#allocation2] }
 0x586   : > { %s1408_s18 = sadd.s32 %s4383_s14, %s1407_s17  ;;  %s1422_s7 = sshll.u32 %s3946_s0, 4  ;;  %s1423_s7 = int_to_ptr.vmem [resolvable:$true] %s1422_s7 }
 0x587   : > { %s4240_s20 = sshll.u32 %s7486_s11, 4  ;;  %s1409_s13 = sld [smem:[#allocation5 + %s1408_s18]] }
 0x588   : > { %s1387_s22 = scalar_lea.hbm %s8033_s1, %s4240_s20 }
 0x589   : > { %s6072_s4 = scalar_lea.hbm %s1387_s22, 16  ;;  %p6075_p0 = scmp.lt.u32.totalorder %s1387_s22, %s8033_s1 }
 0x58a   : > { %p6073_p13 = scmp.ne.s32.totalorder %s1387_s22, %s6072_s4  ;;  %p6076_p1 = scmp.lt.u32.totalorder %s6575_s26, %s6072_s4 }
 0x58b   : > { %p6078_p3 = scmp.lt.u32.totalorder %s6072_s4, %s1387_s22 }
 0x58c   : > { %p6077_p2 = por %p6076_p1, %p6075_p0 }
 0x58e   : > { %p6079_p4 = por %p6078_p3, %p6077_p2 }
 0x590   : > { %p6080_p5 = pnand %p6079_p4, %p6073_p13 }
 0x592   : > { %6083 = shalt.err (!%p6080_p5)  }
 0x593   : > { %s6084_s27 = scalar_lea.vmem %s7483_s9, 16  ;;  %p6089_p7 = scmp.lt.s32.totalorder %s7483_s9, %s6583_s5 }
 0x594   : > { %p6085_p6 = scmp.ne.s32.totalorder %s7483_s9, %s6084_s27  ;;  %p6090_p8 = scmp.lt.s32.totalorder %s6586_s8, %s6084_s27 }
 0x596   : > { %p6091_p9 = por %p6090_p8, %p6089_p7 }
 0x598   : > { %p6092_p10 = pnand %p6091_p9, %p6085_p6 }
 0x59a   : > { %6095 = shalt.err (!%p6092_p10)  }
 0x59b   : > { %1400 = dma.hbm_to_vmem [thread:$0]  %s1387_s22, 16, %s7483_s9, [#allocation3 + $0x6] }
 0x59c   : > { %s1426_s29 = sadd.s32 6, %s7414_s30  ;;  %s3951_s12 = scalar_lea.vmem %s7419_s24, 774 [#allocation2] }
 0x59d   : > { %s1427_s11 = sshra.s32 %s1426_s29, 7  ;;  %s1432_s25 = sand.u32 127, %s1426_s29 }
 0x59e   : > { %s4384_s28 = sshll.u32 %s1427_s11, 7  ;;  %s4243_s16 = sshll.u32 %s1409_s13, 4 }
 0x59f   : > { %s4385_s23 = sadd.s32 768, %s4384_s28  ;;  %s1412_s14 = scalar_lea.hbm %s8033_s1, %s4243_s16 }
 0x5a0   : > { %s1433_s0 = sadd.s32 %s4385_s23, %s1432_s25  ;;  %s6096_s18 = scalar_lea.hbm %s1412_s14, 16 }
 0x5a1   : > { %p6097_p11 = scmp.ne.s32.totalorder %s1412_s14, %s6096_s18  ;;  %p6099_p12 = scmp.lt.u32.totalorder %s1412_s14, %s8033_s1 }
 0x5a2   : > { %p6100_p13 = scmp.lt.u32.totalorder %s6575_s26, %s6096_s18  ;;  %p6102_p1 = scmp.lt.u32.totalorder %s6096_s18, %s1412_s14 }
 0x5a4   : > { %p6101_p0 = por %p6100_p13, %p6099_p12 }
 0x5a6   : > { %p6103_p2 = por %p6102_p1, %p6101_p0 }
 0x5a8   : > { %p6104_p3 = pnand %p6103_p2, %p6097_p11 }
 0x5aa   : > { %6107 = shalt.err (!%p6104_p3)  }
 0x5ab   : > { %s6108_s9 = scalar_lea.vmem %s1423_s7, 16  ;;  %p6113_p5 = scmp.lt.s32.totalorder %s1423_s7, %s6583_s5 }
 0x5ac   : > { %p6109_p4 = scmp.ne.s32.totalorder %s1423_s7, %s6108_s9  ;;  %p6114_p6 = scmp.lt.s32.totalorder %s6586_s8, %s6108_s9 }
 0x5ae   : > { %p6115_p7 = por %p6114_p6, %p6113_p5 }
 0x5b0   : > { %p6116_p8 = pnand %p6115_p7, %p6109_p4 }
 0x5b2   : > { %6119 = shalt.err (!%p6116_p8)  }
 0x5b3   : > { %1425 = dma.hbm_to_vmem [thread:$0]  %s1412_s14, 16, %s1423_s7, [#allocation3 + $0x6] }
 0x5b4   : > { %s1434_s13 = sld [smem:[#allocation5 + %s1433_s0]]  ;;  %s1447_s2 = sshll.u32 %s3951_s12, 4  ;;  %s1448_s2 = int_to_ptr.vmem [resolvable:$true] %s1447_s2 }
 0x5b5   : > { %s1451_s22 = sadd.s32 7, %s7414_s30  ;;  %s3956_s29 = scalar_lea.vmem %s7419_s24, 775 [#allocation2] }
 0x5b6   : > { %s1452_s4 = sshra.s32 %s1451_s22, 7  ;;  %s1457_s15 = sand.u32 127, %s1451_s22 }
 0x5b7   : > { %s4386_s10 = sshll.u32 %s1452_s4, 7  ;;  %s1472_s7 = sshll.u32 %s3956_s29, 4  ;;  %s1473_s7 = int_to_ptr.vmem [resolvable:$true] %s1472_s7 }
 0x5b8   : > { %s4387_s27 = sadd.s32 768, %s4386_s10 }
 0x5b9   : > { %s1458_s11 = sadd.s32 %s4387_s27, %s1457_s15 }
 0x5ba   : > { %s4246_s25 = sshll.u32 %s1434_s13, 4  ;;  %s1459_s28 = sld [smem:[#allocation5 + %s1458_s11]] }
 0x5bb   : > { %s1437_s6 = scalar_lea.hbm %s8033_s1, %s4246_s25 }
 0x5bc   : > { %s6120_s17 = scalar_lea.hbm %s1437_s6, 16  ;;  %p6123_p10 = scmp.lt.u32.totalorder %s1437_s6, %s8033_s1 }
 0x5bd   : > { %p6121_p9 = scmp.ne.s32.totalorder %s1437_s6, %s6120_s17  ;;  %p6124_p11 = scmp.lt.u32.totalorder %s6575_s26, %s6120_s17 }
 0x5be   : > { %p6126_p13 = scmp.lt.u32.totalorder %s6120_s17, %s1437_s6 }
 0x5bf   : > { %p6125_p12 = por %p6124_p11, %p6123_p10 }
 0x5c1   : > { %p6127_p0 = por %p6126_p13, %p6125_p12 }
 0x5c3   : > { %p6128_p1 = pnand %p6127_p0, %p6121_p9 }
 0x5c5   : > { %6131 = shalt.err (!%p6128_p1)  }
 0x5c6   : > { %s6132_s30 = scalar_lea.vmem %s1448_s2, 16  ;;  %p6137_p3 = scmp.lt.s32.totalorder %s1448_s2, %s6583_s5 }
 0x5c7   : > { %p6133_p2 = scmp.ne.s32.totalorder %s1448_s2, %s6132_s30  ;;  %p6138_p4 = scmp.lt.s32.totalorder %s6586_s8, %s6132_s30 }
 0x5c9   : > { %p6139_p5 = por %p6138_p4, %p6137_p3 }
 0x5cb   : > { %p6140_p6 = pnand %p6139_p5, %p6133_p2 }
 0x5cd   : > { %6143 = shalt.err (!%p6140_p6)  }
 0x5ce   : > { %1450 = dma.hbm_to_vmem [thread:$0]  %s1437_s6, 16, %s1448_s2, [#allocation3 + $0x6] }
 0x5cf   : > { %s4249_s24 = sshll.u32 %s1459_s28, 4 }
 0x5d0   : > { %s1462_s20 = scalar_lea.hbm %s8033_s1, %s4249_s24 }
 0x5d1   : > { %s6144_s19 = scalar_lea.hbm %s1462_s20, 16  ;;  %p6147_p8 = scmp.lt.u32.totalorder %s1462_s20, %s8033_s1 }
 0x5d2   : > { %p6145_p7 = scmp.ne.s32.totalorder %s1462_s20, %s6144_s19  ;;  %p6148_p9 = scmp.lt.u32.totalorder %s6575_s26, %s6144_s19 }
 0x5d3   : > { %p6150_p11 = scmp.lt.u32.totalorder %s6144_s19, %s1462_s20 }
 0x5d4   : > { %p6149_p10 = por %p6148_p9, %p6147_p8 }
 0x5d6   : > { %p6151_p12 = por %p6150_p11, %p6149_p10 }
 0x5d8   : > { %p6152_p13 = pnand %p6151_p12, %p6145_p7 }
 0x5da   : > { %6155 = shalt.err (!%p6152_p13)  }
 0x5db   : > { %s6156_s2 = scalar_lea.vmem %s1473_s7, 16  ;;  %p6161_p1 = scmp.lt.s32.totalorder %s1473_s7, %s6583_s5 }
 0x5dc   : > { %p6157_p0 = scmp.ne.s32.totalorder %s1473_s7, %s6156_s2  ;;  %p6162_p2 = scmp.lt.s32.totalorder %s6586_s8, %s6156_s2 }
 0x5de   : > { %p6163_p3 = por %p6162_p2, %p6161_p1 }
 0x5e0   : > { %p6164_p4 = pnand %p6163_p3, %p6157_p0 }
 0x5e2   : > { %6167 = shalt.err (!%p6164_p4)  }
 0x5e3   : > { %1475 = dma.hbm_to_vmem [thread:$0]  %s1462_s20, 16, %s1473_s7, [#allocation3 + $0x6] }
 0x5e4   : > { %s1274_s21 = sadd.s32 1, %s6470_s21  }
 0x5e5   : > { %p1271_p5 = scmp.ge.s32.totalorder %s1274_s21, 16  }
 0x5e6   :  { %s7550_s22 = smov (%p1271_p5), 0  }
 0x5e7   :  { %1273 = sbr.rel (!%p1271_p5) target bundleno = 1305 (0x519), region = 618 }
 0x5ee LB: > { %s7556_s4 = sshll.u32 %s6474_s22, 3  ;;  %s6474_s22 = sphi %s7550_s22, %s1482_s22  }
 0x5ef   : > { %s1485_s15 = sshra.s32 %s7556_s4, 7  ;;  %s1490_s10 = sand.u32 127, %s7556_s4 }
 0x5f0   : > { %s4388_s27 = sshll.u32 %s1485_s15, 7  ;;  %s7561_s21 = scalar_lea.vmem [#allocation2], %s7556_s4 }
 0x5f1   : > { %s4389_s29 = sadd.s32 896, %s4388_s27  ;;  %s3961_s11 = scalar_lea.vmem %s7561_s21, 896 [#allocation2] }
 0x5f2   : > { %s1491_s25 = sadd.s32 %s4389_s29, %s1490_s10  ;;  %s1505_s28 = sshll.u32 %s3961_s11, 4  ;;  %s7564_s28 = int_to_ptr.vmem [resolvable:$true] %s1505_s28 }
 0x5f3   : > { %s1492_s16 = sld [smem:[#allocation5 + %s1491_s25]]  ;;  %s1509_s23 = sadd.s32 1, %s7556_s4 }
 0x5f4   : > { %s3966_s6 = scalar_lea.vmem %s7561_s21, 897 [#allocation2]  ;;  %s1510_s7 = sshra.s32 %s1509_s23, 7 }
 0x5f5   : > { %s1515_s17 = sand.u32 127, %s1509_s23  ;;  %s4390_s14 = sshll.u32 %s1510_s7, 7 }
 0x5f6   : > { %s1530_s12 = sshll.u32 %s3966_s6, 4  ;;  %s4391_s30 = sadd.s32 896, %s4390_s14  ;;  %s7568_s12 = int_to_ptr.vmem [resolvable:$true] %s1530_s12 }
 0x5f7   : > { %s1516_s24 = sadd.s32 %s4391_s30, %s1515_s17  ;;  %s1534_s0 = sadd.s32 2, %s7556_s4 }
 0x5f8   : > { %s7571_s20 = sld [smem:[#allocation5 + %s1516_s24]]  ;;  %s1535_s2 = sshra.s32 %s1534_s0, 7 }
 0x5f9   : > { %s4253_s18 = sshll.u32 %s1492_s16, 4 }
 0x5fa   : > { %s1494_s13 = scalar_lea.hbm %s8033_s1, %s4253_s18 }
 0x5fb   : > { %s6168_s15 = scalar_lea.hbm %s1494_s13, 16  ;;  %p6171_p7 = scmp.lt.u32.totalorder %s1494_s13, %s8033_s1 }
 0x5fc   : > { %p6169_p6 = scmp.ne.s32.totalorder %s1494_s13, %s6168_s15  ;;  %p6172_p8 = scmp.lt.u32.totalorder %s6575_s26, %s6168_s15 }
 0x5fd   : > { %p6174_p10 = scmp.lt.u32.totalorder %s6168_s15, %s1494_s13 }
 0x5fe   : > { %p6173_p9 = por %p6172_p8, %p6171_p7 }
 0x600   : > { %p6175_p11 = por %p6174_p10, %p6173_p9 }
 0x602   : > { %p6176_p12 = pnand %p6175_p11, %p6169_p6 }
 0x604   : > { %6179 = shalt.err (!%p6176_p12)  }
 0x605   : > { %s6180_s29 = scalar_lea.vmem %s7564_s28, 16  ;;  %p6185_p0 = scmp.lt.s32.totalorder %s7564_s28, %s6583_s5 }
 0x606   : > { %p6181_p13 = scmp.ne.s32.totalorder %s7564_s28, %s6180_s29  ;;  %p6186_p1 = scmp.lt.s32.totalorder %s6586_s8, %s6180_s29 }
 0x608   : > { %p6187_p2 = por %p6186_p1, %p6185_p0 }
 0x60a   : > { %p6188_p3 = pnand %p6187_p2, %p6181_p13 }
 0x60c   : > { %6191 = shalt.err (!%p6188_p3)  }
 0x60d   : > { %1508 = dma.hbm_to_vmem [thread:$0]  %s1494_s13, 16, %s7564_s28, [#allocation3 + $0x7] }
 0x60e   : > { %s4392_s11 = sshll.u32 %s1535_s2, 7  ;;  %s1540_s25 = sand.u32 127, %s1534_s0 }
 0x60f   : > { %s4393_s16 = sadd.s32 896, %s4392_s11  ;;  %s3971_s23 = scalar_lea.vmem %s7561_s21, 898 [#allocation2] }
 0x610   : > { %s1541_s6 = sadd.s32 %s4393_s16, %s1540_s25  ;;  %s1555_s7 = sshll.u32 %s3971_s23, 4  ;;  %s7593_s7 = int_to_ptr.vmem [resolvable:$true] %s1555_s7 }
 0x611   : > { %s4256_s17 = sshll.u32 %s7571_s20, 4  ;;  %s7588_s14 = sld [smem:[#allocation5 + %s1541_s6]] }
 0x612   : > { %s1520_s18 = scalar_lea.hbm %s8033_s1, %s4256_s17 }
 0x613   : > { %s6192_s19 = scalar_lea.hbm %s1520_s18, 16  ;;  %p6195_p5 = scmp.lt.u32.totalorder %s1520_s18, %s8033_s1 }
 0x614   : > { %p6193_p4 = scmp.ne.s32.totalorder %s1520_s18, %s6192_s19  ;;  %p6196_p6 = scmp.lt.u32.totalorder %s6575_s26, %s6192_s19 }
 0x615   : > { %p6198_p8 = scmp.lt.u32.totalorder %s6192_s19, %s1520_s18 }
 0x616   : > { %p6197_p7 = por %p6196_p6, %p6195_p5 }
 0x618   : > { %p6199_p9 = por %p6198_p8, %p6197_p7 }
 0x61a   : > { %p6200_p10 = pnand %p6199_p9, %p6193_p4 }
 0x61c   : > { %6203 = shalt.err (!%p6200_p10)  }
 0x61d   : > { %s6204_s28 = scalar_lea.vmem %s7568_s12, 16  ;;  %p6209_p12 = scmp.lt.s32.totalorder %s7568_s12, %s6583_s5 }
 0x61e   : > { %p6205_p11 = scmp.ne.s32.totalorder %s7568_s12, %s6204_s28  ;;  %p6210_p13 = scmp.lt.s32.totalorder %s6586_s8, %s6204_s28 }
 0x620   : > { %p6211_p0 = por %p6210_p13, %p6209_p12 }
 0x622   : > { %p6212_p1 = pnand %p6211_p0, %p6205_p11 }
 0x624   : > { %6215 = shalt.err (!%p6212_p1)  }
 0x625   : > { %1533 = dma.hbm_to_vmem [thread:$0]  %s1520_s18, 16, %s7568_s12, [#allocation3 + $0x7] }
 0x626   : > { %s1559_s0 = sadd.s32 3, %s7556_s4  ;;  %s3976_s20 = scalar_lea.vmem %s7561_s21, 899 [#allocation2] }
 0x627   : > { %s1560_s13 = sshra.s32 %s1559_s0, 7  ;;  %s1565_s2 = sand.u32 127, %s1559_s0 }
 0x628   : > { %s4394_s10 = sshll.u32 %s1560_s13, 7  ;;  %s1580_s27 = sshll.u32 %s3976_s20, 4  ;;  %s7621_s27 = int_to_ptr.vmem [resolvable:$true] %s1580_s27 }
 0x629   : > { %s4259_s29 = sshll.u32 %s7588_s14, 4  ;;  %s4395_s11 = sadd.s32 896, %s4394_s10 }
 0x62a   : > { %s1545_s23 = scalar_lea.hbm %s8033_s1, %s4259_s29  ;;  %s1566_s6 = sadd.s32 %s4395_s11, %s1565_s2 }
 0x62b   : > { %s6216_s17 = scalar_lea.hbm %s1545_s23, 16  ;;  %p6219_p3 = scmp.lt.u32.totalorder %s1545_s23, %s8033_s1 }
 0x62c   : > { %p6217_p2 = scmp.ne.s32.totalorder %s1545_s23, %s6216_s17  ;;  %p6220_p4 = scmp.lt.u32.totalorder %s6575_s26, %s6216_s17 }
 0x62d   : > { %p6222_p6 = scmp.lt.u32.totalorder %s6216_s17, %s1545_s23 }
 0x62e   : > { %p6221_p5 = por %p6220_p4, %p6219_p3 }
 0x630   : > { %p6223_p7 = por %p6222_p6, %p6221_p5 }
 0x632   : > { %p6224_p8 = pnand %p6223_p7, %p6217_p2 }
 0x634   : > { %6227 = shalt.err (!%p6224_p8)  }
 0x635   : > { %s6228_s12 = scalar_lea.vmem %s7593_s7, 16  ;;  %p6233_p10 = scmp.lt.s32.totalorder %s7593_s7, %s6583_s5 }
 0x636   : > { %p6229_p9 = scmp.ne.s32.totalorder %s7593_s7, %s6228_s12  ;;  %p6234_p11 = scmp.lt.s32.totalorder %s6586_s8, %s6228_s12 }
 0x638   : > { %p6235_p12 = por %p6234_p11, %p6233_p10 }
 0x63a   : > { %p6236_p13 = pnand %p6235_p12, %p6229_p9 }
 0x63c   : > { %6239 = shalt.err (!%p6236_p13)  }
 0x63d   : > { %1558 = dma.hbm_to_vmem [thread:$0]  %s1545_s23, 16, %s7593_s7, [#allocation3 + $0x7] }
 0x63e   : > { %s1567_s14 = sld [smem:[#allocation5 + %s1566_s6]]  ;;  %s1584_s18 = sadd.s32 4, %s7556_s4 }
 0x63f   : > { %s3981_s19 = scalar_lea.vmem %s7561_s21, 900 [#allocation2]  ;;  %s1585_s9 = sshra.s32 %s1584_s18, 7 }
 0x640   : > { %s1590_s15 = sand.u32 127, %s1584_s18  ;;  %s4396_s28 = sshll.u32 %s1585_s9, 7 }
 0x641   : > { %s1605_s0 = sshll.u32 %s3981_s19, 4  ;;  %s4397_s20 = sadd.s32 896, %s4396_s28  ;;  %s7625_s0 = int_to_ptr.vmem [resolvable:$true] %s1605_s0 }
 0x642   : > { %s1591_s13 = sadd.s32 %s4397_s20, %s1590_s15  ;;  %s1609_s2 = sadd.s32 5, %s7556_s4 }
 0x643   : > { %s7628_s29 = sld [smem:[#allocation5 + %s1591_s13]]  ;;  %s1610_s16 = sshra.s32 %s1609_s2, 7 }
 0x644   : > { %s4262_s10 = sshll.u32 %s1567_s14, 4 }
 0x645   : > { %s1570_s25 = scalar_lea.hbm %s8033_s1, %s4262_s10 }
 0x646   : > { %s6240_s23 = scalar_lea.hbm %s1570_s25, 16  ;;  %p6243_p1 = scmp.lt.u32.totalorder %s1570_s25, %s8033_s1 }
 0x647   : > { %p6241_p0 = scmp.ne.s32.totalorder %s1570_s25, %s6240_s23  ;;  %p6244_p2 = scmp.lt.u32.totalorder %s6575_s26, %s6240_s23 }
 0x648   : > { %p6246_p4 = scmp.lt.u32.totalorder %s6240_s23, %s1570_s25 }
 0x649   : > { %p6245_p3 = por %p6244_p2, %p6243_p1 }
 0x64b   : > { %p6247_p5 = por %p6246_p4, %p6245_p3 }
 0x64d   : > { %p6248_p6 = pnand %p6247_p5, %p6241_p0 }
 0x64f   : > { %6251 = shalt.err (!%p6248_p6)  }
 0x650   : > { %s6252_s30 = scalar_lea.vmem %s7621_s27, 16  ;;  %p6257_p8 = scmp.lt.s32.totalorder %s7621_s27, %s6583_s5 }
 0x651   : > { %p6253_p7 = scmp.ne.s32.totalorder %s7621_s27, %s6252_s30  ;;  %p6258_p9 = scmp.lt.s32.totalorder %s6586_s8, %s6252_s30 }
 0x653   : > { %p6259_p10 = por %p6258_p9, %p6257_p8 }
 0x655   : > { %p6260_p11 = pnand %p6259_p10, %p6253_p7 }
 0x657   : > { %6263 = shalt.err (!%p6260_p11)  }
 0x658   : > { %1583 = dma.hbm_to_vmem [thread:$0]  %s1570_s25, 16, %s7621_s27, [#allocation3 + $0x7] }
 0x659   : > { %s4398_s24 = sshll.u32 %s1610_s16, 7  ;;  %s1615_s12 = sand.u32 127, %s1609_s2 }
 0x65a   : > { %s4399_s14 = sadd.s32 896, %s4398_s24  ;;  %s3986_s18 = scalar_lea.vmem %s7561_s21, 901 [#allocation2] }
 0x65b   : > { %s1616_s19 = sadd.s32 %s4399_s14, %s1615_s12  ;;  %s1630_s9 = sshll.u32 %s3986_s18, 4  ;;  %s1631_s9 = int_to_ptr.vmem [resolvable:$true] %s1630_s9 }
 0x65c   : > { %s4265_s15 = sshll.u32 %s7628_s29, 4  ;;  %s1617_s28 = sld [smem:[#allocation5 + %s1616_s19]] }
 0x65d   : > { %s1595_s10 = scalar_lea.hbm %s8033_s1, %s4265_s15 }
 0x65e   : > { %s6264_s11 = scalar_lea.hbm %s1595_s10, 16  ;;  %p6267_p13 = scmp.lt.u32.totalorder %s1595_s10, %s8033_s1 }
 0x65f   : > { %p6265_p12 = scmp.ne.s32.totalorder %s1595_s10, %s6264_s11  ;;  %p6268_p0 = scmp.lt.u32.totalorder %s6575_s26, %s6264_s11 }
 0x660   : > { %p6270_p2 = scmp.lt.u32.totalorder %s6264_s11, %s1595_s10 }
 0x661   : > { %p6269_p1 = por %p6268_p0, %p6267_p13 }
 0x663   : > { %p6271_p3 = por %p6270_p2, %p6269_p1 }
 0x665   : > { %p6272_p4 = pnand %p6271_p3, %p6265_p12 }
 0x667   : > { %6275 = shalt.err (!%p6272_p4)  }
 0x668   : > { %s6276_s27 = scalar_lea.vmem %s7625_s0, 16  ;;  %p6281_p6 = scmp.lt.s32.totalorder %s7625_s0, %s6583_s5 }
 0x669   : > { %p6277_p5 = scmp.ne.s32.totalorder %s7625_s0, %s6276_s27  ;;  %p6282_p7 = scmp.lt.s32.totalorder %s6586_s8, %s6276_s27 }
 0x66b   : > { %p6283_p8 = por %p6282_p7, %p6281_p6 }
 0x66d   : > { %p6284_p9 = pnand %p6283_p8, %p6277_p5 }
 0x66f   : > { %6287 = shalt.err (!%p6284_p9)  }
 0x670   : > { %1608 = dma.hbm_to_vmem [thread:$0]  %s1595_s10, 16, %s7625_s0, [#allocation3 + $0x7] }
 0x671   : > { %s1634_s2 = sadd.s32 6, %s7556_s4  ;;  %s3991_s6 = scalar_lea.vmem %s7561_s21, 902 [#allocation2] }
 0x672   : > { %s1635_s29 = sshra.s32 %s1634_s2, 7  ;;  %s1640_s25 = sand.u32 127, %s1634_s2 }
 0x673   : > { %s4400_s16 = sshll.u32 %s1635_s29, 7  ;;  %s4268_s17 = sshll.u32 %s1617_s28, 4 }
 0x674   : > { %s4401_s30 = sadd.s32 896, %s4400_s16  ;;  %s1620_s14 = scalar_lea.hbm %s8033_s1, %s4268_s17 }
 0x675   : > { %s1641_s18 = sadd.s32 %s4401_s30, %s1640_s25  ;;  %s6288_s19 = scalar_lea.hbm %s1620_s14, 16 }
 0x676   : > { %p6289_p10 = scmp.ne.s32.totalorder %s1620_s14, %s6288_s19  ;;  %p6291_p11 = scmp.lt.u32.totalorder %s1620_s14, %s8033_s1 }
 0x677   : > { %p6292_p12 = scmp.lt.u32.totalorder %s6575_s26, %s6288_s19  ;;  %p6294_p0 = scmp.lt.u32.totalorder %s6288_s19, %s1620_s14 }
 0x679   : > { %p6293_p13 = por %p6292_p12, %p6291_p11 }
 0x67b   : > { %p6295_p1 = por %p6294_p0, %p6293_p13 }
 0x67d   : > { %p6296_p2 = pnand %p6295_p1, %p6289_p10 }
 0x67f   : > { %6299 = shalt.err (!%p6296_p2)  }
 0x680   : > { %s6300_s0 = scalar_lea.vmem %s1631_s9, 16  ;;  %p6305_p4 = scmp.lt.s32.totalorder %s1631_s9, %s6583_s5 }
 0x681   : > { %p6301_p3 = scmp.ne.s32.totalorder %s1631_s9, %s6300_s0  ;;  %p6306_p5 = scmp.lt.s32.totalorder %s6586_s8, %s6300_s0 }
 0x683   : > { %p6307_p6 = por %p6306_p5, %p6305_p4 }
 0x685   : > { %p6308_p7 = pnand %p6307_p6, %p6301_p3 }
 0x687   : > { %6311 = shalt.err (!%p6308_p7)  }
 0x688   : > { %1633 = dma.hbm_to_vmem [thread:$0]  %s1620_s14, 16, %s1631_s9, [#allocation3 + $0x7] }
 0x689   : > { %s1642_s28 = sld [smem:[#allocation5 + %s1641_s18]]  ;;  %s1655_s13 = sshll.u32 %s3991_s6, 4  ;;  %s1656_s13 = int_to_ptr.vmem [resolvable:$true] %s1655_s13 }
 0x68a   : > { %s1659_s10 = sadd.s32 7, %s7556_s4  ;;  %s3996_s2 = scalar_lea.vmem %s7561_s21, 903 [#allocation2] }
 0x68b   : > { %s1660_s11 = sshra.s32 %s1659_s10, 7  ;;  %s1665_s7 = sand.u32 127, %s1659_s10 }
 0x68c   : > { %s4402_s23 = sshll.u32 %s1660_s11, 7  ;;  %s1680_s9 = sshll.u32 %s3996_s2, 4  ;;  %s1681_s9 = int_to_ptr.vmem [resolvable:$true] %s1680_s9 }
 0x68d   : > { %s4403_s27 = sadd.s32 896, %s4402_s23 }
 0x68e   : > { %s1666_s29 = sadd.s32 %s4403_s27, %s1665_s7 }
 0x68f   : > { %s4271_s25 = sshll.u32 %s1642_s28, 4  ;;  %s1667_s16 = sld [smem:[#allocation5 + %s1666_s29]] }
 0x690   : > { %s1645_s24 = scalar_lea.hbm %s8033_s1, %s4271_s25 }
 0x691   : > { %s6312_s12 = scalar_lea.hbm %s1645_s24, 16  ;;  %p6315_p9 = scmp.lt.u32.totalorder %s1645_s24, %s8033_s1 }
 0x692   : > { %p6313_p8 = scmp.ne.s32.totalorder %s1645_s24, %s6312_s12  ;;  %p6316_p10 = scmp.lt.u32.totalorder %s6575_s26, %s6312_s12 }
 0x693   : > { %p6318_p12 = scmp.lt.u32.totalorder %s6312_s12, %s1645_s24 }
 0x694   : > { %p6317_p11 = por %p6316_p10, %p6315_p9 }
 0x696   : > { %p6319_p13 = por %p6318_p12, %p6317_p11 }
 0x698   : > { %p6320_p0 = pnand %p6319_p13, %p6313_p8 }
 0x69a   : > { %6323 = shalt.err (!%p6320_p0)  }
 0x69b   : > { %s6324_s4 = scalar_lea.vmem %s1656_s13, 16  ;;  %p6329_p2 = scmp.lt.s32.totalorder %s1656_s13, %s6583_s5 }
 0x69c   : > { %p6325_p1 = scmp.ne.s32.totalorder %s1656_s13, %s6324_s4  ;;  %p6330_p3 = scmp.lt.s32.totalorder %s6586_s8, %s6324_s4 }
 0x69e   : > { %p6331_p4 = por %p6330_p3, %p6329_p2 }
 0x6a0   : > { %p6332_p5 = pnand %p6331_p4, %p6325_p1 }
 0x6a2   : > { %6335 = shalt.err (!%p6332_p5)  }
 0x6a3   : > { %1658 = dma.hbm_to_vmem [thread:$0]  %s1645_s24, 16, %s1656_s13, [#allocation3 + $0x7] }
 0x6a4   : > { %s4274_s21 = sshll.u32 %s1667_s16, 4 }
 0x6a5   : > { %s1670_s15 = scalar_lea.hbm %s8033_s1, %s4274_s21 }
 0x6a6   : > { %s6336_s20 = scalar_lea.hbm %s1670_s15, 16  ;;  %p6339_p7 = scmp.lt.u32.totalorder %s1670_s15, %s8033_s1 }
 0x6a7   : > { %p6337_p6 = scmp.ne.s32.totalorder %s1670_s15, %s6336_s20  ;;  %p6340_p8 = scmp.lt.u32.totalorder %s6575_s26, %s6336_s20 }
 0x6a8   : > { %p6342_p10 = scmp.lt.u32.totalorder %s6336_s20, %s1670_s15 }
 0x6a9   : > { %p6341_p9 = por %p6340_p8, %p6339_p7 }
 0x6ab   : > { %p6343_p11 = por %p6342_p10, %p6341_p9 }
 0x6ad   : > { %p6344_p12 = pnand %p6343_p11, %p6337_p6 }
 0x6af   : > { %6347 = shalt.err (!%p6344_p12)  }
 0x6b0   : > { %s6348_s13 = scalar_lea.vmem %s1681_s9, 16  ;;  %p6353_p0 = scmp.lt.s32.totalorder %s1681_s9, %s6583_s5 }
 0x6b1   : > { %p6349_p13 = scmp.ne.s32.totalorder %s1681_s9, %s6348_s13  ;;  %p6354_p1 = scmp.lt.s32.totalorder %s6586_s8, %s6348_s13 }
 0x6b3   : > { %p6355_p2 = por %p6354_p1, %p6353_p0 }
 0x6b5   : > { %p6356_p3 = pnand %p6355_p2, %p6349_p13 }
 0x6b7   : > { %6359 = shalt.err (!%p6356_p3)  }
 0x6b8   : > { %1683 = dma.hbm_to_vmem [thread:$0]  %s1670_s15, 16, %s1681_s9, [#allocation3 + $0x7] }
 0x6b9   : > { %s1482_s22 = sadd.s32 1, %s6474_s22  }
 0x6ba   : > { %p1479_p4 = scmp.ge.s32.totalorder %s1482_s22, 16  }
 0x6bb   :  { %s6476_s10 = smov (%p1479_p4), 0  }
 0x6bc   :  { %1481 = sbr.rel (!%p1479_p4) target bundleno = 1518 (0x5ee), region = 629 }
 0x6c3 LB: > { %6428 = dma.done.wait [#allocation3], 128  ;;  %s6478_s10 = sphi %s6476_s10, %s1689_s10  }
 0x6c4   : > { %6429 = vsyncadd [#allocation3], 4294967168  ;;  %s1689_s10 = sadd.s32 1, %s6478_s10  }
 0x6c5   : > { %p1686_p5 = scmp.ge.s32.totalorder %s1689_s10, 16  }
 0x6c6   :  { %v1706_v0 = vld [vmem:[#allocation2] sm:$0xff] (%p1686_p5)  ;;  %v1708_v2 = vld [vmem:[#allocation2 + $0x10] sm:$0xff] (%p1686_p5)  ;;  %v1707_v5 = vld [vmem:[#allocation2 + $0x8] sm:$0xff] (%p1686_p5)  ;;  %v1839_v39 = vlaneseq (%p1686_p5)  ;;  %vm1850_vm0 = vcmask (%p1686_p5), 130112   ;;  %vm1857_vm1 = vcmask (%p1686_p5), 195712   ;;  %vm1864_vm2 = vcmask (%p1686_p5), 261312  }
 0x6c7   :  { %1688 = sbr.rel (!%p1686_p5) target bundleno = 1731 (0x6c3), region = 640  ;;  %v4276_v1 = vld [vmem:[#allocation6] ss:$0 sm:$0xff] (%p1686_p5)  ;;  %v1709_v6 = vld [vmem:[#allocation2 + $0x18] sm:$0xff] (%p1686_p5)  ;;  %v1711_v10 = vld [vmem:[#allocation2 + $0x28] sm:$0xff] (%p1686_p5)  ;;  %vm1871_vm3 = vcmask (%p1686_p5), 326912  }
 0x6c8   :  { %v1727_v3 = vmul.f32 (%p1686_p5), %v4276_v1, %v1706_v0  ;;  %v1729_v4 = vmul.f32 (%p1686_p5), %v4276_v1, %v1708_v2  ;;  %v1728_v7 = vmul.f32 (%p1686_p5), %v4276_v1, %v1707_v5  ;;  %v1730_v8 = vmul.f32 (%p1686_p5), %v4276_v1, %v1709_v6  ;;  %v1710_v9 = vld [vmem:[#allocation2 + $0x20] sm:$0xff] (%p1686_p5)  ;;  %v1712_v13 = vld [vmem:[#allocation2 + $0x30] sm:$0xff] (%p1686_p5)  ;;  %v1713_v14 = vld [vmem:[#allocation2 + $0x38] sm:$0xff] (%p1686_p5)  ;;  %s6480_s5 = smov (%p1686_p5), 0  }
 0x6c9   :  { %v1731_v11 = vmul.f32 (%p1686_p5), %v4276_v1, %v1710_v9  ;;  %v1732_v12 = vmul.f32 (%p1686_p5), %v4276_v1, %v1711_v10  ;;  %v1733_v15 = vmul.f32 (%p1686_p5), %v4276_v1, %v1712_v13  ;;  %v1734_v16 = vmul.f32 (%p1686_p5), %v4276_v1, %v1713_v14  ;;  %v1714_v17 = vld [vmem:[#allocation2 + $0x40] sm:$0xff] (%p1686_p5)  ;;  %v1715_v18 = vld [vmem:[#allocation2 + $0x48] sm:$0xff] (%p1686_p5)  ;;  %v1716_v21 = vld [vmem:[#allocation2 + $0x50] sm:$0xff] (%p1686_p5) }
 0x6ca   :  { %1743 = vadd.xlane.f32.xlu0 (%p1686_p5), %v1727_v3  ;;  %1747 = vadd.xlane.f32.xlu1 (%p1686_p5), %v1729_v4  ;;  %v1735_v19 = vmul.f32 (%p1686_p5), %v4276_v1, %v1714_v17  ;;  %v1736_v20 = vmul.f32 (%p1686_p5), %v4276_v1, %v1715_v18  ;;  %v1717_v22 = vld [vmem:[#allocation2 + $0x58] sm:$0xff] (%p1686_p5)  ;;  %v1737_v23 = vmul.f32 (%p1686_p5), %v4276_v1, %v1716_v21  ;;  %v1718_v25 = vld [vmem:[#allocation2 + $0x60] sm:$0xff] (%p1686_p5)  ;;  %v1719_v26 = vld [vmem:[#allocation2 + $0x68] sm:$0xff] (%p1686_p5)  ;;  %v7692_v46 = vand.u32 (%p1686_p5), 127, %v1839_v39 }
 0x6cb   :  { %v1738_v24 = vmul.f32 (%p1686_p5), %v4276_v1, %v1717_v22  ;;  %v1739_v27 = vmul.f32 (%p1686_p5), %v4276_v1, %v1718_v25  ;;  %v1740_v28 = vmul.f32 (%p1686_p5), %v4276_v1, %v1719_v26  ;;  %v1720_v29 = vld [vmem:[#allocation2 + $0x70] sm:$0xff] (%p1686_p5)  ;;  %v1721_v30 = vld [vmem:[#allocation2 + $0x78] sm:$0xff] (%p1686_p5)  ;;  %v7694_v51 = vshrl.u32 (%p1686_p5), %v1839_v39, 7 }
 0x6cc   :  { %v1741_v31 = vmul.f32 (%p1686_p5), %v4276_v1, %v1720_v29  ;;  %v1742_v32 = vmul.f32 (%p1686_p5), %v4276_v1, %v1721_v30  ;;  %v1852_v54 = vadd.s32 (%p1686_p5), 4294967280, %v7692_v46  ;;  %v1845_v55 = vadd.s32 (%p1686_p5), 4294967288, %v7692_v46 }
 0x6cd   :  { %v1859_v56 = vadd.s32 (%p1686_p5), 4294967272, %v7692_v46  ;;  %v1866_v61 = vadd.s32 (%p1686_p5), 4294967264, %v7692_v46  ;;  %v1873_v62 = vadd.s32 (%p1686_p5), 4294967256, %v7692_v46  ;;  %v7703_v63 = vsub.s32 (%p1686_p5), %v7692_v46, %v7694_v51 }
 0x6ce   :  { %1745 = vadd.xlane.f32.xlu0 %v1728_v7  ;;  %1749 = vadd.xlane.f32.xlu1 %v1730_v8  ;;  %v7706_v3 = vsub.s32 %v1852_v54, %v7694_v51  ;;  %v7709_v4 = vsub.s32 %v1845_v55, %v7694_v51  ;;  %v1880_v14 = vadd.s32 4294967248, %v7692_v46  ;;  %v1887_v21 = vadd.s32 4294967240, %v7692_v46 }
 0x6cf   :  { %v7712_v5 = vsub.s32 %v1859_v56, %v7694_v51  ;;  %vm1878_vm4 = vcmask 392512   ;;  %vm1885_vm5 = vcmask 458112   ;;  %v1908_v55 = vadd.s32 4294967216, %v7692_v46 }
 0x6d0   :  { %v1915_v56 = vadd.s32 4294967208, %v7692_v46  ;;  %vm1892_vm6 = vcmask 523712   ;;  %vm1899_vm7 = vcmask 589312   ;;  %vm1906_vm8 = vcmask 654912  }
 0x6d1   :  { %vm1913_vm9 = vcmask 720512   ;;  %vm1920_vm10 = vcmask 786112   ;;  %vm1927_vm11 = vcmask 851712   ;;  %vm1934_vm12 = vcmask 917312  }
 0x6d2   :  { %1751 = vadd.xlane.f32.xlu0 %v1731_v11  ;;  %1753 = vadd.xlane.f32.xlu1 %v1732_v12  ;;  %v7715_v11 = vsub.s32 %v1866_v61, %v7694_v51  ;;  %v7718_v12 = vsub.s32 %v1873_v62, %v7694_v51  ;;  %vm1941_vm13 = vcmask 982912   ;;  %vm1948_vm14 = vcmask 1048512  }
 0x6d6   :  { %1755 = vadd.xlane.f32.xlu0 %v1733_v15  ;;  %1757 = vadd.xlane.f32.xlu1 %v1734_v16 }
 0x6da   :  { %1759 = vadd.xlane.f32.xlu0 %v1735_v19  ;;  %1761 = vadd.xlane.f32.xlu1 %v1736_v20 }
 0x6de   :  { %1763 = vadd.xlane.f32.xlu0 %v1737_v23  ;;  %1765 = vadd.xlane.f32.xlu1 %v1738_v24 }
 0x6e2   :  { %1767 = vadd.xlane.f32.xlu0 %v1739_v27  ;;  %1769 = vadd.xlane.f32.xlu1 %v1740_v28  ;;  %v1894_v28 = vadd.s32 4294967232, %v7692_v46 }
 0x6e6   :  { %1771 = vadd.xlane.f32.xlu0 %v1741_v31  ;;  %1773 = vadd.xlane.f32.xlu1 %v1742_v32  ;;  %v1901_v31 = vadd.s32 4294967224, %v7692_v46 }
 0x757   :  { %v1744_v33 = vpop.xlane.xlu0 %1743  ;;  %v1748_v34 = vpop.xlane.xlu1 %1747 }
 0x758   :  { %v1775_v35 = vmul.f32 14.285714, %v1744_v33  ;;  %v1777_v36 = vmul.f32 14.285714, %v1748_v34 }
 0x75a   :  { %v1791_v37 = vmul.f32 1.442695, %v1775_v35  ;;  %v1795_v38 = vmul.f32 1.442695, %v1777_v36 }
 0x75b   :  { %v1746_v40 = vpop.xlane.xlu0 %1745  ;;  %v1750_v41 = vpop.xlane.xlu1 %1749 }
 0x75c   :  { %v1776_v42 = vmul.f32 14.285714, %v1746_v40  ;;  %v1778_v43 = vmul.f32 14.285714, %v1750_v41  ;;  %4534 = vpow2.f32 %v1791_v37  ;;  %v7733_v37 = vsub.s32 %v1880_v14, %v7694_v51 }
 0x75d   :  { %4536 = vpow2.f32 %v1795_v38  ;;  %v7736_v38 = vsub.s32 %v1887_v21, %v7694_v51  ;;  %v1936_v21 = vadd.s32 4294967184, %v7692_v46 }
 0x75e   :  { %v1793_v44 = vmul.f32 1.442695, %v1776_v42  ;;  %v1797_v45 = vmul.f32 1.442695, %v1778_v43 }
 0x75f   :  { %v1752_v47 = vpop.xlane.xlu0 %1751  ;;  %v1754_v48 = vpop.xlane.xlu1 %1753 }
 0x760   :  { %4538 = vpow2.f32 %v1793_v44  ;;  %v1779_v49 = vmul.f32 14.285714, %v1752_v47  ;;  %v1780_v50 = vmul.f32 14.285714, %v1754_v48  ;;  %v7741_v47 = vsub.s32 %v1894_v28, %v7694_v51 }
 0x761   :  { %4540 = vpow2.f32 %v1797_v45  ;;  %v7744_v48 = vsub.s32 %v1901_v31, %v7694_v51 }
 0x762   :  { %v1799_v52 = vmul.f32 1.442695, %v1779_v49  ;;  %v1801_v53 = vmul.f32 1.442695, %v1780_v50 }
 0x763   :  { %v1756_v57 = vpop.xlane.xlu0 %1755  ;;  %v1758_v58 = vpop.xlane.xlu1 %1757 }
 0x764   :  { %4542 = vpow2.f32 %v1799_v52  ;;  %v1781_v59 = vmul.f32 14.285714, %v1756_v57  ;;  %v1782_v60 = vmul.f32 14.285714, %v1758_v58 }
 0x765   :  { %4544 = vpow2.f32 %v1801_v53 }
 0x766   :  { %v1803_v0 = vmul.f32 1.442695, %v1781_v59  ;;  %v1805_v1 = vmul.f32 1.442695, %v1782_v60  ;;  %v4535_v2 = vpop.eup %4534 }
 0x767   :  { %v1760_v6 = vpop.xlane.xlu0 %1759  ;;  %v1762_v7 = vpop.xlane.xlu1 %1761  ;;  %v1844_v18 = vrot.slane %v4535_v2, %v7703_v63 }
 0x768   :  { %v4537_v8 = vpop.eup %4536  ;;  %4546 = vpow2.f32 %v1803_v0  ;;  %v1783_v9 = vmul.f32 14.285714, %v1760_v6  ;;  %v1784_v10 = vmul.f32 14.285714, %v1762_v7 }
 0x769   :  { %4548 = vpow2.f32 %v1805_v1  ;;  %v1856_v19 = vrot.slane %v4537_v8, %v7706_v3  ;;  %v7754_v8 = vsub.s32 %v1908_v55, %v7694_v51 }
 0x76a   :  { %v4539_v13 = vpop.eup %4538  ;;  %v1807_v15 = vmul.f32 1.442695, %v1783_v9  ;;  %v1809_v16 = vmul.f32 1.442695, %v1784_v10  ;;  %v7757_v9 = vsub.s32 %v1915_v56, %v7694_v51  ;;  %v1922_v10 = vadd.s32 4294967200, %v7692_v46 }
 0x76b   :  { %v4541_v17 = vpop.eup %4540  ;;  %v1849_v20 = vrot.slane %v4539_v13, %v7709_v4  ;;  %v1764_v22 = vpop.xlane.xlu0 %1763 }
 0x76c   :  { %v1766_v23 = vpop.xlane.xlu1 %1765  ;;  %v1863_v24 = vrot.slane %v4541_v17, %v7712_v5  ;;  %4550 = vpow2.f32 %v1807_v15  ;;  %v1785_v25 = vmul.f32 14.285714, %v1764_v22  ;;  %v1929_v15 = vadd.s32 4294967192, %v7692_v46 }
 0x76d   :  { %v1786_v26 = vmul.f32 14.285714, %v1766_v23  ;;  %v1851_v27 = vsel %vm1850_vm0, %v1849_v20, %v1844_v18  ;;  %4552 = vpow2.f32 %v1809_v16  ;;  %v7766_v20 = vsub.s32 %v1922_v10, %v7694_v51 }
 0x76e   :  { %v4543_v29 = vpop.eup %4542  ;;  %v1858_v30 = vsel %vm1857_vm1, %v1856_v19, %v1851_v27  ;;  %v1811_v32 = vmul.f32 1.442695, %v1785_v25  ;;  %v1943_v25 = vadd.s32 4294967176, %v7692_v46 }
 0x76f   :  { %v1813_v33 = vmul.f32 1.442695, %v1786_v26  ;;  %v4545_v34 = vpop.eup %4544  ;;  %v1865_v35 = vsel %vm1864_vm2, %v1863_v24, %v1858_v30  ;;  %v1870_v36 = vrot.slane %v4543_v29, %v7715_v11  ;;  %v1768_v39 = vpop.xlane.xlu0 %1767  ;;  %v7772_v24 = vsub.s32 %v1929_v15, %v7694_v51 }
 0x770   :  { %v1770_v40 = vpop.xlane.xlu1 %1769  ;;  %v1877_v41 = vrot.slane %v4545_v34, %v7718_v12  ;;  %4554 = vpow2.f32 %v1811_v32  ;;  %v1787_v42 = vmul.f32 14.285714, %v1768_v39  ;;  %v7778_v30 = vsub.s32 %v1936_v21, %v7694_v51 }
 0x771   :  { %v1788_v43 = vmul.f32 14.285714, %v1770_v40  ;;  %v1872_v44 = vsel %vm1871_vm3, %v1870_v36, %v1865_v35  ;;  %4556 = vpow2.f32 %v1813_v33  ;;  %v7783_v33 = vsub.s32 %v1943_v25, %v7694_v51 }
 0x772   :  { %v4547_v45 = vpop.eup %4546  ;;  %v1815_v49 = vmul.f32 1.442695, %v1787_v42  ;;  %v1879_v53 = vsel %vm1878_vm4, %v1877_v41, %v1872_v44 }
 0x773   :  { %v1817_v50 = vmul.f32 1.442695, %v1788_v43  ;;  %v4549_v52 = vpop.eup %4548  ;;  %v1884_v54 = vrot.slane %v4547_v45, %v7733_v37  ;;  %v1772_v57 = vpop.xlane.xlu0 %1771 }
 0x774   :  { %v1774_v58 = vpop.xlane.xlu1 %1773  ;;  %v1891_v59 = vrot.slane %v4549_v52, %v7736_v38  ;;  %4558 = vpow2.f32 %v1815_v49  ;;  %v1789_v60 = vmul.f32 14.285714, %v1772_v57 }
 0x775   :  { %v1790_v61 = vmul.f32 14.285714, %v1774_v58  ;;  %v1886_v62 = vsel %vm1885_vm5, %v1884_v54, %v1879_v53  ;;  %4560 = vpow2.f32 %v1817_v50 }
 0x776   :  { %v4551_v0 = vpop.eup %4550  ;;  %v1819_v1 = vmul.f32 1.442695, %v1789_v60  ;;  %v1893_v13 = vsel %vm1892_vm6, %v1891_v59, %v1886_v62 }
 0x777   :  { %v1821_v2 = vmul.f32 1.442695, %v1790_v61  ;;  %v4553_v6 = vpop.eup %4552  ;;  %v1898_v7 = vrot.slane %v4551_v0, %v7741_v47 }
 0x778   :  { %v1905_v14 = vrot.slane %v4553_v6, %v7744_v48  ;;  %4562 = vpow2.f32 %v1819_v1 }
 0x779   :  { %v1900_v16 = vsel %vm1899_vm7, %v1898_v7, %v1893_v13  ;;  %4564 = vpow2.f32 %v1821_v2 }
 0x77a   :  { %v4555_v17 = vpop.eup %4554  ;;  %v1907_v22 = vsel %vm1906_vm8, %v1905_v14, %v1900_v16 }
 0x77b   :  { %v4557_v18 = vpop.eup %4556  ;;  %v1912_v19 = vrot.slane %v4555_v17, %v7754_v8 }
 0x77c   :  { %v1919_v23 = vrot.slane %v4557_v18, %v7757_v9 }
 0x77d   :  { %v1914_v26 = vsel %vm1913_vm9, %v1912_v19, %v1907_v22 }
 0x77e   :  { %v4559_v27 = vpop.eup %4558  ;;  %v1921_v31 = vsel %vm1920_vm10, %v1919_v23, %v1914_v26 }
 0x77f   :  { %v4561_v28 = vpop.eup %4560  ;;  %v1926_v29 = vrot.slane %v4559_v27, %v7766_v20 }
 0x780   :  { %v1933_v32 = vrot.slane %v4561_v28, %v7772_v24 }
 0x781   :  { %v1928_v46 = vsel %vm1927_vm11, %v1926_v29, %v1921_v31 }
 0x782   :  { %v4563_v34 = vpop.eup %4562  ;;  %v1935_v39 = vsel %vm1934_vm12, %v1933_v32, %v1928_v46 }
 0x783   :  { %v4565_v35 = vpop.eup %4564  ;;  %v1940_v36 = vrot.slane %v4563_v34, %v7778_v30 }
 0x784   :  { %v1947_v40 = vrot.slane %v4565_v35, %v7783_v33 }
 0x785   :  { %v1942_v41 = vsel %vm1941_vm13, %v1940_v36, %v1935_v39 }
 0x786   :  { %v1949_v42 = vsel %vm1948_vm14, %v1947_v40, %v1942_v41 }
 0x787   :  { %1951 = vst [vmem:[%s8035_s3] sm:$0x1] %v1949_v42 }
 0x788 LB: > { %6430 = dma.done.wait [#allocation3 + $0x1], 128  ;;  %s6482_s5 = sphi %s6480_s5, %s1957_s5  }
 0x789   : > { %6431 = vsyncadd [#allocation3 + $0x1], 4294967168  ;;  %s1957_s5 = sadd.s32 1, %s6482_s5  }
 0x78a   : > { %p1954_p6 = scmp.ge.s32.totalorder %s1957_s5, 16  }
 0x78b   :  { %v1976_v51 = vld [vmem:[#allocation2 + $0x80] sm:$0xff] (%p1954_p6)  ;;  %v1978_v44 = vld [vmem:[#allocation2 + $0x90] sm:$0xff] (%p1954_p6)  ;;  %v1977_v50 = vld [vmem:[#allocation2 + $0x88] sm:$0xff] (%p1954_p6)  ;;  %s6484_s11 = smov (%p1954_p6), 0  }
 0x78c   :  { %1956 = sbr.rel (!%p1954_p6) target bundleno = 1928 (0x788), region = 651  ;;  %v4277_v43 = vld [vmem:[#allocation6 + $0x1] ss:$0 sm:$0xff] (%p1954_p6)  ;;  %v1979_v52 = vld [vmem:[#allocation2 + $0x98] sm:$0xff] (%p1954_p6)  ;;  %v1981_v56 = vld [vmem:[#allocation2 + $0xa8] sm:$0xff] (%p1954_p6) }
 0x78d   :  { %v1997_v45 = vmul.f32 (%p1954_p6), %v4277_v43, %v1976_v51  ;;  %v1999_v49 = vmul.f32 (%p1954_p6), %v4277_v43, %v1978_v44  ;;  %v1998_v53 = vmul.f32 (%p1954_p6), %v4277_v43, %v1977_v50  ;;  %v2000_v54 = vmul.f32 (%p1954_p6), %v4277_v43, %v1979_v52  ;;  %v1980_v55 = vld [vmem:[#allocation2 + $0xa0] sm:$0xff] (%p1954_p6)  ;;  %v1982_v59 = vld [vmem:[#allocation2 + $0xb0] sm:$0xff] (%p1954_p6)  ;;  %v1983_v60 = vld [vmem:[#allocation2 + $0xb8] sm:$0xff] (%p1954_p6) }
 0x78e   :  { %v2001_v57 = vmul.f32 (%p1954_p6), %v4277_v43, %v1980_v55  ;;  %v2002_v58 = vmul.f32 (%p1954_p6), %v4277_v43, %v1981_v56  ;;  %v2003_v61 = vmul.f32 (%p1954_p6), %v4277_v43, %v1982_v59  ;;  %v2004_v62 = vmul.f32 (%p1954_p6), %v4277_v43, %v1983_v60  ;;  %v1984_v0 = vld [vmem:[#allocation2 + $0xc0] sm:$0xff] (%p1954_p6)  ;;  %v1985_v1 = vld [vmem:[#allocation2 + $0xc8] sm:$0xff] (%p1954_p6)  ;;  %v1986_v7 = vld [vmem:[#allocation2 + $0xd0] sm:$0xff] (%p1954_p6) }
 0x78f   :  { %2013 = vadd.xlane.f32.xlu0 (%p1954_p6), %v1997_v45  ;;  %2017 = vadd.xlane.f32.xlu1 (%p1954_p6), %v1999_v49  ;;  %v2005_v2 = vmul.f32 (%p1954_p6), %v4277_v43, %v1984_v0  ;;  %v2006_v6 = vmul.f32 (%p1954_p6), %v4277_v43, %v1985_v1  ;;  %v1987_v10 = vld [vmem:[#allocation2 + $0xd8] sm:$0xff] (%p1954_p6)  ;;  %v2007_v13 = vmul.f32 (%p1954_p6), %v4277_v43, %v1986_v7  ;;  %v1988_v15 = vld [vmem:[#allocation2 + $0xe0] sm:$0xff] (%p1954_p6)  ;;  %v1989_v16 = vld [vmem:[#allocation2 + $0xe8] sm:$0xff] (%p1954_p6) }
 0x790   :  { %v2008_v14 = vmul.f32 (%p1954_p6), %v4277_v43, %v1987_v10  ;;  %v2009_v17 = vmul.f32 (%p1954_p6), %v4277_v43, %v1988_v15  ;;  %v2010_v18 = vmul.f32 (%p1954_p6), %v4277_v43, %v1989_v16  ;;  %v1990_v19 = vld [vmem:[#allocation2 + $0xf0] sm:$0xff] (%p1954_p6)  ;;  %v1991_v21 = vld [vmem:[#allocation2 + $0xf8] sm:$0xff] (%p1954_p6) }
 0x791   :  { %v2011_v22 = vmul.f32 (%p1954_p6), %v4277_v43, %v1990_v19  ;;  %v2012_v23 = vmul.f32 (%p1954_p6), %v4277_v43, %v1991_v21 }
 0x793   :  { %2015 = vadd.xlane.f32.xlu0 %v1998_v53  ;;  %2019 = vadd.xlane.f32.xlu1 %v2000_v54 }
 0x797   :  { %2021 = vadd.xlane.f32.xlu0 %v2001_v57  ;;  %2023 = vadd.xlane.f32.xlu1 %v2002_v58 }
 0x79b   :  { %2025 = vadd.xlane.f32.xlu0 %v2003_v61  ;;  %2027 = vadd.xlane.f32.xlu1 %v2004_v62 }
 0x79f   :  { %2029 = vadd.xlane.f32.xlu0 %v2005_v2  ;;  %2031 = vadd.xlane.f32.xlu1 %v2006_v6 }
 0x7a3   :  { %2033 = vadd.xlane.f32.xlu0 %v2007_v13  ;;  %2035 = vadd.xlane.f32.xlu1 %v2008_v14 }
 0x7a7   :  { %2037 = vadd.xlane.f32.xlu0 %v2009_v17  ;;  %2039 = vadd.xlane.f32.xlu1 %v2010_v18 }
 0x7ab   :  { %2041 = vadd.xlane.f32.xlu0 %v2011_v22  ;;  %2043 = vadd.xlane.f32.xlu1 %v2012_v23 }
 0x81c   :  { %v2014_v25 = vpop.xlane.xlu0 %2013  ;;  %v2018_v26 = vpop.xlane.xlu1 %2017 }
 0x81d   :  { %v2045_v27 = vmul.f32 14.285714, %v2014_v25  ;;  %v2047_v28 = vmul.f32 14.285714, %v2018_v26 }
 0x81f   :  { %v2061_v29 = vmul.f32 1.442695, %v2045_v27  ;;  %v2065_v31 = vmul.f32 1.442695, %v2047_v28 }
 0x820   :  { %v2016_v32 = vpop.xlane.xlu0 %2015  ;;  %v2020_v46 = vpop.xlane.xlu1 %2019 }
 0x821   :  { %v2046_v34 = vmul.f32 14.285714, %v2016_v32  ;;  %v2048_v35 = vmul.f32 14.285714, %v2020_v46  ;;  %4566 = vpow2.f32 %v2061_v29 }
 0x822   :  { %4568 = vpow2.f32 %v2065_v31 }
 0x823   :  { %v2063_v36 = vmul.f32 1.442695, %v2046_v34  ;;  %v2067_v39 = vmul.f32 1.442695, %v2048_v35 }
 0x824   :  { %v2022_v40 = vpop.xlane.xlu0 %2021  ;;  %v2024_v41 = vpop.xlane.xlu1 %2023 }
 0x825   :  { %4570 = vpow2.f32 %v2063_v36  ;;  %v2049_v42 = vmul.f32 14.285714, %v2022_v40  ;;  %v2050_v51 = vmul.f32 14.285714, %v2024_v41 }
 0x826   :  { %4572 = vpow2.f32 %v2067_v39 }
 0x827   :  { %v2069_v43 = vmul.f32 1.442695, %v2049_v42  ;;  %v2071_v44 = vmul.f32 1.442695, %v2050_v51 }
 0x828   :  { %v2026_v45 = vpop.xlane.xlu0 %2025  ;;  %v2028_v49 = vpop.xlane.xlu1 %2027 }
 0x829   :  { %4574 = vpow2.f32 %v2069_v43  ;;  %v2051_v50 = vmul.f32 14.285714, %v2026_v45  ;;  %v2052_v52 = vmul.f32 14.285714, %v2028_v49 }
 0x82a   :  { %4576 = vpow2.f32 %v2071_v44 }
 0x82b   :  { %v2073_v53 = vmul.f32 1.442695, %v2051_v50  ;;  %v2075_v54 = vmul.f32 1.442695, %v2052_v52  ;;  %v4567_v55 = vpop.eup %4566 }
 0x82c   :  { %v2030_v56 = vpop.xlane.xlu0 %2029  ;;  %v2032_v57 = vpop.xlane.xlu1 %2031  ;;  %v2112_v2 = vrot.slane %v4567_v55, %v7703_v63 }
 0x82d   :  { %v4569_v58 = vpop.eup %4568  ;;  %4578 = vpow2.f32 %v2073_v53  ;;  %v2053_v59 = vmul.f32 14.285714, %v2030_v56  ;;  %v2054_v60 = vmul.f32 14.285714, %v2032_v57 }
 0x82e   :  { %4580 = vpow2.f32 %v2075_v54  ;;  %v2121_v6 = vrot.slane %v4569_v58, %v7706_v3 }
 0x82f   :  { %v4571_v61 = vpop.eup %4570  ;;  %v2077_v62 = vmul.f32 1.442695, %v2053_v59  ;;  %v2079_v0 = vmul.f32 1.442695, %v2054_v60 }
 0x830   :  { %v4573_v1 = vpop.eup %4572  ;;  %v2116_v7 = vrot.slane %v4571_v61, %v7709_v4  ;;  %v2034_v10 = vpop.xlane.xlu0 %2033 }
 0x831   :  { %v2036_v13 = vpop.xlane.xlu1 %2035  ;;  %v2126_v14 = vrot.slane %v4573_v1, %v7712_v5  ;;  %4582 = vpow2.f32 %v2077_v62  ;;  %v2055_v15 = vmul.f32 14.285714, %v2034_v10 }
 0x832   :  { %v2056_v16 = vmul.f32 14.285714, %v2036_v13  ;;  %v2117_v17 = vsel %vm1850_vm0, %v2116_v7, %v2112_v2  ;;  %4584 = vpow2.f32 %v2079_v0 }
 0x833   :  { %v4575_v18 = vpop.eup %4574  ;;  %v2122_v19 = vsel %vm1857_vm1, %v2121_v6, %v2117_v17  ;;  %v2081_v21 = vmul.f32 1.442695, %v2055_v15 }
 0x834   :  { %v2083_v22 = vmul.f32 1.442695, %v2056_v16  ;;  %v4577_v23 = vpop.eup %4576  ;;  %v2127_v25 = vsel %vm1864_vm2, %v2126_v14, %v2122_v19  ;;  %v2131_v26 = vrot.slane %v4575_v18, %v7715_v11  ;;  %v2038_v27 = vpop.xlane.xlu0 %2037 }
 0x835   :  { %v2040_v28 = vpop.xlane.xlu1 %2039  ;;  %v2136_v29 = vrot.slane %v4577_v23, %v7718_v12  ;;  %4586 = vpow2.f32 %v2081_v21  ;;  %v2057_v31 = vmul.f32 14.285714, %v2038_v27 }
 0x836   :  { %v2058_v32 = vmul.f32 14.285714, %v2040_v28  ;;  %v2132_v46 = vsel %vm1871_vm3, %v2131_v26, %v2127_v25  ;;  %4588 = vpow2.f32 %v2083_v22 }
 0x837   :  { %v4579_v34 = vpop.eup %4578  ;;  %v2085_v35 = vmul.f32 1.442695, %v2057_v31  ;;  %v2137_v40 = vsel %vm1878_vm4, %v2136_v29, %v2132_v46 }
 0x838   :  { %v2087_v36 = vmul.f32 1.442695, %v2058_v32  ;;  %v4581_v39 = vpop.eup %4580  ;;  %v2141_v41 = vrot.slane %v4579_v34, %v7733_v37  ;;  %v2042_v42 = vpop.xlane.xlu0 %2041 }
 0x839   :  { %v2044_v51 = vpop.xlane.xlu1 %2043  ;;  %v2146_v43 = vrot.slane %v4581_v39, %v7736_v38  ;;  %4590 = vpow2.f32 %v2085_v35  ;;  %v2059_v44 = vmul.f32 14.285714, %v2042_v42 }
 0x83a   :  { %v2060_v45 = vmul.f32 14.285714, %v2044_v51  ;;  %v2142_v49 = vsel %vm1885_vm5, %v2141_v41, %v2137_v40  ;;  %4592 = vpow2.f32 %v2087_v36 }
 0x83b   :  { %v4583_v50 = vpop.eup %4582  ;;  %v2089_v52 = vmul.f32 1.442695, %v2059_v44  ;;  %v2147_v56 = vsel %vm1892_vm6, %v2146_v43, %v2142_v49 }
 0x83c   :  { %v2091_v53 = vmul.f32 1.442695, %v2060_v45  ;;  %v4585_v54 = vpop.eup %4584  ;;  %v2151_v55 = vrot.slane %v4583_v50, %v7741_v47 }
 0x83d   :  { %v2156_v57 = vrot.slane %v4585_v54, %v7744_v48  ;;  %4594 = vpow2.f32 %v2089_v52 }
 0x83e   :  { %v2152_v58 = vsel %vm1899_vm7, %v2151_v55, %v2147_v56  ;;  %4596 = vpow2.f32 %v2091_v53 }
 0x83f   :  { %v4587_v59 = vpop.eup %4586  ;;  %v2157_v62 = vsel %vm1906_vm8, %v2156_v57, %v2152_v58 }
 0x840   :  { %v4589_v60 = vpop.eup %4588  ;;  %v2161_v61 = vrot.slane %v4587_v59, %v7754_v8 }
 0x841   :  { %v2166_v0 = vrot.slane %v4589_v60, %v7757_v9 }
 0x842   :  { %v2162_v1 = vsel %vm1913_vm9, %v2161_v61, %v2157_v62 }
 0x843   :  { %v4591_v2 = vpop.eup %4590  ;;  %v2167_v10 = vsel %vm1920_vm10, %v2166_v0, %v2162_v1 }
 0x844   :  { %v4593_v6 = vpop.eup %4592  ;;  %v2171_v7 = vrot.slane %v4591_v2, %v7766_v20 }
 0x845   :  { %v2176_v13 = vrot.slane %v4593_v6, %v7772_v24 }
 0x846   :  { %v2172_v14 = vsel %vm1927_vm11, %v2171_v7, %v2167_v10 }
 0x847   :  { %v4595_v15 = vpop.eup %4594  ;;  %v2177_v18 = vsel %vm1934_vm12, %v2176_v13, %v2172_v14 }
 0x848   :  { %v4597_v16 = vpop.eup %4596  ;;  %v2181_v17 = vrot.slane %v4595_v15, %v7778_v30 }
 0x849   :  { %v2186_v19 = vrot.slane %v4597_v16, %v7783_v33 }
 0x84a   :  { %v2182_v21 = vsel %vm1941_vm13, %v2181_v17, %v2177_v18 }
 0x84b   :  { %v2187_v22 = vsel %vm1948_vm14, %v2186_v19, %v2182_v21 }
 0x84c   :  { %2189 = vst [vmem:[%s8035_s3 + $0x1] sm:$0x1] %v2187_v22 }
 0x84d LB: > { %6432 = dma.done.wait [#allocation3 + $0x2], 128  ;;  %s6486_s11 = sphi %s6484_s11, %s2195_s11  }
 0x84e   : > { %6433 = vsyncadd [#allocation3 + $0x2], 4294967168  ;;  %s2195_s11 = sadd.s32 1, %s6486_s11  }
 0x84f   : > { %p2192_p7 = scmp.ge.s32.totalorder %s2195_s11, 16  }
 0x850   :  { %v2214_v23 = vld [vmem:[#allocation2 + $0x100] sm:$0xff] (%p2192_p7)  ;;  %v2216_v26 = vld [vmem:[#allocation2 + $0x110] sm:$0xff] (%p2192_p7)  ;;  %v2215_v29 = vld [vmem:[#allocation2 + $0x108] sm:$0xff] (%p2192_p7)  ;;  %s6488_s27 = smov (%p2192_p7), 0  }
 0x851   :  { %2194 = sbr.rel (!%p2192_p7) target bundleno = 2125 (0x84d), region = 662  ;;  %v4278_v25 = vld [vmem:[#allocation6 + $0x2] ss:$0 sm:$0xff] (%p2192_p7)  ;;  %v2217_v31 = vld [vmem:[#allocation2 + $0x118] sm:$0xff] (%p2192_p7)  ;;  %v2219_v35 = vld [vmem:[#allocation2 + $0x128] sm:$0xff] (%p2192_p7) }
 0x852   :  { %v2235_v27 = vmul.f32 (%p2192_p7), %v4278_v25, %v2214_v23  ;;  %v2237_v28 = vmul.f32 (%p2192_p7), %v4278_v25, %v2216_v26  ;;  %v2236_v32 = vmul.f32 (%p2192_p7), %v4278_v25, %v2215_v29  ;;  %v2238_v46 = vmul.f32 (%p2192_p7), %v4278_v25, %v2217_v31  ;;  %v2218_v34 = vld [vmem:[#allocation2 + $0x120] sm:$0xff] (%p2192_p7)  ;;  %v2220_v40 = vld [vmem:[#allocation2 + $0x130] sm:$0xff] (%p2192_p7)  ;;  %v2221_v41 = vld [vmem:[#allocation2 + $0x138] sm:$0xff] (%p2192_p7) }
 0x853   :  { %v2239_v36 = vmul.f32 (%p2192_p7), %v4278_v25, %v2218_v34  ;;  %v2240_v39 = vmul.f32 (%p2192_p7), %v4278_v25, %v2219_v35  ;;  %v2241_v42 = vmul.f32 (%p2192_p7), %v4278_v25, %v2220_v40  ;;  %v2242_v51 = vmul.f32 (%p2192_p7), %v4278_v25, %v2221_v41  ;;  %v2222_v43 = vld [vmem:[#allocation2 + $0x140] sm:$0xff] (%p2192_p7)  ;;  %v2223_v44 = vld [vmem:[#allocation2 + $0x148] sm:$0xff] (%p2192_p7)  ;;  %v2224_v50 = vld [vmem:[#allocation2 + $0x150] sm:$0xff] (%p2192_p7) }
 0x854   :  { %2251 = vadd.xlane.f32.xlu0 (%p2192_p7), %v2235_v27  ;;  %2255 = vadd.xlane.f32.xlu1 (%p2192_p7), %v2237_v28  ;;  %v2243_v45 = vmul.f32 (%p2192_p7), %v4278_v25, %v2222_v43  ;;  %v2244_v49 = vmul.f32 (%p2192_p7), %v4278_v25, %v2223_v44  ;;  %v2225_v52 = vld [vmem:[#allocation2 + $0x158] sm:$0xff] (%p2192_p7)  ;;  %v2245_v53 = vmul.f32 (%p2192_p7), %v4278_v25, %v2224_v50  ;;  %v2226_v55 = vld [vmem:[#allocation2 + $0x160] sm:$0xff] (%p2192_p7)  ;;  %v2227_v56 = vld [vmem:[#allocation2 + $0x168] sm:$0xff] (%p2192_p7) }
 0x855   :  { %v2246_v54 = vmul.f32 (%p2192_p7), %v4278_v25, %v2225_v52  ;;  %v2247_v57 = vmul.f32 (%p2192_p7), %v4278_v25, %v2226_v55  ;;  %v2248_v58 = vmul.f32 (%p2192_p7), %v4278_v25, %v2227_v56  ;;  %v2228_v59 = vld [vmem:[#allocation2 + $0x170] sm:$0xff] (%p2192_p7)  ;;  %v2229_v60 = vld [vmem:[#allocation2 + $0x178] sm:$0xff] (%p2192_p7) }
 0x856   :  { %v2249_v61 = vmul.f32 (%p2192_p7), %v4278_v25, %v2228_v59  ;;  %v2250_v62 = vmul.f32 (%p2192_p7), %v4278_v25, %v2229_v60 }
 0x858   :  { %2253 = vadd.xlane.f32.xlu0 %v2236_v32  ;;  %2257 = vadd.xlane.f32.xlu1 %v2238_v46 }
 0x85c   :  { %2259 = vadd.xlane.f32.xlu0 %v2239_v36  ;;  %2261 = vadd.xlane.f32.xlu1 %v2240_v39 }
 0x860   :  { %2263 = vadd.xlane.f32.xlu0 %v2241_v42  ;;  %2265 = vadd.xlane.f32.xlu1 %v2242_v51 }
 0x864   :  { %2267 = vadd.xlane.f32.xlu0 %v2243_v45  ;;  %2269 = vadd.xlane.f32.xlu1 %v2244_v49 }
 0x868   :  { %2271 = vadd.xlane.f32.xlu0 %v2245_v53  ;;  %2273 = vadd.xlane.f32.xlu1 %v2246_v54 }
 0x86c   :  { %2275 = vadd.xlane.f32.xlu0 %v2247_v57  ;;  %2277 = vadd.xlane.f32.xlu1 %v2248_v58 }
 0x870   :  { %2279 = vadd.xlane.f32.xlu0 %v2249_v61  ;;  %2281 = vadd.xlane.f32.xlu1 %v2250_v62 }
 0x8e1   :  { %v2252_v0 = vpop.xlane.xlu0 %2251  ;;  %v2256_v1 = vpop.xlane.xlu1 %2255 }
 0x8e2   :  { %v2283_v2 = vmul.f32 14.285714, %v2252_v0  ;;  %v2285_v6 = vmul.f32 14.285714, %v2256_v1 }
 0x8e4   :  { %v2299_v7 = vmul.f32 1.442695, %v2283_v2  ;;  %v2303_v10 = vmul.f32 1.442695, %v2285_v6 }
 0x8e5   :  { %v2254_v13 = vpop.xlane.xlu0 %2253  ;;  %v2258_v14 = vpop.xlane.xlu1 %2257 }
 0x8e6   :  { %v2284_v15 = vmul.f32 14.285714, %v2254_v13  ;;  %v2286_v16 = vmul.f32 14.285714, %v2258_v14  ;;  %4598 = vpow2.f32 %v2299_v7 }
 0x8e7   :  { %4600 = vpow2.f32 %v2303_v10 }
 0x8e8   :  { %v2301_v17 = vmul.f32 1.442695, %v2284_v15  ;;  %v2305_v18 = vmul.f32 1.442695, %v2286_v16 }
 0x8e9   :  { %v2260_v19 = vpop.xlane.xlu0 %2259  ;;  %v2262_v21 = vpop.xlane.xlu1 %2261 }
 0x8ea   :  { %4602 = vpow2.f32 %v2301_v17  ;;  %v2287_v22 = vmul.f32 14.285714, %v2260_v19  ;;  %v2288_v23 = vmul.f32 14.285714, %v2262_v21 }
 0x8eb   :  { %4604 = vpow2.f32 %v2305_v18 }
 0x8ec   :  { %v2307_v25 = vmul.f32 1.442695, %v2287_v22  ;;  %v2309_v26 = vmul.f32 1.442695, %v2288_v23 }
 0x8ed   :  { %v2264_v27 = vpop.xlane.xlu0 %2263  ;;  %v2266_v28 = vpop.xlane.xlu1 %2265 }
 0x8ee   :  { %4606 = vpow2.f32 %v2307_v25  ;;  %v2289_v29 = vmul.f32 14.285714, %v2264_v27  ;;  %v2290_v31 = vmul.f32 14.285714, %v2266_v28 }
 0x8ef   :  { %4608 = vpow2.f32 %v2309_v26 }
 0x8f0   :  { %v2311_v32 = vmul.f32 1.442695, %v2289_v29  ;;  %v2313_v46 = vmul.f32 1.442695, %v2290_v31  ;;  %v4599_v34 = vpop.eup %4598 }
 0x8f1   :  { %v2268_v35 = vpop.xlane.xlu0 %2267  ;;  %v2270_v36 = vpop.xlane.xlu1 %2269  ;;  %v2350_v45 = vrot.slane %v4599_v34, %v7703_v63 }
 0x8f2   :  { %v4601_v39 = vpop.eup %4600  ;;  %4610 = vpow2.f32 %v2311_v32  ;;  %v2291_v40 = vmul.f32 14.285714, %v2268_v35  ;;  %v2292_v41 = vmul.f32 14.285714, %v2270_v36 }
 0x8f3   :  { %4612 = vpow2.f32 %v2313_v46  ;;  %v2359_v49 = vrot.slane %v4601_v39, %v7706_v3 }
 0x8f4   :  { %v4603_v42 = vpop.eup %4602  ;;  %v2315_v51 = vmul.f32 1.442695, %v2291_v40  ;;  %v2317_v43 = vmul.f32 1.442695, %v2292_v41 }
 0x8f5   :  { %v4605_v44 = vpop.eup %4604  ;;  %v2354_v50 = vrot.slane %v4603_v42, %v7709_v4  ;;  %v2272_v52 = vpop.xlane.xlu0 %2271 }
 0x8f6   :  { %v2274_v53 = vpop.xlane.xlu1 %2273  ;;  %v2364_v54 = vrot.slane %v4605_v44, %v7712_v5  ;;  %4614 = vpow2.f32 %v2315_v51  ;;  %v2293_v55 = vmul.f32 14.285714, %v2272_v52 }
 0x8f7   :  { %v2294_v56 = vmul.f32 14.285714, %v2274_v53  ;;  %v2355_v57 = vsel %vm1850_vm0, %v2354_v50, %v2350_v45  ;;  %4616 = vpow2.f32 %v2317_v43 }
 0x8f8   :  { %v4607_v58 = vpop.eup %4606  ;;  %v2360_v59 = vsel %vm1857_vm1, %v2359_v49, %v2355_v57  ;;  %v2319_v60 = vmul.f32 1.442695, %v2293_v55 }
 0x8f9   :  { %v2321_v61 = vmul.f32 1.442695, %v2294_v56  ;;  %v4609_v62 = vpop.eup %4608  ;;  %v2365_v0 = vsel %vm1864_vm2, %v2364_v54, %v2360_v59  ;;  %v2369_v1 = vrot.slane %v4607_v58, %v7715_v11  ;;  %v2276_v2 = vpop.xlane.xlu0 %2275 }
 0x8fa   :  { %v2278_v6 = vpop.xlane.xlu1 %2277  ;;  %v2374_v7 = vrot.slane %v4609_v62, %v7718_v12  ;;  %4618 = vpow2.f32 %v2319_v60  ;;  %v2295_v10 = vmul.f32 14.285714, %v2276_v2 }
 0x8fb   :  { %v2296_v13 = vmul.f32 14.285714, %v2278_v6  ;;  %v2370_v14 = vsel %vm1871_vm3, %v2369_v1, %v2365_v0  ;;  %4620 = vpow2.f32 %v2321_v61 }
 0x8fc   :  { %v4611_v15 = vpop.eup %4610  ;;  %v2323_v16 = vmul.f32 1.442695, %v2295_v10  ;;  %v2375_v19 = vsel %vm1878_vm4, %v2374_v7, %v2370_v14 }
 0x8fd   :  { %v2325_v17 = vmul.f32 1.442695, %v2296_v13  ;;  %v4613_v18 = vpop.eup %4612  ;;  %v2379_v21 = vrot.slane %v4611_v15, %v7733_v37  ;;  %v2280_v22 = vpop.xlane.xlu0 %2279 }
 0x8fe   :  { %v2282_v23 = vpop.xlane.xlu1 %2281  ;;  %v2384_v25 = vrot.slane %v4613_v18, %v7736_v38  ;;  %4622 = vpow2.f32 %v2323_v16  ;;  %v2297_v26 = vmul.f32 14.285714, %v2280_v22 }
 0x8ff   :  { %v2298_v27 = vmul.f32 14.285714, %v2282_v23  ;;  %v2380_v28 = vsel %vm1885_vm5, %v2379_v21, %v2375_v19  ;;  %4624 = vpow2.f32 %v2325_v17 }
 0x900   :  { %v4615_v29 = vpop.eup %4614  ;;  %v2327_v31 = vmul.f32 1.442695, %v2297_v26  ;;  %v2385_v35 = vsel %vm1892_vm6, %v2384_v25, %v2380_v28 }
 0x901   :  { %v2329_v32 = vmul.f32 1.442695, %v2298_v27  ;;  %v4617_v46 = vpop.eup %4616  ;;  %v2389_v34 = vrot.slane %v4615_v29, %v7741_v47 }
 0x902   :  { %v2394_v36 = vrot.slane %v4617_v46, %v7744_v48  ;;  %4626 = vpow2.f32 %v2327_v31 }
 0x903   :  { %v2390_v39 = vsel %vm1899_vm7, %v2389_v34, %v2385_v35  ;;  %4628 = vpow2.f32 %v2329_v32 }
 0x904   :  { %v4619_v40 = vpop.eup %4618  ;;  %v2395_v51 = vsel %vm1906_vm8, %v2394_v36, %v2390_v39 }
 0x905   :  { %v4621_v41 = vpop.eup %4620  ;;  %v2399_v42 = vrot.slane %v4619_v40, %v7754_v8 }
 0x906   :  { %v2404_v43 = vrot.slane %v4621_v41, %v7757_v9 }
 0x907   :  { %v2400_v44 = vsel %vm1913_vm9, %v2399_v42, %v2395_v51 }
 0x908   :  { %v4623_v45 = vpop.eup %4622  ;;  %v2405_v52 = vsel %vm1920_vm10, %v2404_v43, %v2400_v44 }
 0x909   :  { %v4625_v49 = vpop.eup %4624  ;;  %v2409_v50 = vrot.slane %v4623_v45, %v7766_v20 }
 0x90a   :  { %v2414_v53 = vrot.slane %v4625_v49, %v7772_v24 }
 0x90b   :  { %v2410_v54 = vsel %vm1927_vm11, %v2409_v50, %v2405_v52 }
 0x90c   :  { %v4627_v55 = vpop.eup %4626  ;;  %v2415_v58 = vsel %vm1934_vm12, %v2414_v53, %v2410_v54 }
 0x90d   :  { %v4629_v56 = vpop.eup %4628  ;;  %v2419_v57 = vrot.slane %v4627_v55, %v7778_v30 }
 0x90e   :  { %v2424_v59 = vrot.slane %v4629_v56, %v7783_v33 }
 0x90f   :  { %v2420_v60 = vsel %vm1941_vm13, %v2419_v57, %v2415_v58 }
 0x910   :  { %v2425_v61 = vsel %vm1948_vm14, %v2424_v59, %v2420_v60 }
 0x911   :  { %2427 = vst [vmem:[%s8035_s3 + $0x2] sm:$0x1] %v2425_v61 }
 0x912 LB: > { %6434 = dma.done.wait [#allocation3 + $0x3], 128  ;;  %s6490_s27 = sphi %s6488_s27, %s2433_s27  }
 0x913   : > { %6435 = vsyncadd [#allocation3 + $0x3], 4294967168  ;;  %s2433_s27 = sadd.s32 1, %s6490_s27  }
 0x914   : > { %p2430_p8 = scmp.ge.s32.totalorder %s2433_s27, 16  }
 0x915   :  { %v2452_v62 = vld [vmem:[#allocation2 + $0x180] sm:$0xff] (%p2430_p8)  ;;  %v2454_v1 = vld [vmem:[#allocation2 + $0x190] sm:$0xff] (%p2430_p8)  ;;  %v2453_v7 = vld [vmem:[#allocation2 + $0x188] sm:$0xff] (%p2430_p8)  ;;  %s6492_s25 = smov (%p2430_p8), 0  }
 0x916   :  { %2432 = sbr.rel (!%p2430_p8) target bundleno = 2322 (0x912), region = 673  ;;  %v4279_v0 = vld [vmem:[#allocation6 + $0x3] ss:$0 sm:$0xff] (%p2430_p8)  ;;  %v2455_v10 = vld [vmem:[#allocation2 + $0x198] sm:$0xff] (%p2430_p8)  ;;  %v2457_v16 = vld [vmem:[#allocation2 + $0x1a8] sm:$0xff] (%p2430_p8) }
 0x917   :  { %v2473_v2 = vmul.f32 (%p2430_p8), %v4279_v0, %v2452_v62  ;;  %v2475_v6 = vmul.f32 (%p2430_p8), %v4279_v0, %v2454_v1  ;;  %v2474_v13 = vmul.f32 (%p2430_p8), %v4279_v0, %v2453_v7  ;;  %v2476_v14 = vmul.f32 (%p2430_p8), %v4279_v0, %v2455_v10  ;;  %v2456_v15 = vld [vmem:[#allocation2 + $0x1a0] sm:$0xff] (%p2430_p8)  ;;  %v2458_v19 = vld [vmem:[#allocation2 + $0x1b0] sm:$0xff] (%p2430_p8)  ;;  %v2459_v21 = vld [vmem:[#allocation2 + $0x1b8] sm:$0xff] (%p2430_p8) }
 0x918   :  { %v2477_v17 = vmul.f32 (%p2430_p8), %v4279_v0, %v2456_v15  ;;  %v2478_v18 = vmul.f32 (%p2430_p8), %v4279_v0, %v2457_v16  ;;  %v2479_v22 = vmul.f32 (%p2430_p8), %v4279_v0, %v2458_v19  ;;  %v2480_v23 = vmul.f32 (%p2430_p8), %v4279_v0, %v2459_v21  ;;  %v2460_v25 = vld [vmem:[#allocation2 + $0x1c0] sm:$0xff] (%p2430_p8)  ;;  %v2461_v26 = vld [vmem:[#allocation2 + $0x1c8] sm:$0xff] (%p2430_p8)  ;;  %v2462_v29 = vld [vmem:[#allocation2 + $0x1d0] sm:$0xff] (%p2430_p8) }
 0x919   :  { %2489 = vadd.xlane.f32.xlu0 (%p2430_p8), %v2473_v2  ;;  %2493 = vadd.xlane.f32.xlu1 (%p2430_p8), %v2475_v6  ;;  %v2481_v27 = vmul.f32 (%p2430_p8), %v4279_v0, %v2460_v25  ;;  %v2482_v28 = vmul.f32 (%p2430_p8), %v4279_v0, %v2461_v26  ;;  %v2463_v31 = vld [vmem:[#allocation2 + $0x1d8] sm:$0xff] (%p2430_p8)  ;;  %v2483_v32 = vmul.f32 (%p2430_p8), %v4279_v0, %v2462_v29  ;;  %v2464_v34 = vld [vmem:[#allocation2 + $0x1e0] sm:$0xff] (%p2430_p8)  ;;  %v2465_v35 = vld [vmem:[#allocation2 + $0x1e8] sm:$0xff] (%p2430_p8) }
 0x91a   :  { %v2484_v46 = vmul.f32 (%p2430_p8), %v4279_v0, %v2463_v31  ;;  %v2485_v36 = vmul.f32 (%p2430_p8), %v4279_v0, %v2464_v34  ;;  %v2486_v39 = vmul.f32 (%p2430_p8), %v4279_v0, %v2465_v35  ;;  %v2466_v40 = vld [vmem:[#allocation2 + $0x1f0] sm:$0xff] (%p2430_p8)  ;;  %v2467_v41 = vld [vmem:[#allocation2 + $0x1f8] sm:$0xff] (%p2430_p8) }
 0x91b   :  { %v2487_v42 = vmul.f32 (%p2430_p8), %v4279_v0, %v2466_v40  ;;  %v2488_v51 = vmul.f32 (%p2430_p8), %v4279_v0, %v2467_v41 }
 0x91d   :  { %2491 = vadd.xlane.f32.xlu0 %v2474_v13  ;;  %2495 = vadd.xlane.f32.xlu1 %v2476_v14 }
 0x921   :  { %2497 = vadd.xlane.f32.xlu0 %v2477_v17  ;;  %2499 = vadd.xlane.f32.xlu1 %v2478_v18 }
 0x925   :  { %2501 = vadd.xlane.f32.xlu0 %v2479_v22  ;;  %2503 = vadd.xlane.f32.xlu1 %v2480_v23 }
 0x929   :  { %2505 = vadd.xlane.f32.xlu0 %v2481_v27  ;;  %2507 = vadd.xlane.f32.xlu1 %v2482_v28 }
 0x92d   :  { %2509 = vadd.xlane.f32.xlu0 %v2483_v32  ;;  %2511 = vadd.xlane.f32.xlu1 %v2484_v46 }
 0x931   :  { %2513 = vadd.xlane.f32.xlu0 %v2485_v36  ;;  %2515 = vadd.xlane.f32.xlu1 %v2486_v39 }
 0x935   :  { %2517 = vadd.xlane.f32.xlu0 %v2487_v42  ;;  %2519 = vadd.xlane.f32.xlu1 %v2488_v51 }
 0x9a6   :  { %v2490_v43 = vpop.xlane.xlu0 %2489  ;;  %v2494_v44 = vpop.xlane.xlu1 %2493 }
 0x9a7   :  { %v2521_v45 = vmul.f32 14.285714, %v2490_v43  ;;  %v2523_v49 = vmul.f32 14.285714, %v2494_v44 }
 0x9a9   :  { %v2537_v50 = vmul.f32 1.442695, %v2521_v45  ;;  %v2541_v52 = vmul.f32 1.442695, %v2523_v49 }
 0x9aa   :  { %v2492_v53 = vpop.xlane.xlu0 %2491  ;;  %v2496_v54 = vpop.xlane.xlu1 %2495 }
 0x9ab   :  { %v2522_v55 = vmul.f32 14.285714, %v2492_v53  ;;  %v2524_v56 = vmul.f32 14.285714, %v2496_v54  ;;  %4630 = vpow2.f32 %v2537_v50 }
 0x9ac   :  { %4632 = vpow2.f32 %v2541_v52 }
 0x9ad   :  { %v2539_v57 = vmul.f32 1.442695, %v2522_v55  ;;  %v2543_v58 = vmul.f32 1.442695, %v2524_v56 }
 0x9ae   :  { %v2498_v59 = vpop.xlane.xlu0 %2497  ;;  %v2500_v60 = vpop.xlane.xlu1 %2499 }
 0x9af   :  { %4634 = vpow2.f32 %v2539_v57  ;;  %v2525_v61 = vmul.f32 14.285714, %v2498_v59  ;;  %v2526_v62 = vmul.f32 14.285714, %v2500_v60 }
 0x9b0   :  { %4636 = vpow2.f32 %v2543_v58 }
 0x9b1   :  { %v2545_v0 = vmul.f32 1.442695, %v2525_v61  ;;  %v2547_v1 = vmul.f32 1.442695, %v2526_v62 }
 0x9b2   :  { %v2502_v2 = vpop.xlane.xlu0 %2501  ;;  %v2504_v6 = vpop.xlane.xlu1 %2503 }
 0x9b3   :  { %4638 = vpow2.f32 %v2545_v0  ;;  %v2527_v7 = vmul.f32 14.285714, %v2502_v2  ;;  %v2528_v10 = vmul.f32 14.285714, %v2504_v6 }
 0x9b4   :  { %4640 = vpow2.f32 %v2547_v1 }
 0x9b5   :  { %v2549_v13 = vmul.f32 1.442695, %v2527_v7  ;;  %v2551_v14 = vmul.f32 1.442695, %v2528_v10  ;;  %v4631_v15 = vpop.eup %4630 }
 0x9b6   :  { %v2506_v16 = vpop.xlane.xlu0 %2505  ;;  %v2508_v17 = vpop.xlane.xlu1 %2507  ;;  %v2588_v27 = vrot.slane %v4631_v15, %v7703_v63 }
 0x9b7   :  { %v4633_v18 = vpop.eup %4632  ;;  %4642 = vpow2.f32 %v2549_v13  ;;  %v2529_v19 = vmul.f32 14.285714, %v2506_v16  ;;  %v2530_v21 = vmul.f32 14.285714, %v2508_v17 }
 0x9b8   :  { %4644 = vpow2.f32 %v2551_v14  ;;  %v2597_v28 = vrot.slane %v4633_v18, %v7706_v3 }
 0x9b9   :  { %v4635_v22 = vpop.eup %4634  ;;  %v2553_v23 = vmul.f32 1.442695, %v2529_v19  ;;  %v2555_v25 = vmul.f32 1.442695, %v2530_v21 }
 0x9ba   :  { %v4637_v26 = vpop.eup %4636  ;;  %v2592_v29 = vrot.slane %v4635_v22, %v7709_v4  ;;  %v2510_v31 = vpop.xlane.xlu0 %2509 }
 0x9bb   :  { %v2512_v32 = vpop.xlane.xlu1 %2511  ;;  %v2602_v46 = vrot.slane %v4637_v26, %v7712_v5  ;;  %4646 = vpow2.f32 %v2553_v23  ;;  %v2531_v34 = vmul.f32 14.285714, %v2510_v31 }
 0x9bc   :  { %v2532_v35 = vmul.f32 14.285714, %v2512_v32  ;;  %v2593_v36 = vsel %vm1850_vm0, %v2592_v29, %v2588_v27  ;;  %4648 = vpow2.f32 %v2555_v25 }
 0x9bd   :  { %v4639_v39 = vpop.eup %4638  ;;  %v2598_v40 = vsel %vm1857_vm1, %v2597_v28, %v2593_v36  ;;  %v2557_v41 = vmul.f32 1.442695, %v2531_v34 }
 0x9be   :  { %v2559_v42 = vmul.f32 1.442695, %v2532_v35  ;;  %v4641_v51 = vpop.eup %4640  ;;  %v2603_v43 = vsel %vm1864_vm2, %v2602_v46, %v2598_v40  ;;  %v2607_v44 = vrot.slane %v4639_v39, %v7715_v11  ;;  %v2514_v45 = vpop.xlane.xlu0 %2513 }
 0x9bf   :  { %v2516_v49 = vpop.xlane.xlu1 %2515  ;;  %v2612_v50 = vrot.slane %v4641_v51, %v7718_v12  ;;  %4650 = vpow2.f32 %v2557_v41  ;;  %v2533_v52 = vmul.f32 14.285714, %v2514_v45 }
 0x9c0   :  { %v2534_v53 = vmul.f32 14.285714, %v2516_v49  ;;  %v2608_v54 = vsel %vm1871_vm3, %v2607_v44, %v2603_v43  ;;  %4652 = vpow2.f32 %v2559_v42 }
 0x9c1   :  { %v4643_v55 = vpop.eup %4642  ;;  %v2561_v56 = vmul.f32 1.442695, %v2533_v52  ;;  %v2613_v59 = vsel %vm1878_vm4, %v2612_v50, %v2608_v54 }
 0x9c2   :  { %v2563_v57 = vmul.f32 1.442695, %v2534_v53  ;;  %v4645_v58 = vpop.eup %4644  ;;  %v2617_v60 = vrot.slane %v4643_v55, %v7733_v37  ;;  %v2518_v61 = vpop.xlane.xlu0 %2517 }
 0x9c3   :  { %v2520_v62 = vpop.xlane.xlu1 %2519  ;;  %v2622_v0 = vrot.slane %v4645_v58, %v7736_v38  ;;  %4654 = vpow2.f32 %v2561_v56  ;;  %v2535_v1 = vmul.f32 14.285714, %v2518_v61 }
 0x9c4   :  { %v2536_v2 = vmul.f32 14.285714, %v2520_v62  ;;  %v2618_v6 = vsel %vm1885_vm5, %v2617_v60, %v2613_v59  ;;  %4656 = vpow2.f32 %v2563_v57 }
 0x9c5   :  { %v4647_v7 = vpop.eup %4646  ;;  %v2565_v10 = vmul.f32 1.442695, %v2535_v1  ;;  %v2623_v16 = vsel %vm1892_vm6, %v2622_v0, %v2618_v6 }
 0x9c6   :  { %v2567_v13 = vmul.f32 1.442695, %v2536_v2  ;;  %v4649_v14 = vpop.eup %4648  ;;  %v2627_v15 = vrot.slane %v4647_v7, %v7741_v47 }
 0x9c7   :  { %v2632_v17 = vrot.slane %v4649_v14, %v7744_v48  ;;  %4658 = vpow2.f32 %v2565_v10 }
 0x9c8   :  { %v2628_v18 = vsel %vm1899_vm7, %v2627_v15, %v2623_v16  ;;  %4660 = vpow2.f32 %v2567_v13 }
 0x9c9   :  { %v4651_v19 = vpop.eup %4650  ;;  %v2633_v23 = vsel %vm1906_vm8, %v2632_v17, %v2628_v18 }
 0x9ca   :  { %v4653_v21 = vpop.eup %4652  ;;  %v2637_v22 = vrot.slane %v4651_v19, %v7754_v8 }
 0x9cb   :  { %v2642_v25 = vrot.slane %v4653_v21, %v7757_v9 }
 0x9cc   :  { %v2638_v26 = vsel %vm1913_vm9, %v2637_v22, %v2633_v23 }
 0x9cd   :  { %v4655_v27 = vpop.eup %4654  ;;  %v2643_v31 = vsel %vm1920_vm10, %v2642_v25, %v2638_v26 }
 0x9ce   :  { %v4657_v28 = vpop.eup %4656  ;;  %v2647_v29 = vrot.slane %v4655_v27, %v7766_v20 }
 0x9cf   :  { %v2652_v32 = vrot.slane %v4657_v28, %v7772_v24 }
 0x9d0   :  { %v2648_v46 = vsel %vm1927_vm11, %v2647_v29, %v2643_v31 }
 0x9d1   :  { %v4659_v34 = vpop.eup %4658  ;;  %v2653_v39 = vsel %vm1934_vm12, %v2652_v32, %v2648_v46 }
 0x9d2   :  { %v4661_v35 = vpop.eup %4660  ;;  %v2657_v36 = vrot.slane %v4659_v34, %v7778_v30 }
 0x9d3   :  { %v2662_v40 = vrot.slane %v4661_v35, %v7783_v33 }
 0x9d4   :  { %v2658_v41 = vsel %vm1941_vm13, %v2657_v36, %v2653_v39 }
 0x9d5   :  { %v2663_v42 = vsel %vm1948_vm14, %v2662_v40, %v2658_v41 }
 0x9d6   :  { %2665 = vst [vmem:[%s8035_s3 + $0x3] sm:$0x1] %v2663_v42 }
 0x9d7 LB: > { %6436 = dma.done.wait [#allocation3 + $0x4], 128  ;;  %s6494_s25 = sphi %s6492_s25, %s2671_s25  }
 0x9d8   : > { %6437 = vsyncadd [#allocation3 + $0x4], 4294967168  ;;  %s2671_s25 = sadd.s32 1, %s6494_s25  }
 0x9d9   : > { %p2668_p9 = scmp.ge.s32.totalorder %s2671_s25, 16  }
 0x9da   :  { %v2690_v51 = vld [vmem:[#allocation2 + $0x200] sm:$0xff] (%p2668_p9)  ;;  %v2692_v44 = vld [vmem:[#allocation2 + $0x210] sm:$0xff] (%p2668_p9)  ;;  %v2691_v50 = vld [vmem:[#allocation2 + $0x208] sm:$0xff] (%p2668_p9)  ;;  %s6496_s30 = smov (%p2668_p9), 0  }
 0x9db   :  { %2670 = sbr.rel (!%p2668_p9) target bundleno = 2519 (0x9d7), region = 684  ;;  %v4280_v43 = vld [vmem:[#allocation6 + $0x4] ss:$0 sm:$0xff] (%p2668_p9)  ;;  %v2693_v52 = vld [vmem:[#allocation2 + $0x218] sm:$0xff] (%p2668_p9)  ;;  %v2695_v56 = vld [vmem:[#allocation2 + $0x228] sm:$0xff] (%p2668_p9) }
 0x9dc   :  { %v2711_v45 = vmul.f32 (%p2668_p9), %v4280_v43, %v2690_v51  ;;  %v2713_v49 = vmul.f32 (%p2668_p9), %v4280_v43, %v2692_v44  ;;  %v2712_v53 = vmul.f32 (%p2668_p9), %v4280_v43, %v2691_v50  ;;  %v2714_v54 = vmul.f32 (%p2668_p9), %v4280_v43, %v2693_v52  ;;  %v2694_v55 = vld [vmem:[#allocation2 + $0x220] sm:$0xff] (%p2668_p9)  ;;  %v2696_v59 = vld [vmem:[#allocation2 + $0x230] sm:$0xff] (%p2668_p9)  ;;  %v2697_v60 = vld [vmem:[#allocation2 + $0x238] sm:$0xff] (%p2668_p9) }
 0x9dd   :  { %v2715_v57 = vmul.f32 (%p2668_p9), %v4280_v43, %v2694_v55  ;;  %v2716_v58 = vmul.f32 (%p2668_p9), %v4280_v43, %v2695_v56  ;;  %v2717_v61 = vmul.f32 (%p2668_p9), %v4280_v43, %v2696_v59  ;;  %v2718_v62 = vmul.f32 (%p2668_p9), %v4280_v43, %v2697_v60  ;;  %v2698_v0 = vld [vmem:[#allocation2 + $0x240] sm:$0xff] (%p2668_p9)  ;;  %v2699_v1 = vld [vmem:[#allocation2 + $0x248] sm:$0xff] (%p2668_p9)  ;;  %v2700_v7 = vld [vmem:[#allocation2 + $0x250] sm:$0xff] (%p2668_p9) }
 0x9de   :  { %2727 = vadd.xlane.f32.xlu0 (%p2668_p9), %v2711_v45  ;;  %2731 = vadd.xlane.f32.xlu1 (%p2668_p9), %v2713_v49  ;;  %v2719_v2 = vmul.f32 (%p2668_p9), %v4280_v43, %v2698_v0  ;;  %v2720_v6 = vmul.f32 (%p2668_p9), %v4280_v43, %v2699_v1  ;;  %v2701_v10 = vld [vmem:[#allocation2 + $0x258] sm:$0xff] (%p2668_p9)  ;;  %v2721_v13 = vmul.f32 (%p2668_p9), %v4280_v43, %v2700_v7  ;;  %v2702_v15 = vld [vmem:[#allocation2 + $0x260] sm:$0xff] (%p2668_p9)  ;;  %v2703_v16 = vld [vmem:[#allocation2 + $0x268] sm:$0xff] (%p2668_p9) }
 0x9df   :  { %v2722_v14 = vmul.f32 (%p2668_p9), %v4280_v43, %v2701_v10  ;;  %v2723_v17 = vmul.f32 (%p2668_p9), %v4280_v43, %v2702_v15  ;;  %v2724_v18 = vmul.f32 (%p2668_p9), %v4280_v43, %v2703_v16  ;;  %v2704_v19 = vld [vmem:[#allocation2 + $0x270] sm:$0xff] (%p2668_p9)  ;;  %v2705_v21 = vld [vmem:[#allocation2 + $0x278] sm:$0xff] (%p2668_p9) }
 0x9e0   :  { %v2725_v22 = vmul.f32 (%p2668_p9), %v4280_v43, %v2704_v19  ;;  %v2726_v23 = vmul.f32 (%p2668_p9), %v4280_v43, %v2705_v21 }
 0x9e2   :  { %2729 = vadd.xlane.f32.xlu0 %v2712_v53  ;;  %2733 = vadd.xlane.f32.xlu1 %v2714_v54 }
 0x9e6   :  { %2735 = vadd.xlane.f32.xlu0 %v2715_v57  ;;  %2737 = vadd.xlane.f32.xlu1 %v2716_v58 }
 0x9ea   :  { %2739 = vadd.xlane.f32.xlu0 %v2717_v61  ;;  %2741 = vadd.xlane.f32.xlu1 %v2718_v62 }
 0x9ee   :  { %2743 = vadd.xlane.f32.xlu0 %v2719_v2  ;;  %2745 = vadd.xlane.f32.xlu1 %v2720_v6 }
 0x9f2   :  { %2747 = vadd.xlane.f32.xlu0 %v2721_v13  ;;  %2749 = vadd.xlane.f32.xlu1 %v2722_v14 }
 0x9f6   :  { %2751 = vadd.xlane.f32.xlu0 %v2723_v17  ;;  %2753 = vadd.xlane.f32.xlu1 %v2724_v18 }
 0x9fa   :  { %2755 = vadd.xlane.f32.xlu0 %v2725_v22  ;;  %2757 = vadd.xlane.f32.xlu1 %v2726_v23 }
 0xa6b   :  { %v2728_v25 = vpop.xlane.xlu0 %2727  ;;  %v2732_v26 = vpop.xlane.xlu1 %2731 }
 0xa6c   :  { %v2759_v27 = vmul.f32 14.285714, %v2728_v25  ;;  %v2761_v28 = vmul.f32 14.285714, %v2732_v26 }
 0xa6e   :  { %v2775_v29 = vmul.f32 1.442695, %v2759_v27  ;;  %v2779_v31 = vmul.f32 1.442695, %v2761_v28 }
 0xa6f   :  { %v2730_v32 = vpop.xlane.xlu0 %2729  ;;  %v2734_v46 = vpop.xlane.xlu1 %2733 }
 0xa70   :  { %v2760_v34 = vmul.f32 14.285714, %v2730_v32  ;;  %v2762_v35 = vmul.f32 14.285714, %v2734_v46  ;;  %4662 = vpow2.f32 %v2775_v29 }
 0xa71   :  { %4664 = vpow2.f32 %v2779_v31 }
 0xa72   :  { %v2777_v36 = vmul.f32 1.442695, %v2760_v34  ;;  %v2781_v39 = vmul.f32 1.442695, %v2762_v35 }
 0xa73   :  { %v2736_v40 = vpop.xlane.xlu0 %2735  ;;  %v2738_v41 = vpop.xlane.xlu1 %2737 }
 0xa74   :  { %4666 = vpow2.f32 %v2777_v36  ;;  %v2763_v42 = vmul.f32 14.285714, %v2736_v40  ;;  %v2764_v51 = vmul.f32 14.285714, %v2738_v41 }
 0xa75   :  { %4668 = vpow2.f32 %v2781_v39 }
 0xa76   :  { %v2783_v43 = vmul.f32 1.442695, %v2763_v42  ;;  %v2785_v44 = vmul.f32 1.442695, %v2764_v51 }
 0xa77   :  { %v2740_v45 = vpop.xlane.xlu0 %2739  ;;  %v2742_v49 = vpop.xlane.xlu1 %2741 }
 0xa78   :  { %4670 = vpow2.f32 %v2783_v43  ;;  %v2765_v50 = vmul.f32 14.285714, %v2740_v45  ;;  %v2766_v52 = vmul.f32 14.285714, %v2742_v49 }
 0xa79   :  { %4672 = vpow2.f32 %v2785_v44 }
 0xa7a   :  { %v2787_v53 = vmul.f32 1.442695, %v2765_v50  ;;  %v2789_v54 = vmul.f32 1.442695, %v2766_v52  ;;  %v4663_v55 = vpop.eup %4662 }
 0xa7b   :  { %v2744_v56 = vpop.xlane.xlu0 %2743  ;;  %v2746_v57 = vpop.xlane.xlu1 %2745  ;;  %v2826_v2 = vrot.slane %v4663_v55, %v7703_v63 }
 0xa7c   :  { %v4665_v58 = vpop.eup %4664  ;;  %4674 = vpow2.f32 %v2787_v53  ;;  %v2767_v59 = vmul.f32 14.285714, %v2744_v56  ;;  %v2768_v60 = vmul.f32 14.285714, %v2746_v57 }
 0xa7d   :  { %4676 = vpow2.f32 %v2789_v54  ;;  %v2835_v6 = vrot.slane %v4665_v58, %v7706_v3 }
 0xa7e   :  { %v4667_v61 = vpop.eup %4666  ;;  %v2791_v62 = vmul.f32 1.442695, %v2767_v59  ;;  %v2793_v0 = vmul.f32 1.442695, %v2768_v60 }
 0xa7f   :  { %v4669_v1 = vpop.eup %4668  ;;  %v2830_v7 = vrot.slane %v4667_v61, %v7709_v4  ;;  %v2748_v10 = vpop.xlane.xlu0 %2747 }
 0xa80   :  { %v2750_v13 = vpop.xlane.xlu1 %2749  ;;  %v2840_v14 = vrot.slane %v4669_v1, %v7712_v5  ;;  %4678 = vpow2.f32 %v2791_v62  ;;  %v2769_v15 = vmul.f32 14.285714, %v2748_v10 }
 0xa81   :  { %v2770_v16 = vmul.f32 14.285714, %v2750_v13  ;;  %v2831_v17 = vsel %vm1850_vm0, %v2830_v7, %v2826_v2  ;;  %4680 = vpow2.f32 %v2793_v0 }
 0xa82   :  { %v4671_v18 = vpop.eup %4670  ;;  %v2836_v19 = vsel %vm1857_vm1, %v2835_v6, %v2831_v17  ;;  %v2795_v21 = vmul.f32 1.442695, %v2769_v15 }
 0xa83   :  { %v2797_v22 = vmul.f32 1.442695, %v2770_v16  ;;  %v4673_v23 = vpop.eup %4672  ;;  %v2841_v25 = vsel %vm1864_vm2, %v2840_v14, %v2836_v19  ;;  %v2845_v26 = vrot.slane %v4671_v18, %v7715_v11  ;;  %v2752_v27 = vpop.xlane.xlu0 %2751 }
 0xa84   :  { %v2754_v28 = vpop.xlane.xlu1 %2753  ;;  %v2850_v29 = vrot.slane %v4673_v23, %v7718_v12  ;;  %4682 = vpow2.f32 %v2795_v21  ;;  %v2771_v31 = vmul.f32 14.285714, %v2752_v27 }
 0xa85   :  { %v2772_v32 = vmul.f32 14.285714, %v2754_v28  ;;  %v2846_v46 = vsel %vm1871_vm3, %v2845_v26, %v2841_v25  ;;  %4684 = vpow2.f32 %v2797_v22 }
 0xa86   :  { %v4675_v34 = vpop.eup %4674  ;;  %v2799_v35 = vmul.f32 1.442695, %v2771_v31  ;;  %v2851_v40 = vsel %vm1878_vm4, %v2850_v29, %v2846_v46 }
 0xa87   :  { %v2801_v36 = vmul.f32 1.442695, %v2772_v32  ;;  %v4677_v39 = vpop.eup %4676  ;;  %v2855_v41 = vrot.slane %v4675_v34, %v7733_v37  ;;  %v2756_v42 = vpop.xlane.xlu0 %2755 }
 0xa88   :  { %v2758_v51 = vpop.xlane.xlu1 %2757  ;;  %v2860_v43 = vrot.slane %v4677_v39, %v7736_v38  ;;  %4686 = vpow2.f32 %v2799_v35  ;;  %v2773_v44 = vmul.f32 14.285714, %v2756_v42 }
 0xa89   :  { %v2774_v45 = vmul.f32 14.285714, %v2758_v51  ;;  %v2856_v49 = vsel %vm1885_vm5, %v2855_v41, %v2851_v40  ;;  %4688 = vpow2.f32 %v2801_v36 }
 0xa8a   :  { %v4679_v50 = vpop.eup %4678  ;;  %v2803_v52 = vmul.f32 1.442695, %v2773_v44  ;;  %v2861_v56 = vsel %vm1892_vm6, %v2860_v43, %v2856_v49 }
 0xa8b   :  { %v2805_v53 = vmul.f32 1.442695, %v2774_v45  ;;  %v4681_v54 = vpop.eup %4680  ;;  %v2865_v55 = vrot.slane %v4679_v50, %v7741_v47 }
 0xa8c   :  { %v2870_v57 = vrot.slane %v4681_v54, %v7744_v48  ;;  %4690 = vpow2.f32 %v2803_v52 }
 0xa8d   :  { %v2866_v58 = vsel %vm1899_vm7, %v2865_v55, %v2861_v56  ;;  %4692 = vpow2.f32 %v2805_v53 }
 0xa8e   :  { %v4683_v59 = vpop.eup %4682  ;;  %v2871_v62 = vsel %vm1906_vm8, %v2870_v57, %v2866_v58 }
 0xa8f   :  { %v4685_v60 = vpop.eup %4684  ;;  %v2875_v61 = vrot.slane %v4683_v59, %v7754_v8 }
 0xa90   :  { %v2880_v0 = vrot.slane %v4685_v60, %v7757_v9 }
 0xa91   :  { %v2876_v1 = vsel %vm1913_vm9, %v2875_v61, %v2871_v62 }
 0xa92   :  { %v4687_v2 = vpop.eup %4686  ;;  %v2881_v10 = vsel %vm1920_vm10, %v2880_v0, %v2876_v1 }
 0xa93   :  { %v4689_v6 = vpop.eup %4688  ;;  %v2885_v7 = vrot.slane %v4687_v2, %v7766_v20 }
 0xa94   :  { %v2890_v13 = vrot.slane %v4689_v6, %v7772_v24 }
 0xa95   :  { %v2886_v14 = vsel %vm1927_vm11, %v2885_v7, %v2881_v10 }
 0xa96   :  { %v4691_v15 = vpop.eup %4690  ;;  %v2891_v18 = vsel %vm1934_vm12, %v2890_v13, %v2886_v14 }
 0xa97   :  { %v4693_v16 = vpop.eup %4692  ;;  %v2895_v17 = vrot.slane %v4691_v15, %v7778_v30 }
 0xa98   :  { %v2900_v19 = vrot.slane %v4693_v16, %v7783_v33 }
 0xa99   :  { %v2896_v21 = vsel %vm1941_vm13, %v2895_v17, %v2891_v18 }
 0xa9a   :  { %v2901_v22 = vsel %vm1948_vm14, %v2900_v19, %v2896_v21 }
 0xa9b   :  { %2903 = vst [vmem:[%s8035_s3 + $0x4] sm:$0x1] %v2901_v22 }
 0xa9c LB: > { %6438 = dma.done.wait [#allocation3 + $0x5], 128  ;;  %s6498_s30 = sphi %s6496_s30, %s2909_s30  }
 0xa9d   : > { %6439 = vsyncadd [#allocation3 + $0x5], 4294967168  ;;  %s2909_s30 = sadd.s32 1, %s6498_s30  }
 0xa9e   : > { %p2906_p10 = scmp.ge.s32.totalorder %s2909_s30, 16  }
 0xa9f   :  { %v2928_v23 = vld [vmem:[#allocation2 + $0x280] sm:$0xff] (%p2906_p10)  ;;  %v2930_v26 = vld [vmem:[#allocation2 + $0x290] sm:$0xff] (%p2906_p10)  ;;  %v2929_v29 = vld [vmem:[#allocation2 + $0x288] sm:$0xff] (%p2906_p10)  ;;  %s6500_s12 = smov (%p2906_p10), 0  }
 0xaa0   :  { %2908 = sbr.rel (!%p2906_p10) target bundleno = 2716 (0xa9c), region = 695  ;;  %v4281_v25 = vld [vmem:[#allocation6 + $0x5] ss:$0 sm:$0xff] (%p2906_p10)  ;;  %v2931_v31 = vld [vmem:[#allocation2 + $0x298] sm:$0xff] (%p2906_p10)  ;;  %v2933_v35 = vld [vmem:[#allocation2 + $0x2a8] sm:$0xff] (%p2906_p10) }
 0xaa1   :  { %v2949_v27 = vmul.f32 (%p2906_p10), %v4281_v25, %v2928_v23  ;;  %v2951_v28 = vmul.f32 (%p2906_p10), %v4281_v25, %v2930_v26  ;;  %v2950_v32 = vmul.f32 (%p2906_p10), %v4281_v25, %v2929_v29  ;;  %v2952_v46 = vmul.f32 (%p2906_p10), %v4281_v25, %v2931_v31  ;;  %v2932_v34 = vld [vmem:[#allocation2 + $0x2a0] sm:$0xff] (%p2906_p10)  ;;  %v2934_v40 = vld [vmem:[#allocation2 + $0x2b0] sm:$0xff] (%p2906_p10)  ;;  %v2935_v41 = vld [vmem:[#allocation2 + $0x2b8] sm:$0xff] (%p2906_p10) }
 0xaa2   :  { %v2953_v36 = vmul.f32 (%p2906_p10), %v4281_v25, %v2932_v34  ;;  %v2954_v39 = vmul.f32 (%p2906_p10), %v4281_v25, %v2933_v35  ;;  %v2955_v42 = vmul.f32 (%p2906_p10), %v4281_v25, %v2934_v40  ;;  %v2956_v51 = vmul.f32 (%p2906_p10), %v4281_v25, %v2935_v41  ;;  %v2936_v43 = vld [vmem:[#allocation2 + $0x2c0] sm:$0xff] (%p2906_p10)  ;;  %v2937_v44 = vld [vmem:[#allocation2 + $0x2c8] sm:$0xff] (%p2906_p10)  ;;  %v2938_v50 = vld [vmem:[#allocation2 + $0x2d0] sm:$0xff] (%p2906_p10) }
 0xaa3   :  { %2965 = vadd.xlane.f32.xlu0 (%p2906_p10), %v2949_v27  ;;  %2969 = vadd.xlane.f32.xlu1 (%p2906_p10), %v2951_v28  ;;  %v2957_v45 = vmul.f32 (%p2906_p10), %v4281_v25, %v2936_v43  ;;  %v2958_v49 = vmul.f32 (%p2906_p10), %v4281_v25, %v2937_v44  ;;  %v2939_v52 = vld [vmem:[#allocation2 + $0x2d8] sm:$0xff] (%p2906_p10)  ;;  %v2959_v53 = vmul.f32 (%p2906_p10), %v4281_v25, %v2938_v50  ;;  %v2940_v55 = vld [vmem:[#allocation2 + $0x2e0] sm:$0xff] (%p2906_p10)  ;;  %v2941_v56 = vld [vmem:[#allocation2 + $0x2e8] sm:$0xff] (%p2906_p10) }
 0xaa4   :  { %v2960_v54 = vmul.f32 (%p2906_p10), %v4281_v25, %v2939_v52  ;;  %v2961_v57 = vmul.f32 (%p2906_p10), %v4281_v25, %v2940_v55  ;;  %v2962_v58 = vmul.f32 (%p2906_p10), %v4281_v25, %v2941_v56  ;;  %v2942_v59 = vld [vmem:[#allocation2 + $0x2f0] sm:$0xff] (%p2906_p10)  ;;  %v2943_v60 = vld [vmem:[#allocation2 + $0x2f8] sm:$0xff] (%p2906_p10) }
 0xaa5   :  { %v2963_v61 = vmul.f32 (%p2906_p10), %v4281_v25, %v2942_v59  ;;  %v2964_v62 = vmul.f32 (%p2906_p10), %v4281_v25, %v2943_v60 }
 0xaa7   :  { %2967 = vadd.xlane.f32.xlu0 %v2950_v32  ;;  %2971 = vadd.xlane.f32.xlu1 %v2952_v46 }
 0xaab   :  { %2973 = vadd.xlane.f32.xlu0 %v2953_v36  ;;  %2975 = vadd.xlane.f32.xlu1 %v2954_v39 }
 0xaaf   :  { %2977 = vadd.xlane.f32.xlu0 %v2955_v42  ;;  %2979 = vadd.xlane.f32.xlu1 %v2956_v51 }
 0xab3   :  { %2981 = vadd.xlane.f32.xlu0 %v2957_v45  ;;  %2983 = vadd.xlane.f32.xlu1 %v2958_v49 }
 0xab7   :  { %2985 = vadd.xlane.f32.xlu0 %v2959_v53  ;;  %2987 = vadd.xlane.f32.xlu1 %v2960_v54 }
 0xabb   :  { %2989 = vadd.xlane.f32.xlu0 %v2961_v57  ;;  %2991 = vadd.xlane.f32.xlu1 %v2962_v58 }
 0xabf   :  { %2993 = vadd.xlane.f32.xlu0 %v2963_v61  ;;  %2995 = vadd.xlane.f32.xlu1 %v2964_v62 }
 0xb30   :  { %v2966_v0 = vpop.xlane.xlu0 %2965  ;;  %v2970_v1 = vpop.xlane.xlu1 %2969 }
 0xb31   :  { %v2997_v2 = vmul.f32 14.285714, %v2966_v0  ;;  %v2999_v6 = vmul.f32 14.285714, %v2970_v1 }
 0xb33   :  { %v3013_v7 = vmul.f32 1.442695, %v2997_v2  ;;  %v3017_v10 = vmul.f32 1.442695, %v2999_v6 }
 0xb34   :  { %v2968_v13 = vpop.xlane.xlu0 %2967  ;;  %v2972_v14 = vpop.xlane.xlu1 %2971 }
 0xb35   :  { %v2998_v15 = vmul.f32 14.285714, %v2968_v13  ;;  %v3000_v16 = vmul.f32 14.285714, %v2972_v14  ;;  %4694 = vpow2.f32 %v3013_v7 }
 0xb36   :  { %4696 = vpow2.f32 %v3017_v10 }
 0xb37   :  { %v3015_v17 = vmul.f32 1.442695, %v2998_v15  ;;  %v3019_v18 = vmul.f32 1.442695, %v3000_v16 }
 0xb38   :  { %v2974_v19 = vpop.xlane.xlu0 %2973  ;;  %v2976_v21 = vpop.xlane.xlu1 %2975 }
 0xb39   :  { %4698 = vpow2.f32 %v3015_v17  ;;  %v3001_v22 = vmul.f32 14.285714, %v2974_v19  ;;  %v3002_v23 = vmul.f32 14.285714, %v2976_v21 }
 0xb3a   :  { %4700 = vpow2.f32 %v3019_v18 }
 0xb3b   :  { %v3021_v25 = vmul.f32 1.442695, %v3001_v22  ;;  %v3023_v26 = vmul.f32 1.442695, %v3002_v23 }
 0xb3c   :  { %v2978_v27 = vpop.xlane.xlu0 %2977  ;;  %v2980_v28 = vpop.xlane.xlu1 %2979 }
 0xb3d   :  { %4702 = vpow2.f32 %v3021_v25  ;;  %v3003_v29 = vmul.f32 14.285714, %v2978_v27  ;;  %v3004_v31 = vmul.f32 14.285714, %v2980_v28 }
 0xb3e   :  { %4704 = vpow2.f32 %v3023_v26 }
 0xb3f   :  { %v3025_v32 = vmul.f32 1.442695, %v3003_v29  ;;  %v3027_v46 = vmul.f32 1.442695, %v3004_v31  ;;  %v4695_v34 = vpop.eup %4694 }
 0xb40   :  { %v2982_v35 = vpop.xlane.xlu0 %2981  ;;  %v2984_v36 = vpop.xlane.xlu1 %2983  ;;  %v3064_v45 = vrot.slane %v4695_v34, %v7703_v63 }
 0xb41   :  { %v4697_v39 = vpop.eup %4696  ;;  %4706 = vpow2.f32 %v3025_v32  ;;  %v3005_v40 = vmul.f32 14.285714, %v2982_v35  ;;  %v3006_v41 = vmul.f32 14.285714, %v2984_v36 }
 0xb42   :  { %4708 = vpow2.f32 %v3027_v46  ;;  %v3073_v49 = vrot.slane %v4697_v39, %v7706_v3 }
 0xb43   :  { %v4699_v42 = vpop.eup %4698  ;;  %v3029_v51 = vmul.f32 1.442695, %v3005_v40  ;;  %v3031_v43 = vmul.f32 1.442695, %v3006_v41 }
 0xb44   :  { %v4701_v44 = vpop.eup %4700  ;;  %v3068_v50 = vrot.slane %v4699_v42, %v7709_v4  ;;  %v2986_v52 = vpop.xlane.xlu0 %2985 }
 0xb45   :  { %v2988_v53 = vpop.xlane.xlu1 %2987  ;;  %v3078_v54 = vrot.slane %v4701_v44, %v7712_v5  ;;  %4710 = vpow2.f32 %v3029_v51  ;;  %v3007_v55 = vmul.f32 14.285714, %v2986_v52 }
 0xb46   :  { %v3008_v56 = vmul.f32 14.285714, %v2988_v53  ;;  %v3069_v57 = vsel %vm1850_vm0, %v3068_v50, %v3064_v45  ;;  %4712 = vpow2.f32 %v3031_v43 }
 0xb47   :  { %v4703_v58 = vpop.eup %4702  ;;  %v3074_v59 = vsel %vm1857_vm1, %v3073_v49, %v3069_v57  ;;  %v3033_v60 = vmul.f32 1.442695, %v3007_v55 }
 0xb48   :  { %v3035_v61 = vmul.f32 1.442695, %v3008_v56  ;;  %v4705_v62 = vpop.eup %4704  ;;  %v3079_v0 = vsel %vm1864_vm2, %v3078_v54, %v3074_v59  ;;  %v3083_v1 = vrot.slane %v4703_v58, %v7715_v11  ;;  %v2990_v2 = vpop.xlane.xlu0 %2989 }
 0xb49   :  { %v2992_v6 = vpop.xlane.xlu1 %2991  ;;  %v3088_v7 = vrot.slane %v4705_v62, %v7718_v12  ;;  %4714 = vpow2.f32 %v3033_v60  ;;  %v3009_v10 = vmul.f32 14.285714, %v2990_v2 }
 0xb4a   :  { %v3010_v13 = vmul.f32 14.285714, %v2992_v6  ;;  %v3084_v14 = vsel %vm1871_vm3, %v3083_v1, %v3079_v0  ;;  %4716 = vpow2.f32 %v3035_v61 }
 0xb4b   :  { %v4707_v15 = vpop.eup %4706  ;;  %v3037_v16 = vmul.f32 1.442695, %v3009_v10  ;;  %v3089_v19 = vsel %vm1878_vm4, %v3088_v7, %v3084_v14 }
 0xb4c   :  { %v3039_v17 = vmul.f32 1.442695, %v3010_v13  ;;  %v4709_v18 = vpop.eup %4708  ;;  %v3093_v21 = vrot.slane %v4707_v15, %v7733_v37  ;;  %v2994_v22 = vpop.xlane.xlu0 %2993 }
 0xb4d   :  { %v2996_v23 = vpop.xlane.xlu1 %2995  ;;  %v3098_v25 = vrot.slane %v4709_v18, %v7736_v38  ;;  %4718 = vpow2.f32 %v3037_v16  ;;  %v3011_v26 = vmul.f32 14.285714, %v2994_v22 }
 0xb4e   :  { %v3012_v27 = vmul.f32 14.285714, %v2996_v23  ;;  %v3094_v28 = vsel %vm1885_vm5, %v3093_v21, %v3089_v19  ;;  %4720 = vpow2.f32 %v3039_v17 }
 0xb4f   :  { %v4711_v29 = vpop.eup %4710  ;;  %v3041_v31 = vmul.f32 1.442695, %v3011_v26  ;;  %v3099_v35 = vsel %vm1892_vm6, %v3098_v25, %v3094_v28 }
 0xb50   :  { %v3043_v32 = vmul.f32 1.442695, %v3012_v27  ;;  %v4713_v46 = vpop.eup %4712  ;;  %v3103_v34 = vrot.slane %v4711_v29, %v7741_v47 }
 0xb51   :  { %v3108_v36 = vrot.slane %v4713_v46, %v7744_v48  ;;  %4722 = vpow2.f32 %v3041_v31 }
 0xb52   :  { %v3104_v39 = vsel %vm1899_vm7, %v3103_v34, %v3099_v35  ;;  %4724 = vpow2.f32 %v3043_v32 }
 0xb53   :  { %v4715_v40 = vpop.eup %4714  ;;  %v3109_v51 = vsel %vm1906_vm8, %v3108_v36, %v3104_v39 }
 0xb54   :  { %v4717_v41 = vpop.eup %4716  ;;  %v3113_v42 = vrot.slane %v4715_v40, %v7754_v8 }
 0xb55   :  { %v3118_v43 = vrot.slane %v4717_v41, %v7757_v9 }
 0xb56   :  { %v3114_v44 = vsel %vm1913_vm9, %v3113_v42, %v3109_v51 }
 0xb57   :  { %v4719_v45 = vpop.eup %4718  ;;  %v3119_v52 = vsel %vm1920_vm10, %v3118_v43, %v3114_v44 }
 0xb58   :  { %v4721_v49 = vpop.eup %4720  ;;  %v3123_v50 = vrot.slane %v4719_v45, %v7766_v20 }
 0xb59   :  { %v3128_v53 = vrot.slane %v4721_v49, %v7772_v24 }
 0xb5a   :  { %v3124_v54 = vsel %vm1927_vm11, %v3123_v50, %v3119_v52 }
 0xb5b   :  { %v4723_v55 = vpop.eup %4722  ;;  %v3129_v58 = vsel %vm1934_vm12, %v3128_v53, %v3124_v54 }
 0xb5c   :  { %v4725_v56 = vpop.eup %4724  ;;  %v3133_v57 = vrot.slane %v4723_v55, %v7778_v30 }
 0xb5d   :  { %v3138_v59 = vrot.slane %v4725_v56, %v7783_v33 }
 0xb5e   :  { %v3134_v60 = vsel %vm1941_vm13, %v3133_v57, %v3129_v58 }
 0xb5f   :  { %v3139_v61 = vsel %vm1948_vm14, %v3138_v59, %v3134_v60 }
 0xb60   :  { %3141 = vst [vmem:[%s8035_s3 + $0x5] sm:$0x1] %v3139_v61 }
 0xb61 LB: > { %6440 = dma.done.wait [#allocation3 + $0x6], 128  ;;  %s6502_s12 = sphi %s6500_s12, %s3147_s12  }
 0xb62   : > { %6441 = vsyncadd [#allocation3 + $0x6], 4294967168  ;;  %s3147_s12 = sadd.s32 1, %s6502_s12  }
 0xb63   : > { %p3144_p11 = scmp.ge.s32.totalorder %s3147_s12, 16  }
 0xb64   :  { %v3166_v62 = vld [vmem:[#allocation2 + $0x300] sm:$0xff] (%p3144_p11)  ;;  %v3168_v1 = vld [vmem:[#allocation2 + $0x310] sm:$0xff] (%p3144_p11)  ;;  %v3167_v7 = vld [vmem:[#allocation2 + $0x308] sm:$0xff] (%p3144_p11)  ;;  %s6504_s4 = smov (%p3144_p11), 0  }
 0xb65   :  { %3146 = sbr.rel (!%p3144_p11) target bundleno = 2913 (0xb61), region = 706  ;;  %v4282_v0 = vld [vmem:[#allocation6 + $0x6] ss:$0 sm:$0xff] (%p3144_p11)  ;;  %v3169_v10 = vld [vmem:[#allocation2 + $0x318] sm:$0xff] (%p3144_p11)  ;;  %v3171_v16 = vld [vmem:[#allocation2 + $0x328] sm:$0xff] (%p3144_p11) }
 0xb66   :  { %v3187_v2 = vmul.f32 (%p3144_p11), %v4282_v0, %v3166_v62  ;;  %v3189_v6 = vmul.f32 (%p3144_p11), %v4282_v0, %v3168_v1  ;;  %v3188_v13 = vmul.f32 (%p3144_p11), %v4282_v0, %v3167_v7  ;;  %v3190_v14 = vmul.f32 (%p3144_p11), %v4282_v0, %v3169_v10  ;;  %v3170_v15 = vld [vmem:[#allocation2 + $0x320] sm:$0xff] (%p3144_p11)  ;;  %v3172_v19 = vld [vmem:[#allocation2 + $0x330] sm:$0xff] (%p3144_p11)  ;;  %v3173_v21 = vld [vmem:[#allocation2 + $0x338] sm:$0xff] (%p3144_p11) }
 0xb67   :  { %v3191_v17 = vmul.f32 (%p3144_p11), %v4282_v0, %v3170_v15  ;;  %v3192_v18 = vmul.f32 (%p3144_p11), %v4282_v0, %v3171_v16  ;;  %v3193_v22 = vmul.f32 (%p3144_p11), %v4282_v0, %v3172_v19  ;;  %v3194_v23 = vmul.f32 (%p3144_p11), %v4282_v0, %v3173_v21  ;;  %v3174_v25 = vld [vmem:[#allocation2 + $0x340] sm:$0xff] (%p3144_p11)  ;;  %v3175_v26 = vld [vmem:[#allocation2 + $0x348] sm:$0xff] (%p3144_p11)  ;;  %v3176_v29 = vld [vmem:[#allocation2 + $0x350] sm:$0xff] (%p3144_p11) }
 0xb68   :  { %3203 = vadd.xlane.f32.xlu0 (%p3144_p11), %v3187_v2  ;;  %3207 = vadd.xlane.f32.xlu1 (%p3144_p11), %v3189_v6  ;;  %v3195_v27 = vmul.f32 (%p3144_p11), %v4282_v0, %v3174_v25  ;;  %v3196_v28 = vmul.f32 (%p3144_p11), %v4282_v0, %v3175_v26  ;;  %v3177_v31 = vld [vmem:[#allocation2 + $0x358] sm:$0xff] (%p3144_p11)  ;;  %v3197_v32 = vmul.f32 (%p3144_p11), %v4282_v0, %v3176_v29  ;;  %v3178_v34 = vld [vmem:[#allocation2 + $0x360] sm:$0xff] (%p3144_p11)  ;;  %v3179_v35 = vld [vmem:[#allocation2 + $0x368] sm:$0xff] (%p3144_p11) }
 0xb69   :  { %v3198_v46 = vmul.f32 (%p3144_p11), %v4282_v0, %v3177_v31  ;;  %v3199_v36 = vmul.f32 (%p3144_p11), %v4282_v0, %v3178_v34  ;;  %v3200_v39 = vmul.f32 (%p3144_p11), %v4282_v0, %v3179_v35  ;;  %v3180_v40 = vld [vmem:[#allocation2 + $0x370] sm:$0xff] (%p3144_p11)  ;;  %v3181_v41 = vld [vmem:[#allocation2 + $0x378] sm:$0xff] (%p3144_p11) }
 0xb6a   :  { %v3201_v42 = vmul.f32 (%p3144_p11), %v4282_v0, %v3180_v40  ;;  %v3202_v51 = vmul.f32 (%p3144_p11), %v4282_v0, %v3181_v41 }
 0xb6c   :  { %3205 = vadd.xlane.f32.xlu0 %v3188_v13  ;;  %3209 = vadd.xlane.f32.xlu1 %v3190_v14 }
 0xb70   :  { %3211 = vadd.xlane.f32.xlu0 %v3191_v17  ;;  %3213 = vadd.xlane.f32.xlu1 %v3192_v18 }
 0xb74   :  { %3215 = vadd.xlane.f32.xlu0 %v3193_v22  ;;  %3217 = vadd.xlane.f32.xlu1 %v3194_v23 }
 0xb78   :  { %3219 = vadd.xlane.f32.xlu0 %v3195_v27  ;;  %3221 = vadd.xlane.f32.xlu1 %v3196_v28 }
 0xb7c   :  { %3223 = vadd.xlane.f32.xlu0 %v3197_v32  ;;  %3225 = vadd.xlane.f32.xlu1 %v3198_v46 }
 0xb80   :  { %3227 = vadd.xlane.f32.xlu0 %v3199_v36  ;;  %3229 = vadd.xlane.f32.xlu1 %v3200_v39 }
 0xb84   :  { %3231 = vadd.xlane.f32.xlu0 %v3201_v42  ;;  %3233 = vadd.xlane.f32.xlu1 %v3202_v51 }
 0xbf5   :  { %v3204_v43 = vpop.xlane.xlu0 %3203  ;;  %v3208_v44 = vpop.xlane.xlu1 %3207 }
 0xbf6   :  { %v3235_v45 = vmul.f32 14.285714, %v3204_v43  ;;  %v3237_v49 = vmul.f32 14.285714, %v3208_v44 }
 0xbf8   :  { %v3251_v50 = vmul.f32 1.442695, %v3235_v45  ;;  %v3255_v52 = vmul.f32 1.442695, %v3237_v49 }
 0xbf9   :  { %v3206_v53 = vpop.xlane.xlu0 %3205  ;;  %v3210_v54 = vpop.xlane.xlu1 %3209 }
 0xbfa   :  { %v3236_v55 = vmul.f32 14.285714, %v3206_v53  ;;  %v3238_v56 = vmul.f32 14.285714, %v3210_v54  ;;  %4726 = vpow2.f32 %v3251_v50 }
 0xbfb   :  { %4728 = vpow2.f32 %v3255_v52 }
 0xbfc   :  { %v3253_v57 = vmul.f32 1.442695, %v3236_v55  ;;  %v3257_v58 = vmul.f32 1.442695, %v3238_v56 }
 0xbfd   :  { %v3212_v59 = vpop.xlane.xlu0 %3211  ;;  %v3214_v60 = vpop.xlane.xlu1 %3213 }
 0xbfe   :  { %4730 = vpow2.f32 %v3253_v57  ;;  %v3239_v61 = vmul.f32 14.285714, %v3212_v59  ;;  %v3240_v62 = vmul.f32 14.285714, %v3214_v60 }
 0xbff   :  { %4732 = vpow2.f32 %v3257_v58 }
 0xc00   :  { %v3259_v0 = vmul.f32 1.442695, %v3239_v61  ;;  %v3261_v1 = vmul.f32 1.442695, %v3240_v62 }
 0xc01   :  { %v3216_v2 = vpop.xlane.xlu0 %3215  ;;  %v3218_v6 = vpop.xlane.xlu1 %3217 }
 0xc02   :  { %4734 = vpow2.f32 %v3259_v0  ;;  %v3241_v7 = vmul.f32 14.285714, %v3216_v2  ;;  %v3242_v10 = vmul.f32 14.285714, %v3218_v6 }
 0xc03   :  { %4736 = vpow2.f32 %v3261_v1 }
 0xc04   :  { %v3263_v13 = vmul.f32 1.442695, %v3241_v7  ;;  %v3265_v14 = vmul.f32 1.442695, %v3242_v10  ;;  %v4727_v15 = vpop.eup %4726 }
 0xc05   :  { %v3220_v16 = vpop.xlane.xlu0 %3219  ;;  %v3222_v17 = vpop.xlane.xlu1 %3221  ;;  %v3302_v27 = vrot.slane %v4727_v15, %v7703_v63 }
 0xc06   :  { %v4729_v18 = vpop.eup %4728  ;;  %4738 = vpow2.f32 %v3263_v13  ;;  %v3243_v19 = vmul.f32 14.285714, %v3220_v16  ;;  %v3244_v21 = vmul.f32 14.285714, %v3222_v17 }
 0xc07   :  { %4740 = vpow2.f32 %v3265_v14  ;;  %v3311_v28 = vrot.slane %v4729_v18, %v7706_v3 }
 0xc08   :  { %v4731_v22 = vpop.eup %4730  ;;  %v3267_v23 = vmul.f32 1.442695, %v3243_v19  ;;  %v3269_v25 = vmul.f32 1.442695, %v3244_v21 }
 0xc09   :  { %v4733_v26 = vpop.eup %4732  ;;  %v3306_v29 = vrot.slane %v4731_v22, %v7709_v4  ;;  %v3224_v31 = vpop.xlane.xlu0 %3223 }
 0xc0a   :  { %v3226_v32 = vpop.xlane.xlu1 %3225  ;;  %v3316_v46 = vrot.slane %v4733_v26, %v7712_v5  ;;  %4742 = vpow2.f32 %v3267_v23  ;;  %v3245_v34 = vmul.f32 14.285714, %v3224_v31 }
 0xc0b   :  { %v3246_v35 = vmul.f32 14.285714, %v3226_v32  ;;  %v3307_v36 = vsel %vm1850_vm0, %v3306_v29, %v3302_v27  ;;  %4744 = vpow2.f32 %v3269_v25 }
 0xc0c   :  { %v4735_v39 = vpop.eup %4734  ;;  %v3312_v40 = vsel %vm1857_vm1, %v3311_v28, %v3307_v36  ;;  %v3271_v41 = vmul.f32 1.442695, %v3245_v34 }
 0xc0d   :  { %v3273_v42 = vmul.f32 1.442695, %v3246_v35  ;;  %v4737_v51 = vpop.eup %4736  ;;  %v3317_v43 = vsel %vm1864_vm2, %v3316_v46, %v3312_v40  ;;  %v3321_v44 = vrot.slane %v4735_v39, %v7715_v11  ;;  %v3228_v45 = vpop.xlane.xlu0 %3227 }
 0xc0e   :  { %v3230_v49 = vpop.xlane.xlu1 %3229  ;;  %v3326_v50 = vrot.slane %v4737_v51, %v7718_v12  ;;  %4746 = vpow2.f32 %v3271_v41  ;;  %v3247_v52 = vmul.f32 14.285714, %v3228_v45 }
 0xc0f   :  { %v3248_v53 = vmul.f32 14.285714, %v3230_v49  ;;  %v3322_v54 = vsel %vm1871_vm3, %v3321_v44, %v3317_v43  ;;  %4748 = vpow2.f32 %v3273_v42 }
 0xc10   :  { %v4739_v55 = vpop.eup %4738  ;;  %v3275_v56 = vmul.f32 1.442695, %v3247_v52  ;;  %v3327_v59 = vsel %vm1878_vm4, %v3326_v50, %v3322_v54 }
 0xc11   :  { %v3277_v57 = vmul.f32 1.442695, %v3248_v53  ;;  %v4741_v58 = vpop.eup %4740  ;;  %v3331_v60 = vrot.slane %v4739_v55, %v7733_v37  ;;  %v3232_v61 = vpop.xlane.xlu0 %3231 }
 0xc12   :  { %v3234_v62 = vpop.xlane.xlu1 %3233  ;;  %v3336_v0 = vrot.slane %v4741_v58, %v7736_v38  ;;  %4750 = vpow2.f32 %v3275_v56  ;;  %v3249_v1 = vmul.f32 14.285714, %v3232_v61 }
 0xc13   :  { %v3250_v2 = vmul.f32 14.285714, %v3234_v62  ;;  %v3332_v6 = vsel %vm1885_vm5, %v3331_v60, %v3327_v59  ;;  %4752 = vpow2.f32 %v3277_v57 }
 0xc14   :  { %v4743_v7 = vpop.eup %4742  ;;  %v3279_v10 = vmul.f32 1.442695, %v3249_v1  ;;  %v3337_v16 = vsel %vm1892_vm6, %v3336_v0, %v3332_v6 }
 0xc15   :  { %v3281_v13 = vmul.f32 1.442695, %v3250_v2  ;;  %v4745_v14 = vpop.eup %4744  ;;  %v3341_v15 = vrot.slane %v4743_v7, %v7741_v47 }
 0xc16   :  { %v3346_v17 = vrot.slane %v4745_v14, %v7744_v48  ;;  %4754 = vpow2.f32 %v3279_v10 }
 0xc17   :  { %v3342_v18 = vsel %vm1899_vm7, %v3341_v15, %v3337_v16  ;;  %4756 = vpow2.f32 %v3281_v13 }
 0xc18   :  { %v4747_v19 = vpop.eup %4746  ;;  %v3347_v23 = vsel %vm1906_vm8, %v3346_v17, %v3342_v18 }
 0xc19   :  { %v4749_v21 = vpop.eup %4748  ;;  %v3351_v22 = vrot.slane %v4747_v19, %v7754_v8 }
 0xc1a   :  { %v3356_v25 = vrot.slane %v4749_v21, %v7757_v9 }
 0xc1b   :  { %v3352_v26 = vsel %vm1913_vm9, %v3351_v22, %v3347_v23 }
 0xc1c   :  { %v4751_v27 = vpop.eup %4750  ;;  %v3357_v31 = vsel %vm1920_vm10, %v3356_v25, %v3352_v26 }
 0xc1d   :  { %v4753_v28 = vpop.eup %4752  ;;  %v3361_v29 = vrot.slane %v4751_v27, %v7766_v20 }
 0xc1e   :  { %v3366_v32 = vrot.slane %v4753_v28, %v7772_v24 }
 0xc1f   :  { %v3362_v46 = vsel %vm1927_vm11, %v3361_v29, %v3357_v31 }
 0xc20   :  { %v4755_v34 = vpop.eup %4754  ;;  %v3367_v39 = vsel %vm1934_vm12, %v3366_v32, %v3362_v46 }
 0xc21   :  { %v4757_v35 = vpop.eup %4756  ;;  %v3371_v36 = vrot.slane %v4755_v34, %v7778_v30 }
 0xc22   :  { %v3376_v40 = vrot.slane %v4757_v35, %v7783_v33 }
 0xc23   :  { %v3372_v41 = vsel %vm1941_vm13, %v3371_v36, %v3367_v39 }
 0xc24   :  { %v3377_v42 = vsel %vm1948_vm14, %v3376_v40, %v3372_v41 }
 0xc25   :  { %3379 = vst [vmem:[%s8035_s3 + $0x6] sm:$0x1] %v3377_v42 }
 0xc26 LB: > { %6442 = dma.done.wait [#allocation3 + $0x7], 128  ;;  %s6506_s4 = sphi %s6504_s4, %s3385_s4  }
 0xc27   : > { %6443 = vsyncadd [#allocation3 + $0x7], 4294967168  ;;  %s3385_s4 = sadd.s32 1, %s6506_s4  }
 0xc28   : > { %p3382_p12 = scmp.ge.s32.totalorder %s3385_s4, 16  }
 0xc29   :  { %v3404_v51 = vld [vmem:[#allocation2 + $0x380] sm:$0xff] (%p3382_p12)  ;;  %v3406_v44 = vld [vmem:[#allocation2 + $0x390] sm:$0xff] (%p3382_p12)  ;;  %v3405_v50 = vld [vmem:[#allocation2 + $0x388] sm:$0xff] (%p3382_p12) }
 0xc2a   :  { %3384 = sbr.rel (!%p3382_p12) target bundleno = 3110 (0xc26), region = 717  ;;  %v4283_v43 = vld [vmem:[#allocation6 + $0x7] ss:$0 sm:$0xff] (%p3382_p12)  ;;  %v3407_v52 = vld [vmem:[#allocation2 + $0x398] sm:$0xff] (%p3382_p12)  ;;  %v3409_v56 = vld [vmem:[#allocation2 + $0x3a8] sm:$0xff] (%p3382_p12) }
 0xc2b   :  { %v3425_v45 = vmul.f32 (%p3382_p12), %v4283_v43, %v3404_v51  ;;  %v3427_v49 = vmul.f32 (%p3382_p12), %v4283_v43, %v3406_v44  ;;  %v3426_v53 = vmul.f32 (%p3382_p12), %v4283_v43, %v3405_v50  ;;  %v3428_v54 = vmul.f32 (%p3382_p12), %v4283_v43, %v3407_v52  ;;  %v3408_v55 = vld [vmem:[#allocation2 + $0x3a0] sm:$0xff] (%p3382_p12)  ;;  %v3410_v59 = vld [vmem:[#allocation2 + $0x3b0] sm:$0xff] (%p3382_p12)  ;;  %v3411_v60 = vld [vmem:[#allocation2 + $0x3b8] sm:$0xff] (%p3382_p12) }
 0xc2c   :  { %v3429_v57 = vmul.f32 (%p3382_p12), %v4283_v43, %v3408_v55  ;;  %v3430_v58 = vmul.f32 (%p3382_p12), %v4283_v43, %v3409_v56  ;;  %v3431_v61 = vmul.f32 (%p3382_p12), %v4283_v43, %v3410_v59  ;;  %v3432_v62 = vmul.f32 (%p3382_p12), %v4283_v43, %v3411_v60  ;;  %v3412_v0 = vld [vmem:[#allocation2 + $0x3c0] sm:$0xff] (%p3382_p12)  ;;  %v3413_v1 = vld [vmem:[#allocation2 + $0x3c8] sm:$0xff] (%p3382_p12)  ;;  %v3414_v7 = vld [vmem:[#allocation2 + $0x3d0] sm:$0xff] (%p3382_p12) }
 0xc2d   :  { %3441 = vadd.xlane.f32.xlu0 (%p3382_p12), %v3425_v45  ;;  %3445 = vadd.xlane.f32.xlu1 (%p3382_p12), %v3427_v49  ;;  %v3433_v2 = vmul.f32 (%p3382_p12), %v4283_v43, %v3412_v0  ;;  %v3434_v6 = vmul.f32 (%p3382_p12), %v4283_v43, %v3413_v1  ;;  %v3415_v10 = vld [vmem:[#allocation2 + $0x3d8] sm:$0xff] (%p3382_p12)  ;;  %v3435_v13 = vmul.f32 (%p3382_p12), %v4283_v43, %v3414_v7  ;;  %v3416_v15 = vld [vmem:[#allocation2 + $0x3e0] sm:$0xff] (%p3382_p12)  ;;  %v3417_v16 = vld [vmem:[#allocation2 + $0x3e8] sm:$0xff] (%p3382_p12) }
 0xc2e   :  { %v3436_v14 = vmul.f32 (%p3382_p12), %v4283_v43, %v3415_v10  ;;  %v3437_v17 = vmul.f32 (%p3382_p12), %v4283_v43, %v3416_v15  ;;  %v3438_v18 = vmul.f32 (%p3382_p12), %v4283_v43, %v3417_v16  ;;  %v3418_v19 = vld [vmem:[#allocation2 + $0x3f0] sm:$0xff] (%p3382_p12)  ;;  %v3419_v21 = vld [vmem:[#allocation2 + $0x3f8] sm:$0xff] (%p3382_p12) }
 0xc2f   :  { %v3439_v22 = vmul.f32 (%p3382_p12), %v4283_v43, %v3418_v19  ;;  %v3440_v23 = vmul.f32 (%p3382_p12), %v4283_v43, %v3419_v21 }
 0xc31   :  { %3443 = vadd.xlane.f32.xlu0 %v3426_v53  ;;  %3447 = vadd.xlane.f32.xlu1 %v3428_v54 }
 0xc35   :  { %3449 = vadd.xlane.f32.xlu0 %v3429_v57  ;;  %3451 = vadd.xlane.f32.xlu1 %v3430_v58 }
 0xc39   :  { %3453 = vadd.xlane.f32.xlu0 %v3431_v61  ;;  %3455 = vadd.xlane.f32.xlu1 %v3432_v62 }
 0xc3d   :  { %3457 = vadd.xlane.f32.xlu0 %v3433_v2  ;;  %3459 = vadd.xlane.f32.xlu1 %v3434_v6 }
 0xc41   :  { %3461 = vadd.xlane.f32.xlu0 %v3435_v13  ;;  %3463 = vadd.xlane.f32.xlu1 %v3436_v14 }
 0xc45   :  { %3465 = vadd.xlane.f32.xlu0 %v3437_v17  ;;  %3467 = vadd.xlane.f32.xlu1 %v3438_v18 }
 0xc49   :  { %3469 = vadd.xlane.f32.xlu0 %v3439_v22  ;;  %3471 = vadd.xlane.f32.xlu1 %v3440_v23 }
 0xcba   :  { %v3442_v25 = vpop.xlane.xlu0 %3441  ;;  %v3446_v26 = vpop.xlane.xlu1 %3445 }
 0xcbb   :  { %v3473_v27 = vmul.f32 14.285714, %v3442_v25  ;;  %v3475_v28 = vmul.f32 14.285714, %v3446_v26 }
 0xcbd   :  { %v3489_v29 = vmul.f32 1.442695, %v3473_v27  ;;  %v3493_v31 = vmul.f32 1.442695, %v3475_v28 }
 0xcbe   :  { %v3444_v32 = vpop.xlane.xlu0 %3443  ;;  %v3448_v46 = vpop.xlane.xlu1 %3447 }
 0xcbf   :  { %v3474_v34 = vmul.f32 14.285714, %v3444_v32  ;;  %v3476_v35 = vmul.f32 14.285714, %v3448_v46  ;;  %4758 = vpow2.f32 %v3489_v29 }
 0xcc0   :  { %4760 = vpow2.f32 %v3493_v31 }
 0xcc1   :  { %v3491_v36 = vmul.f32 1.442695, %v3474_v34  ;;  %v3495_v39 = vmul.f32 1.442695, %v3476_v35 }
 0xcc2   :  { %v3450_v40 = vpop.xlane.xlu0 %3449  ;;  %v3452_v41 = vpop.xlane.xlu1 %3451 }
 0xcc3   :  { %4762 = vpow2.f32 %v3491_v36  ;;  %v3477_v42 = vmul.f32 14.285714, %v3450_v40  ;;  %v3478_v51 = vmul.f32 14.285714, %v3452_v41 }
 0xcc4   :  { %4764 = vpow2.f32 %v3495_v39 }
 0xcc5   :  { %v3497_v43 = vmul.f32 1.442695, %v3477_v42  ;;  %v3499_v44 = vmul.f32 1.442695, %v3478_v51 }
 0xcc6   :  { %v3454_v45 = vpop.xlane.xlu0 %3453  ;;  %v3456_v49 = vpop.xlane.xlu1 %3455 }
 0xcc7   :  { %4766 = vpow2.f32 %v3497_v43  ;;  %v3479_v50 = vmul.f32 14.285714, %v3454_v45  ;;  %v3480_v52 = vmul.f32 14.285714, %v3456_v49 }
 0xcc8   :  { %4768 = vpow2.f32 %v3499_v44 }
 0xcc9   :  { %v3501_v53 = vmul.f32 1.442695, %v3479_v50  ;;  %v3503_v54 = vmul.f32 1.442695, %v3480_v52  ;;  %v4759_v55 = vpop.eup %4758 }
 0xcca   :  { %v3458_v56 = vpop.xlane.xlu0 %3457  ;;  %v3460_v57 = vpop.xlane.xlu1 %3459  ;;  %v3540_v2 = vrot.slane %v4759_v55, %v7703_v63 }
 0xccb   :  { %v4761_v58 = vpop.eup %4760  ;;  %4770 = vpow2.f32 %v3501_v53  ;;  %v3481_v59 = vmul.f32 14.285714, %v3458_v56  ;;  %v3482_v60 = vmul.f32 14.285714, %v3460_v57 }
 0xccc   :  { %4772 = vpow2.f32 %v3503_v54  ;;  %v3549_v6 = vrot.slane %v4761_v58, %v7706_v3 }
 0xccd   :  { %v4763_v61 = vpop.eup %4762  ;;  %v3505_v62 = vmul.f32 1.442695, %v3481_v59  ;;  %v3507_v0 = vmul.f32 1.442695, %v3482_v60 }
 0xcce   :  { %v4765_v1 = vpop.eup %4764  ;;  %v3544_v7 = vrot.slane %v4763_v61, %v7709_v4  ;;  %v3462_v10 = vpop.xlane.xlu0 %3461 }
 0xccf   :  { %v3464_v13 = vpop.xlane.xlu1 %3463  ;;  %v3554_v14 = vrot.slane %v4765_v1, %v7712_v5  ;;  %4774 = vpow2.f32 %v3505_v62  ;;  %v3483_v15 = vmul.f32 14.285714, %v3462_v10 }
 0xcd0   :  { %v3484_v16 = vmul.f32 14.285714, %v3464_v13  ;;  %v3545_v17 = vsel %vm1850_vm0, %v3544_v7, %v3540_v2  ;;  %4776 = vpow2.f32 %v3507_v0 }
 0xcd1   :  { %v4767_v18 = vpop.eup %4766  ;;  %v3550_v19 = vsel %vm1857_vm1, %v3549_v6, %v3545_v17  ;;  %v3509_v21 = vmul.f32 1.442695, %v3483_v15 }
 0xcd2   :  { %v3511_v22 = vmul.f32 1.442695, %v3484_v16  ;;  %v4769_v63 = vpop.eup %4768  ;;  %v3555_v3 = vsel %vm1864_vm2, %v3554_v14, %v3550_v19  ;;  %v3559_v4 = vrot.slane %v4767_v18, %v7715_v11  ;;  %v3466_v23 = vpop.xlane.xlu0 %3465 }
 0xcd3   :  { %v3468_v25 = vpop.xlane.xlu1 %3467  ;;  %v3564_v5 = vrot.slane %v4769_v63, %v7718_v12  ;;  %4778 = vpow2.f32 %v3509_v21  ;;  %v3485_v26 = vmul.f32 14.285714, %v3466_v23 }
 0xcd4   :  { %v3486_v27 = vmul.f32 14.285714, %v3468_v25  ;;  %v3560_v28 = vsel %vm1871_vm3, %v3559_v4, %v3555_v3  ;;  %4780 = vpow2.f32 %v3511_v22 }
 0xcd5   :  { %v4771_v29 = vpop.eup %4770  ;;  %v3513_v31 = vmul.f32 1.442695, %v3485_v26  ;;  %v3565_v34 = vsel %vm1878_vm4, %v3564_v5, %v3560_v28 }
 0xcd6   :  { %v3515_v32 = vmul.f32 1.442695, %v3486_v27  ;;  %v4773_v46 = vpop.eup %4772  ;;  %v3569_v35 = vrot.slane %v4771_v29, %v7733_v37  ;;  %v3470_v36 = vpop.xlane.xlu0 %3469 }
 0xcd7   :  { %v3472_v11 = vpop.xlane.xlu1 %3471  ;;  %v3574_v39 = vrot.slane %v4773_v46, %v7736_v38  ;;  %4782 = vpow2.f32 %v3513_v31  ;;  %v3487_v12 = vmul.f32 14.285714, %v3470_v36 }
 0xcd8   :  { %v3488_v40 = vmul.f32 14.285714, %v3472_v11  ;;  %v3570_v41 = vsel %vm1885_vm5, %v3569_v35, %v3565_v34  ;;  %4784 = vpow2.f32 %v3515_v32 }
 0xcd9   :  { %v4775_v42 = vpop.eup %4774  ;;  %v3517_v51 = vmul.f32 1.442695, %v3487_v12  ;;  %v3575_v49 = vsel %vm1892_vm6, %v3574_v39, %v3570_v41 }
 0xcda   :  { %v3519_v43 = vmul.f32 1.442695, %v3488_v40  ;;  %v4777_v44 = vpop.eup %4776  ;;  %v3579_v45 = vrot.slane %v4775_v42, %v7741_v47 }
 0xcdb   :  { %v3584_v37 = vrot.slane %v4777_v44, %v7744_v48  ;;  %4786 = vpow2.f32 %v3517_v51 }
 0xcdc   :  { %v3580_v50 = vsel %vm1899_vm7, %v3579_v45, %v3575_v49  ;;  %4788 = vpow2.f32 %v3519_v43 }
 0xcdd   :  { %v4779_v38 = vpop.eup %4778  ;;  %v3585_v54 = vsel %vm1906_vm8, %v3584_v37, %v3580_v50 }
 0xcde   :  { %v4781_v52 = vpop.eup %4780  ;;  %v3589_v53 = vrot.slane %v4779_v38, %v7754_v8 }
 0xcdf   :  { %v3594_v55 = vrot.slane %v4781_v52, %v7757_v9 }
 0xce0   :  { %v3590_v56 = vsel %vm1913_vm9, %v3589_v53, %v3585_v54 }
 0xce1   :  { %v4783_v57 = vpop.eup %4782  ;;  %v3595_v48 = vsel %vm1920_vm10, %v3594_v55, %v3590_v56 }
 0xce2   :  { %v4785_v47 = vpop.eup %4784  ;;  %v3599_v58 = vrot.slane %v4783_v57, %v7766_v20 }
 0xce3   :  { %v3604_v59 = vrot.slane %v4785_v47, %v7772_v24 }
 0xce4   :  { %v3600_v60 = vsel %vm1927_vm11, %v3599_v58, %v3595_v48 }
 0xce5   :  { %v4787_v61 = vpop.eup %4786  ;;  %v3605_v0 = vsel %vm1934_vm12, %v3604_v59, %v3600_v60 }
 0xce6   :  { %v4789_v62 = vpop.eup %4788  ;;  %v3609_v8 = vrot.slane %v4787_v61, %v7778_v30 }
 0xce7   :  { %v3614_v9 = vrot.slane %v4789_v62, %v7783_v33 }
 0xce8   :  { %v3610_v1 = vsel %vm1941_vm13, %v3609_v8, %v3605_v0 }
 0xce9   :  { %v3615_v2 = vsel %vm1948_vm14, %v3614_v9, %v3610_v1 }
 0xcea   :  { %3617 = vst [vmem:[%s8035_s3 + $0x7] sm:$0x1] %v3615_v2 }
 0xceb   :  { %3622 = vsyncpa [#allocation7], 1 }
 0xcec   :  { %3623 = vsyncmov [#allocation3] }
 0xcef   :  { %s3624_s19 = vpop.sfrf %3623 }
 0xcf0   :  { %p4284_p13 = scmp.ne.s32.totalorder %s3624_s19, 0 }
 0xcf2   :  { %3628 = shalt.err (%p4284_p13)  }
 0xcf3   :  { %3630 = vsyncmov [#allocation3 + $0x1] }
 0xcf6   :  { %s3631_s15 = vpop.sfrf %3630 }
 0xcf7   :  { %p4285_p0 = scmp.ne.s32.totalorder %s3631_s15, 0 }
 0xcf9   :  { %3635 = shalt.err (%p4285_p0)  }
 0xcfa   :  { %3637 = vsyncmov [#allocation3 + $0x2] }
 0xcfd   :  { %s3638_s20 = vpop.sfrf %3637 }
 0xcfe   :  { %p4286_p1 = scmp.ne.s32.totalorder %s3638_s20, 0 }
 0xd00   :  { %3642 = shalt.err (%p4286_p1)  }
 0xd01   :  { %3644 = vsyncmov [#allocation3 + $0x3] }
 0xd04   :  { %s3645_s0 = vpop.sfrf %3644 }
 0xd05   :  { %p4287_p2 = scmp.ne.s32.totalorder %s3645_s0, 0 }
 0xd07   :  { %3649 = shalt.err (%p4287_p2)  }
 0xd08   :  { %3651 = vsyncmov [#allocation3 + $0x4] }
 0xd0b   :  { %s3652_s28 = vpop.sfrf %3651 }
 0xd0c   :  { %p4288_p3 = scmp.ne.s32.totalorder %s3652_s28, 0 }
 0xd0e   :  { %3656 = shalt.err (%p4288_p3)  }
 0xd0f   :  { %3658 = vsyncmov [#allocation3 + $0x5] }
 0xd12   :  { %s3659_s3 = vpop.sfrf %3658 }
 0xd13   :  { %p4289_p4 = scmp.ne.s32.totalorder %s3659_s3, 0 }
 0xd15   :  { %3663 = shalt.err (%p4289_p4)  }
 0xd16   :  { %3665 = vsyncmov [#allocation3 + $0x6] }
 0xd19   :  { %s3666_s13 = vpop.sfrf %3665 }
 0xd1a   :  { %p4290_p5 = scmp.ne.s32.totalorder %s3666_s13, 0 }
 0xd1c   :  { %3670 = shalt.err (%p4290_p5)  }
 0xd1d   :  { %3672 = vsyncmov [#allocation3 + $0x7] }
 0xd20   :  { %s3673_s10 = vpop.sfrf %3672 }
 0xd21   :  { %p4291_p6 = scmp.ne.s32.totalorder %s3673_s10, 0 }
 0xd23   :  { %3677 = shalt.err (%p4291_p6)  }

</bundles_post_ra>
